<compile_context>
chip_gen: v5e
topology: v5e:2x2
jax: 0.10.0
libtpu: 0.0.40
codegen_flags: <defaults>
</compile_context>

<pallas_src>
import functools

import jax
import jax.numpy as jnp
import numpy as np
from jax.experimental import pallas as pl
from jax.experimental.pallas import tpu as pltpu

INPUT_DIM = 4      # len(['stop_id', 'day', 'day_of_year', 'scheduled_time'])
HIDDEN_DIM = 128
NUM_LAYERS = 3
OUTPUT_DIM = 1


def _lstm_kernel(T, B, H,
                 x2d_ref, wih0_ref, b0_ref, whh0_ref,
                 wih1_ref, b1_ref, whh1_ref,
                 wih2_ref, b2_ref, whh2_ref,
                 wfc_ref, bfc_ref,
                 out_ref,
                 proj_ref, hall_ref):
    """x2d: (T*B, D) bf16 time-major; wih*/whh*: bf16 with gate cols [i,f,o,g];
    b*: (1,4H) f32 (permuted, b_ih+b_hh pre-summed); wfc: (1,H) f32;
    bfc: (1,1) f32; out: (B,1) f32.
    Scratch: proj (T*B,4H) f32, hall (T*B,H) f32 — reused across layers."""
    f32 = jnp.float32
    bf16 = jnp.bfloat16
    H3 = 3 * H

    def sigmoid(x):
        # single-EUP sigmoid: 0.5*tanh(0.5*x) + 0.5
        return 0.5 * jnp.tanh(0.5 * x) + 0.5

    def gates_to_hc(gates, c_prev):
        # gate column order after wrapper permutation: [i, f, o, g]
        s = sigmoid(gates[:, 0:H3])          # one dispatch over (B, 3H)
        i = s[:, 0:H]
        f = s[:, H:2 * H]
        o = s[:, 2 * H:H3]
        g = jnp.tanh(gates[:, H3:4 * H])
        c_new = f * c_prev + i * g           # f32 on VPU (portable to v5e)
        h_new = o * jnp.tanh(c_new)
        return h_new, c_new

    def run_layer(whh_ref, write_h):
        """T-step recurrence for one layer; input projection already in proj_ref."""
        h = jnp.zeros((B, H), f32)
        c = jnp.zeros((B, H), f32)
        for t in range(T):                   # T is a small static constant
            sl = pl.ds(t * B, B)
            g = proj_ref[sl, :] + jnp.dot(h.astype(bf16), whh_ref[...],
                                          preferred_element_type=f32)
            h, c = gates_to_hc(g, c)
            if write_h:
                hall_ref[sl, :] = h
        return h

    # ---- layer 0: batched input projection (bias folded in), then recurrence
    proj_ref[...] = (jnp.dot(x2d_ref[...], wih0_ref[...],
                             preferred_element_type=f32) + b0_ref[...])
    run_layer(whh0_ref, write_h=True)

    # ---- layer 1: one batched (T*B,H)@(H,4H) projection of layer-0 outputs
    proj_ref[...] = (jnp.dot(hall_ref[...].astype(bf16), wih1_ref[...],
                             preferred_element_type=f32) + b1_ref[...])
    run_layer(whh1_ref, write_h=True)

    # ---- layer 2: same; final layer does not need to store its h history
    proj_ref[...] = (jnp.dot(hall_ref[...].astype(bf16), wih2_ref[...],
                             preferred_element_type=f32) + b2_ref[...])
    h2 = run_layer(whh2_ref, write_h=False)

    # ---- fc head on hidden[-1]: VPU multiply + lane reduction (N=1)
    out_ref[...] = (jnp.sum(h2 * wfc_ref[...], axis=-1, keepdims=True)
                    + bfc_ref[...])


def prepare_params(params):
    """One-time weight prep (NOT inside the jitted forward): permute gate
    columns from PyTorch [i,f,g,o] to kernel [i,f,o,g], cast matmul weights to
    bf16, reshape the fc weight to a (1,H) row."""
    H = HIDDEN_DIM
    perm = np.concatenate([np.arange(0, H), np.arange(H, 2 * H),
                           np.arange(3 * H, 4 * H), np.arange(2 * H, 3 * H)])
    bf16 = jnp.bfloat16

    def pw(w):  # weight: (in, 4H) -> permuted bf16
        return jnp.asarray(w)[:, perm].astype(bf16)

    def pb(b):  # bias: (1, 4H) -> permuted f32
        return jnp.asarray(b)[:, perm].astype(jnp.float32)

    return {
        'wih0': pw(params['wih0']), 'whh0': pw(params['whh0']), 'b0': pb(params['b0']),
        'wih1': pw(params['wih1']), 'whh1': pw(params['whh1']), 'b1': pb(params['b1']),
        'wih2': pw(params['wih2']), 'whh2': pw(params['whh2']), 'b2': pb(params['b2']),
        'wfc':  jnp.asarray(params['wfc']).reshape(1, H).astype(jnp.float32),
        'bfc':  jnp.asarray(params['bfc']).astype(jnp.float32),
    }


@jax.jit
def lstm_model_forward(x_btd, kparams):
    """x_btd: (B, T, D_in) float32 (PyTorch batch_first layout).
    kparams: output of prepare_params()."""
    B, T, D = x_btd.shape
    H = HIDDEN_DIM

    # Layout plumbing only: time-major, flatten, bf16 for the MXU projection.
    x2d = jnp.transpose(x_btd, (1, 0, 2)).reshape(T * B, D).astype(jnp.bfloat16)

    inputs = [
        x2d,
        kparams['wih0'], kparams['b0'], kparams['whh0'],
        kparams['wih1'], kparams['b1'], kparams['whh1'],
        kparams['wih2'], kparams['b2'], kparams['whh2'],
        kparams['wfc'], kparams['bfc'],
    ]

    vmem = pl.BlockSpec(memory_space=pltpu.MemorySpace.VMEM)
    kernel = functools.partial(_lstm_kernel, T, B, H)

    return pl.pallas_call(
        kernel,
        out_shape=jax.ShapeDtypeStruct((B, OUTPUT_DIM), jnp.float32),
        in_specs=[vmem] * len(inputs),
        out_specs=vmem,
        scratch_shapes=[
            pltpu.VMEM((T * B, 4 * H), jnp.float32),   # per-layer projection
            pltpu.VMEM((T * B, H), jnp.float32),       # per-layer h history
        ],
        compiler_params=pltpu.CompilerParams(
            # Resident data here is ~1 MiB; explicit limit so scaling B/T
            # surfaces as a clear error instead of a silent default-limit OOM.
            vmem_limit_bytes=32 * 1024 * 1024,
        ),
    )(*inputs)


def init_params(key):
    """Deterministic params; shapes follow nn.LSTM/nn.Linear but pre-transposed
    to (in_features, 4H) / (H, 1), PyTorch gate order [i,f,g,o], b_ih + b_hh
    pre-summed."""
    H, D = HIDDEN_DIM, INPUT_DIM
    scale = 1.0 / np.sqrt(H)
    keys = jax.random.split(key, 11)

    def u(k, shape):
        return jax.random.uniform(k, shape, jnp.float32, -scale, scale)

    return {
        'wih0': u(keys[0], (D, 4 * H)),
        'whh0': u(keys[1], (H, 4 * H)),
        'b0':   u(keys[2], (1, 4 * H)),
        'wih1': u(keys[3], (H, 4 * H)),
        'whh1': u(keys[4], (H, 4 * H)),
        'b1':   u(keys[5], (1, 4 * H)),
        'wih2': u(keys[6], (H, 4 * H)),
        'whh2': u(keys[7], (H, 4 * H)),
        'b2':   u(keys[8], (1, 4 * H)),
        'wfc':  u(keys[9], (H, OUTPUT_DIM)),
        'bfc':  u(keys[10], (1, OUTPUT_DIM)),
    }


def reference_forward(x_btd, params):
    """Pure-JAX f32 reference of the eval-mode LSTM forward (PyTorch semantics)."""
    B, T, D = x_btd.shape
    H = HIDDEN_DIM

    def cell(x_t, h_prev, c_prev, wih, whh, b):
        gates = x_t @ wih + h_prev @ whh + b
        i = jax.nn.sigmoid(gates[:, 0:H])
        f = jax.nn.sigmoid(gates[:, H:2 * H])
        g = jnp.tanh(gates[:, 2 * H:3 * H])
        o = jax.nn.sigmoid(gates[:, 3 * H:4 * H])
        c_new = f * c_prev + i * g
        h_new = o * jnp.tanh(c_new)
        return h_new, c_new

    layer_ws = [
        (params['wih0'], params['whh0'], params['b0']),
        (params['wih1'], params['whh1'], params['b1']),
        (params['wih2'], params['whh2'], params['b2']),
    ]
    h = [jnp.zeros((B, H), jnp.float32) for _ in range(NUM_LAYERS)]
    c = [jnp.zeros((B, H), jnp.float32) for _ in range(NUM_LAYERS)]
    for t in range(T):
        inp = x_btd[:, t, :]
        for l, (wih, whh, b) in enumerate(layer_ws):
            h[l], c[l] = cell(inp, h[l], c[l], wih, whh, b)
            inp = h[l]
    return h[-1] @ params['wfc'] + params['bfc']


if __name__ == "__main__":
    key = jax.random.PRNGKey(0)
    k_param, k_x = jax.random.split(key)

    B, T = 8, 8
    x = jax.random.normal(k_x, (B, T, INPUT_DIM), jnp.float32)
    params = init_params(k_param)
    kparams = prepare_params(params)         # one-time kernel-layout weights

    out = lstm_model_forward(x, kparams)
    out = jax.block_until_ready(out)

    ref = reference_forward(x, params)
    assert out.shape == (B, OUTPUT_DIM)
    # Tolerance relaxed vs the pure-f32 reference: all matmuls use bf16
    # operands (f32 accumulation); observed drift is a few 1e-3 at T=8.
    np.testing.assert_allclose(np.asarray(out), np.asarray(ref),
                               rtol=3e-2, atol=3e-2)
    print("KERNEL_OK")
</pallas_src>

<mosaic_0001>
module attributes {stable_mosaic.version = 11 : i64} {
  func.func @_lstm_kernel(%arg0: memref<64x4xbf16, #tpu.memory_space<vmem>>, %arg1: memref<4x512xbf16, #tpu.memory_space<vmem>>, %arg2: memref<1x512xf32, #tpu.memory_space<vmem>>, %arg3: memref<128x512xbf16, #tpu.memory_space<vmem>>, %arg4: memref<128x512xbf16, #tpu.memory_space<vmem>>, %arg5: memref<1x512xf32, #tpu.memory_space<vmem>>, %arg6: memref<128x512xbf16, #tpu.memory_space<vmem>>, %arg7: memref<128x512xbf16, #tpu.memory_space<vmem>>, %arg8: memref<1x512xf32, #tpu.memory_space<vmem>>, %arg9: memref<128x512xbf16, #tpu.memory_space<vmem>>, %arg10: memref<1x128xf32, #tpu.memory_space<vmem>>, %arg11: memref<1x1xf32, #tpu.memory_space<vmem>>, %arg12: memref<8x1xf32, #tpu.memory_space<vmem>>, %arg13: memref<64x512xf32, #tpu.memory_space<vmem>>, %arg14: memref<64x128xf32, #tpu.memory_space<vmem>>) attributes {dimension_semantics = [], scalar_prefetch = 0 : i64, scratch_operands = 2 : i64, tpu.core_type = #tpu.core_type<tc>} {
    %c0 = arith.constant 0 : index
    %c0_0 = arith.constant 0 : index
    %0 = vector.load %arg0[%c0, %c0_0] : memref<64x4xbf16, #tpu.memory_space<vmem>>, vector<64x4xbf16>
    %c0_1 = arith.constant 0 : index
    %c0_2 = arith.constant 0 : index
    %1 = vector.load %arg1[%c0_1, %c0_2] : memref<4x512xbf16, #tpu.memory_space<vmem>>, vector<4x512xbf16>
    %cst = arith.constant dense<0.000000e+00> : vector<64x512xf32>
    %2 = tpu.matmul %0, %1, %cst {dimension_numbers = #tpu.dot_dimension_numbers<[1], [0], [0], [1], [0, 0, 1, 1], [], []>} : vector<64x4xbf16>, vector<4x512xbf16>, vector<64x512xf32> -> vector<64x512xf32>
    %c0_3 = arith.constant 0 : index
    %c0_4 = arith.constant 0 : index
    %3 = vector.load %arg2[%c0_3, %c0_4] : memref<1x512xf32, #tpu.memory_space<vmem>>, vector<1x512xf32>
    %4 = vector.broadcast %3 : vector<1x512xf32> to vector<64x512xf32>
    %5 = arith.addf %2, %4 : vector<64x512xf32>
    %c0_5 = arith.constant 0 : index
    %c0_6 = arith.constant 0 : index
    %6 = vector.load %arg13[%c0_5, %c0_6] : memref<64x512xf32, #tpu.memory_space<vmem>>, vector<64x512xf32>
    tpu.vector_store %arg13[%c0_5, %c0_6], %5 {strides = array<i32>} : memref<64x512xf32, #tpu.memory_space<vmem>>, vector<64x512xf32>,
    %cst_7 = arith.constant 0.000000e+00 : f32
    %7 = vector.broadcast %cst_7 : f32 to vector<8x128xf32>
    %cst_8 = arith.constant 0.000000e+00 : f32
    %8 = vector.broadcast %cst_8 : f32 to vector<8x128xf32>
    %c0_9 = arith.constant 0 : index
    %c0_10 = arith.constant 0 : index
    %9 = vector.load %arg13[%c0_9, %c0_10] : memref<64x512xf32, #tpu.memory_space<vmem>>, vector<8x512xf32>
    %10 = arith.truncf %7 : vector<8x128xf32> to vector<8x128xbf16>
    %c0_11 = arith.constant 0 : index
    %c0_12 = arith.constant 0 : index
    %11 = vector.load %arg3[%c0_11, %c0_12] : memref<128x512xbf16, #tpu.memory_space<vmem>>, vector<128x512xbf16>
    %cst_13 = arith.constant dense<0.000000e+00> : vector<8x512xf32>
    %12 = tpu.matmul %10, %11, %cst_13 {dimension_numbers = #tpu.dot_dimension_numbers<[1], [0], [0], [1], [0, 0, 1, 1], [], []>} : vector<8x128xbf16>, vector<128x512xbf16>, vector<8x512xf32> -> vector<8x512xf32>
    %13 = arith.addf %9, %12 : vector<8x512xf32>
    %14 = vector.extract_strided_slice %13 {offsets = [0, 0], sizes = [8, 384], strides = [1, 1]} : vector<8x512xf32> to vector<8x384xf32>
    %cst_14 = arith.constant 5.000000e-01 : f32
    %15 = vector.broadcast %cst_14 : f32 to vector<8x384xf32>
    %16 = arith.mulf %15, %14 : vector<8x384xf32>
    %17 = math.tanh %16 : vector<8x384xf32>
    %cst_15 = arith.constant 5.000000e-01 : f32
    %18 = vector.broadcast %cst_15 : f32 to vector<8x384xf32>
    %19 = arith.mulf %18, %17 : vector<8x384xf32>
    %cst_16 = arith.constant 5.000000e-01 : f32
    %20 = vector.broadcast %cst_16 : f32 to vector<8x384xf32>
    %21 = arith.addf %19, %20 : vector<8x384xf32>
    %22 = vector.extract_strided_slice %21 {offsets = [0, 0], sizes = [8, 128], strides = [1, 1]} : vector<8x384xf32> to vector<8x128xf32>
    %23 = vector.extract_strided_slice %21 {offsets = [0, 128], sizes = [8, 128], strides = [1, 1]} : vector<8x384xf32> to vector<8x128xf32>
    %24 = vector.extract_strided_slice %21 {offsets = [0, 256], sizes = [8, 128], strides = [1, 1]} : vector<8x384xf32> to vector<8x128xf32>
    %25 = vector.extract_strided_slice %13 {offsets = [0, 384], sizes = [8, 128], strides = [1, 1]} : vector<8x512xf32> to vector<8x128xf32>
    %26 = math.tanh %25 : vector<8x128xf32>
    %27 = arith.mulf %23, %8 : vector<8x128xf32>
    %28 = arith.mulf %22, %26 : vector<8x128xf32>
    %29 = arith.addf %27, %28 : vector<8x128xf32>
    %30 = math.tanh %29 : vector<8x128xf32>
    %31 = arith.mulf %24, %30 : vector<8x128xf32>
    %c0_17 = arith.constant 0 : index
    %c0_18 = arith.constant 0 : index
    %32 = vector.load %arg14[%c0_17, %c0_18] : memref<64x128xf32, #tpu.memory_space<vmem>>, vector<8x128xf32>
    tpu.vector_store %arg14[%c0_17, %c0_18], %31 {strides = array<i32>} : memref<64x128xf32, #tpu.memory_space<vmem>>, vector<8x128xf32>,
    %c8 = arith.constant 8 : index
    %c0_19 = arith.constant 0 : index
    %33 = vector.load %arg13[%c8, %c0_19] : memref<64x512xf32, #tpu.memory_space<vmem>>, vector<8x512xf32>
    %34 = arith.truncf %31 : vector<8x128xf32> to vector<8x128xbf16>
    %c0_20 = arith.constant 0 : index
    %c0_21 = arith.constant 0 : index
    %35 = vector.load %arg3[%c0_20, %c0_21] : memref<128x512xbf16, #tpu.memory_space<vmem>>, vector<128x512xbf16>
    %cst_22 = arith.constant dense<0.000000e+00> : vector<8x512xf32>
    %36 = tpu.matmul %34, %35, %cst_22 {dimension_numbers = #tpu.dot_dimension_numbers<[1], [0], [0], [1], [0, 0, 1, 1], [], []>} : vector<8x128xbf16>, vector<128x512xbf16>, vector<8x512xf32> -> vector<8x512xf32>
    %37 = arith.addf %33, %36 : vector<8x512xf32>
    %38 = vector.extract_strided_slice %37 {offsets = [0, 0], sizes = [8, 384], strides = [1, 1]} : vector<8x512xf32> to vector<8x384xf32>
    %cst_23 = arith.constant 5.000000e-01 : f32
    %39 = vector.broadcast %cst_23 : f32 to vector<8x384xf32>
    %40 = arith.mulf %39, %38 : vector<8x384xf32>
    %41 = math.tanh %40 : vector<8x384xf32>
    %cst_24 = arith.constant 5.000000e-01 : f32
    %42 = vector.broadcast %cst_24 : f32 to vector<8x384xf32>
    %43 = arith.mulf %42, %41 : vector<8x384xf32>
    %cst_25 = arith.constant 5.000000e-01 : f32
    %44 = vector.broadcast %cst_25 : f32 to vector<8x384xf32>
    %45 = arith.addf %43, %44 : vector<8x384xf32>
    %46 = vector.extract_strided_slice %45 {offsets = [0, 0], sizes = [8, 128], strides = [1, 1]} : vector<8x384xf32> to vector<8x128xf32>
    %47 = vector.extract_strided_slice %45 {offsets = [0, 128], sizes = [8, 128], strides = [1, 1]} : vector<8x384xf32> to vector<8x128xf32>
    %48 = vector.extract_strided_slice %45 {offsets = [0, 256], sizes = [8, 128], strides = [1, 1]} : vector<8x384xf32> to vector<8x128xf32>
    %49 = vector.extract_strided_slice %37 {offsets = [0, 384], sizes = [8, 128], strides = [1, 1]} : vector<8x512xf32> to vector<8x128xf32>
    %50 = math.tanh %49 : vector<8x128xf32>
    %51 = arith.mulf %47, %29 : vector<8x128xf32>
    %52 = arith.mulf %46, %50 : vector<8x128xf32>
    %53 = arith.addf %51, %52 : vector<8x128xf32>
    %54 = math.tanh %53 : vector<8x128xf32>
    %55 = arith.mulf %48, %54 : vector<8x128xf32>
    %c8_26 = arith.constant 8 : index
    %c0_27 = arith.constant 0 : index
    %56 = vector.load %arg14[%c8_26, %c0_27] : memref<64x128xf32, #tpu.memory_space<vmem>>, vector<8x128xf32>
    tpu.vector_store %arg14[%c8_26, %c0_27], %55 {strides = array<i32>} : memref<64x128xf32, #tpu.memory_space<vmem>>, vector<8x128xf32>,
    %c16 = arith.constant 16 : index
    %c0_28 = arith.constant 0 : index
    %57 = vector.load %arg13[%c16, %c0_28] : memref<64x512xf32, #tpu.memory_space<vmem>>, vector<8x512xf32>
    %58 = arith.truncf %55 : vector<8x128xf32> to vector<8x128xbf16>
    %c0_29 = arith.constant 0 : index
    %c0_30 = arith.constant 0 : index
    %59 = vector.load %arg3[%c0_29, %c0_30] : memref<128x512xbf16, #tpu.memory_space<vmem>>, vector<128x512xbf16>
    %cst_31 = arith.constant dense<0.000000e+00> : vector<8x512xf32>
    %60 = tpu.matmul %58, %59, %cst_31 {dimension_numbers = #tpu.dot_dimension_numbers<[1], [0], [0], [1], [0, 0, 1, 1], [], []>} : vector<8x128xbf16>, vector<128x512xbf16>, vector<8x512xf32> -> vector<8x512xf32>
    %61 = arith.addf %57, %60 : vector<8x512xf32>
    %62 = vector.extract_strided_slice %61 {offsets = [0, 0], sizes = [8, 384], strides = [1, 1]} : vector<8x512xf32> to vector<8x384xf32>
    %cst_32 = arith.constant 5.000000e-01 : f32
    %63 = vector.broadcast %cst_32 : f32 to vector<8x384xf32>
    %64 = arith.mulf %63, %62 : vector<8x384xf32>
    %65 = math.tanh %64 : vector<8x384xf32>
    %cst_33 = arith.constant 5.000000e-01 : f32
    %66 = vector.broadcast %cst_33 : f32 to vector<8x384xf32>
    %67 = arith.mulf %66, %65 : vector<8x384xf32>
    %cst_34 = arith.constant 5.000000e-01 : f32
    %68 = vector.broadcast %cst_34 : f32 to vector<8x384xf32>
    %69 = arith.addf %67, %68 : vector<8x384xf32>
    %70 = vector.extract_strided_slice %69 {offsets = [0, 0], sizes = [8, 128], strides = [1, 1]} : vector<8x384xf32> to vector<8x128xf32>
    %71 = vector.extract_strided_slice %69 {offsets = [0, 128], sizes = [8, 128], strides = [1, 1]} : vector<8x384xf32> to vector<8x128xf32>
    %72 = vector.extract_strided_slice %69 {offsets = [0, 256], sizes = [8, 128], strides = [1, 1]} : vector<8x384xf32> to vector<8x128xf32>
    %73 = vector.extract_strided_slice %61 {offsets = [0, 384], sizes = [8, 128], strides = [1, 1]} : vector<8x512xf32> to vector<8x128xf32>
    %74 = math.tanh %73 : vector<8x128xf32>
    %75 = arith.mulf %71, %53 : vector<8x128xf32>
    %76 = arith.mulf %70, %74 : vector<8x128xf32>
    %77 = arith.addf %75, %76 : vector<8x128xf32>
    %78 = math.tanh %77 : vector<8x128xf32>
    %79 = arith.mulf %72, %78 : vector<8x128xf32>
    %c16_35 = arith.constant 16 : index
    %c0_36 = arith.constant 0 : index
    %80 = vector.load %arg14[%c16_35, %c0_36] : memref<64x128xf32, #tpu.memory_space<vmem>>, vector<8x128xf32>
    tpu.vector_store %arg14[%c16_35, %c0_36], %79 {strides = array<i32>} : memref<64x128xf32, #tpu.memory_space<vmem>>, vector<8x128xf32>,
    %c24 = arith.constant 24 : index
    %c0_37 = arith.constant 0 : index
    %81 = vector.load %arg13[%c24, %c0_37] : memref<64x512xf32, #tpu.memory_space<vmem>>, vector<8x512xf32>
    %82 = arith.truncf %79 : vector<8x128xf32> to vector<8x128xbf16>
    %c0_38 = arith.constant 0 : index
    %c0_39 = arith.constant 0 : index
    %83 = vector.load %arg3[%c0_38, %c0_39] : memref<128x512xbf16, #tpu.memory_space<vmem>>, vector<128x512xbf16>
    %cst_40 = arith.constant dense<0.000000e+00> : vector<8x512xf32>
    %84 = tpu.matmul %82, %83, %cst_40 {dimension_numbers = #tpu.dot_dimension_numbers<[1], [0], [0], [1], [0, 0, 1, 1], [], []>} : vector<8x128xbf16>, vector<128x512xbf16>, vector<8x512xf32> -> vector<8x512xf32>
    %85 = arith.addf %81, %84 : vector<8x512xf32>
    %86 = vector.extract_strided_slice %85 {offsets = [0, 0], sizes = [8, 384], strides = [1, 1]} : vector<8x512xf32> to vector<8x384xf32>
    %cst_41 = arith.constant 5.000000e-01 : f32
    %87 = vector.broadcast %cst_41 : f32 to vector<8x384xf32>
    %88 = arith.mulf %87, %86 : vector<8x384xf32>
    %89 = math.tanh %88 : vector<8x384xf32>
    %cst_42 = arith.constant 5.000000e-01 : f32
    %90 = vector.broadcast %cst_42 : f32 to vector<8x384xf32>
    %91 = arith.mulf %90, %89 : vector<8x384xf32>
    %cst_43 = arith.constant 5.000000e-01 : f32
    %92 = vector.broadcast %cst_43 : f32 to vector<8x384xf32>
    %93 = arith.addf %91, %92 : vector<8x384xf32>
    %94 = vector.extract_strided_slice %93 {offsets = [0, 0], sizes = [8, 128], strides = [1, 1]} : vector<8x384xf32> to vector<8x128xf32>
    %95 = vector.extract_strided_slice %93 {offsets = [0, 128], sizes = [8, 128], strides = [1, 1]} : vector<8x384xf32> to vector<8x128xf32>
    %96 = vector.extract_strided_slice %93 {offsets = [0, 256], sizes = [8, 128], strides = [1, 1]} : vector<8x384xf32> to vector<8x128xf32>
    %97 = vector.extract_strided_slice %85 {offsets = [0, 384], sizes = [8, 128], strides = [1, 1]} : vector<8x512xf32> to vector<8x128xf32>
    %98 = math.tanh %97 : vector<8x128xf32>
    %99 = arith.mulf %95, %77 : vector<8x128xf32>
    %100 = arith.mulf %94, %98 : vector<8x128xf32>
    %101 = arith.addf %99, %100 : vector<8x128xf32>
    %102 = math.tanh %101 : vector<8x128xf32>
    %103 = arith.mulf %96, %102 : vector<8x128xf32>
    %c24_44 = arith.constant 24 : index
    %c0_45 = arith.constant 0 : index
    %104 = vector.load %arg14[%c24_44, %c0_45] : memref<64x128xf32, #tpu.memory_space<vmem>>, vector<8x128xf32>
    tpu.vector_store %arg14[%c24_44, %c0_45], %103 {strides = array<i32>} : memref<64x128xf32, #tpu.memory_space<vmem>>, vector<8x128xf32>,
    %c32 = arith.constant 32 : index
    %c0_46 = arith.constant 0 : index
    %105 = vector.load %arg13[%c32, %c0_46] : memref<64x512xf32, #tpu.memory_space<vmem>>, vector<8x512xf32>
    %106 = arith.truncf %103 : vector<8x128xf32> to vector<8x128xbf16>
    %c0_47 = arith.constant 0 : index
    %c0_48 = arith.constant 0 : index
    %107 = vector.load %arg3[%c0_47, %c0_48] : memref<128x512xbf16, #tpu.memory_space<vmem>>, vector<128x512xbf16>
    %cst_49 = arith.constant dense<0.000000e+00> : vector<8x512xf32>
    %108 = tpu.matmul %106, %107, %cst_49 {dimension_numbers = #tpu.dot_dimension_numbers<[1], [0], [0], [1], [0, 0, 1, 1], [], []>} : vector<8x128xbf16>, vector<128x512xbf16>, vector<8x512xf32> -> vector<8x512xf32>
    %109 = arith.addf %105, %108 : vector<8x512xf32>
    %110 = vector.extract_strided_slice %109 {offsets = [0, 0], sizes = [8, 384], strides = [1, 1]} : vector<8x512xf32> to vector<8x384xf32>
    %cst_50 = arith.constant 5.000000e-01 : f32
    %111 = vector.broadcast %cst_50 : f32 to vector<8x384xf32>
    %112 = arith.mulf %111, %110 : vector<8x384xf32>
    %113 = math.tanh %112 : vector<8x384xf32>
    %cst_51 = arith.constant 5.000000e-01 : f32
    %114 = vector.broadcast %cst_51 : f32 to vector<8x384xf32>
    %115 = arith.mulf %114, %113 : vector<8x384xf32>
    %cst_52 = arith.constant 5.000000e-01 : f32
    %116 = vector.broadcast %cst_52 : f32 to vector<8x384xf32>
    %117 = arith.addf %115, %116 : vector<8x384xf32>
    %118 = vector.extract_strided_slice %117 {offsets = [0, 0], sizes = [8, 128], strides = [1, 1]} : vector<8x384xf32> to vector<8x128xf32>
    %119 = vector.extract_strided_slice %117 {offsets = [0, 128], sizes = [8, 128], strides = [1, 1]} : vector<8x384xf32> to vector<8x128xf32>
    %120 = vector.extract_strided_slice %117 {offsets = [0, 256], sizes = [8, 128], strides = [1, 1]} : vector<8x384xf32> to vector<8x128xf32>
    %121 = vector.extract_strided_slice %109 {offsets = [0, 384], sizes = [8, 128], strides = [1, 1]} : vector<8x512xf32> to vector<8x128xf32>
    %122 = math.tanh %121 : vector<8x128xf32>
    %123 = arith.mulf %119, %101 : vector<8x128xf32>
    %124 = arith.mulf %118, %122 : vector<8x128xf32>
    %125 = arith.addf %123, %124 : vector<8x128xf32>
    %126 = math.tanh %125 : vector<8x128xf32>
    %127 = arith.mulf %120, %126 : vector<8x128xf32>
    %c32_53 = arith.constant 32 : index
    %c0_54 = arith.constant 0 : index
    %128 = vector.load %arg14[%c32_53, %c0_54] : memref<64x128xf32, #tpu.memory_space<vmem>>, vector<8x128xf32>
    tpu.vector_store %arg14[%c32_53, %c0_54], %127 {strides = array<i32>} : memref<64x128xf32, #tpu.memory_space<vmem>>, vector<8x128xf32>,
    %c40 = arith.constant 40 : index
    %c0_55 = arith.constant 0 : index
    %129 = vector.load %arg13[%c40, %c0_55] : memref<64x512xf32, #tpu.memory_space<vmem>>, vector<8x512xf32>
    %130 = arith.truncf %127 : vector<8x128xf32> to vector<8x128xbf16>
    %c0_56 = arith.constant 0 : index
    %c0_57 = arith.constant 0 : index
    %131 = vector.load %arg3[%c0_56, %c0_57] : memref<128x512xbf16, #tpu.memory_space<vmem>>, vector<128x512xbf16>
    %cst_58 = arith.constant dense<0.000000e+00> : vector<8x512xf32>
    %132 = tpu.matmul %130, %131, %cst_58 {dimension_numbers = #tpu.dot_dimension_numbers<[1], [0], [0], [1], [0, 0, 1, 1], [], []>} : vector<8x128xbf16>, vector<128x512xbf16>, vector<8x512xf32> -> vector<8x512xf32>
    %133 = arith.addf %129, %132 : vector<8x512xf32>
    %134 = vector.extract_strided_slice %133 {offsets = [0, 0], sizes = [8, 384], strides = [1, 1]} : vector<8x512xf32> to vector<8x384xf32>
    %cst_59 = arith.constant 5.000000e-01 : f32
    %135 = vector.broadcast %cst_59 : f32 to vector<8x384xf32>
    %136 = arith.mulf %135, %134 : vector<8x384xf32>
    %137 = math.tanh %136 : vector<8x384xf32>
    %cst_60 = arith.constant 5.000000e-01 : f32
    %138 = vector.broadcast %cst_60 : f32 to vector<8x384xf32>
    %139 = arith.mulf %138, %137 : vector<8x384xf32>
    %cst_61 = arith.constant 5.000000e-01 : f32
    %140 = vector.broadcast %cst_61 : f32 to vector<8x384xf32>
    %141 = arith.addf %139, %140 : vector<8x384xf32>
    %142 = vector.extract_strided_slice %141 {offsets = [0, 0], sizes = [8, 128], strides = [1, 1]} : vector<8x384xf32> to vector<8x128xf32>
    %143 = vector.extract_strided_slice %141 {offsets = [0, 128], sizes = [8, 128], strides = [1, 1]} : vector<8x384xf32> to vector<8x128xf32>
    %144 = vector.extract_strided_slice %141 {offsets = [0, 256], sizes = [8, 128], strides = [1, 1]} : vector<8x384xf32> to vector<8x128xf32>
    %145 = vector.extract_strided_slice %133 {offsets = [0, 384], sizes = [8, 128], strides = [1, 1]} : vector<8x512xf32> to vector<8x128xf32>
    %146 = math.tanh %145 : vector<8x128xf32>
    %147 = arith.mulf %143, %125 : vector<8x128xf32>
    %148 = arith.mulf %142, %146 : vector<8x128xf32>
    %149 = arith.addf %147, %148 : vector<8x128xf32>
    %150 = math.tanh %149 : vector<8x128xf32>
    %151 = arith.mulf %144, %150 : vector<8x128xf32>
    %c40_62 = arith.constant 40 : index
    %c0_63 = arith.constant 0 : index
    %152 = vector.load %arg14[%c40_62, %c0_63] : memref<64x128xf32, #tpu.memory_space<vmem>>, vector<8x128xf32>
    tpu.vector_store %arg14[%c40_62, %c0_63], %151 {strides = array<i32>} : memref<64x128xf32, #tpu.memory_space<vmem>>, vector<8x128xf32>,
    %c48 = arith.constant 48 : index
    %c0_64 = arith.constant 0 : index
    %153 = vector.load %arg13[%c48, %c0_64] : memref<64x512xf32, #tpu.memory_space<vmem>>, vector<8x512xf32>
    %154 = arith.truncf %151 : vector<8x128xf32> to vector<8x128xbf16>
    %c0_65 = arith.constant 0 : index
    %c0_66 = arith.constant 0 : index
    %155 = vector.load %arg3[%c0_65, %c0_66] : memref<128x512xbf16, #tpu.memory_space<vmem>>, vector<128x512xbf16>
    %cst_67 = arith.constant dense<0.000000e+00> : vector<8x512xf32>
    %156 = tpu.matmul %154, %155, %cst_67 {dimension_numbers = #tpu.dot_dimension_numbers<[1], [0], [0], [1], [0, 0, 1, 1], [], []>} : vector<8x128xbf16>, vector<128x512xbf16>, vector<8x512xf32> -> vector<8x512xf32>
    %157 = arith.addf %153, %156 : vector<8x512xf32>
    %158 = vector.extract_strided_slice %157 {offsets = [0, 0], sizes = [8, 384], strides = [1, 1]} : vector<8x512xf32> to vector<8x384xf32>
    %cst_68 = arith.constant 5.000000e-01 : f32
    %159 = vector.broadcast %cst_68 : f32 to vector<8x384xf32>
    %160 = arith.mulf %159, %158 : vector<8x384xf32>
    %161 = math.tanh %160 : vector<8x384xf32>
    %cst_69 = arith.constant 5.000000e-01 : f32
    %162 = vector.broadcast %cst_69 : f32 to vector<8x384xf32>
    %163 = arith.mulf %162, %161 : vector<8x384xf32>
    %cst_70 = arith.constant 5.000000e-01 : f32
    %164 = vector.broadcast %cst_70 : f32 to vector<8x384xf32>
    %165 = arith.addf %163, %164 : vector<8x384xf32>
    %166 = vector.extract_strided_slice %165 {offsets = [0, 0], sizes = [8, 128], strides = [1, 1]} : vector<8x384xf32> to vector<8x128xf32>
    %167 = vector.extract_strided_slice %165 {offsets = [0, 128], sizes = [8, 128], strides = [1, 1]} : vector<8x384xf32> to vector<8x128xf32>
    %168 = vector.extract_strided_slice %165 {offsets = [0, 256], sizes = [8, 128], strides = [1, 1]} : vector<8x384xf32> to vector<8x128xf32>
    %169 = vector.extract_strided_slice %157 {offsets = [0, 384], sizes = [8, 128], strides = [1, 1]} : vector<8x512xf32> to vector<8x128xf32>
    %170 = math.tanh %169 : vector<8x128xf32>
    %171 = arith.mulf %167, %149 : vector<8x128xf32>
    %172 = arith.mulf %166, %170 : vector<8x128xf32>
    %173 = arith.addf %171, %172 : vector<8x128xf32>
    %174 = math.tanh %173 : vector<8x128xf32>
    %175 = arith.mulf %168, %174 : vector<8x128xf32>
    %c48_71 = arith.constant 48 : index
    %c0_72 = arith.constant 0 : index
    %176 = vector.load %arg14[%c48_71, %c0_72] : memref<64x128xf32, #tpu.memory_space<vmem>>, vector<8x128xf32>
    tpu.vector_store %arg14[%c48_71, %c0_72], %175 {strides = array<i32>} : memref<64x128xf32, #tpu.memory_space<vmem>>, vector<8x128xf32>,
    %c56 = arith.constant 56 : index
    %c0_73 = arith.constant 0 : index
    %177 = vector.load %arg13[%c56, %c0_73] : memref<64x512xf32, #tpu.memory_space<vmem>>, vector<8x512xf32>
    %178 = arith.truncf %175 : vector<8x128xf32> to vector<8x128xbf16>
    %c0_74 = arith.constant 0 : index
    %c0_75 = arith.constant 0 : index
    %179 = vector.load %arg3[%c0_74, %c0_75] : memref<128x512xbf16, #tpu.memory_space<vmem>>, vector<128x512xbf16>
    %cst_76 = arith.constant dense<0.000000e+00> : vector<8x512xf32>
    %180 = tpu.matmul %178, %179, %cst_76 {dimension_numbers = #tpu.dot_dimension_numbers<[1], [0], [0], [1], [0, 0, 1, 1], [], []>} : vector<8x128xbf16>, vector<128x512xbf16>, vector<8x512xf32> -> vector<8x512xf32>
    %181 = arith.addf %177, %180 : vector<8x512xf32>
    %182 = vector.extract_strided_slice %181 {offsets = [0, 0], sizes = [8, 384], strides = [1, 1]} : vector<8x512xf32> to vector<8x384xf32>
    %cst_77 = arith.constant 5.000000e-01 : f32
    %183 = vector.broadcast %cst_77 : f32 to vector<8x384xf32>
    %184 = arith.mulf %183, %182 : vector<8x384xf32>
    %185 = math.tanh %184 : vector<8x384xf32>
    %cst_78 = arith.constant 5.000000e-01 : f32
    %186 = vector.broadcast %cst_78 : f32 to vector<8x384xf32>
    %187 = arith.mulf %186, %185 : vector<8x384xf32>
    %cst_79 = arith.constant 5.000000e-01 : f32
    %188 = vector.broadcast %cst_79 : f32 to vector<8x384xf32>
    %189 = arith.addf %187, %188 : vector<8x384xf32>
    %190 = vector.extract_strided_slice %189 {offsets = [0, 0], sizes = [8, 128], strides = [1, 1]} : vector<8x384xf32> to vector<8x128xf32>
    %191 = vector.extract_strided_slice %189 {offsets = [0, 128], sizes = [8, 128], strides = [1, 1]} : vector<8x384xf32> to vector<8x128xf32>
    %192 = vector.extract_strided_slice %189 {offsets = [0, 256], sizes = [8, 128], strides = [1, 1]} : vector<8x384xf32> to vector<8x128xf32>
    %193 = vector.extract_strided_slice %181 {offsets = [0, 384], sizes = [8, 128], strides = [1, 1]} : vector<8x512xf32> to vector<8x128xf32>
    %194 = math.tanh %193 : vector<8x128xf32>
    %195 = arith.mulf %191, %173 : vector<8x128xf32>
    %196 = arith.mulf %190, %194 : vector<8x128xf32>
    %197 = arith.addf %195, %196 : vector<8x128xf32>
    %198 = math.tanh %197 : vector<8x128xf32>
    %199 = arith.mulf %192, %198 : vector<8x128xf32>
    %c56_80 = arith.constant 56 : index
    %c0_81 = arith.constant 0 : index
    %200 = vector.load %arg14[%c56_80, %c0_81] : memref<64x128xf32, #tpu.memory_space<vmem>>, vector<8x128xf32>
    tpu.vector_store %arg14[%c56_80, %c0_81], %199 {strides = array<i32>} : memref<64x128xf32, #tpu.memory_space<vmem>>, vector<8x128xf32>,
    %c0_82 = arith.constant 0 : index
    %c0_83 = arith.constant 0 : index
    %201 = vector.load %arg14[%c0_82, %c0_83] : memref<64x128xf32, #tpu.memory_space<vmem>>, vector<64x128xf32>
    %202 = arith.truncf %201 : vector<64x128xf32> to vector<64x128xbf16>
    %c0_84 = arith.constant 0 : index
    %c0_85 = arith.constant 0 : index
    %203 = vector.load %arg4[%c0_84, %c0_85] : memref<128x512xbf16, #tpu.memory_space<vmem>>, vector<128x512xbf16>
    %cst_86 = arith.constant dense<0.000000e+00> : vector<64x512xf32>
    %204 = tpu.matmul %202, %203, %cst_86 {dimension_numbers = #tpu.dot_dimension_numbers<[1], [0], [0], [1], [0, 0, 1, 1], [], []>} : vector<64x128xbf16>, vector<128x512xbf16>, vector<64x512xf32> -> vector<64x512xf32>
    %c0_87 = arith.constant 0 : index
    %c0_88 = arith.constant 0 : index
    %205 = vector.load %arg5[%c0_87, %c0_88] : memref<1x512xf32, #tpu.memory_space<vmem>>, vector<1x512xf32>
    %206 = vector.broadcast %205 : vector<1x512xf32> to vector<64x512xf32>
    %207 = arith.addf %204, %206 : vector<64x512xf32>
    %c0_89 = arith.constant 0 : index
    %c0_90 = arith.constant 0 : index
    %208 = vector.load %arg13[%c0_89, %c0_90] : memref<64x512xf32, #tpu.memory_space<vmem>>, vector<64x512xf32>
    tpu.vector_store %arg13[%c0_89, %c0_90], %207 {strides = array<i32>} : memref<64x512xf32, #tpu.memory_space<vmem>>, vector<64x512xf32>,
    %cst_91 = arith.constant 0.000000e+00 : f32
    %209 = vector.broadcast %cst_91 : f32 to vector<8x128xf32>
    %cst_92 = arith.constant 0.000000e+00 : f32
    %210 = vector.broadcast %cst_92 : f32 to vector<8x128xf32>
    %c0_93 = arith.constant 0 : index
    %c0_94 = arith.constant 0 : index
    %211 = vector.load %arg13[%c0_93, %c0_94] : memref<64x512xf32, #tpu.memory_space<vmem>>, vector<8x512xf32>
    %212 = arith.truncf %209 : vector<8x128xf32> to vector<8x128xbf16>
    %c0_95 = arith.constant 0 : index
    %c0_96 = arith.constant 0 : index
    %213 = vector.load %arg6[%c0_95, %c0_96] : memref<128x512xbf16, #tpu.memory_space<vmem>>, vector<128x512xbf16>
    %cst_97 = arith.constant dense<0.000000e+00> : vector<8x512xf32>
    %214 = tpu.matmul %212, %213, %cst_97 {dimension_numbers = #tpu.dot_dimension_numbers<[1], [0], [0], [1], [0, 0, 1, 1], [], []>} : vector<8x128xbf16>, vector<128x512xbf16>, vector<8x512xf32> -> vector<8x512xf32>
    %215 = arith.addf %211, %214 : vector<8x512xf32>
    %216 = vector.extract_strided_slice %215 {offsets = [0, 0], sizes = [8, 384], strides = [1, 1]} : vector<8x512xf32> to vector<8x384xf32>
    %cst_98 = arith.constant 5.000000e-01 : f32
    %217 = vector.broadcast %cst_98 : f32 to vector<8x384xf32>
    %218 = arith.mulf %217, %216 : vector<8x384xf32>
    %219 = math.tanh %218 : vector<8x384xf32>
    %cst_99 = arith.constant 5.000000e-01 : f32
    %220 = vector.broadcast %cst_99 : f32 to vector<8x384xf32>
    %221 = arith.mulf %220, %219 : vector<8x384xf32>
    %cst_100 = arith.constant 5.000000e-01 : f32
    %222 = vector.broadcast %cst_100 : f32 to vector<8x384xf32>
    %223 = arith.addf %221, %222 : vector<8x384xf32>
    %224 = vector.extract_strided_slice %223 {offsets = [0, 0], sizes = [8, 128], strides = [1, 1]} : vector<8x384xf32> to vector<8x128xf32>
    %225 = vector.extract_strided_slice %223 {offsets = [0, 128], sizes = [8, 128], strides = [1, 1]} : vector<8x384xf32> to vector<8x128xf32>
    %226 = vector.extract_strided_slice %223 {offsets = [0, 256], sizes = [8, 128], strides = [1, 1]} : vector<8x384xf32> to vector<8x128xf32>
    %227 = vector.extract_strided_slice %215 {offsets = [0, 384], sizes = [8, 128], strides = [1, 1]} : vector<8x512xf32> to vector<8x128xf32>
    %228 = math.tanh %227 : vector<8x128xf32>
    %229 = arith.mulf %225, %210 : vector<8x128xf32>
    %230 = arith.mulf %224, %228 : vector<8x128xf32>
    %231 = arith.addf %229, %230 : vector<8x128xf32>
    %232 = math.tanh %231 : vector<8x128xf32>
    %233 = arith.mulf %226, %232 : vector<8x128xf32>
    %c0_101 = arith.constant 0 : index
    %c0_102 = arith.constant 0 : index
    %234 = vector.load %arg14[%c0_101, %c0_102] : memref<64x128xf32, #tpu.memory_space<vmem>>, vector<8x128xf32>
    tpu.vector_store %arg14[%c0_101, %c0_102], %233 {strides = array<i32>} : memref<64x128xf32, #tpu.memory_space<vmem>>, vector<8x128xf32>,
    %c8_103 = arith.constant 8 : index
    %c0_104 = arith.constant 0 : index
    %235 = vector.load %arg13[%c8_103, %c0_104] : memref<64x512xf32, #tpu.memory_space<vmem>>, vector<8x512xf32>
    %236 = arith.truncf %233 : vector<8x128xf32> to vector<8x128xbf16>
    %c0_105 = arith.constant 0 : index
    %c0_106 = arith.constant 0 : index
    %237 = vector.load %arg6[%c0_105, %c0_106] : memref<128x512xbf16, #tpu.memory_space<vmem>>, vector<128x512xbf16>
    %cst_107 = arith.constant dense<0.000000e+00> : vector<8x512xf32>
    %238 = tpu.matmul %236, %237, %cst_107 {dimension_numbers = #tpu.dot_dimension_numbers<[1], [0], [0], [1], [0, 0, 1, 1], [], []>} : vector<8x128xbf16>, vector<128x512xbf16>, vector<8x512xf32> -> vector<8x512xf32>
    %239 = arith.addf %235, %238 : vector<8x512xf32>
    %240 = vector.extract_strided_slice %239 {offsets = [0, 0], sizes = [8, 384], strides = [1, 1]} : vector<8x512xf32> to vector<8x384xf32>
    %cst_108 = arith.constant 5.000000e-01 : f32
    %241 = vector.broadcast %cst_108 : f32 to vector<8x384xf32>
    %242 = arith.mulf %241, %240 : vector<8x384xf32>
    %243 = math.tanh %242 : vector<8x384xf32>
    %cst_109 = arith.constant 5.000000e-01 : f32
    %244 = vector.broadcast %cst_109 : f32 to vector<8x384xf32>
    %245 = arith.mulf %244, %243 : vector<8x384xf32>
    %cst_110 = arith.constant 5.000000e-01 : f32
    %246 = vector.broadcast %cst_110 : f32 to vector<8x384xf32>
    %247 = arith.addf %245, %246 : vector<8x384xf32>
    %248 = vector.extract_strided_slice %247 {offsets = [0, 0], sizes = [8, 128], strides = [1, 1]} : vector<8x384xf32> to vector<8x128xf32>
    %249 = vector.extract_strided_slice %247 {offsets = [0, 128], sizes = [8, 128], strides = [1, 1]} : vector<8x384xf32> to vector<8x128xf32>
    %250 = vector.extract_strided_slice %247 {offsets = [0, 256], sizes = [8, 128], strides = [1, 1]} : vector<8x384xf32> to vector<8x128xf32>
    %251 = vector.extract_strided_slice %239 {offsets = [0, 384], sizes = [8, 128], strides = [1, 1]} : vector<8x512xf32> to vector<8x128xf32>
    %252 = math.tanh %251 : vector<8x128xf32>
    %253 = arith.mulf %249, %231 : vector<8x128xf32>
    %254 = arith.mulf %248, %252 : vector<8x128xf32>
    %255 = arith.addf %253, %254 : vector<8x128xf32>
    %256 = math.tanh %255 : vector<8x128xf32>
    %257 = arith.mulf %250, %256 : vector<8x128xf32>
    %c8_111 = arith.constant 8 : index
    %c0_112 = arith.constant 0 : index
    %258 = vector.load %arg14[%c8_111, %c0_112] : memref<64x128xf32, #tpu.memory_space<vmem>>, vector<8x128xf32>
    tpu.vector_store %arg14[%c8_111, %c0_112], %257 {strides = array<i32>} : memref<64x128xf32, #tpu.memory_space<vmem>>, vector<8x128xf32>,
    %c16_113 = arith.constant 16 : index
    %c0_114 = arith.constant 0 : index
    %259 = vector.load %arg13[%c16_113, %c0_114] : memref<64x512xf32, #tpu.memory_space<vmem>>, vector<8x512xf32>
    %260 = arith.truncf %257 : vector<8x128xf32> to vector<8x128xbf16>
    %c0_115 = arith.constant 0 : index
    %c0_116 = arith.constant 0 : index
    %261 = vector.load %arg6[%c0_115, %c0_116] : memref<128x512xbf16, #tpu.memory_space<vmem>>, vector<128x512xbf16>
    %cst_117 = arith.constant dense<0.000000e+00> : vector<8x512xf32>
    %262 = tpu.matmul %260, %261, %cst_117 {dimension_numbers = #tpu.dot_dimension_numbers<[1], [0], [0], [1], [0, 0, 1, 1], [], []>} : vector<8x128xbf16>, vector<128x512xbf16>, vector<8x512xf32> -> vector<8x512xf32>
    %263 = arith.addf %259, %262 : vector<8x512xf32>
    %264 = vector.extract_strided_slice %263 {offsets = [0, 0], sizes = [8, 384], strides = [1, 1]} : vector<8x512xf32> to vector<8x384xf32>
    %cst_118 = arith.constant 5.000000e-01 : f32
    %265 = vector.broadcast %cst_118 : f32 to vector<8x384xf32>
    %266 = arith.mulf %265, %264 : vector<8x384xf32>
    %267 = math.tanh %266 : vector<8x384xf32>
    %cst_119 = arith.constant 5.000000e-01 : f32
    %268 = vector.broadcast %cst_119 : f32 to vector<8x384xf32>
    %269 = arith.mulf %268, %267 : vector<8x384xf32>
    %cst_120 = arith.constant 5.000000e-01 : f32
    %270 = vector.broadcast %cst_120 : f32 to vector<8x384xf32>
    %271 = arith.addf %269, %270 : vector<8x384xf32>
    %272 = vector.extract_strided_slice %271 {offsets = [0, 0], sizes = [8, 128], strides = [1, 1]} : vector<8x384xf32> to vector<8x128xf32>
    %273 = vector.extract_strided_slice %271 {offsets = [0, 128], sizes = [8, 128], strides = [1, 1]} : vector<8x384xf32> to vector<8x128xf32>
    %274 = vector.extract_strided_slice %271 {offsets = [0, 256], sizes = [8, 128], strides = [1, 1]} : vector<8x384xf32> to vector<8x128xf32>
    %275 = vector.extract_strided_slice %263 {offsets = [0, 384], sizes = [8, 128], strides = [1, 1]} : vector<8x512xf32> to vector<8x128xf32>
    %276 = math.tanh %275 : vector<8x128xf32>
    %277 = arith.mulf %273, %255 : vector<8x128xf32>
    %278 = arith.mulf %272, %276 : vector<8x128xf32>
    %279 = arith.addf %277, %278 : vector<8x128xf32>
    %280 = math.tanh %279 : vector<8x128xf32>
    %281 = arith.mulf %274, %280 : vector<8x128xf32>
    %c16_121 = arith.constant 16 : index
    %c0_122 = arith.constant 0 : index
    %282 = vector.load %arg14[%c16_121, %c0_122] : memref<64x128xf32, #tpu.memory_space<vmem>>, vector<8x128xf32>
    tpu.vector_store %arg14[%c16_121, %c0_122], %281 {strides = array<i32>} : memref<64x128xf32, #tpu.memory_space<vmem>>, vector<8x128xf32>,
    %c24_123 = arith.constant 24 : index
    %c0_124 = arith.constant 0 : index
    %283 = vector.load %arg13[%c24_123, %c0_124] : memref<64x512xf32, #tpu.memory_space<vmem>>, vector<8x512xf32>
    %284 = arith.truncf %281 : vector<8x128xf32> to vector<8x128xbf16>
    %c0_125 = arith.constant 0 : index
    %c0_126 = arith.constant 0 : index
    %285 = vector.load %arg6[%c0_125, %c0_126] : memref<128x512xbf16, #tpu.memory_space<vmem>>, vector<128x512xbf16>
    %cst_127 = arith.constant dense<0.000000e+00> : vector<8x512xf32>
    %286 = tpu.matmul %284, %285, %cst_127 {dimension_numbers = #tpu.dot_dimension_numbers<[1], [0], [0], [1], [0, 0, 1, 1], [], []>} : vector<8x128xbf16>, vector<128x512xbf16>, vector<8x512xf32> -> vector<8x512xf32>
    %287 = arith.addf %283, %286 : vector<8x512xf32>
    %288 = vector.extract_strided_slice %287 {offsets = [0, 0], sizes = [8, 384], strides = [1, 1]} : vector<8x512xf32> to vector<8x384xf32>
    %cst_128 = arith.constant 5.000000e-01 : f32
    %289 = vector.broadcast %cst_128 : f32 to vector<8x384xf32>
    %290 = arith.mulf %289, %288 : vector<8x384xf32>
    %291 = math.tanh %290 : vector<8x384xf32>
    %cst_129 = arith.constant 5.000000e-01 : f32
    %292 = vector.broadcast %cst_129 : f32 to vector<8x384xf32>
    %293 = arith.mulf %292, %291 : vector<8x384xf32>
    %cst_130 = arith.constant 5.000000e-01 : f32
    %294 = vector.broadcast %cst_130 : f32 to vector<8x384xf32>
    %295 = arith.addf %293, %294 : vector<8x384xf32>
    %296 = vector.extract_strided_slice %295 {offsets = [0, 0], sizes = [8, 128], strides = [1, 1]} : vector<8x384xf32> to vector<8x128xf32>
    %297 = vector.extract_strided_slice %295 {offsets = [0, 128], sizes = [8, 128], strides = [1, 1]} : vector<8x384xf32> to vector<8x128xf32>
    %298 = vector.extract_strided_slice %295 {offsets = [0, 256], sizes = [8, 128], strides = [1, 1]} : vector<8x384xf32> to vector<8x128xf32>
    %299 = vector.extract_strided_slice %287 {offsets = [0, 384], sizes = [8, 128], strides = [1, 1]} : vector<8x512xf32> to vector<8x128xf32>
    %300 = math.tanh %299 : vector<8x128xf32>
    %301 = arith.mulf %297, %279 : vector<8x128xf32>
    %302 = arith.mulf %296, %300 : vector<8x128xf32>
    %303 = arith.addf %301, %302 : vector<8x128xf32>
    %304 = math.tanh %303 : vector<8x128xf32>
    %305 = arith.mulf %298, %304 : vector<8x128xf32>
    %c24_131 = arith.constant 24 : index
    %c0_132 = arith.constant 0 : index
    %306 = vector.load %arg14[%c24_131, %c0_132] : memref<64x128xf32, #tpu.memory_space<vmem>>, vector<8x128xf32>
    tpu.vector_store %arg14[%c24_131, %c0_132], %305 {strides = array<i32>} : memref<64x128xf32, #tpu.memory_space<vmem>>, vector<8x128xf32>,
    %c32_133 = arith.constant 32 : index
    %c0_134 = arith.constant 0 : index
    %307 = vector.load %arg13[%c32_133, %c0_134] : memref<64x512xf32, #tpu.memory_space<vmem>>, vector<8x512xf32>
    %308 = arith.truncf %305 : vector<8x128xf32> to vector<8x128xbf16>
    %c0_135 = arith.constant 0 : index
    %c0_136 = arith.constant 0 : index
    %309 = vector.load %arg6[%c0_135, %c0_136] : memref<128x512xbf16, #tpu.memory_space<vmem>>, vector<128x512xbf16>
    %cst_137 = arith.constant dense<0.000000e+00> : vector<8x512xf32>
    %310 = tpu.matmul %308, %309, %cst_137 {dimension_numbers = #tpu.dot_dimension_numbers<[1], [0], [0], [1], [0, 0, 1, 1], [], []>} : vector<8x128xbf16>, vector<128x512xbf16>, vector<8x512xf32> -> vector<8x512xf32>
    %311 = arith.addf %307, %310 : vector<8x512xf32>
    %312 = vector.extract_strided_slice %311 {offsets = [0, 0], sizes = [8, 384], strides = [1, 1]} : vector<8x512xf32> to vector<8x384xf32>
    %cst_138 = arith.constant 5.000000e-01 : f32
    %313 = vector.broadcast %cst_138 : f32 to vector<8x384xf32>
    %314 = arith.mulf %313, %312 : vector<8x384xf32>
    %315 = math.tanh %314 : vector<8x384xf32>
    %cst_139 = arith.constant 5.000000e-01 : f32
    %316 = vector.broadcast %cst_139 : f32 to vector<8x384xf32>
    %317 = arith.mulf %316, %315 : vector<8x384xf32>
    %cst_140 = arith.constant 5.000000e-01 : f32
    %318 = vector.broadcast %cst_140 : f32 to vector<8x384xf32>
    %319 = arith.addf %317, %318 : vector<8x384xf32>
    %320 = vector.extract_strided_slice %319 {offsets = [0, 0], sizes = [8, 128], strides = [1, 1]} : vector<8x384xf32> to vector<8x128xf32>
    %321 = vector.extract_strided_slice %319 {offsets = [0, 128], sizes = [8, 128], strides = [1, 1]} : vector<8x384xf32> to vector<8x128xf32>
    %322 = vector.extract_strided_slice %319 {offsets = [0, 256], sizes = [8, 128], strides = [1, 1]} : vector<8x384xf32> to vector<8x128xf32>
    %323 = vector.extract_strided_slice %311 {offsets = [0, 384], sizes = [8, 128], strides = [1, 1]} : vector<8x512xf32> to vector<8x128xf32>
    %324 = math.tanh %323 : vector<8x128xf32>
    %325 = arith.mulf %321, %303 : vector<8x128xf32>
    %326 = arith.mulf %320, %324 : vector<8x128xf32>
    %327 = arith.addf %325, %326 : vector<8x128xf32>
    %328 = math.tanh %327 : vector<8x128xf32>
    %329 = arith.mulf %322, %328 : vector<8x128xf32>
    %c32_141 = arith.constant 32 : index
    %c0_142 = arith.constant 0 : index
    %330 = vector.load %arg14[%c32_141, %c0_142] : memref<64x128xf32, #tpu.memory_space<vmem>>, vector<8x128xf32>
    tpu.vector_store %arg14[%c32_141, %c0_142], %329 {strides = array<i32>} : memref<64x128xf32, #tpu.memory_space<vmem>>, vector<8x128xf32>,
    %c40_143 = arith.constant 40 : index
    %c0_144 = arith.constant 0 : index
    %331 = vector.load %arg13[%c40_143, %c0_144] : memref<64x512xf32, #tpu.memory_space<vmem>>, vector<8x512xf32>
    %332 = arith.truncf %329 : vector<8x128xf32> to vector<8x128xbf16>
    %c0_145 = arith.constant 0 : index
    %c0_146 = arith.constant 0 : index
    %333 = vector.load %arg6[%c0_145, %c0_146] : memref<128x512xbf16, #tpu.memory_space<vmem>>, vector<128x512xbf16>
    %cst_147 = arith.constant dense<0.000000e+00> : vector<8x512xf32>
    %334 = tpu.matmul %332, %333, %cst_147 {dimension_numbers = #tpu.dot_dimension_numbers<[1], [0], [0], [1], [0, 0, 1, 1], [], []>} : vector<8x128xbf16>, vector<128x512xbf16>, vector<8x512xf32> -> vector<8x512xf32>
    %335 = arith.addf %331, %334 : vector<8x512xf32>
    %336 = vector.extract_strided_slice %335 {offsets = [0, 0], sizes = [8, 384], strides = [1, 1]} : vector<8x512xf32> to vector<8x384xf32>
    %cst_148 = arith.constant 5.000000e-01 : f32
    %337 = vector.broadcast %cst_148 : f32 to vector<8x384xf32>
    %338 = arith.mulf %337, %336 : vector<8x384xf32>
    %339 = math.tanh %338 : vector<8x384xf32>
    %cst_149 = arith.constant 5.000000e-01 : f32
    %340 = vector.broadcast %cst_149 : f32 to vector<8x384xf32>
    %341 = arith.mulf %340, %339 : vector<8x384xf32>
    %cst_150 = arith.constant 5.000000e-01 : f32
    %342 = vector.broadcast %cst_150 : f32 to vector<8x384xf32>
    %343 = arith.addf %341, %342 : vector<8x384xf32>
    %344 = vector.extract_strided_slice %343 {offsets = [0, 0], sizes = [8, 128], strides = [1, 1]} : vector<8x384xf32> to vector<8x128xf32>
    %345 = vector.extract_strided_slice %343 {offsets = [0, 128], sizes = [8, 128], strides = [1, 1]} : vector<8x384xf32> to vector<8x128xf32>
    %346 = vector.extract_strided_slice %343 {offsets = [0, 256], sizes = [8, 128], strides = [1, 1]} : vector<8x384xf32> to vector<8x128xf32>
    %347 = vector.extract_strided_slice %335 {offsets = [0, 384], sizes = [8, 128], strides = [1, 1]} : vector<8x512xf32> to vector<8x128xf32>
    %348 = math.tanh %347 : vector<8x128xf32>
    %349 = arith.mulf %345, %327 : vector<8x128xf32>
    %350 = arith.mulf %344, %348 : vector<8x128xf32>
    %351 = arith.addf %349, %350 : vector<8x128xf32>
    %352 = math.tanh %351 : vector<8x128xf32>
    %353 = arith.mulf %346, %352 : vector<8x128xf32>
    %c40_151 = arith.constant 40 : index
    %c0_152 = arith.constant 0 : index
    %354 = vector.load %arg14[%c40_151, %c0_152] : memref<64x128xf32, #tpu.memory_space<vmem>>, vector<8x128xf32>
    tpu.vector_store %arg14[%c40_151, %c0_152], %353 {strides = array<i32>} : memref<64x128xf32, #tpu.memory_space<vmem>>, vector<8x128xf32>,
    %c48_153 = arith.constant 48 : index
    %c0_154 = arith.constant 0 : index
    %355 = vector.load %arg13[%c48_153, %c0_154] : memref<64x512xf32, #tpu.memory_space<vmem>>, vector<8x512xf32>
    %356 = arith.truncf %353 : vector<8x128xf32> to vector<8x128xbf16>
    %c0_155 = arith.constant 0 : index
    %c0_156 = arith.constant 0 : index
    %357 = vector.load %arg6[%c0_155, %c0_156] : memref<128x512xbf16, #tpu.memory_space<vmem>>, vector<128x512xbf16>
    %cst_157 = arith.constant dense<0.000000e+00> : vector<8x512xf32>
    %358 = tpu.matmul %356, %357, %cst_157 {dimension_numbers = #tpu.dot_dimension_numbers<[1], [0], [0], [1], [0, 0, 1, 1], [], []>} : vector<8x128xbf16>, vector<128x512xbf16>, vector<8x512xf32> -> vector<8x512xf32>
    %359 = arith.addf %355, %358 : vector<8x512xf32>
    %360 = vector.extract_strided_slice %359 {offsets = [0, 0], sizes = [8, 384], strides = [1, 1]} : vector<8x512xf32> to vector<8x384xf32>
    %cst_158 = arith.constant 5.000000e-01 : f32
    %361 = vector.broadcast %cst_158 : f32 to vector<8x384xf32>
    %362 = arith.mulf %361, %360 : vector<8x384xf32>
    %363 = math.tanh %362 : vector<8x384xf32>
    %cst_159 = arith.constant 5.000000e-01 : f32
    %364 = vector.broadcast %cst_159 : f32 to vector<8x384xf32>
    %365 = arith.mulf %364, %363 : vector<8x384xf32>
    %cst_160 = arith.constant 5.000000e-01 : f32
    %366 = vector.broadcast %cst_160 : f32 to vector<8x384xf32>
    %367 = arith.addf %365, %366 : vector<8x384xf32>
    %368 = vector.extract_strided_slice %367 {offsets = [0, 0], sizes = [8, 128], strides = [1, 1]} : vector<8x384xf32> to vector<8x128xf32>
    %369 = vector.extract_strided_slice %367 {offsets = [0, 128], sizes = [8, 128], strides = [1, 1]} : vector<8x384xf32> to vector<8x128xf32>
    %370 = vector.extract_strided_slice %367 {offsets = [0, 256], sizes = [8, 128], strides = [1, 1]} : vector<8x384xf32> to vector<8x128xf32>
    %371 = vector.extract_strided_slice %359 {offsets = [0, 384], sizes = [8, 128], strides = [1, 1]} : vector<8x512xf32> to vector<8x128xf32>
    %372 = math.tanh %371 : vector<8x128xf32>
    %373 = arith.mulf %369, %351 : vector<8x128xf32>
    %374 = arith.mulf %368, %372 : vector<8x128xf32>
    %375 = arith.addf %373, %374 : vector<8x128xf32>
    %376 = math.tanh %375 : vector<8x128xf32>
    %377 = arith.mulf %370, %376 : vector<8x128xf32>
    %c48_161 = arith.constant 48 : index
    %c0_162 = arith.constant 0 : index
    %378 = vector.load %arg14[%c48_161, %c0_162] : memref<64x128xf32, #tpu.memory_space<vmem>>, vector<8x128xf32>
    tpu.vector_store %arg14[%c48_161, %c0_162], %377 {strides = array<i32>} : memref<64x128xf32, #tpu.memory_space<vmem>>, vector<8x128xf32>,
    %c56_163 = arith.constant 56 : index
    %c0_164 = arith.constant 0 : index
    %379 = vector.load %arg13[%c56_163, %c0_164] : memref<64x512xf32, #tpu.memory_space<vmem>>, vector<8x512xf32>
    %380 = arith.truncf %377 : vector<8x128xf32> to vector<8x128xbf16>
    %c0_165 = arith.constant 0 : index
    %c0_166 = arith.constant 0 : index
    %381 = vector.load %arg6[%c0_165, %c0_166] : memref<128x512xbf16, #tpu.memory_space<vmem>>, vector<128x512xbf16>
    %cst_167 = arith.constant dense<0.000000e+00> : vector<8x512xf32>
    %382 = tpu.matmul %380, %381, %cst_167 {dimension_numbers = #tpu.dot_dimension_numbers<[1], [0], [0], [1], [0, 0, 1, 1], [], []>} : vector<8x128xbf16>, vector<128x512xbf16>, vector<8x512xf32> -> vector<8x512xf32>
    %383 = arith.addf %379, %382 : vector<8x512xf32>
    %384 = vector.extract_strided_slice %383 {offsets = [0, 0], sizes = [8, 384], strides = [1, 1]} : vector<8x512xf32> to vector<8x384xf32>
    %cst_168 = arith.constant 5.000000e-01 : f32
    %385 = vector.broadcast %cst_168 : f32 to vector<8x384xf32>
    %386 = arith.mulf %385, %384 : vector<8x384xf32>
    %387 = math.tanh %386 : vector<8x384xf32>
    %cst_169 = arith.constant 5.000000e-01 : f32
    %388 = vector.broadcast %cst_169 : f32 to vector<8x384xf32>
    %389 = arith.mulf %388, %387 : vector<8x384xf32>
    %cst_170 = arith.constant 5.000000e-01 : f32
    %390 = vector.broadcast %cst_170 : f32 to vector<8x384xf32>
    %391 = arith.addf %389, %390 : vector<8x384xf32>
    %392 = vector.extract_strided_slice %391 {offsets = [0, 0], sizes = [8, 128], strides = [1, 1]} : vector<8x384xf32> to vector<8x128xf32>
    %393 = vector.extract_strided_slice %391 {offsets = [0, 128], sizes = [8, 128], strides = [1, 1]} : vector<8x384xf32> to vector<8x128xf32>
    %394 = vector.extract_strided_slice %391 {offsets = [0, 256], sizes = [8, 128], strides = [1, 1]} : vector<8x384xf32> to vector<8x128xf32>
    %395 = vector.extract_strided_slice %383 {offsets = [0, 384], sizes = [8, 128], strides = [1, 1]} : vector<8x512xf32> to vector<8x128xf32>
    %396 = math.tanh %395 : vector<8x128xf32>
    %397 = arith.mulf %393, %375 : vector<8x128xf32>
    %398 = arith.mulf %392, %396 : vector<8x128xf32>
    %399 = arith.addf %397, %398 : vector<8x128xf32>
    %400 = math.tanh %399 : vector<8x128xf32>
    %401 = arith.mulf %394, %400 : vector<8x128xf32>
    %c56_171 = arith.constant 56 : index
    %c0_172 = arith.constant 0 : index
    %402 = vector.load %arg14[%c56_171, %c0_172] : memref<64x128xf32, #tpu.memory_space<vmem>>, vector<8x128xf32>
    tpu.vector_store %arg14[%c56_171, %c0_172], %401 {strides = array<i32>} : memref<64x128xf32, #tpu.memory_space<vmem>>, vector<8x128xf32>,
    %c0_173 = arith.constant 0 : index
    %c0_174 = arith.constant 0 : index
    %403 = vector.load %arg14[%c0_173, %c0_174] : memref<64x128xf32, #tpu.memory_space<vmem>>, vector<64x128xf32>
    %404 = arith.truncf %403 : vector<64x128xf32> to vector<64x128xbf16>
    %c0_175 = arith.constant 0 : index
    %c0_176 = arith.constant 0 : index
    %405 = vector.load %arg7[%c0_175, %c0_176] : memref<128x512xbf16, #tpu.memory_space<vmem>>, vector<128x512xbf16>
    %cst_177 = arith.constant dense<0.000000e+00> : vector<64x512xf32>
    %406 = tpu.matmul %404, %405, %cst_177 {dimension_numbers = #tpu.dot_dimension_numbers<[1], [0], [0], [1], [0, 0, 1, 1], [], []>} : vector<64x128xbf16>, vector<128x512xbf16>, vector<64x512xf32> -> vector<64x512xf32>
    %c0_178 = arith.constant 0 : index
    %c0_179 = arith.constant 0 : index
    %407 = vector.load %arg8[%c0_178, %c0_179] : memref<1x512xf32, #tpu.memory_space<vmem>>, vector<1x512xf32>
    %408 = vector.broadcast %407 : vector<1x512xf32> to vector<64x512xf32>
    %409 = arith.addf %406, %408 : vector<64x512xf32>
    %c0_180 = arith.constant 0 : index
    %c0_181 = arith.constant 0 : index
    %410 = vector.load %arg13[%c0_180, %c0_181] : memref<64x512xf32, #tpu.memory_space<vmem>>, vector<64x512xf32>
    tpu.vector_store %arg13[%c0_180, %c0_181], %409 {strides = array<i32>} : memref<64x512xf32, #tpu.memory_space<vmem>>, vector<64x512xf32>,
    %cst_182 = arith.constant 0.000000e+00 : f32
    %411 = vector.broadcast %cst_182 : f32 to vector<8x128xf32>
    %cst_183 = arith.constant 0.000000e+00 : f32
    %412 = vector.broadcast %cst_183 : f32 to vector<8x128xf32>
    %c0_184 = arith.constant 0 : index
    %c0_185 = arith.constant 0 : index
    %413 = vector.load %arg13[%c0_184, %c0_185] : memref<64x512xf32, #tpu.memory_space<vmem>>, vector<8x512xf32>
    %414 = arith.truncf %411 : vector<8x128xf32> to vector<8x128xbf16>
    %c0_186 = arith.constant 0 : index
    %c0_187 = arith.constant 0 : index
    %415 = vector.load %arg9[%c0_186, %c0_187] : memref<128x512xbf16, #tpu.memory_space<vmem>>, vector<128x512xbf16>
    %cst_188 = arith.constant dense<0.000000e+00> : vector<8x512xf32>
    %416 = tpu.matmul %414, %415, %cst_188 {dimension_numbers = #tpu.dot_dimension_numbers<[1], [0], [0], [1], [0, 0, 1, 1], [], []>} : vector<8x128xbf16>, vector<128x512xbf16>, vector<8x512xf32> -> vector<8x512xf32>
    %417 = arith.addf %413, %416 : vector<8x512xf32>
    %418 = vector.extract_strided_slice %417 {offsets = [0, 0], sizes = [8, 384], strides = [1, 1]} : vector<8x512xf32> to vector<8x384xf32>
    %cst_189 = arith.constant 5.000000e-01 : f32
    %419 = vector.broadcast %cst_189 : f32 to vector<8x384xf32>
    %420 = arith.mulf %419, %418 : vector<8x384xf32>
    %421 = math.tanh %420 : vector<8x384xf32>
    %cst_190 = arith.constant 5.000000e-01 : f32
    %422 = vector.broadcast %cst_190 : f32 to vector<8x384xf32>
    %423 = arith.mulf %422, %421 : vector<8x384xf32>
    %cst_191 = arith.constant 5.000000e-01 : f32
    %424 = vector.broadcast %cst_191 : f32 to vector<8x384xf32>
    %425 = arith.addf %423, %424 : vector<8x384xf32>
    %426 = vector.extract_strided_slice %425 {offsets = [0, 0], sizes = [8, 128], strides = [1, 1]} : vector<8x384xf32> to vector<8x128xf32>
    %427 = vector.extract_strided_slice %425 {offsets = [0, 128], sizes = [8, 128], strides = [1, 1]} : vector<8x384xf32> to vector<8x128xf32>
    %428 = vector.extract_strided_slice %425 {offsets = [0, 256], sizes = [8, 128], strides = [1, 1]} : vector<8x384xf32> to vector<8x128xf32>
    %429 = vector.extract_strided_slice %417 {offsets = [0, 384], sizes = [8, 128], strides = [1, 1]} : vector<8x512xf32> to vector<8x128xf32>
    %430 = math.tanh %429 : vector<8x128xf32>
    %431 = arith.mulf %427, %412 : vector<8x128xf32>
    %432 = arith.mulf %426, %430 : vector<8x128xf32>
    %433 = arith.addf %431, %432 : vector<8x128xf32>
    %434 = math.tanh %433 : vector<8x128xf32>
    %435 = arith.mulf %428, %434 : vector<8x128xf32>
    %c8_192 = arith.constant 8 : index
    %c0_193 = arith.constant 0 : index
    %436 = vector.load %arg13[%c8_192, %c0_193] : memref<64x512xf32, #tpu.memory_space<vmem>>, vector<8x512xf32>
    %437 = arith.truncf %435 : vector<8x128xf32> to vector<8x128xbf16>
    %c0_194 = arith.constant 0 : index
    %c0_195 = arith.constant 0 : index
    %438 = vector.load %arg9[%c0_194, %c0_195] : memref<128x512xbf16, #tpu.memory_space<vmem>>, vector<128x512xbf16>
    %cst_196 = arith.constant dense<0.000000e+00> : vector<8x512xf32>
    %439 = tpu.matmul %437, %438, %cst_196 {dimension_numbers = #tpu.dot_dimension_numbers<[1], [0], [0], [1], [0, 0, 1, 1], [], []>} : vector<8x128xbf16>, vector<128x512xbf16>, vector<8x512xf32> -> vector<8x512xf32>
    %440 = arith.addf %436, %439 : vector<8x512xf32>
    %441 = vector.extract_strided_slice %440 {offsets = [0, 0], sizes = [8, 384], strides = [1, 1]} : vector<8x512xf32> to vector<8x384xf32>
    %cst_197 = arith.constant 5.000000e-01 : f32
    %442 = vector.broadcast %cst_197 : f32 to vector<8x384xf32>
    %443 = arith.mulf %442, %441 : vector<8x384xf32>
    %444 = math.tanh %443 : vector<8x384xf32>
    %cst_198 = arith.constant 5.000000e-01 : f32
    %445 = vector.broadcast %cst_198 : f32 to vector<8x384xf32>
    %446 = arith.mulf %445, %444 : vector<8x384xf32>
    %cst_199 = arith.constant 5.000000e-01 : f32
    %447 = vector.broadcast %cst_199 : f32 to vector<8x384xf32>
    %448 = arith.addf %446, %447 : vector<8x384xf32>
    %449 = vector.extract_strided_slice %448 {offsets = [0, 0], sizes = [8, 128], strides = [1, 1]} : vector<8x384xf32> to vector<8x128xf32>
    %450 = vector.extract_strided_slice %448 {offsets = [0, 128], sizes = [8, 128], strides = [1, 1]} : vector<8x384xf32> to vector<8x128xf32>
    %451 = vector.extract_strided_slice %448 {offsets = [0, 256], sizes = [8, 128], strides = [1, 1]} : vector<8x384xf32> to vector<8x128xf32>
    %452 = vector.extract_strided_slice %440 {offsets = [0, 384], sizes = [8, 128], strides = [1, 1]} : vector<8x512xf32> to vector<8x128xf32>
    %453 = math.tanh %452 : vector<8x128xf32>
    %454 = arith.mulf %450, %433 : vector<8x128xf32>
    %455 = arith.mulf %449, %453 : vector<8x128xf32>
    %456 = arith.addf %454, %455 : vector<8x128xf32>
    %457 = math.tanh %456 : vector<8x128xf32>
    %458 = arith.mulf %451, %457 : vector<8x128xf32>
    %c16_200 = arith.constant 16 : index
    %c0_201 = arith.constant 0 : index
    %459 = vector.load %arg13[%c16_200, %c0_201] : memref<64x512xf32, #tpu.memory_space<vmem>>, vector<8x512xf32>
    %460 = arith.truncf %458 : vector<8x128xf32> to vector<8x128xbf16>
    %c0_202 = arith.constant 0 : index
    %c0_203 = arith.constant 0 : index
    %461 = vector.load %arg9[%c0_202, %c0_203] : memref<128x512xbf16, #tpu.memory_space<vmem>>, vector<128x512xbf16>
    %cst_204 = arith.constant dense<0.000000e+00> : vector<8x512xf32>
    %462 = tpu.matmul %460, %461, %cst_204 {dimension_numbers = #tpu.dot_dimension_numbers<[1], [0], [0], [1], [0, 0, 1, 1], [], []>} : vector<8x128xbf16>, vector<128x512xbf16>, vector<8x512xf32> -> vector<8x512xf32>
    %463 = arith.addf %459, %462 : vector<8x512xf32>
    %464 = vector.extract_strided_slice %463 {offsets = [0, 0], sizes = [8, 384], strides = [1, 1]} : vector<8x512xf32> to vector<8x384xf32>
    %cst_205 = arith.constant 5.000000e-01 : f32
    %465 = vector.broadcast %cst_205 : f32 to vector<8x384xf32>
    %466 = arith.mulf %465, %464 : vector<8x384xf32>
    %467 = math.tanh %466 : vector<8x384xf32>
    %cst_206 = arith.constant 5.000000e-01 : f32
    %468 = vector.broadcast %cst_206 : f32 to vector<8x384xf32>
    %469 = arith.mulf %468, %467 : vector<8x384xf32>
    %cst_207 = arith.constant 5.000000e-01 : f32
    %470 = vector.broadcast %cst_207 : f32 to vector<8x384xf32>
    %471 = arith.addf %469, %470 : vector<8x384xf32>
    %472 = vector.extract_strided_slice %471 {offsets = [0, 0], sizes = [8, 128], strides = [1, 1]} : vector<8x384xf32> to vector<8x128xf32>
    %473 = vector.extract_strided_slice %471 {offsets = [0, 128], sizes = [8, 128], strides = [1, 1]} : vector<8x384xf32> to vector<8x128xf32>
    %474 = vector.extract_strided_slice %471 {offsets = [0, 256], sizes = [8, 128], strides = [1, 1]} : vector<8x384xf32> to vector<8x128xf32>
    %475 = vector.extract_strided_slice %463 {offsets = [0, 384], sizes = [8, 128], strides = [1, 1]} : vector<8x512xf32> to vector<8x128xf32>
    %476 = math.tanh %475 : vector<8x128xf32>
    %477 = arith.mulf %473, %456 : vector<8x128xf32>
    %478 = arith.mulf %472, %476 : vector<8x128xf32>
    %479 = arith.addf %477, %478 : vector<8x128xf32>
    %480 = math.tanh %479 : vector<8x128xf32>
    %481 = arith.mulf %474, %480 : vector<8x128xf32>
    %c24_208 = arith.constant 24 : index
    %c0_209 = arith.constant 0 : index
    %482 = vector.load %arg13[%c24_208, %c0_209] : memref<64x512xf32, #tpu.memory_space<vmem>>, vector<8x512xf32>
    %483 = arith.truncf %481 : vector<8x128xf32> to vector<8x128xbf16>
    %c0_210 = arith.constant 0 : index
    %c0_211 = arith.constant 0 : index
    %484 = vector.load %arg9[%c0_210, %c0_211] : memref<128x512xbf16, #tpu.memory_space<vmem>>, vector<128x512xbf16>
    %cst_212 = arith.constant dense<0.000000e+00> : vector<8x512xf32>
    %485 = tpu.matmul %483, %484, %cst_212 {dimension_numbers = #tpu.dot_dimension_numbers<[1], [0], [0], [1], [0, 0, 1, 1], [], []>} : vector<8x128xbf16>, vector<128x512xbf16>, vector<8x512xf32> -> vector<8x512xf32>
    %486 = arith.addf %482, %485 : vector<8x512xf32>
    %487 = vector.extract_strided_slice %486 {offsets = [0, 0], sizes = [8, 384], strides = [1, 1]} : vector<8x512xf32> to vector<8x384xf32>
    %cst_213 = arith.constant 5.000000e-01 : f32
    %488 = vector.broadcast %cst_213 : f32 to vector<8x384xf32>
    %489 = arith.mulf %488, %487 : vector<8x384xf32>
    %490 = math.tanh %489 : vector<8x384xf32>
    %cst_214 = arith.constant 5.000000e-01 : f32
    %491 = vector.broadcast %cst_214 : f32 to vector<8x384xf32>
    %492 = arith.mulf %491, %490 : vector<8x384xf32>
    %cst_215 = arith.constant 5.000000e-01 : f32
    %493 = vector.broadcast %cst_215 : f32 to vector<8x384xf32>
    %494 = arith.addf %492, %493 : vector<8x384xf32>
    %495 = vector.extract_strided_slice %494 {offsets = [0, 0], sizes = [8, 128], strides = [1, 1]} : vector<8x384xf32> to vector<8x128xf32>
    %496 = vector.extract_strided_slice %494 {offsets = [0, 128], sizes = [8, 128], strides = [1, 1]} : vector<8x384xf32> to vector<8x128xf32>
    %497 = vector.extract_strided_slice %494 {offsets = [0, 256], sizes = [8, 128], strides = [1, 1]} : vector<8x384xf32> to vector<8x128xf32>
    %498 = vector.extract_strided_slice %486 {offsets = [0, 384], sizes = [8, 128], strides = [1, 1]} : vector<8x512xf32> to vector<8x128xf32>
    %499 = math.tanh %498 : vector<8x128xf32>
    %500 = arith.mulf %496, %479 : vector<8x128xf32>
    %501 = arith.mulf %495, %499 : vector<8x128xf32>
    %502 = arith.addf %500, %501 : vector<8x128xf32>
    %503 = math.tanh %502 : vector<8x128xf32>
    %504 = arith.mulf %497, %503 : vector<8x128xf32>
    %c32_216 = arith.constant 32 : index
    %c0_217 = arith.constant 0 : index
    %505 = vector.load %arg13[%c32_216, %c0_217] : memref<64x512xf32, #tpu.memory_space<vmem>>, vector<8x512xf32>
    %506 = arith.truncf %504 : vector<8x128xf32> to vector<8x128xbf16>
    %c0_218 = arith.constant 0 : index
    %c0_219 = arith.constant 0 : index
    %507 = vector.load %arg9[%c0_218, %c0_219] : memref<128x512xbf16, #tpu.memory_space<vmem>>, vector<128x512xbf16>
    %cst_220 = arith.constant dense<0.000000e+00> : vector<8x512xf32>
    %508 = tpu.matmul %506, %507, %cst_220 {dimension_numbers = #tpu.dot_dimension_numbers<[1], [0], [0], [1], [0, 0, 1, 1], [], []>} : vector<8x128xbf16>, vector<128x512xbf16>, vector<8x512xf32> -> vector<8x512xf32>
    %509 = arith.addf %505, %508 : vector<8x512xf32>
    %510 = vector.extract_strided_slice %509 {offsets = [0, 0], sizes = [8, 384], strides = [1, 1]} : vector<8x512xf32> to vector<8x384xf32>
    %cst_221 = arith.constant 5.000000e-01 : f32
    %511 = vector.broadcast %cst_221 : f32 to vector<8x384xf32>
    %512 = arith.mulf %511, %510 : vector<8x384xf32>
    %513 = math.tanh %512 : vector<8x384xf32>
    %cst_222 = arith.constant 5.000000e-01 : f32
    %514 = vector.broadcast %cst_222 : f32 to vector<8x384xf32>
    %515 = arith.mulf %514, %513 : vector<8x384xf32>
    %cst_223 = arith.constant 5.000000e-01 : f32
    %516 = vector.broadcast %cst_223 : f32 to vector<8x384xf32>
    %517 = arith.addf %515, %516 : vector<8x384xf32>
    %518 = vector.extract_strided_slice %517 {offsets = [0, 0], sizes = [8, 128], strides = [1, 1]} : vector<8x384xf32> to vector<8x128xf32>
    %519 = vector.extract_strided_slice %517 {offsets = [0, 128], sizes = [8, 128], strides = [1, 1]} : vector<8x384xf32> to vector<8x128xf32>
    %520 = vector.extract_strided_slice %517 {offsets = [0, 256], sizes = [8, 128], strides = [1, 1]} : vector<8x384xf32> to vector<8x128xf32>
    %521 = vector.extract_strided_slice %509 {offsets = [0, 384], sizes = [8, 128], strides = [1, 1]} : vector<8x512xf32> to vector<8x128xf32>
    %522 = math.tanh %521 : vector<8x128xf32>
    %523 = arith.mulf %519, %502 : vector<8x128xf32>
    %524 = arith.mulf %518, %522 : vector<8x128xf32>
    %525 = arith.addf %523, %524 : vector<8x128xf32>
    %526 = math.tanh %525 : vector<8x128xf32>
    %527 = arith.mulf %520, %526 : vector<8x128xf32>
    %c40_224 = arith.constant 40 : index
    %c0_225 = arith.constant 0 : index
    %528 = vector.load %arg13[%c40_224, %c0_225] : memref<64x512xf32, #tpu.memory_space<vmem>>, vector<8x512xf32>
    %529 = arith.truncf %527 : vector<8x128xf32> to vector<8x128xbf16>
    %c0_226 = arith.constant 0 : index
    %c0_227 = arith.constant 0 : index
    %530 = vector.load %arg9[%c0_226, %c0_227] : memref<128x512xbf16, #tpu.memory_space<vmem>>, vector<128x512xbf16>
    %cst_228 = arith.constant dense<0.000000e+00> : vector<8x512xf32>
    %531 = tpu.matmul %529, %530, %cst_228 {dimension_numbers = #tpu.dot_dimension_numbers<[1], [0], [0], [1], [0, 0, 1, 1], [], []>} : vector<8x128xbf16>, vector<128x512xbf16>, vector<8x512xf32> -> vector<8x512xf32>
    %532 = arith.addf %528, %531 : vector<8x512xf32>
    %533 = vector.extract_strided_slice %532 {offsets = [0, 0], sizes = [8, 384], strides = [1, 1]} : vector<8x512xf32> to vector<8x384xf32>
    %cst_229 = arith.constant 5.000000e-01 : f32
    %534 = vector.broadcast %cst_229 : f32 to vector<8x384xf32>
    %535 = arith.mulf %534, %533 : vector<8x384xf32>
    %536 = math.tanh %535 : vector<8x384xf32>
    %cst_230 = arith.constant 5.000000e-01 : f32
    %537 = vector.broadcast %cst_230 : f32 to vector<8x384xf32>
    %538 = arith.mulf %537, %536 : vector<8x384xf32>
    %cst_231 = arith.constant 5.000000e-01 : f32
    %539 = vector.broadcast %cst_231 : f32 to vector<8x384xf32>
    %540 = arith.addf %538, %539 : vector<8x384xf32>
    %541 = vector.extract_strided_slice %540 {offsets = [0, 0], sizes = [8, 128], strides = [1, 1]} : vector<8x384xf32> to vector<8x128xf32>
    %542 = vector.extract_strided_slice %540 {offsets = [0, 128], sizes = [8, 128], strides = [1, 1]} : vector<8x384xf32> to vector<8x128xf32>
    %543 = vector.extract_strided_slice %540 {offsets = [0, 256], sizes = [8, 128], strides = [1, 1]} : vector<8x384xf32> to vector<8x128xf32>
    %544 = vector.extract_strided_slice %532 {offsets = [0, 384], sizes = [8, 128], strides = [1, 1]} : vector<8x512xf32> to vector<8x128xf32>
    %545 = math.tanh %544 : vector<8x128xf32>
    %546 = arith.mulf %542, %525 : vector<8x128xf32>
    %547 = arith.mulf %541, %545 : vector<8x128xf32>
    %548 = arith.addf %546, %547 : vector<8x128xf32>
    %549 = math.tanh %548 : vector<8x128xf32>
    %550 = arith.mulf %543, %549 : vector<8x128xf32>
    %c48_232 = arith.constant 48 : index
    %c0_233 = arith.constant 0 : index
    %551 = vector.load %arg13[%c48_232, %c0_233] : memref<64x512xf32, #tpu.memory_space<vmem>>, vector<8x512xf32>
    %552 = arith.truncf %550 : vector<8x128xf32> to vector<8x128xbf16>
    %c0_234 = arith.constant 0 : index
    %c0_235 = arith.constant 0 : index
    %553 = vector.load %arg9[%c0_234, %c0_235] : memref<128x512xbf16, #tpu.memory_space<vmem>>, vector<128x512xbf16>
    %cst_236 = arith.constant dense<0.000000e+00> : vector<8x512xf32>
    %554 = tpu.matmul %552, %553, %cst_236 {dimension_numbers = #tpu.dot_dimension_numbers<[1], [0], [0], [1], [0, 0, 1, 1], [], []>} : vector<8x128xbf16>, vector<128x512xbf16>, vector<8x512xf32> -> vector<8x512xf32>
    %555 = arith.addf %551, %554 : vector<8x512xf32>
    %556 = vector.extract_strided_slice %555 {offsets = [0, 0], sizes = [8, 384], strides = [1, 1]} : vector<8x512xf32> to vector<8x384xf32>
    %cst_237 = arith.constant 5.000000e-01 : f32
    %557 = vector.broadcast %cst_237 : f32 to vector<8x384xf32>
    %558 = arith.mulf %557, %556 : vector<8x384xf32>
    %559 = math.tanh %558 : vector<8x384xf32>
    %cst_238 = arith.constant 5.000000e-01 : f32
    %560 = vector.broadcast %cst_238 : f32 to vector<8x384xf32>
    %561 = arith.mulf %560, %559 : vector<8x384xf32>
    %cst_239 = arith.constant 5.000000e-01 : f32
    %562 = vector.broadcast %cst_239 : f32 to vector<8x384xf32>
    %563 = arith.addf %561, %562 : vector<8x384xf32>
    %564 = vector.extract_strided_slice %563 {offsets = [0, 0], sizes = [8, 128], strides = [1, 1]} : vector<8x384xf32> to vector<8x128xf32>
    %565 = vector.extract_strided_slice %563 {offsets = [0, 128], sizes = [8, 128], strides = [1, 1]} : vector<8x384xf32> to vector<8x128xf32>
    %566 = vector.extract_strided_slice %563 {offsets = [0, 256], sizes = [8, 128], strides = [1, 1]} : vector<8x384xf32> to vector<8x128xf32>
    %567 = vector.extract_strided_slice %555 {offsets = [0, 384], sizes = [8, 128], strides = [1, 1]} : vector<8x512xf32> to vector<8x128xf32>
    %568 = math.tanh %567 : vector<8x128xf32>
    %569 = arith.mulf %565, %548 : vector<8x128xf32>
    %570 = arith.mulf %564, %568 : vector<8x128xf32>
    %571 = arith.addf %569, %570 : vector<8x128xf32>
    %572 = math.tanh %571 : vector<8x128xf32>
    %573 = arith.mulf %566, %572 : vector<8x128xf32>
    %c56_240 = arith.constant 56 : index
    %c0_241 = arith.constant 0 : index
    %574 = vector.load %arg13[%c56_240, %c0_241] : memref<64x512xf32, #tpu.memory_space<vmem>>, vector<8x512xf32>
    %575 = arith.truncf %573 : vector<8x128xf32> to vector<8x128xbf16>
    %c0_242 = arith.constant 0 : index
    %c0_243 = arith.constant 0 : index
    %576 = vector.load %arg9[%c0_242, %c0_243] : memref<128x512xbf16, #tpu.memory_space<vmem>>, vector<128x512xbf16>
    %cst_244 = arith.constant dense<0.000000e+00> : vector<8x512xf32>
    %577 = tpu.matmul %575, %576, %cst_244 {dimension_numbers = #tpu.dot_dimension_numbers<[1], [0], [0], [1], [0, 0, 1, 1], [], []>} : vector<8x128xbf16>, vector<128x512xbf16>, vector<8x512xf32> -> vector<8x512xf32>
    %578 = arith.addf %574, %577 : vector<8x512xf32>
    %579 = vector.extract_strided_slice %578 {offsets = [0, 0], sizes = [8, 384], strides = [1, 1]} : vector<8x512xf32> to vector<8x384xf32>
    %cst_245 = arith.constant 5.000000e-01 : f32
    %580 = vector.broadcast %cst_245 : f32 to vector<8x384xf32>
    %581 = arith.mulf %580, %579 : vector<8x384xf32>
    %582 = math.tanh %581 : vector<8x384xf32>
    %cst_246 = arith.constant 5.000000e-01 : f32
    %583 = vector.broadcast %cst_246 : f32 to vector<8x384xf32>
    %584 = arith.mulf %583, %582 : vector<8x384xf32>
    %cst_247 = arith.constant 5.000000e-01 : f32
    %585 = vector.broadcast %cst_247 : f32 to vector<8x384xf32>
    %586 = arith.addf %584, %585 : vector<8x384xf32>
    %587 = vector.extract_strided_slice %586 {offsets = [0, 0], sizes = [8, 128], strides = [1, 1]} : vector<8x384xf32> to vector<8x128xf32>
    %588 = vector.extract_strided_slice %586 {offsets = [0, 128], sizes = [8, 128], strides = [1, 1]} : vector<8x384xf32> to vector<8x128xf32>
    %589 = vector.extract_strided_slice %586 {offsets = [0, 256], sizes = [8, 128], strides = [1, 1]} : vector<8x384xf32> to vector<8x128xf32>
    %590 = vector.extract_strided_slice %578 {offsets = [0, 384], sizes = [8, 128], strides = [1, 1]} : vector<8x512xf32> to vector<8x128xf32>
    %591 = math.tanh %590 : vector<8x128xf32>
    %592 = arith.mulf %588, %571 : vector<8x128xf32>
    %593 = arith.mulf %587, %591 : vector<8x128xf32>
    %594 = arith.addf %592, %593 : vector<8x128xf32>
    %595 = math.tanh %594 : vector<8x128xf32>
    %596 = arith.mulf %589, %595 : vector<8x128xf32>
    %c0_248 = arith.constant 0 : index
    %c0_249 = arith.constant 0 : index
    %597 = vector.load %arg10[%c0_248, %c0_249] : memref<1x128xf32, #tpu.memory_space<vmem>>, vector<1x128xf32>
    %598 = vector.broadcast %597 : vector<1x128xf32> to vector<8x128xf32>
    %599 = arith.mulf %596, %598 : vector<8x128xf32>
    %cst_250 = arith.constant dense<0.000000e+00> : vector<8xf32>
    %600 = vector.multi_reduction <add>, %599, %cst_250 [1] : vector<8x128xf32> to vector<8xf32>
    %601 = vector.shape_cast %600 : vector<8xf32> to vector<8x1xf32>
    %c0_251 = arith.constant 0 : index
    %c0_252 = arith.constant 0 : index
    %602 = vector.load %arg11[%c0_251, %c0_252] : memref<1x1xf32, #tpu.memory_space<vmem>>, vector<1x1xf32>
    %603 = vector.broadcast %602 : vector<1x1xf32> to vector<8x1xf32>
    %604 = arith.addf %601, %603 : vector<8x1xf32>
    %c0_253 = arith.constant 0 : index
    %c0_254 = arith.constant 0 : index
    %605 = vector.load %arg12[%c0_253, %c0_254] : memref<8x1xf32, #tpu.memory_space<vmem>>, vector<8x1xf32>
    tpu.vector_store %arg12[%c0_253, %c0_254], %604 {strides = array<i32>} : memref<8x1xf32, #tpu.memory_space<vmem>>, vector<8x1xf32>,
    return
  }
}

</mosaic_0001>

<bundles_post_ra>
// kernel: lstm_model_forward.1
= control target key start
LH: loop header
LB: loop body
LE: loop exit
PB: predicated region body
PF: predicated region fallthrough
CT: control target
= control target key end

     0   :  { %s10722_s0 = inlined_call_operand.vmem [shape: bf16[64,4], index: 0, kind: input, shape index: {}]   ;;  %s10723_s1 = inlined_call_operand.vmem [shape: bf16[4,512], index: 1, kind: input, shape index: {}]   ;;  %s10724_s2 = inlined_call_operand.vmem [shape: f32[1,512], index: 2, kind: input, shape index: {}]   ;;  %s10725_s3 = inlined_call_operand.hbm [shape: bf16[128,512], index: 3, kind: input, shape index: {}]   ;;  %s10726_s4 = inlined_call_operand.hbm [shape: bf16[128,512], index: 4, kind: input, shape index: {}]   ;;  %s10727_s5 = inlined_call_operand.vmem [shape: f32[1,512], index: 5, kind: input, shape index: {}]   ;;  %s10728_s6 = inlined_call_operand.hbm [shape: bf16[128,512], index: 6, kind: input, shape index: {}]   ;;  %s10729_s7 = inlined_call_operand.hbm [shape: bf16[128,512], index: 7, kind: input, shape index: {}]   ;;  %s10730_s8 = inlined_call_operand.vmem [shape: f32[1,512], index: 8, kind: input, shape index: {}]   ;;  %s10731_s9 = inlined_call_operand.hbm [shape: bf16[128,512], index: 9, kind: input, shape index: {}]   ;;  %s10732_s10 = inlined_call_operand.vmem [shape: f32[1,128], index: 10, kind: input, shape index: {}]   ;;  %s10733_s11 = inlined_call_operand.<no memory space> [shape: f32[1,1], index: 11, kind: input, shape index: {}]   ;;  %s10734_s12 = inlined_call_operand.vmem [shape: f32[8,1], index: 12, kind: output, shape index: {}]  }
   0x1   :  { %v17_v0 = vstv %s10733_s11 }
   0x2   :  { %18 = vst [vmem:[#allocation4] sm:$0x1] %v17_v0 }
   0x3   :  { %19 = vsyncpa [#allocation6], 0 }
   0x4   :  { %20 = vsyncpa [#allocation8], 0 }
   0x5   :  { %21 = vsyncpa [#allocation11], 0  ;;  %s45_s25 = sshll.u32 %s10726_s4, 4  ;;  %s9707_s26 = smov [#allocation7]   ;;  %s46_s25 = int_to_ptr.hbm [resolvable:$true] %s45_s25 }
   0x6   :  { %s47_s27 = sshll.u32 %s9707_s26, 4  ;;  %s73_s30 = sshll.u32 %s10729_s7, 4  ;;  %s48_s27 = int_to_ptr.vmem [resolvable:$true] %s47_s27  ;;  %s74_s30 = int_to_ptr.hbm [resolvable:$true] %s73_s30 }
   0x7   :  { %s9708_s13 = smov 256   ;;  %s9709_s14 = smov 16  }
   0x8   :  { %53 = dma.hbm_to_vmem [thread:$0]  %s46_s25, 4096, %s48_s27, [#allocation8], %s9708_s13, %s9708_s13, %s9709_s14  }
   0x9   :  { %s9710_s11 = smov [#allocation10]   ;;  %s32_s18 = sshll.u32 %s10725_s3, 4  ;;  %s33_s18 = int_to_ptr.hbm [resolvable:$true] %s32_s18 }
   0xa   :  { %s75_s15 = sshll.u32 %s9710_s11, 4  ;;  %s60_s20 = sshll.u32 %s10728_s6, 4  ;;  %s76_s15 = int_to_ptr.vmem [resolvable:$true] %s75_s15  ;;  %s61_s20 = int_to_ptr.hbm [resolvable:$true] %s60_s20 }
   0xb   :  { %81 = dma.hbm_to_vmem [thread:$0]  %s74_s30, 4096, %s76_s15, [#allocation11], %s9708_s13, %s9708_s13, %s9709_s14  }
   0xc   :  { %s9711_s21 = smov [#allocation5]   ;;  %s9712_s7 = smov [#allocation9]  }
   0xd   :  { %s34_s22 = sshll.u32 %s9711_s21, 4  ;;  %s62_s23 = sshll.u32 %s9712_s7, 4  ;;  %s35_s22 = int_to_ptr.vmem [resolvable:$true] %s34_s22  ;;  %s63_s23 = int_to_ptr.vmem [resolvable:$true] %s62_s23 }
   0xe   :  { %40 = dma.hbm_to_vmem [thread:$0]  %s33_s18, 4096, %s35_s22, [#allocation6], %s9708_s13, %s9708_s13, %s9709_s14  }
   0xf   :  { %s88_s26 = sshll.u32 %s10731_s9, 4  ;;  %s9713_s3 = smov [#allocation12]   ;;  %s89_s26 = int_to_ptr.hbm [resolvable:$true] %s88_s26 }
  0x10   :  { %68 = dma.hbm_to_vmem [thread:$0]  %s61_s20, 4096, %s63_s23, [#allocation8], %s9708_s13, %s9708_s13, %s9709_s14  }
  0x11   :  { %s90_s27 = sshll.u32 %s9713_s3, 4  ;;  %s91_s27 = int_to_ptr.vmem [resolvable:$true] %s90_s27 }
  0x12   :  { %96 = dma.hbm_to_vmem [thread:$0]  %s89_s26, 4096, %s91_s27, [#allocation11], %s9708_s13, %s9708_s13, %s9709_s14  }
  0x13   :  { %9701 = dma.done.wait [#allocation6], 4096  }
  0x14   :  { %9702 = vsyncadd [#allocation6], 4294963200 }
  0x15   :  { %9703 = dma.done.wait [#allocation8], 8192  }
  0x16   :  { %9704 = vsyncadd [#allocation8], 4294959104 }
  0x17   :  { %9705 = dma.done.wait [#allocation11], 8192  }
  0x18   :  { %9706 = vsyncadd [#allocation11], 4294959104  ;;  %v130_v1 = vld [vmem:[%s10723_s1] sm:$0xff]  ;;  %vm180_vm0 = vcmask 1041408   ;;  %v6401_v2 = vld [vmem:[#allocation5 + $0xe0] sm:$0xf] }
  0x19   :  { %162 = vst [vmem:[#allocation1] ss:$4 sm:$0xff] %v130_v1  ;;  %v8753_v3 = vld [vmem:[#allocation5 + $0xec] sm:$0xf0]  ;;  %v8751_v4 = vld [vmem:[#allocation5 + $0xe4] sm:$0xf] }
  0x1a   :  { %v6403_v5 = vld [vmem:[#allocation5 + $0xf0] sm:$0xf0]  ;;  %v8752_v6 = vld [vmem:[#allocation5 + $0xec] sm:$0xf]  ;;  %v6411_v7 = vld [vmem:[#allocation5 + $0xf8] sm:$0xf0]  ;;  %v6402_v10 = vor.u32 %v8753_v3, %v6401_v2 }
  0x1b   :  { %v6409_v8 = vld [vmem:[#allocation5 + $0xe8] sm:$0xf]  ;;  %v8754_v9 = vld [vmem:[#allocation5 + $0xf4] sm:$0xf0]  ;;  %v6385_v11 = vld [vmem:[#allocation5 + $0xc0] sm:$0xf]  ;;  %v6406_v17 = vor.u32 %v8751_v4, %v6403_v5  ;;  %v6414_v24 = vor.u32 %v8752_v6, %v6411_v7 }
  0x1c   :  { %v8749_v12 = vld [vmem:[#allocation5 + $0xcc] sm:$0xf0]  ;;  %v8747_v13 = vld [vmem:[#allocation5 + $0xc4] sm:$0xf]  ;;  %v6387_v14 = vld [vmem:[#allocation5 + $0xd0] sm:$0xf0]  ;;  %v6410_v26 = vor.u32 %v8754_v9, %v6409_v8 }
  0x1d   :  { %v8719_v21 = vld [vmem:[%s10722_s0] sm:$0xff]  ;;  %vm167_vm1 = vcmask 31744   ;;  %v8748_v27 = vld [vmem:[#allocation5 + $0xcc] sm:$0xf]  ;;  %v6386_v29 = vor.u32 %v8749_v12, %v6385_v11  ;;  %v6390_v30 = vor.u32 %v8747_v13, %v6387_v14  ;;  %v6393_v31 = vld [vmem:[#allocation5 + $0xc8] sm:$0xf] }
  0x1e   :  { %v6395_v28 = vld [vmem:[#allocation5 + $0xd8] sm:$0xf0]  ;;  %v8750_v32 = vld [vmem:[#allocation5 + $0xd4] sm:$0xf0]  ;;  %v6369_v33 = vld [vmem:[#allocation5 + $0xa0] sm:$0xf] }
  0x1f   :  { %v8745_v34 = vld [vmem:[#allocation5 + $0xac] sm:$0xf0]  ;;  %v8743_v35 = vld [vmem:[#allocation5 + $0xa4] sm:$0xf]  ;;  %v6371_v36 = vld [vmem:[#allocation5 + $0xb0] sm:$0xf0]  ;;  %v6398_v37 = vor.u32 %v8748_v27, %v6395_v28  ;;  %v6394_v38 = vor.u32 %v8750_v32, %v6393_v31 }
  0x20   :  { %v163_v15 = vld.sshfl [vmem:[#allocation1] sm:$0xff pattern:$0x73625140]  ;;  %v164_v16 = vld.sshfl [vmem:[#allocation1 + $0x8] sm:$0xff pattern:$0x73625140]  ;;  %v6370_v41 = vor.u32 %v8745_v34, %v6369_v33  ;;  %v6374_v42 = vor.u32 %v8743_v35, %v6371_v36 }
  0x21   :  { %v181_v18 = vsel %vm180_vm0, %v163_v15, 0  ;;  %v183_v19 = vsel %vm180_vm0, %v164_v16, 0  ;;  %v165_v20 = vld.sshfl [vmem:[#allocation1 + $0x10] sm:$0xff pattern:$0x73625140]  ;;  %v8720_v62 = vld [vmem:[%s10722_s0 + $0x8] sm:$0xff] }
  0x22   :  { %196 = vmatpush.bf16.msra.mxu0 %v181_v18  ;;  %225 = vmatpush.bf16.msra.mxu1 %v183_v19  ;;  %v185_v22 = vsel %vm180_vm0, %v165_v20, 0  ;;  %v166_v23 = vld.sshfl [vmem:[#allocation1 + $0x18] sm:$0xff pattern:$0x73625140]  ;;  %v6379_v40 = vld [vmem:[#allocation5 + $0xb8] sm:$0xf0] }
  0x23   :  { %254 = vmatpush.bf16.msra.mxu2 %v185_v22  ;;  %v187_v25 = vsel %vm180_vm0, %v166_v23, 0  ;;  %v8744_v39 = vld [vmem:[#allocation5 + $0xac] sm:$0xf]  ;;  %v6377_v43 = vld [vmem:[#allocation5 + $0xa8] sm:$0xf]  ;;  %vm6246_vm2 = vcmask 7168  }
  0x24   :  { %283 = vmatpush.bf16.msra.mxu3 %v187_v25  ;;  %v8746_v44 = vld [vmem:[#allocation5 + $0xb4] sm:$0xf0]  ;;  %v6353_v45 = vld [vmem:[#allocation5 + $0x80] sm:$0xf]  ;;  %v8741_v46 = vld [vmem:[#allocation5 + $0x8c] sm:$0xf0]  ;;  %v6382_v49 = vor.u32 %v8744_v39, %v6379_v40 }
  0x25   :  { %6271 = vmatmul.msk.bf16.vlgmr.msra.gmra.mxu0 %vm167_vm1, %v8719_v21  ;;  %6275 = vmatmul.msk.bf16.vlgmr.msra.gmra.mxu1 %vm167_vm1, %v8719_v21  ;;  %v8739_v47 = vld [vmem:[#allocation5 + $0x84] sm:$0xf]  ;;  %v6355_v48 = vld [vmem:[#allocation5 + $0x90] sm:$0xf0]  ;;  %v8740_v50 = vld [vmem:[#allocation5 + $0x8c] sm:$0xf]  ;;  %v6378_v51 = vor.u32 %v8746_v44, %v6377_v43  ;;  %v6354_v55 = vor.u32 %v8741_v46, %v6353_v45 }
  0x26   :  { %533 = vmatpush.bf16.msrb.mxu0 %v6402_v10  ;;  %546 = vmatpush.bf16.msrb.mxu1 %v6406_v17  ;;  %v6363_v52 = vld [vmem:[#allocation5 + $0x98] sm:$0xf0]  ;;  %v6361_v53 = vld [vmem:[#allocation5 + $0x88] sm:$0xf]  ;;  %v8742_v54 = vld [vmem:[#allocation5 + $0x94] sm:$0xf0]  ;;  %v6358_v56 = vor.u32 %v8739_v47, %v6355_v48 }
  0x27   :  { %6279 = vmatmul.msk.bf16.vlgmr.msra.gmra.mxu2 %vm167_vm1, %v8719_v21  ;;  %6283 = vmatmul.msk.bf16.vlgmr.msra.gmra.mxu3 %vm167_vm1, %v8719_v21  ;;  %v6337_v57 = vld [vmem:[#allocation5 + $0x60] sm:$0xf]  ;;  %v8737_v58 = vld [vmem:[#allocation5 + $0x6c] sm:$0xf0]  ;;  %v8735_v59 = vld [vmem:[#allocation5 + $0x64] sm:$0xf]  ;;  %v6366_v61 = vor.u32 %v8740_v50, %v6363_v52  ;;  %v6362_v63 = vor.u32 %v8742_v54, %v6361_v53 }
  0x28   :  { %572 = vmatpush.bf16.msrb.mxu3 %v6414_v24  ;;  %559 = vmatpush.bf16.msrb.mxu2 %v6410_v26  ;;  %v6339_v60 = vld [vmem:[#allocation5 + $0x70] sm:$0xf0]  ;;  %v8736_v0 = vld [vmem:[#allocation5 + $0x6c] sm:$0xf]  ;;  %v6347_v1 = vld [vmem:[#allocation5 + $0x78] sm:$0xf0]  ;;  %v6338_v2 = vor.u32 %v8737_v58, %v6337_v57 }
  0x29   :  { %v6342_v3 = vor.u32 %v8735_v59, %v6339_v60  ;;  %v6345_v4 = vld [vmem:[#allocation5 + $0x68] sm:$0xf]  ;;  %v8738_v5 = vld [vmem:[#allocation5 + $0x74] sm:$0xf0]  ;;  %v6321_v6 = vld [vmem:[#allocation5 + $0x40] sm:$0xf]  ;;  %v6350_v10 = vor.u32 %v8736_v0, %v6347_v1 }
  0x2a   :  { %534 = vmatpush.bf16.msrb.mxu0 %v6386_v29  ;;  %547 = vmatpush.bf16.msrb.mxu1 %v6390_v30  ;;  %v8733_v7 = vld [vmem:[#allocation5 + $0x4c] sm:$0xf0]  ;;  %v8731_v8 = vld [vmem:[#allocation5 + $0x44] sm:$0xf]  ;;  %v6323_v9 = vld [vmem:[#allocation5 + $0x50] sm:$0xf0]  ;;  %v6346_v11 = vor.u32 %v8738_v5, %v6345_v4 }
  0x2b   :  { %v8732_v12 = vld [vmem:[#allocation5 + $0x4c] sm:$0xf]  ;;  %v6331_v13 = vld [vmem:[#allocation5 + $0x58] sm:$0xf0]  ;;  %v6322_v14 = vor.u32 %v8733_v7, %v6321_v6  ;;  %v6326_v15 = vor.u32 %v8731_v8, %v6323_v9  ;;  %v6329_v16 = vld [vmem:[#allocation5 + $0x48] sm:$0xf] }
  0x2c   :  { %573 = vmatpush.bf16.msrb.mxu3 %v6398_v37  ;;  %560 = vmatpush.bf16.msrb.mxu2 %v6394_v38  ;;  %v8734_v17 = vld [vmem:[#allocation5 + $0x54] sm:$0xf0]  ;;  %v6334_v18 = vor.u32 %v8732_v12, %v6331_v13  ;;  %v6305_v20 = vld [vmem:[#allocation5 + $0x20] sm:$0xf]  ;;  %v8729_v21 = vld [vmem:[#allocation5 + $0x2c] sm:$0xf0] }
  0x2d   :  { %v6330_v19 = vor.u32 %v8734_v17, %v6329_v16  ;;  %v8727_v22 = vld [vmem:[#allocation5 + $0x24] sm:$0xf]  ;;  %v6306_v23 = vor.u32 %v8729_v21, %v6305_v20  ;;  %v6307_v24 = vld [vmem:[#allocation5 + $0x30] sm:$0xf0]  ;;  %v8728_v25 = vld [vmem:[#allocation5 + $0x2c] sm:$0xf] }
  0x2e   :  { %535 = vmatpush.bf16.msrb.mxu0 %v6370_v41  ;;  %548 = vmatpush.bf16.msrb.mxu1 %v6374_v42  ;;  %v6315_v26 = vld [vmem:[#allocation5 + $0x38] sm:$0xf0]  ;;  %v6310_v27 = vor.u32 %v8727_v22, %v6307_v24  ;;  %v6313_v28 = vld [vmem:[#allocation5 + $0x28] sm:$0xf]  ;;  %v8730_v29 = vld [vmem:[#allocation5 + $0x34] sm:$0xf0] }
  0x2f   :  { %v6289_v30 = vld [vmem:[#allocation5] sm:$0xf]  ;;  %v6318_v31 = vor.u32 %v8728_v25, %v6315_v26  ;;  %v8725_v32 = vld [vmem:[#allocation5 + $0xc] sm:$0xf0]  ;;  %v8723_v33 = vld [vmem:[#allocation5 + $0x4] sm:$0xf]  ;;  %v6314_v35 = vor.u32 %v8730_v29, %v6313_v28 }
  0x30   :  { %574 = vmatpush.bf16.msrb.mxu3 %v6382_v49  ;;  %561 = vmatpush.bf16.msrb.mxu2 %v6378_v51  ;;  %v6291_v34 = vld [vmem:[#allocation5 + $0x10] sm:$0xf0]  ;;  %v8724_v36 = vld [vmem:[#allocation5 + $0xc] sm:$0xf]  ;;  %v6299_v37 = vld [vmem:[#allocation5 + $0x18] sm:$0xf0]  ;;  %v6290_v38 = vor.u32 %v8725_v32, %v6289_v30 }
  0x31   :  { %v6294_v39 = vor.u32 %v8723_v33, %v6291_v34  ;;  %v6297_v40 = vld [vmem:[#allocation5 + $0x8] sm:$0xf]  ;;  %v8726_v41 = vld [vmem:[#allocation5 + $0x14] sm:$0xf0]  ;;  %v6302_v42 = vor.u32 %v8724_v36, %v6299_v37  ;;  %v8722_v45 = vld [vmem:[%s10722_s0 + $0x18] sm:$0xff]  ;;  %v9714_v46 = vmov 0  }
  0x32   :  { %536 = vmatpush.bf16.msrb.mxu0 %v6354_v55  ;;  %549 = vmatpush.bf16.msrb.mxu1 %v6358_v56  ;;  %v6298_v43 = vor.u32 %v8726_v41, %v6297_v40  ;;  %v8721_v44 = vld [vmem:[%s10722_s0 + $0x10] sm:$0xff]  ;;  %v131_v53 = vld [vmem:[%s10724_s2] sm:$0xf]  ;;  %v6529_v7 = vld [vmem:[#allocation5 + $0xe0] sm:$0xf] }
  0x33   :  { %v9852_v54 = vperm.slane %v131_v53, 0  ;;  %v9856_v56 = vperm.slane %v131_v53, 1  ;;  %v8785_v8 = vld [vmem:[#allocation5 + $0xec] sm:$0xf0]  ;;  %v8783_v9 = vld [vmem:[#allocation5 + $0xe4] sm:$0xf] }
  0x34   :  { %575 = vmatpush.bf16.msrb.mxu3 %v6366_v61  ;;  %562 = vmatpush.bf16.msrb.mxu2 %v6362_v63  ;;  %v9868_v63 = vperm.slane %v131_v53, 3  ;;  %v6530_v12 = vor.u32 %v8785_v8, %v6529_v7  ;;  %v6531_v13 = vld [vmem:[#allocation5 + $0xf0] sm:$0xf0]  ;;  %v8784_v20 = vld [vmem:[#allocation5 + $0xec] sm:$0xf] }
  0x35   :  { %6272 = vmatmul.msk.bf16.gmra.mxu0 %vm167_vm1, %v8720_v62  ;;  %6276 = vmatmul.msk.bf16.gmra.mxu1 %vm167_vm1, %v8720_v62  ;;  %v6539_v21 = vld [vmem:[#allocation5 + $0xf8] sm:$0xf0]  ;;  %v6513_v24 = vld [vmem:[#allocation5 + $0xc0] sm:$0xf]  ;;  %v8781_v25 = vld [vmem:[#allocation5 + $0xcc] sm:$0xf0] }
  0x36   :  { %537 = vmatpush.bf16.msrb.mxu0 %v6338_v2  ;;  %550 = vmatpush.bf16.msrb.mxu1 %v6342_v3  ;;  %v8779_v26 = vld [vmem:[#allocation5 + $0xc4] sm:$0xf]  ;;  %v6515_v28 = vld [vmem:[#allocation5 + $0xd0] sm:$0xf0]  ;;  %v6521_v29 = vld [vmem:[#allocation5 + $0xc8] sm:$0xf] }
  0x37   :  { %6280 = vmatmul.msk.bf16.gmra.mxu2 %vm167_vm1, %v8720_v62  ;;  %6284 = vmatmul.msk.bf16.gmra.mxu3 %vm167_vm1, %v8720_v62  ;;  %v9866_v62 = vperm.slane %v131_v53, 2  ;;  %v8782_v30 = vld [vmem:[#allocation5 + $0xd4] sm:$0xf0]  ;;  %v8780_v33 = vld [vmem:[#allocation5 + $0xcc] sm:$0xf] }
  0x38   :  { %576 = vmatpush.bf16.msrb.mxu3 %v6350_v10  ;;  %563 = vmatpush.bf16.msrb.mxu2 %v6346_v11  ;;  %v6522_v32 = vor.u32 %v8782_v30, %v6521_v29  ;;  %v6523_v34 = vld [vmem:[#allocation5 + $0xd8] sm:$0xf0]  ;;  %v6497_v37 = vld [vmem:[#allocation5 + $0xa0] sm:$0xf]  ;;  %v8778_v53 = vld [vmem:[#allocation5 + $0xb4] sm:$0xf0] }
  0x39   :  { %v8776_v7 = vld [vmem:[#allocation5 + $0xac] sm:$0xf]  ;;  %v6507_v8 = vld [vmem:[#allocation5 + $0xb8] sm:$0xf0] }
  0x3a   :  { %538 = vmatpush.bf16.msrb.mxu0 %v6322_v14  ;;  %551 = vmatpush.bf16.msrb.mxu1 %v6326_v15  ;;  %v6537_v14 = vld [vmem:[#allocation5 + $0xe8] sm:$0xf]  ;;  %v8786_v15 = vld [vmem:[#allocation5 + $0xf4] sm:$0xf0] }
  0x3c   :  { %577 = vmatpush.bf16.msrb.mxu3 %v6334_v18  ;;  %564 = vmatpush.bf16.msrb.mxu2 %v6330_v19  ;;  %v6534_v18 = vor.u32 %v8783_v9, %v6531_v13  ;;  %v6538_v19 = vor.u32 %v8786_v15, %v6537_v14  ;;  %v6510_v9 = vor.u32 %v8776_v7, %v6507_v8  ;;  %v8771_v13 = vld [vmem:[#allocation5 + $0x84] sm:$0xf]  ;;  %v6483_v15 = vld [vmem:[#allocation5 + $0x90] sm:$0xf0]  ;;  %v6457_v8 = vld [vmem:[#allocation5 + $0x48] sm:$0xf] }
  0x3d   :  { %v6451_v7 = vld [vmem:[#allocation5 + $0x50] sm:$0xf0] }
  0x3e   :  { %539 = vmatpush.bf16.msrb.mxu0 %v6306_v23  ;;  %552 = vmatpush.bf16.msrb.mxu1 %v6310_v27  ;;  %v6542_v23 = vor.u32 %v8784_v20, %v6539_v21  ;;  %v6514_v27 = vor.u32 %v8781_v25, %v6513_v24  ;;  %v8772_v21 = vld [vmem:[#allocation5 + $0x8c] sm:$0xf] }
  0x40   :  { %578 = vmatpush.bf16.msrb.mxu3 %v6318_v31  ;;  %565 = vmatpush.bf16.msrb.mxu2 %v6314_v35  ;;  %v6518_v31 = vor.u32 %v8779_v26, %v6515_v28  ;;  %v6526_v35 = vor.u32 %v8780_v33, %v6523_v34  ;;  %v6465_v26 = vld [vmem:[#allocation5 + $0x60] sm:$0xf]  ;;  %v8767_v28 = vld [vmem:[#allocation5 + $0x64] sm:$0xf]  ;;  %v6473_v33 = vld [vmem:[#allocation5 + $0x68] sm:$0xf] }
  0x41   :  { %v8770_v34 = vld [vmem:[#allocation5 + $0x74] sm:$0xf0] }
  0x42   :  { %540 = vmatpush.bf16.msrb.mxu0 %v6290_v38  ;;  %553 = vmatpush.bf16.msrb.mxu1 %v6294_v39  ;;  %v8777_v38 = vld [vmem:[#allocation5 + $0xac] sm:$0xf0]  ;;  %v8775_v39 = vld [vmem:[#allocation5 + $0xa4] sm:$0xf] }
  0x44   :  { %579 = vmatpush.bf16.msrb.mxu3 %v6302_v42  ;;  %566 = vmatpush.bf16.msrb.mxu2 %v6298_v43  ;;  %v6498_v43 = vor.u32 %v8777_v38, %v6497_v37  ;;  %v6474_v38 = vor.u32 %v8770_v34, %v6473_v33  ;;  %v8760_v33 = vld [vmem:[#allocation5 + $0x2c] sm:$0xf]  ;;  %v6443_v34 = vld [vmem:[#allocation5 + $0x38] sm:$0xf0] }
  0x45   :  { %6273 = vmatmul.msk.bf16.gmra.mxu0 %vm167_vm1, %v8721_v44  ;;  %6277 = vmatmul.msk.bf16.gmra.mxu1 %vm167_vm1, %v8721_v44 }
  0x46   :  { %805 = vmatpush.bf16.msra.mxu0 %v6530_v12  ;;  %818 = vmatpush.bf16.msra.mxu1 %v6534_v18  ;;  %v8773_v12 = vld [vmem:[#allocation5 + $0x8c] sm:$0xf0]  ;;  %v8774_v18 = vld [vmem:[#allocation5 + $0x94] sm:$0xf0] }
  0x47   :  { %6281 = vmatmul.msk.bf16.gmra.mxu2 %vm167_vm1, %v8721_v44  ;;  %6285 = vmatmul.msk.bf16.gmra.mxu3 %vm167_vm1, %v8721_v44  ;;  %v6499_v44 = vld [vmem:[#allocation5 + $0xb0] sm:$0xf0] }
  0x48   :  { %831 = vmatpush.bf16.msra.mxu2 %v6538_v19  ;;  %844 = vmatpush.bf16.msra.mxu3 %v6542_v23  ;;  %v6486_v19 = vor.u32 %v8771_v13, %v6483_v15  ;;  %v6491_v23 = vld [vmem:[#allocation5 + $0x98] sm:$0xf0]  ;;  %v8764_v13 = vld [vmem:[#allocation5 + $0x4c] sm:$0xf] }
  0x49   :  { %v6494_v24 = vor.u32 %v8772_v21, %v6491_v23  ;;  %v6435_v23 = vld [vmem:[#allocation5 + $0x30] sm:$0xf0] }
  0x4a   :  { %806 = vmatpush.bf16.msra.mxu0 %v6514_v27  ;;  %819 = vmatpush.bf16.msra.mxu1 %v6518_v31  ;;  %v8769_v27 = vld [vmem:[#allocation5 + $0x6c] sm:$0xf0] }
  0x4b   :  { %v6466_v31 = vor.u32 %v8769_v27, %v6465_v26  ;;  %v8762_v26 = vld [vmem:[#allocation5 + $0x34] sm:$0xf0] }
  0x4c   :  { %832 = vmatpush.bf16.msra.mxu2 %v6522_v32  ;;  %845 = vmatpush.bf16.msra.mxu3 %v6526_v35  ;;  %v6467_v32 = vld [vmem:[#allocation5 + $0x70] sm:$0xf0] }
  0x4d   :  { %v6470_v37 = vor.u32 %v8767_v28, %v6467_v32 }
  0x4e   :  { %807 = vmatpush.bf16.msra.mxu0 %v6498_v43 }
  0x50   :  { %846 = vmatpush.bf16.msra.mxu3 %v6510_v9  ;;  %v8766_v9 = vld [vmem:[#allocation5 + $0x54] sm:$0xf0] }
  0x54   :  { %847 = vmatpush.bf16.msra.mxu3 %v6494_v24  ;;  %v6441_v24 = vld [vmem:[#allocation5 + $0x28] sm:$0xf] }
  0x55   :  { %6274 = vmatmul.msk.bf16.gmra.mxu0 %vm167_vm1, %v8722_v45  ;;  %6278 = vmatmul.msk.bf16.gmra.mxu1 %vm167_vm1, %v8722_v45  ;;  %v6442_v32 = vor.u32 %v8762_v26, %v6441_v24 }
  0x57   :  { %6282 = vmatmul.msk.bf16.gmra.mxu2 %vm167_vm1, %v8722_v45  ;;  %6286 = vmatmul.msk.bf16.gmra.mxu3 %vm167_vm1, %v8722_v45  ;;  %v6505_v45 = vld [vmem:[#allocation5 + $0xa8] sm:$0xf] }
  0x65   :  { %541 = vmatmul.bf16.vlgmr.msrb.gmra.mxu0 %v9714_v46  ;;  %554 = vmatmul.bf16.vlgmr.msrb.gmra.mxu1 %v9714_v46 }
  0x67   :  { %567 = vmatmul.bf16.vlgmr.msrb.gmra.mxu2 %v9714_v46  ;;  %580 = vmatmul.bf16.vlgmr.msrb.gmra.mxu3 %v9714_v46 }
  0xa2   :  { %v9837_v47 = vpop.f32.mrf.mxu0  ;;  %v9839_v48 = vpop.f32.mrf.mxu1 }
  0xaa   :  { %v9841_v49 = vpop.f32.mrf.mxu2  ;;  %v9843_v50 = vpop.f32.mrf.mxu3 }
  0xab   :  { %v9845_v51 = vpop.f32.mrf.mxu0  ;;  %v9847_v52 = vpop.f32.mrf.mxu1  ;;  %v286_v26 = vadd.f32 %v9843_v50, %v9868_v63 }
  0xb2   :  { %v9854_v55 = vpop.f32.mrf.mxu2  ;;  %v9858_v57 = vpop.f32.mrf.mxu3 }
  0xb3   :  { %v203_v58 = vpop.f32.mrf.mxu0  ;;  %v232_v60 = vpop.f32.mrf.mxu1 }
  0xb4   :  { %v9861_v59 = vadd.f32 %v203_v58, %v9852_v54  ;;  %v9864_v61 = vadd.f32 %v232_v60, %v9856_v56 }
  0xba   :  { %v261_v0 = vpop.f32.mrf.mxu2  ;;  %v290_v2 = vpop.f32.mrf.mxu3 }
  0xbb   :  { %v9871_v1 = vadd.f32 %v261_v0, %v9866_v62  ;;  %v9873_v3 = vpop.f32.mrf.mxu0  ;;  %v9876_v4 = vadd.f32 %v290_v2, %v9868_v63  ;;  %v9878_v5 = vpop.f32.mrf.mxu1  ;;  %v6502_v0 = vor.u32 %v8775_v39, %v6499_v44  ;;  %v6506_v2 = vor.u32 %v8778_v53, %v6505_v45  ;;  %v8768_v39 = vld [vmem:[#allocation5 + $0x6c] sm:$0xf]  ;;  %v6449_v45 = vld [vmem:[#allocation5 + $0x40] sm:$0xf]  ;;  %v8765_v53 = vld [vmem:[#allocation5 + $0x4c] sm:$0xf0] }
  0xbd   :  { %820 = vmatpush.bf16.msra.mxu1 %v6502_v0  ;;  %833 = vmatpush.bf16.msra.mxu2 %v6506_v2  ;;  %v8763_v0 = vld [vmem:[#allocation5 + $0x44] sm:$0xf]  ;;  %v6450_v2 = vor.u32 %v8765_v53, %v6449_v45  ;;  %v6419_v45 = vld [vmem:[#allocation5 + $0x10] sm:$0xf0] }
  0xc1   :  { %821 = vmatpush.bf16.msra.mxu1 %v6486_v19  ;;  %v8759_v19 = vld [vmem:[#allocation5 + $0x24] sm:$0xf] }
  0xc2   :  { %v9880_v6 = vpop.f32.mrf.mxu2  ;;  %v9882_v10 = vpop.f32.mrf.mxu3 }
  0xc3   :  { %v208_v11 = vpop.f32.mrf.mxu0  ;;  %v237_v17 = vpop.f32.mrf.mxu1 }
  0xc4   :  { %v9885_v16 = vadd.f32 %v208_v11, %v9852_v54  ;;  %v9888_v22 = vadd.f32 %v237_v17, %v9856_v56  ;;  %v6481_v11 = vld [vmem:[#allocation5 + $0x80] sm:$0xf]  ;;  %v6489_v17 = vld [vmem:[#allocation5 + $0x88] sm:$0xf] }
  0xc5   :  { %v6482_v14 = vor.u32 %v8773_v12, %v6481_v11  ;;  %v6490_v20 = vor.u32 %v8774_v18, %v6489_v17  ;;  %822 = vmatpush.bf16.msra.mxu1 %v6470_v37  ;;  %v6454_v11 = vor.u32 %v8763_v0, %v6451_v7  ;;  %v6458_v12 = vor.u32 %v8766_v9, %v6457_v8  ;;  %v6433_v17 = vld [vmem:[#allocation5 + $0x20] sm:$0xf]  ;;  %v8761_v18 = vld [vmem:[#allocation5 + $0x2c] sm:$0xf0]  ;;  %v6425_v0 = vld [vmem:[#allocation5 + $0x8] sm:$0xf] }
  0xc6   :  { %v6434_v21 = vor.u32 %v8761_v18, %v6433_v17  ;;  %v8756_v7 = vld [vmem:[#allocation5 + $0xc] sm:$0xf] }
  0xc7   :  { %808 = vmatpush.bf16.msra.mxu0 %v6482_v14  ;;  %834 = vmatpush.bf16.msra.mxu2 %v6490_v20  ;;  %v6459_v14 = vld [vmem:[#allocation5 + $0x58] sm:$0xf0] }
  0xc8   :  { %v6462_v15 = vor.u32 %v8764_v13, %v6459_v14  ;;  %v199_v13 = vadd.f32 %v9837_v47, %v9852_v54  ;;  %v257_v47 = vadd.f32 %v9841_v49, %v9866_v62 }
  0xc9   :  { %823 = vmatpush.bf16.msra.mxu1 %v6454_v11  ;;  %v6427_v11 = vld [vmem:[#allocation5 + $0x18] sm:$0xf0] }
  0xca   :  { %v266_v36 = vpop.f32.mrf.mxu2  ;;  %v295_v41 = vpop.f32.mrf.mxu3 }
  0xcb   :  { %v9891_v40 = vadd.f32 %v266_v36, %v9866_v62  ;;  %v9893_v42 = vpop.f32.mrf.mxu0  ;;  %v9896_v58 = vadd.f32 %v295_v41, %v9868_v63  ;;  %v9898_v60 = vpop.f32.mrf.mxu1  ;;  %v6475_v41 = vld [vmem:[#allocation5 + $0x78] sm:$0xf0]  ;;  %809 = vmatpush.bf16.msra.mxu0 %v6466_v31  ;;  %835 = vmatpush.bf16.msra.mxu2 %v6474_v38  ;;  %v6438_v31 = vor.u32 %v8759_v19, %v6435_v23 }
  0xcc   :  { %v6478_v44 = vor.u32 %v8768_v39, %v6475_v41  ;;  %v6446_v39 = vor.u32 %v8760_v33, %v6443_v34  ;;  %v8757_v41 = vld [vmem:[#allocation5 + $0xc] sm:$0xf0] }
  0xcd   :  { %824 = vmatpush.bf16.msra.mxu1 %v6438_v31 }
  0xce   :  { %848 = vmatpush.bf16.msra.mxu3 %v6478_v44  ;;  %v8755_v44 = vld [vmem:[#allocation5 + $0x4] sm:$0xf] }
  0xcf   :  { %810 = vmatpush.bf16.msra.mxu0 %v6450_v2  ;;  %836 = vmatpush.bf16.msra.mxu2 %v6458_v12  ;;  %v8758_v2 = vld [vmem:[#allocation5 + $0x14] sm:$0xf0]  ;;  %v6422_v8 = vor.u32 %v8755_v44, %v6419_v45  ;;  %v6430_v12 = vor.u32 %v8756_v7, %v6427_v11 }
  0xd0   :  { %v6426_v9 = vor.u32 %v8758_v2, %v6425_v0 }
  0xd1   :  { %825 = vmatpush.bf16.msra.mxu1 %v6422_v8 }
  0xd2   :  { %v9900_v25 = vpop.f32.mrf.mxu2  ;;  %v9902_v29 = vpop.f32.mrf.mxu3  ;;  %849 = vmatpush.bf16.msra.mxu3 %v6462_v15  ;;  %v228_v15 = vadd.f32 %v9839_v48, %v9856_v56 }
  0xd3   :  { %v213_v30 = vpop.f32.mrf.mxu0  ;;  %v242_v36 = vpop.f32.mrf.mxu1  ;;  %811 = vmatpush.bf16.msra.mxu0 %v6434_v21  ;;  %837 = vmatpush.bf16.msra.mxu2 %v6442_v32 }
  0xd4   :  { %v9905_v35 = vadd.f32 %v213_v30, %v9852_v54  ;;  %v9908_v43 = vadd.f32 %v242_v36, %v9856_v56  ;;  %v6417_v36 = vld [vmem:[#allocation5] sm:$0xf] }
  0xd5   :  { %v6418_v53 = vor.u32 %v8757_v41, %v6417_v36 }
  0xd6   :  { %850 = vmatpush.bf16.msra.mxu3 %v6446_v39 }
  0xd7   :  { %812 = vmatpush.bf16.msra.mxu0 %v6418_v53  ;;  %838 = vmatpush.bf16.msra.mxu2 %v6426_v9 }
  0xda   :  { %v271_v20 = vpop.f32.mrf.mxu2  ;;  %v300_v28 = vpop.f32.mrf.mxu3  ;;  %851 = vmatpush.bf16.msra.mxu3 %v6430_v12 }
  0xdb   :  { %v9911_v27 = vadd.f32 %v271_v20, %v9866_v62  ;;  %v9913_v30 = vpop.f32.mrf.mxu0  ;;  %v9916_v37 = vadd.f32 %v300_v28, %v9868_v63  ;;  %v9918_v38 = vpop.f32.mrf.mxu1 }
  0xe2   :  { %v9922_v14 = vpop.f32.mrf.mxu2  ;;  %v9926_v17 = vpop.f32.mrf.mxu3 }
  0xe3   :  { %v542_v18 = vpop.f32.mrf.mxu0  ;;  %v555_v20 = vpop.f32.mrf.mxu1 }
  0xe4   :  { %v585_v19 = vadd.f32 %v542_v18, %v199_v13  ;;  %v586_v21 = vadd.f32 %v555_v20, %v228_v15  ;;  %v6657_v20 = vld [vmem:[#allocation5 + $0xe0] sm:$0xf] }
  0xe6   :  { %v589_v23 = vmul.f32 0.5, %v585_v19  ;;  %v590_v24 = vmul.f32 0.5, %v586_v21  ;;  %v8817_v21 = vld [vmem:[#allocation5 + $0xec] sm:$0xf0] }
  0xe8   :  { %9341 = vtanh.f32 %v589_v23  ;;  %v8815_v23 = vld [vmem:[#allocation5 + $0xe4] sm:$0xf] }
  0xe9   :  { %9343 = vtanh.f32 %v590_v24  ;;  %v6658_v24 = vor.u32 %v8817_v21, %v6657_v20  ;;  %v6633_v20 = vld [vmem:[#allocation5 + $0xa8] sm:$0xf]  ;;  %v8810_v21 = vld [vmem:[#allocation5 + $0xb4] sm:$0xf0] }
  0xea   :  { %v568_v28 = vpop.f32.mrf.mxu2  ;;  %v581_v48 = vpop.f32.mrf.mxu3 }
  0xeb   :  { %v587_v31 = vadd.f32 %v568_v28, %v257_v47  ;;  %v544_v32 = vpop.f32.mrf.mxu0  ;;  %v588_v33 = vadd.f32 %v581_v48, %v286_v26  ;;  %v557_v34 = vpop.f32.mrf.mxu1  ;;  %v6659_v47 = vld [vmem:[#allocation5 + $0xf0] sm:$0xf0]  ;;  %v6665_v26 = vld [vmem:[#allocation5 + $0xe8] sm:$0xf]  ;;  %v8818_v28 = vld [vmem:[#allocation5 + $0xf4] sm:$0xf0]  ;;  %1077 = vmatpush.bf16.msrb.mxu0 %v6658_v24  ;;  %v6634_v24 = vor.u32 %v8810_v21, %v6633_v20 }
  0xec   :  { %v6666_v48 = vor.u32 %v8818_v28, %v6665_v26  ;;  %v8816_v32 = vld [vmem:[#allocation5 + $0xec] sm:$0xf]  ;;  %v6635_v26 = vld [vmem:[#allocation5 + $0xb8] sm:$0xf0] }
  0xed   :  { %v591_v36 = vmul.f32 0.5, %v587_v31  ;;  %9345 = vtanh.f32 %v588_v33  ;;  %v6662_v31 = vor.u32 %v8815_v23, %v6659_v47  ;;  %v6667_v33 = vld [vmem:[#allocation5 + $0xf8] sm:$0xf0]  ;;  %v8808_v47 = vld [vmem:[#allocation5 + $0xac] sm:$0xf] }
  0xee   :  { %v9342_v39 = vpop.eup %9341  ;;  %v6670_v34 = vor.u32 %v8816_v32, %v6667_v33  ;;  %1103 = vmatpush.bf16.msrb.mxu2 %v6666_v48  ;;  %v6638_v28 = vor.u32 %v8808_v47, %v6635_v26  ;;  %v8805_v48 = vld [vmem:[#allocation5 + $0x8c] sm:$0xf0]  ;;  %v8803_v32 = vld [vmem:[#allocation5 + $0x84] sm:$0xf]  ;;  %v6603_v20 = vld [vmem:[#allocation5 + $0x78] sm:$0xf0] }
  0xef   :  { %v9344_v41 = vpop.eup %9343  ;;  %v595_v44 = vmul.f32 0.5, %v9342_v39  ;;  %9347 = vtanh.f32 %v591_v36  ;;  %1090 = vmatpush.bf16.msrb.mxu1 %v6662_v31  ;;  %v6641_v36 = vld [vmem:[#allocation5 + $0xc0] sm:$0xf]  ;;  %v8813_v39 = vld [vmem:[#allocation5 + $0xcc] sm:$0xf0] }
  0xf0   :  { %v596_v45 = vmul.f32 0.5, %v9344_v41  ;;  %v8811_v41 = vld [vmem:[#allocation5 + $0xc4] sm:$0xf]  ;;  %1116 = vmatpush.bf16.msrb.mxu3 %v6670_v34  ;;  %v6609_v31 = vld [vmem:[#allocation5 + $0x80] sm:$0xf] }
  0xf1   :  { %v598_v53 = vadd.f32 0.5, %v595_v44  ;;  %v6642_v44 = vor.u32 %v8813_v39, %v6641_v36  ;;  %v6610_v33 = vor.u32 %v8805_v48, %v6609_v31  ;;  %v6611_v34 = vld [vmem:[#allocation5 + $0x90] sm:$0xf0]  ;;  %v6617_v36 = vld [vmem:[#allocation5 + $0x88] sm:$0xf] }
  0xf2   :  { %v599_v0 = vadd.f32 0.5, %v596_v45  ;;  %v570_v49 = vpop.f32.mrf.mxu2  ;;  %v583_v2 = vpop.f32.mrf.mxu3  ;;  %v6643_v45 = vld [vmem:[#allocation5 + $0xd0] sm:$0xf0]  ;;  %v8806_v39 = vld [vmem:[#allocation5 + $0x94] sm:$0xf0] }
  0xf3   :  { %v9346_v7 = vpop.eup %9345  ;;  %v6646_v49 = vor.u32 %v8811_v41, %v6643_v45  ;;  %1078 = vmatpush.bf16.msrb.mxu0 %v6642_v44  ;;  %v6614_v41 = vor.u32 %v8803_v32, %v6611_v34  ;;  %v6618_v44 = vor.u32 %v8806_v39, %v6617_v36  ;;  %v8804_v45 = vld [vmem:[#allocation5 + $0x8c] sm:$0xf]  ;;  %v8795_v47 = vld [vmem:[#allocation5 + $0x44] sm:$0xf]  ;;  %v6585_v31 = vld [vmem:[#allocation5 + $0x48] sm:$0xf] }
  0xf4   :  { %v602_v8 = vmul.f32 0.0, %v599_v0  ;;  %v603_v50 = vmul.f32 %v9346_v7, %v598_v53  ;;  %v6649_v53 = vld [vmem:[#allocation5 + $0xc8] sm:$0xf]  ;;  %v8814_v0 = vld [vmem:[#allocation5 + $0xd4] sm:$0xf0] }
  0xf5   :  { %v9348_v9 = vpop.eup %9347  ;;  %v6650_v2 = vor.u32 %v8814_v0, %v6649_v53  ;;  %v8812_v7 = vld [vmem:[#allocation5 + $0xcc] sm:$0xf]  ;;  %1091 = vmatpush.bf16.msrb.mxu1 %v6646_v49  ;;  %v6619_v53 = vld [vmem:[#allocation5 + $0x98] sm:$0xf0]  ;;  %v6593_v49 = vld [vmem:[#allocation5 + $0x60] sm:$0xf] }
  0xf6   :  { %v9932_v11 = vadd.f32 %v603_v50, %v602_v8  ;;  %v597_v12 = vmul.f32 0.5, %v9348_v9  ;;  %v6651_v8 = vld [vmem:[#allocation5 + $0xd8] sm:$0xf0]  ;;  %v6625_v9 = vld [vmem:[#allocation5 + $0xa0] sm:$0xf]  ;;  %v6622_v0 = vor.u32 %v8804_v45, %v6619_v53 }
  0xf7   :  { %v6654_v50 = vor.u32 %v8812_v7, %v6651_v8  ;;  %1104 = vmatpush.bf16.msrb.mxu2 %v6650_v2  ;;  %v8801_v2 = vld [vmem:[#allocation5 + $0x6c] sm:$0xf0]  ;;  %v8799_v7 = vld [vmem:[#allocation5 + $0x64] sm:$0xf]  ;;  %v8798_v48 = vld [vmem:[#allocation5 + $0x54] sm:$0xf0] }
  0xf8   :  { %9349 = vtanh.f32 %v9932_v11  ;;  %v600_v13 = vadd.f32 0.5, %v597_v12  ;;  %v8809_v12 = vld [vmem:[#allocation5 + $0xac] sm:$0xf0]  ;;  %v6594_v8 = vor.u32 %v8801_v2, %v6593_v49  ;;  %v8796_v34 = vld [vmem:[#allocation5 + $0x4c] sm:$0xf] }
  0xf9   :  { %1117 = vmatpush.bf16.msrb.mxu3 %v6654_v50  ;;  %v6595_v50 = vld [vmem:[#allocation5 + $0x70] sm:$0xf0]  ;;  %v6587_v36 = vld [vmem:[#allocation5 + $0x58] sm:$0xf0]  ;;  %v8791_v45 = vld [vmem:[#allocation5 + $0x24] sm:$0xf] }
  0xfa   :  { %v6590_v39 = vor.u32 %v8796_v34, %v6587_v36  ;;  %v6569_v49 = vld [vmem:[#allocation5 + $0x28] sm:$0xf]  ;;  %v8794_v2 = vld [vmem:[#allocation5 + $0x34] sm:$0xf0] }
  0xfb   :  { %1105 = vmatpush.bf16.msrb.mxu2 %v6634_v24  ;;  %v8797_v24 = vld [vmem:[#allocation5 + $0x4c] sm:$0xf0] }
  0xfd   :  { %1118 = vmatpush.bf16.msrb.mxu3 %v6638_v28  ;;  %v6579_v28 = vld [vmem:[#allocation5 + $0x50] sm:$0xf0] }
  0xfe   :  { %v9350_v15 = vpop.eup %9349  ;;  %v6582_v32 = vor.u32 %v8795_v47, %v6579_v28  ;;  %v8788_v47 = vld [vmem:[#allocation5 + $0xc] sm:$0xf] }
  0xff   :  { %v9935_v18 = vmul.f32 %v9350_v15, %v600_v13  ;;  %v8807_v13 = vld [vmem:[#allocation5 + $0xa4] sm:$0xf]  ;;  %v6626_v15 = vor.u32 %v8809_v12, %v6625_v9  ;;  %1106 = vmatpush.bf16.msrb.mxu2 %v6618_v44  ;;  %v6601_v9 = vld [vmem:[#allocation5 + $0x68] sm:$0xf]  ;;  %v8802_v12 = vld [vmem:[#allocation5 + $0x74] sm:$0xf0] }
 0x100   :  { %v8793_v44 = vld [vmem:[#allocation5 + $0x2c] sm:$0xf0] }
 0x101   :  { %v612_v19 = vpack.c.bf16 %v9935_v18, %v9935_v18  ;;  %1079 = vmatpush.bf16.msrb.mxu0 %v6626_v15  ;;  %1119 = vmatpush.bf16.msrb.mxu3 %v6622_v0  ;;  %v6602_v15 = vor.u32 %v8802_v12, %v6601_v9  ;;  %v6563_v0 = vld [vmem:[#allocation5 + $0x30] sm:$0xf0]  ;;  %v6571_v9 = vld [vmem:[#allocation5 + $0x38] sm:$0xf0]  ;;  %v6545_v12 = vld [vmem:[#allocation5] sm:$0xf] }
 0x103   :  { %813 = vmatmul.bf16.vlgmr.msra.gmra.mxu0 %v612_v19  ;;  %826 = vmatmul.bf16.vlgmr.msra.gmra.mxu1 %v612_v19 }
 0x104   :  { %839 = vmatmul.bf16.vlgmr.msra.gmra.mxu2 %v612_v19  ;;  %852 = vmatmul.bf16.vlgmr.msra.gmra.mxu3 %v612_v19  ;;  %v6627_v19 = vld [vmem:[#allocation5 + $0xb0] sm:$0xf0] }
 0x105   :  { %v6630_v23 = vor.u32 %v8807_v13, %v6627_v19  ;;  %1080 = vmatpush.bf16.msrb.mxu0 %v6610_v33  ;;  %v6598_v13 = vor.u32 %v8799_v7, %v6595_v50  ;;  %v8800_v19 = vld [vmem:[#allocation5 + $0x6c] sm:$0xf]  ;;  %1107 = vmatpush.bf16.msrb.mxu2 %v6602_v15  ;;  %v6586_v33 = vor.u32 %v8798_v48, %v6585_v31  ;;  %v8789_v15 = vld [vmem:[#allocation5 + $0xc] sm:$0xf0]  ;;  %v6555_v31 = vld [vmem:[#allocation5 + $0x18] sm:$0xf0] }
 0x106   :  { %v6606_v21 = vor.u32 %v8800_v19, %v6603_v20  ;;  %v6566_v7 = vor.u32 %v8791_v45, %v6563_v0  ;;  %v8792_v50 = vld [vmem:[#allocation5 + $0x2c] sm:$0xf]  ;;  %v8787_v19 = vld [vmem:[#allocation5 + $0x4] sm:$0xf]  ;;  %v6547_v20 = vld [vmem:[#allocation5 + $0x10] sm:$0xf0]  ;;  %v6558_v48 = vor.u32 %v8788_v47, %v6555_v31  ;;  %v288_v0 = vadd.f32 %v9858_v57, %v9868_v63 }
 0x107   :  { %1092 = vmatpush.bf16.msrb.mxu1 %v6630_v23  ;;  %v6577_v23 = vld [vmem:[#allocation5 + $0x40] sm:$0xf] }
 0x108   :  { %1120 = vmatpush.bf16.msrb.mxu3 %v6606_v21  ;;  %v6578_v26 = vor.u32 %v8797_v24, %v6577_v23  ;;  %v6546_v21 = vor.u32 %v8789_v15, %v6545_v12  ;;  %v6553_v23 = vld [vmem:[#allocation5 + $0x8] sm:$0xf]  ;;  %v8790_v24 = vld [vmem:[#allocation5 + $0x14] sm:$0xf0] }
 0x109   :  { %1081 = vmatpush.bf16.msrb.mxu0 %v6594_v8  ;;  %1108 = vmatpush.bf16.msrb.mxu2 %v6586_v33  ;;  %v6570_v8 = vor.u32 %v8794_v2, %v6569_v49  ;;  %v6554_v28 = vor.u32 %v8790_v24, %v6553_v23  ;;  %v230_v33 = vadd.f32 %v9847_v52, %v9856_v56 }
 0x10b   :  { %1093 = vmatpush.bf16.msrb.mxu1 %v6614_v41  ;;  %v6561_v41 = vld [vmem:[#allocation5 + $0x20] sm:$0xf] }
 0x10c   :  { %v6562_v53 = vor.u32 %v8793_v44, %v6561_v41  ;;  %1121 = vmatpush.bf16.msrb.mxu3 %v6590_v39 }
 0x10d   :  { %1082 = vmatpush.bf16.msrb.mxu0 %v6578_v26  ;;  %1109 = vmatpush.bf16.msrb.mxu2 %v6570_v8  ;;  %v6550_v26 = vor.u32 %v8787_v19, %v6547_v20 }
 0x10f   :  { %1094 = vmatpush.bf16.msrb.mxu1 %v6598_v13  ;;  %v6574_v13 = vor.u32 %v8792_v50, %v6571_v9 }
 0x111   :  { %1083 = vmatpush.bf16.msrb.mxu0 %v6562_v53  ;;  %1122 = vmatpush.bf16.msrb.mxu3 %v6574_v13  ;;  %v259_v53 = vadd.f32 %v9854_v55, %v9866_v62 }
 0x112   :  { %1110 = vmatpush.bf16.msrb.mxu2 %v6554_v28 }
 0x113   :  { %1095 = vmatpush.bf16.msrb.mxu1 %v6582_v32  ;;  %v201_v32 = vadd.f32 %v9845_v51, %v9852_v54 }
 0x115   :  { %1084 = vmatpush.bf16.msrb.mxu0 %v6546_v21  ;;  %1123 = vmatpush.bf16.msrb.mxu3 %v6558_v48 }
 0x117   :  { %1096 = vmatpush.bf16.msrb.mxu1 %v6566_v7 }
 0x11b   :  { %1097 = vmatpush.bf16.msrb.mxu1 %v6550_v26 }
 0x180   :  { %v814_v34 = vpop.f32.mrf.mxu0  ;;  %v827_v36 = vpop.f32.mrf.mxu1 }
 0x181   :  { %v857_v39 = vadd.f32 %v814_v34, %v201_v32  ;;  %v858_v41 = vadd.f32 %v827_v36, %v230_v33  ;;  %v6785_v34 = vld [vmem:[#allocation5 + $0xe0] sm:$0xf]  ;;  %v8847_v36 = vld [vmem:[#allocation5 + $0xe4] sm:$0xf] }
 0x183   :  { %v861_v44 = vmul.f32 0.5, %v857_v39  ;;  %v862_v45 = vmul.f32 0.5, %v858_v41  ;;  %v6787_v41 = vld [vmem:[#allocation5 + $0xf0] sm:$0xf0] }
 0x185   :  { %9351 = vtanh.f32 %v861_v44  ;;  %v6793_v44 = vld [vmem:[#allocation5 + $0xe8] sm:$0xf] }
 0x186   :  { %9353 = vtanh.f32 %v862_v45  ;;  %v8850_v45 = vld [vmem:[#allocation5 + $0xf4] sm:$0xf0] }
 0x187   :  { %v840_v49 = vpop.f32.mrf.mxu2  ;;  %v853_v51 = vpop.f32.mrf.mxu3 }
 0x188   :  { %v859_v2 = vadd.f32 %v840_v49, %v259_v53  ;;  %v860_v7 = vadd.f32 %v853_v51, %v288_v0  ;;  %v816_v52 = vpop.f32.mrf.mxu0  ;;  %v829_v8 = vpop.f32.mrf.mxu1  ;;  %v6790_v53 = vor.u32 %v8847_v36, %v6787_v41  ;;  %v6794_v0 = vor.u32 %v8850_v45, %v6793_v44  ;;  %v8848_v49 = vld [vmem:[#allocation5 + $0xec] sm:$0xf]  ;;  %v6795_v51 = vld [vmem:[#allocation5 + $0xf8] sm:$0xf0]  ;;  %v6737_v41 = vld [vmem:[#allocation5 + $0x80] sm:$0xf] }
 0x189   :  { %v8845_v52 = vld [vmem:[#allocation5 + $0xcc] sm:$0xf0]  ;;  %v8843_v8 = vld [vmem:[#allocation5 + $0xc4] sm:$0xf]  ;;  %v6763_v36 = vld [vmem:[#allocation5 + $0xb8] sm:$0xf0] }
 0x18a   :  { %v863_v50 = vmul.f32 0.5, %v859_v2  ;;  %9355 = vtanh.f32 %v860_v7  ;;  %v6798_v2 = vor.u32 %v8848_v49, %v6795_v51  ;;  %1362 = vmatpush.bf16.msra.mxu1 %v6790_v53  ;;  %1375 = vmatpush.bf16.msra.mxu2 %v6794_v0  ;;  %v6769_v7 = vld [vmem:[#allocation5 + $0xc0] sm:$0xf]  ;;  %v8837_v44 = vld [vmem:[#allocation5 + $0x8c] sm:$0xf0] }
 0x18b   :  { %v9352_v9 = vpop.eup %9351  ;;  %v8835_v45 = vld [vmem:[#allocation5 + $0x84] sm:$0xf]  ;;  %v6738_v53 = vor.u32 %v8837_v44, %v6737_v41  ;;  %v6739_v0 = vld [vmem:[#allocation5 + $0x90] sm:$0xf0]  ;;  %v6745_v49 = vld [vmem:[#allocation5 + $0x88] sm:$0xf] }
 0x18c   :  { %v9354_v12 = vpop.eup %9353  ;;  %v867_v13 = vmul.f32 0.5, %v9352_v9  ;;  %9357 = vtanh.f32 %v863_v50  ;;  %1388 = vmatpush.bf16.msra.mxu3 %v6798_v2  ;;  %v6770_v50 = vor.u32 %v8845_v52, %v6769_v7  ;;  %v6771_v9 = vld [vmem:[#allocation5 + $0xd0] sm:$0xf0]  ;;  %v8838_v51 = vld [vmem:[#allocation5 + $0x94] sm:$0xf0]  ;;  %v6742_v2 = vor.u32 %v8835_v45, %v6739_v0 }
 0x18d   :  { %v868_v15 = vmul.f32 0.5, %v9354_v12  ;;  %v6777_v12 = vld [vmem:[#allocation5 + $0xc8] sm:$0xf]  ;;  %v6746_v7 = vor.u32 %v8838_v51, %v6745_v49  ;;  %v8836_v52 = vld [vmem:[#allocation5 + $0x8c] sm:$0xf] }
 0x18e   :  { %v870_v19 = vadd.f32 0.5, %v867_v13  ;;  %v8846_v13 = vld [vmem:[#allocation5 + $0xd4] sm:$0xf0]  ;;  %v8828_v44 = vld [vmem:[#allocation5 + $0x4c] sm:$0xf] }
 0x18f   :  { %v871_v20 = vadd.f32 0.5, %v868_v15  ;;  %v842_v55 = vpop.f32.mrf.mxu2  ;;  %v855_v21 = vpop.f32.mrf.mxu3  ;;  %v6774_v15 = vor.u32 %v8843_v8, %v6771_v9  ;;  %v6747_v8 = vld [vmem:[#allocation5 + $0x98] sm:$0xf0]  ;;  %v6721_v9 = vld [vmem:[#allocation5 + $0x60] sm:$0xf] }
 0x190   :  { %v9356_v23 = vpop.eup %9355  ;;  %v6779_v55 = vld [vmem:[#allocation5 + $0xd8] sm:$0xf0]  ;;  %v6689_v0 = vld [vmem:[#allocation5 + $0x20] sm:$0xf]  ;;  %v8825_v49 = vld [vmem:[#allocation5 + $0x2c] sm:$0xf0] }
 0x191   :  { %v874_v57 = vmul.f32 %v871_v20, %v9932_v11  ;;  %v875_v24 = vmul.f32 %v9356_v23, %v870_v19  ;;  %v8849_v11 = vld [vmem:[#allocation5 + $0xec] sm:$0xf0]  ;;  %v6778_v19 = vor.u32 %v8846_v13, %v6777_v12  ;;  %v8844_v20 = vld [vmem:[#allocation5 + $0xcc] sm:$0xf]  ;;  %1363 = vmatpush.bf16.msra.mxu1 %v6774_v15  ;;  %v6753_v23 = vld [vmem:[#allocation5 + $0xa0] sm:$0xf] }
 0x192   :  { %v9358_v47 = vpop.eup %9357  ;;  %v6786_v39 = vor.u32 %v8849_v11, %v6785_v34  ;;  %v6782_v21 = vor.u32 %v8844_v20, %v6779_v55  ;;  %v8840_v11 = vld [vmem:[#allocation5 + $0xac] sm:$0xf]  ;;  %v8833_v12 = vld [vmem:[#allocation5 + $0x6c] sm:$0xf0]  ;;  %v8831_v13 = vld [vmem:[#allocation5 + $0x64] sm:$0xf] }
 0x193   :  { %v9948_v26 = vadd.f32 %v875_v24, %v874_v57  ;;  %v869_v28 = vmul.f32 0.5, %v9358_v47  ;;  %1376 = vmatpush.bf16.msra.mxu2 %v6778_v19  ;;  %v8841_v57 = vld [vmem:[#allocation5 + $0xac] sm:$0xf0]  ;;  %v8839_v24 = vld [vmem:[#allocation5 + $0xa4] sm:$0xf]  ;;  %v6722_v15 = vor.u32 %v8833_v12, %v6721_v9 }
 0x194   :  { %1349 = vmatpush.bf16.msra.mxu0 %v6786_v39  ;;  %1389 = vmatpush.bf16.msra.mxu3 %v6782_v21  ;;  %v6754_v47 = vor.u32 %v8841_v57, %v6753_v23  ;;  %v6766_v39 = vor.u32 %v8840_v11, %v6763_v36  ;;  %v6723_v19 = vld [vmem:[#allocation5 + $0x70] sm:$0xf0]  ;;  %v6729_v20 = vld [vmem:[#allocation5 + $0x68] sm:$0xf]  ;;  %v8834_v55 = vld [vmem:[#allocation5 + $0x74] sm:$0xf0] }
 0x195   :  { %9359 = vtanh.f32 %v9948_v26  ;;  %v872_v31 = vadd.f32 0.5, %v869_v28  ;;  %v6755_v28 = vld [vmem:[#allocation5 + $0xb0] sm:$0xf0]  ;;  %v6726_v21 = vor.u32 %v8831_v13, %v6723_v19  ;;  %v6730_v23 = vor.u32 %v8834_v55, %v6729_v20  ;;  %v8832_v57 = vld [vmem:[#allocation5 + $0x6c] sm:$0xf] }
 0x196   :  { %v6713_v11 = vld [vmem:[#allocation5 + $0x48] sm:$0xf]  ;;  %v8830_v36 = vld [vmem:[#allocation5 + $0x54] sm:$0xf0]  ;;  %v6715_v45 = vld [vmem:[#allocation5 + $0x58] sm:$0xf0] }
 0x197   :  { %v6714_v41 = vor.u32 %v8830_v36, %v6713_v11  ;;  %v8823_v51 = vld [vmem:[#allocation5 + $0x24] sm:$0xf]  ;;  %v8824_v12 = vld [vmem:[#allocation5 + $0x2c] sm:$0xf]  ;;  %v6699_v13 = vld [vmem:[#allocation5 + $0x38] sm:$0xf0] }
 0x198   :  { %1350 = vmatpush.bf16.msra.mxu0 %v6770_v50  ;;  %1390 = vmatpush.bf16.msra.mxu3 %v6766_v39  ;;  %v6750_v50 = vor.u32 %v8836_v52, %v6747_v8  ;;  %v6697_v52 = vld [vmem:[#allocation5 + $0x28] sm:$0xf]  ;;  %v8826_v8 = vld [vmem:[#allocation5 + $0x34] sm:$0xf0]  ;;  %v6702_v19 = vor.u32 %v8824_v12, %v6699_v13  ;;  %v8821_v20 = vld [vmem:[#allocation5 + $0xc] sm:$0xf0] }
 0x199   :  { %v6698_v9 = vor.u32 %v8826_v8, %v6697_v52  ;;  %v8819_v55 = vld [vmem:[#allocation5 + $0x4] sm:$0xf] }
 0x19b   :  { %v9360_v48 = vpop.eup %9359 }
 0x19c   :  { %v9951_v32 = vmul.f32 %v9360_v48, %v872_v31  ;;  %v6761_v31 = vld [vmem:[#allocation5 + $0xa8] sm:$0xf]  ;;  %v8842_v48 = vld [vmem:[#allocation5 + $0xb4] sm:$0xf0]  ;;  %1351 = vmatpush.bf16.msra.mxu0 %v6754_v47  ;;  %1391 = vmatpush.bf16.msra.mxu3 %v6750_v50 }
 0x19d   :  { %v6762_v34 = vor.u32 %v8842_v48, %v6761_v31  ;;  %v8829_v31 = vld [vmem:[#allocation5 + $0x4c] sm:$0xf0]  ;;  %v8827_v48 = vld [vmem:[#allocation5 + $0x44] sm:$0xf] }
 0x19e   :  { %v884_v33 = vpack.c.bf16 %v9951_v32, %v9951_v32 }
 0x19f   :  { %1377 = vmatpush.bf16.msra.mxu2 %v6762_v34  ;;  %v6707_v34 = vld [vmem:[#allocation5 + $0x50] sm:$0xf0] }
 0x1a0   :  { %1085 = vmatmul.bf16.vlgmr.msrb.gmra.mxu0 %v884_v33  ;;  %1098 = vmatmul.bf16.vlgmr.msrb.gmra.mxu1 %v884_v33  ;;  %v6710_v39 = vor.u32 %v8827_v48, %v6707_v34  ;;  %v6683_v48 = vld [vmem:[#allocation5 + $0x18] sm:$0xf0] }
 0x1a1   :  { %1111 = vmatmul.bf16.vlgmr.msrb.gmra.mxu2 %v884_v33  ;;  %1124 = vmatmul.bf16.vlgmr.msrb.gmra.mxu3 %v884_v33  ;;  %v6758_v33 = vor.u32 %v8839_v24, %v6755_v28  ;;  %v6731_v24 = vld [vmem:[#allocation5 + $0x78] sm:$0xf0]  ;;  %v6705_v28 = vld [vmem:[#allocation5 + $0x40] sm:$0xf] }
 0x1a2   :  { %1352 = vmatpush.bf16.msra.mxu0 %v6738_v53  ;;  %v6734_v47 = vor.u32 %v8832_v57, %v6731_v24  ;;  %v6718_v53 = vor.u32 %v8828_v44, %v6715_v45  ;;  %v6681_v57 = vld [vmem:[#allocation5 + $0x8] sm:$0xf]  ;;  %v8822_v24 = vld [vmem:[#allocation5 + $0x14] sm:$0xf0] }
 0x1a3   :  { %1364 = vmatpush.bf16.msra.mxu1 %v6758_v33  ;;  %1378 = vmatpush.bf16.msra.mxu2 %v6746_v7  ;;  %v6706_v33 = vor.u32 %v8829_v31, %v6705_v28  ;;  %v6691_v7 = vld [vmem:[#allocation5 + $0x30] sm:$0xf0]  ;;  %v6682_v31 = vor.u32 %v8822_v24, %v6681_v57 }
 0x1a4   :  { %1392 = vmatpush.bf16.msra.mxu3 %v6734_v47  ;;  %v6694_v50 = vor.u32 %v8823_v51, %v6691_v7  ;;  %v8820_v47 = vld [vmem:[#allocation5 + $0xc] sm:$0xf] }
 0x1a6   :  { %1353 = vmatpush.bf16.msra.mxu0 %v6722_v15  ;;  %v6673_v15 = vld [vmem:[#allocation5] sm:$0xf] }
 0x1a7   :  { %1365 = vmatpush.bf16.msra.mxu1 %v6742_v2  ;;  %1379 = vmatpush.bf16.msra.mxu2 %v6730_v23  ;;  %v6690_v2 = vor.u32 %v8825_v49, %v6689_v0  ;;  %v6674_v23 = vor.u32 %v8821_v20, %v6673_v15 }
 0x1a8   :  { %1393 = vmatpush.bf16.msra.mxu3 %v6718_v53 }
 0x1aa   :  { %1354 = vmatpush.bf16.msra.mxu0 %v6706_v33  ;;  %v6686_v33 = vor.u32 %v8820_v47, %v6683_v48  ;;  %v6913_v47 = vld [vmem:[#allocation5 + $0xe0] sm:$0xf]  ;;  %v6915_v48 = vld [vmem:[#allocation5 + $0xf0] sm:$0xf0] }
 0x1ab   :  { %1366 = vmatpush.bf16.msra.mxu1 %v6726_v21  ;;  %1380 = vmatpush.bf16.msra.mxu2 %v6714_v41  ;;  %v6675_v21 = vld [vmem:[#allocation5 + $0x10] sm:$0xf0] }
 0x1ac   :  { %v6678_v28 = vor.u32 %v8819_v55, %v6675_v21  ;;  %1394 = vmatpush.bf16.msra.mxu3 %v6702_v19 }
 0x1ae   :  { %1355 = vmatpush.bf16.msra.mxu0 %v6690_v2 }
 0x1af   :  { %1367 = vmatpush.bf16.msra.mxu1 %v6710_v39  ;;  %1381 = vmatpush.bf16.msra.mxu2 %v6698_v9 }
 0x1b0   :  { %1395 = vmatpush.bf16.msra.mxu3 %v6686_v33  ;;  %v6921_v33 = vld [vmem:[#allocation5 + $0xe8] sm:$0xf] }
 0x1b2   :  { %1356 = vmatpush.bf16.msra.mxu0 %v6674_v23 }
 0x1b3   :  { %1368 = vmatpush.bf16.msra.mxu1 %v6694_v50  ;;  %1382 = vmatpush.bf16.msra.mxu2 %v6682_v31 }
 0x1b7   :  { %1369 = vmatpush.bf16.msra.mxu1 %v6678_v28  ;;  %v8879_v28 = vld [vmem:[#allocation5 + $0xe4] sm:$0xf] }
 0x21d   :  { %v1086_v34 = vpop.f32.mrf.mxu0  ;;  %v1099_v11 = vpop.f32.mrf.mxu1 }
 0x21e   :  { %v1129_v36 = vadd.f32 %v1086_v34, %v9861_v59  ;;  %v1130_v39 = vadd.f32 %v1099_v11, %v9864_v61  ;;  %v8882_v34 = vld [vmem:[#allocation5 + $0xf4] sm:$0xf0]  ;;  %v6918_v11 = vor.u32 %v8879_v28, %v6915_v48  ;;  %v8869_v28 = vld [vmem:[#allocation5 + $0x8c] sm:$0xf0] }
 0x220   :  { %v1133_v41 = vmul.f32 0.5, %v1129_v36  ;;  %v1134_v44 = vmul.f32 0.5, %v1130_v39  ;;  %v6922_v36 = vor.u32 %v8882_v34, %v6921_v33  ;;  %v8880_v39 = vld [vmem:[#allocation5 + $0xec] sm:$0xf]  ;;  %1634 = vmatpush.bf16.msrb.mxu1 %v6918_v11  ;;  %v6867_v33 = vld [vmem:[#allocation5 + $0x90] sm:$0xf0] }
 0x221   :  { %v6873_v34 = vld [vmem:[#allocation5 + $0x88] sm:$0xf]  ;;  %v8870_v11 = vld [vmem:[#allocation5 + $0x94] sm:$0xf0] }
 0x222   :  { %9361 = vtanh.f32 %v1133_v41  ;;  %v6923_v41 = vld [vmem:[#allocation5 + $0xf8] sm:$0xf0]  ;;  %1647 = vmatpush.bf16.msrb.mxu2 %v6922_v36 }
 0x223   :  { %9363 = vtanh.f32 %v1134_v44  ;;  %v6926_v44 = vor.u32 %v8880_v39, %v6923_v41  ;;  %v6874_v39 = vor.u32 %v8870_v11, %v6873_v34  ;;  %v8868_v41 = vld [vmem:[#allocation5 + $0x8c] sm:$0xf]  ;;  %v6819_v34 = vld [vmem:[#allocation5 + $0x30] sm:$0xf0]  ;;  %v6825_v11 = vld [vmem:[#allocation5 + $0x28] sm:$0xf] }
 0x224   :  { %v1112_v45 = vpop.f32.mrf.mxu2  ;;  %v1125_v53 = vpop.f32.mrf.mxu3 }
 0x225   :  { %v1131_v0 = vadd.f32 %v1112_v45, %v9871_v1  ;;  %v1132_v49 = vadd.f32 %v1125_v53, %v9876_v4  ;;  %v1088_v51 = vpop.f32.mrf.mxu0  ;;  %v1101_v2 = vpop.f32.mrf.mxu1  ;;  %v6897_v45 = vld [vmem:[#allocation5 + $0xc0] sm:$0xf]  ;;  %v8877_v53 = vld [vmem:[#allocation5 + $0xcc] sm:$0xf0]  ;;  %1660 = vmatpush.bf16.msrb.mxu3 %v6926_v44  ;;  %v6875_v44 = vld [vmem:[#allocation5 + $0x98] sm:$0xf0] }
 0x226   :  { %v6899_v51 = vld [vmem:[#allocation5 + $0xd0] sm:$0xf0]  ;;  %v6905_v2 = vld [vmem:[#allocation5 + $0xc8] sm:$0xf] }
 0x227   :  { %v1135_v7 = vmul.f32 0.5, %v1131_v0  ;;  %9365 = vtanh.f32 %v1132_v49  ;;  %v8875_v0 = vld [vmem:[#allocation5 + $0xc4] sm:$0xf]  ;;  %v6898_v49 = vor.u32 %v8877_v53, %v6897_v45  ;;  %v6878_v45 = vor.u32 %v8868_v41, %v6875_v44  ;;  %v6849_v53 = vld [vmem:[#allocation5 + $0x60] sm:$0xf] }
 0x228   :  { %v9362_v52 = vpop.eup %9361  ;;  %v8856_v44 = vld [vmem:[#allocation5 + $0x2c] sm:$0xf] }
 0x229   :  { %v9364_v8 = vpop.eup %9363  ;;  %v1139_v50 = vmul.f32 0.5, %v9362_v52  ;;  %9367 = vtanh.f32 %v1135_v7  ;;  %v8878_v7 = vld [vmem:[#allocation5 + $0xd4] sm:$0xf0]  ;;  %v6902_v52 = vor.u32 %v8875_v0, %v6899_v51  ;;  %v8865_v0 = vld [vmem:[#allocation5 + $0x6c] sm:$0xf0] }
 0x22a   :  { %v1140_v59 = vmul.f32 0.5, %v9364_v8  ;;  %v6906_v8 = vor.u32 %v8878_v7, %v6905_v2  ;;  %v6850_v51 = vor.u32 %v8865_v0, %v6849_v53  ;;  %v6851_v2 = vld [vmem:[#allocation5 + $0x70] sm:$0xf0]  ;;  %v6857_v7 = vld [vmem:[#allocation5 + $0x68] sm:$0xf] }
 0x22b   :  { %v1142_v61 = vadd.f32 0.5, %v1139_v50  ;;  %v8876_v50 = vld [vmem:[#allocation5 + $0xcc] sm:$0xf]  ;;  %1635 = vmatpush.bf16.msrb.mxu1 %v6902_v52  ;;  %v8866_v52 = vld [vmem:[#allocation5 + $0x74] sm:$0xf0] }
 0x22c   :  { %v1143_v9 = vadd.f32 0.5, %v1140_v59  ;;  %v1114_v12 = vpop.f32.mrf.mxu2  ;;  %v1127_v13 = vpop.f32.mrf.mxu3  ;;  %v6907_v59 = vld [vmem:[#allocation5 + $0xd8] sm:$0xf0]  ;;  %1648 = vmatpush.bf16.msrb.mxu2 %v6906_v8  ;;  %v6801_v53 = vld [vmem:[#allocation5] sm:$0xf] }
 0x22d   :  { %v9366_v15 = vpop.eup %9365  ;;  %v8873_v12 = vld [vmem:[#allocation5 + $0xac] sm:$0xf0]  ;;  %v8871_v13 = vld [vmem:[#allocation5 + $0xa4] sm:$0xf] }
 0x22e   :  { %v1146_v19 = vmul.f32 %v1143_v9, %v9948_v26  ;;  %v1147_v20 = vmul.f32 %v9366_v15, %v1142_v61  ;;  %v8881_v26 = vld [vmem:[#allocation5 + $0xec] sm:$0xf0]  ;;  %v6910_v61 = vor.u32 %v8876_v50, %v6907_v59  ;;  %v6881_v9 = vld [vmem:[#allocation5 + $0xa0] sm:$0xf]  ;;  %v6858_v50 = vor.u32 %v8866_v52, %v6857_v7  ;;  %v8864_v59 = vld [vmem:[#allocation5 + $0x6c] sm:$0xf] }
 0x22f   :  { %v9368_v1 = vpop.eup %9367  ;;  %v6914_v31 = vor.u32 %v8881_v26, %v6913_v47  ;;  %v6882_v15 = vor.u32 %v8873_v12, %v6881_v9  ;;  %v6865_v26 = vld [vmem:[#allocation5 + $0x80] sm:$0xf]  ;;  %v6809_v52 = vld [vmem:[#allocation5 + $0x8] sm:$0xf] }
 0x230   :  { %v9960_v55 = vadd.f32 %v1147_v20, %v1146_v19  ;;  %v1141_v4 = vmul.f32 0.5, %v9368_v1  ;;  %1661 = vmatpush.bf16.msrb.mxu3 %v6910_v61  ;;  %v6883_v19 = vld [vmem:[#allocation5 + $0xb0] sm:$0xf0]  ;;  %v6889_v20 = vld [vmem:[#allocation5 + $0xa8] sm:$0xf]  ;;  %v6866_v48 = vor.u32 %v8869_v28, %v6865_v26 }
 0x231   :  { %1621 = vmatpush.bf16.msrb.mxu0 %v6914_v31  ;;  %v8874_v1 = vld [vmem:[#allocation5 + $0xb4] sm:$0xf0]  ;;  %v8867_v31 = vld [vmem:[#allocation5 + $0x84] sm:$0xf]  ;;  %v6859_v61 = vld [vmem:[#allocation5 + $0x78] sm:$0xf0] }
 0x232   :  { %9369 = vtanh.f32 %v9960_v55  ;;  %v1144_v21 = vadd.f32 0.5, %v1141_v4  ;;  %v6886_v4 = vor.u32 %v8871_v13, %v6883_v19  ;;  %v6870_v36 = vor.u32 %v8867_v31, %v6867_v33  ;;  %v6833_v12 = vld [vmem:[#allocation5 + $0x40] sm:$0xf]  ;;  %v8861_v13 = vld [vmem:[#allocation5 + $0x4c] sm:$0xf0] }
 0x233   :  { %v6862_v9 = vor.u32 %v8864_v59, %v6859_v61  ;;  %v6834_v19 = vor.u32 %v8861_v13, %v6833_v12  ;;  %v6817_v28 = vld [vmem:[#allocation5 + $0x20] sm:$0xf]  ;;  %v8857_v31 = vld [vmem:[#allocation5 + $0x2c] sm:$0xf0]  ;;  %v206_v13 = vadd.f32 %v9873_v3, %v9852_v54 }
 0x234   :  { %1636 = vmatpush.bf16.msrb.mxu1 %v6886_v4  ;;  %v8862_v4 = vld [vmem:[#allocation5 + $0x54] sm:$0xf0]  ;;  %v6818_v33 = vor.u32 %v8857_v31, %v6817_v28 }
 0x235   :  { %1622 = vmatpush.bf16.msrb.mxu0 %v6898_v49  ;;  %v8863_v49 = vld [vmem:[#allocation5 + $0x64] sm:$0xf] }
 0x236   :  { %v6854_v8 = vor.u32 %v8863_v49, %v6851_v2  ;;  %v8853_v49 = vld [vmem:[#allocation5 + $0xc] sm:$0xf0]  ;;  %v6803_v2 = vld [vmem:[#allocation5 + $0x10] sm:$0xf0] }
 0x237   :  { %v6802_v7 = vor.u32 %v8853_v49, %v6801_v53 }
 0x238   :  { %v9370_v23 = vpop.eup %9369  ;;  %1637 = vmatpush.bf16.msrb.mxu1 %v6870_v36  ;;  %v8858_v36 = vld [vmem:[#allocation5 + $0x34] sm:$0xf0] }
 0x239   :  { %v9963_v57 = vmul.f32 %v9370_v23, %v1144_v21  ;;  %v6890_v21 = vor.u32 %v8874_v1, %v6889_v20  ;;  %v8872_v23 = vld [vmem:[#allocation5 + $0xac] sm:$0xf]  ;;  %1623 = vmatpush.bf16.msrb.mxu0 %v6882_v15  ;;  %v8859_v15 = vld [vmem:[#allocation5 + $0x44] sm:$0xf]  ;;  %v6835_v20 = vld [vmem:[#allocation5 + $0x50] sm:$0xf0]  ;;  %v6826_v41 = vor.u32 %v8858_v36, %v6825_v11 }
 0x23a   :  { %v6841_v1 = vld [vmem:[#allocation5 + $0x48] sm:$0xf] }
 0x23b   :  { %v1156_v24 = vpack.c.bf16 %v9963_v57, %v9963_v57  ;;  %1649 = vmatpush.bf16.msrb.mxu2 %v6890_v21  ;;  %v6838_v21 = vor.u32 %v8859_v15, %v6835_v20  ;;  %v235_v15 = vadd.f32 %v9878_v5, %v9856_v56 }
 0x23c   :  { %1638 = vmatpush.bf16.msrb.mxu1 %v6854_v8  ;;  %v8854_v8 = vld [vmem:[#allocation5 + $0x14] sm:$0xf0] }
 0x23d   :  { %1357 = vmatmul.bf16.vlgmr.msra.gmra.mxu0 %v1156_v24  ;;  %1370 = vmatmul.bf16.vlgmr.msra.gmra.mxu1 %v1156_v24  ;;  %v6810_v61 = vor.u32 %v8854_v8, %v6809_v52 }
 0x23e   :  { %1383 = vmatmul.bf16.vlgmr.msra.gmra.mxu2 %v1156_v24  ;;  %1396 = vmatmul.bf16.vlgmr.msra.gmra.mxu3 %v1156_v24  ;;  %v6891_v24 = vld [vmem:[#allocation5 + $0xb8] sm:$0xf0] }
 0x23f   :  { %v6894_v47 = vor.u32 %v8872_v23, %v6891_v24  ;;  %1624 = vmatpush.bf16.msrb.mxu0 %v6866_v48  ;;  %1650 = vmatpush.bf16.msrb.mxu2 %v6874_v39  ;;  %v6842_v23 = vor.u32 %v8862_v4, %v6841_v1  ;;  %v8860_v24 = vld [vmem:[#allocation5 + $0x4c] sm:$0xf]  ;;  %v8855_v48 = vld [vmem:[#allocation5 + $0x24] sm:$0xf] }
 0x240   :  { %1639 = vmatpush.bf16.msrb.mxu1 %v6838_v21  ;;  %v6822_v39 = vor.u32 %v8855_v48, %v6819_v34 }
 0x241   :  { %1662 = vmatpush.bf16.msrb.mxu3 %v6894_v47  ;;  %v6843_v47 = vld [vmem:[#allocation5 + $0x58] sm:$0xf0] }
 0x242   :  { %v6846_v26 = vor.u32 %v8860_v24, %v6843_v47  ;;  %v264_v24 = vadd.f32 %v9880_v6, %v9866_v62  ;;  %v293_v47 = vadd.f32 %v9882_v10, %v9868_v63 }
 0x243   :  { %1625 = vmatpush.bf16.msrb.mxu0 %v6850_v51  ;;  %1651 = vmatpush.bf16.msrb.mxu2 %v6858_v50  ;;  %v8851_v51 = vld [vmem:[#allocation5 + $0x4] sm:$0xf]  ;;  %v8852_v50 = vld [vmem:[#allocation5 + $0xc] sm:$0xf] }
 0x244   :  { %1640 = vmatpush.bf16.msrb.mxu1 %v6822_v39  ;;  %v6806_v59 = vor.u32 %v8851_v51, %v6803_v2 }
 0x245   :  { %1663 = vmatpush.bf16.msrb.mxu3 %v6878_v45  ;;  %v6827_v45 = vld [vmem:[#allocation5 + $0x38] sm:$0xf0] }
 0x246   :  { %v6830_v0 = vor.u32 %v8856_v44, %v6827_v45 }
 0x247   :  { %1626 = vmatpush.bf16.msrb.mxu0 %v6834_v19  ;;  %1652 = vmatpush.bf16.msrb.mxu2 %v6842_v23 }
 0x248   :  { %1641 = vmatpush.bf16.msrb.mxu1 %v6806_v59  ;;  %v7041_v59 = vld [vmem:[#allocation5 + $0xe0] sm:$0xf] }
 0x249   :  { %1664 = vmatpush.bf16.msrb.mxu3 %v6862_v9  ;;  %v6811_v9 = vld [vmem:[#allocation5 + $0x18] sm:$0xf0] }
 0x24a   :  { %v6814_v12 = vor.u32 %v8852_v50, %v6811_v9 }
 0x24b   :  { %1627 = vmatpush.bf16.msrb.mxu0 %v6818_v33  ;;  %1653 = vmatpush.bf16.msrb.mxu2 %v6826_v41 }
 0x24d   :  { %1665 = vmatpush.bf16.msrb.mxu3 %v6846_v26 }
 0x24f   :  { %1628 = vmatpush.bf16.msrb.mxu0 %v6802_v7  ;;  %1654 = vmatpush.bf16.msrb.mxu2 %v6810_v61  ;;  %v8911_v61 = vld [vmem:[#allocation5 + $0xe4] sm:$0xf] }
 0x251   :  { %1666 = vmatpush.bf16.msrb.mxu3 %v6830_v0 }
 0x255   :  { %1667 = vmatpush.bf16.msrb.mxu3 %v6814_v12  ;;  %v7043_v12 = vld [vmem:[#allocation5 + $0xf0] sm:$0xf0] }
 0x2ba   :  { %v1358_v19 = vpop.f32.mrf.mxu0  ;;  %v1371_v20 = vpop.f32.mrf.mxu1 }
 0x2bb   :  { %v1401_v1 = vadd.f32 %v1358_v19, %v206_v13  ;;  %v1402_v4 = vadd.f32 %v1371_v20, %v235_v15  ;;  %v7049_v13 = vld [vmem:[#allocation5 + $0xe8] sm:$0xf]  ;;  %v8914_v15 = vld [vmem:[#allocation5 + $0xf4] sm:$0xf0]  ;;  %v7046_v19 = vor.u32 %v8911_v61, %v7043_v12  ;;  %v6995_v61 = vld [vmem:[#allocation5 + $0x90] sm:$0xf0] }
 0x2bc   :  { %v7050_v20 = vor.u32 %v8914_v15, %v7049_v13  ;;  %v8902_v12 = vld [vmem:[#allocation5 + $0x94] sm:$0xf0] }
 0x2bd   :  { %v1405_v21 = vmul.f32 0.5, %v1401_v1  ;;  %v1406_v23 = vmul.f32 0.5, %v1402_v4  ;;  %v8912_v1 = vld [vmem:[#allocation5 + $0xec] sm:$0xf]  ;;  %v7051_v4 = vld [vmem:[#allocation5 + $0xf8] sm:$0xf0]  ;;  %1906 = vmatpush.bf16.msra.mxu1 %v7046_v19 }
 0x2be   :  { %1919 = vmatpush.bf16.msra.mxu2 %v7050_v20  ;;  %v8900_v19 = vld [vmem:[#allocation5 + $0x8c] sm:$0xf]  ;;  %v7003_v20 = vld [vmem:[#allocation5 + $0x98] sm:$0xf0] }
 0x2bf   :  { %9371 = vtanh.f32 %v1405_v21  ;;  %v7054_v21 = vor.u32 %v8912_v1, %v7051_v4  ;;  %v7006_v1 = vor.u32 %v8900_v19, %v7003_v20  ;;  %v6977_v4 = vld [vmem:[#allocation5 + $0x60] sm:$0xf] }
 0x2c0   :  { %9373 = vtanh.f32 %v1406_v23  ;;  %v7025_v23 = vld [vmem:[#allocation5 + $0xc0] sm:$0xf] }
 0x2c1   :  { %v1384_v26 = vpop.f32.mrf.mxu2  ;;  %v1397_v3 = vpop.f32.mrf.mxu3  ;;  %1932 = vmatpush.bf16.msra.mxu3 %v7054_v21  ;;  %v8897_v21 = vld [vmem:[#allocation5 + $0x6c] sm:$0xf0]  ;;  %v6929_v19 = vld [vmem:[#allocation5] sm:$0xf] }
 0x2c2   :  { %v1403_v28 = vadd.f32 %v1384_v26, %v264_v24  ;;  %v1404_v31 = vadd.f32 %v1397_v3, %v293_v47  ;;  %v1360_v5 = vpop.f32.mrf.mxu0  ;;  %v1373_v48 = vpop.f32.mrf.mxu1  ;;  %v8909_v24 = vld [vmem:[#allocation5 + $0xcc] sm:$0xf0]  ;;  %v8907_v47 = vld [vmem:[#allocation5 + $0xc4] sm:$0xf]  ;;  %v7027_v3 = vld [vmem:[#allocation5 + $0xd0] sm:$0xf0] }
 0x2c3   :  { %v7026_v26 = vor.u32 %v8909_v24, %v7025_v23  ;;  %v7030_v5 = vor.u32 %v8907_v47, %v7027_v3  ;;  %v8895_v23 = vld [vmem:[#allocation5 + $0x64] sm:$0xf]  ;;  %v6978_v24 = vor.u32 %v8897_v21, %v6977_v4  ;;  %v6979_v47 = vld [vmem:[#allocation5 + $0x70] sm:$0xf0]  ;;  %v8898_v3 = vld [vmem:[#allocation5 + $0x74] sm:$0xf0] }
 0x2c4   :  { %v1407_v33 = vmul.f32 0.5, %v1403_v28  ;;  %9375 = vtanh.f32 %v1404_v31  ;;  %v7033_v28 = vld [vmem:[#allocation5 + $0xc8] sm:$0xf]  ;;  %v8910_v31 = vld [vmem:[#allocation5 + $0xd4] sm:$0xf0] }
 0x2c5   :  { %v9372_v34 = vpop.eup %9371  ;;  %v7034_v48 = vor.u32 %v8910_v31, %v7033_v28  ;;  %1907 = vmatpush.bf16.msra.mxu1 %v7030_v5  ;;  %v6982_v28 = vor.u32 %v8895_v23, %v6979_v47  ;;  %v8896_v5 = vld [vmem:[#allocation5 + $0x6c] sm:$0xf]  ;;  %v8883_v4 = vld [vmem:[#allocation5 + $0x4] sm:$0xf]  ;;  %v6931_v21 = vld [vmem:[#allocation5 + $0x10] sm:$0xf0] }
 0x2c6   :  { %v9374_v11 = vpop.eup %9373  ;;  %v1411_v36 = vmul.f32 0.5, %v9372_v34  ;;  %9377 = vtanh.f32 %v1407_v33  ;;  %v8908_v33 = vld [vmem:[#allocation5 + $0xcc] sm:$0xf]  ;;  %v7035_v34 = vld [vmem:[#allocation5 + $0xd8] sm:$0xf0] }
 0x2c7   :  { %v1412_v39 = vmul.f32 0.5, %v9374_v11  ;;  %v7038_v11 = vor.u32 %v8908_v33, %v7035_v34  ;;  %1920 = vmatpush.bf16.msra.mxu2 %v7034_v48  ;;  %v6987_v48 = vld [vmem:[#allocation5 + $0x78] sm:$0xf0]  ;;  %v6961_v34 = vld [vmem:[#allocation5 + $0x40] sm:$0xf] }
 0x2c8   :  { %v1414_v41 = vadd.f32 0.5, %v1411_v36  ;;  %v7009_v36 = vld [vmem:[#allocation5 + $0xa0] sm:$0xf]  ;;  %v6990_v33 = vor.u32 %v8896_v5, %v6987_v48  ;;  %v8886_v47 = vld [vmem:[#allocation5 + $0x14] sm:$0xf0] }
 0x2c9   :  { %v1415_v44 = vadd.f32 0.5, %v1412_v39  ;;  %v1386_v6 = vpop.f32.mrf.mxu2  ;;  %v1399_v45 = vpop.f32.mrf.mxu3  ;;  %v8905_v39 = vld [vmem:[#allocation5 + $0xac] sm:$0xf0]  ;;  %1933 = vmatpush.bf16.msra.mxu3 %v7038_v11 }
 0x2ca   :  { %v9376_v53 = vpop.eup %9375  ;;  %v7011_v6 = vld [vmem:[#allocation5 + $0xb0] sm:$0xf0]  ;;  %v7017_v45 = vld [vmem:[#allocation5 + $0xa8] sm:$0xf]  ;;  %v8893_v11 = vld [vmem:[#allocation5 + $0x4c] sm:$0xf0] }
 0x2cb   :  { %v1418_v10 = vmul.f32 %v1415_v44, %v9960_v55  ;;  %v1419_v0 = vmul.f32 %v9376_v53, %v1414_v41  ;;  %v8913_v55 = vld [vmem:[#allocation5 + $0xec] sm:$0xf0]  ;;  %v8903_v41 = vld [vmem:[#allocation5 + $0xa4] sm:$0xf]  ;;  %v7010_v44 = vor.u32 %v8905_v39, %v7009_v36  ;;  %v8906_v53 = vld [vmem:[#allocation5 + $0xb4] sm:$0xf0]  ;;  %v6962_v39 = vor.u32 %v8893_v11, %v6961_v34 }
 0x2cc   :  { %v9378_v49 = vpop.eup %9377  ;;  %v7042_v9 = vor.u32 %v8913_v55, %v7041_v59  ;;  %v8899_v59 = vld [vmem:[#allocation5 + $0x84] sm:$0xf] }
 0x2cd   :  { %v9976_v51 = vadd.f32 %v1419_v0, %v1418_v10  ;;  %v1413_v2 = vmul.f32 0.5, %v9378_v49  ;;  %v7014_v10 = vor.u32 %v8903_v41, %v7011_v6  ;;  %v7018_v0 = vor.u32 %v8906_v53, %v7017_v45  ;;  %v8904_v49 = vld [vmem:[#allocation5 + $0xac] sm:$0xf]  ;;  %v8891_v36 = vld [vmem:[#allocation5 + $0x44] sm:$0xf] }
 0x2ce   :  { %1893 = vmatpush.bf16.msra.mxu0 %v7042_v9  ;;  %v7001_v9 = vld [vmem:[#allocation5 + $0x88] sm:$0xf]  ;;  %v6998_v13 = vor.u32 %v8899_v59, %v6995_v61  ;;  %v6963_v41 = vld [vmem:[#allocation5 + $0x50] sm:$0xf0]  ;;  %v8894_v6 = vld [vmem:[#allocation5 + $0x54] sm:$0xf0] }
 0x2cf   :  { %9379 = vtanh.f32 %v9976_v51  ;;  %v1416_v7 = vadd.f32 0.5, %v1413_v2  ;;  %v7019_v2 = vld [vmem:[#allocation5 + $0xb8] sm:$0xf0]  ;;  %1908 = vmatpush.bf16.msra.mxu1 %v7014_v10  ;;  %1921 = vmatpush.bf16.msra.mxu2 %v7018_v0  ;;  %v7002_v15 = vor.u32 %v8902_v12, %v7001_v9  ;;  %v6966_v45 = vor.u32 %v8891_v36, %v6963_v41  ;;  %v8892_v10 = vld [vmem:[#allocation5 + $0x4c] sm:$0xf] }
 0x2d0   :  { %v6971_v0 = vld [vmem:[#allocation5 + $0x58] sm:$0xf0]  ;;  %v6947_v59 = vld [vmem:[#allocation5 + $0x30] sm:$0xf0]  ;;  %v8890_v61 = vld [vmem:[#allocation5 + $0x34] sm:$0xf0] }
 0x2d2   :  { %1894 = vmatpush.bf16.msra.mxu0 %v7026_v26  ;;  %v6985_v26 = vld [vmem:[#allocation5 + $0x68] sm:$0xf] }
 0x2d3   :  { %1909 = vmatpush.bf16.msra.mxu1 %v6998_v13  ;;  %1922 = vmatpush.bf16.msra.mxu2 %v7002_v15  ;;  %v6986_v31 = vor.u32 %v8898_v3, %v6985_v26  ;;  %v8888_v13 = vld [vmem:[#allocation5 + $0x2c] sm:$0xf]  ;;  %v6955_v15 = vld [vmem:[#allocation5 + $0x38] sm:$0xf0]  ;;  %v6934_v3 = vor.u32 %v8883_v4, %v6931_v21  ;;  %v8943_v4 = vld [vmem:[#allocation5 + $0xe4] sm:$0xf] }
 0x2d4   :  { %v6958_v20 = vor.u32 %v8888_v13, %v6955_v15  ;;  %v8884_v26 = vld [vmem:[#allocation5 + $0xc] sm:$0xf] }
 0x2d5   :  { %v9380_v52 = vpop.eup %9379 }
 0x2d6   :  { %v9979_v8 = vmul.f32 %v9380_v52, %v1416_v7  ;;  %1895 = vmatpush.bf16.msra.mxu0 %v7010_v44  ;;  %v7022_v7 = vor.u32 %v8904_v49, %v7019_v2  ;;  %v6993_v52 = vld [vmem:[#allocation5 + $0x80] sm:$0xf]  ;;  %v6969_v44 = vld [vmem:[#allocation5 + $0x48] sm:$0xf]  ;;  %v6974_v49 = vor.u32 %v8892_v10, %v6971_v0 }
 0x2d7   :  { %1910 = vmatpush.bf16.msra.mxu1 %v6982_v28  ;;  %1923 = vmatpush.bf16.msra.mxu2 %v6986_v31  ;;  %v6970_v53 = vor.u32 %v8894_v6, %v6969_v44  ;;  %v6945_v2 = vld [vmem:[#allocation5 + $0x20] sm:$0xf]  ;;  %v6939_v31 = vld [vmem:[#allocation5 + $0x18] sm:$0xf0] }
 0x2d8   :  { %v1428_v50 = vpack.c.bf16 %v9979_v8, %v9979_v8  ;;  %1934 = vmatpush.bf16.msra.mxu3 %v7022_v7  ;;  %v8889_v7 = vld [vmem:[#allocation5 + $0x2c] sm:$0xf0]  ;;  %v6942_v5 = vor.u32 %v8884_v26, %v6939_v31  ;;  %v7179_v31 = vld [vmem:[#allocation5 + $0xf8] sm:$0xf0] }
 0x2da   :  { %1629 = vmatmul.bf16.vlgmr.msrb.gmra.mxu0 %v1428_v50  ;;  %1642 = vmatmul.bf16.vlgmr.msrb.gmra.mxu1 %v1428_v50 }
 0x2db   :  { %1655 = vmatmul.bf16.vlgmr.msrb.gmra.mxu2 %v1428_v50  ;;  %1668 = vmatmul.bf16.vlgmr.msrb.gmra.mxu3 %v1428_v50  ;;  %v8901_v50 = vld [vmem:[#allocation5 + $0x8c] sm:$0xf0] }
 0x2dc   :  { %v6994_v55 = vor.u32 %v8901_v50, %v6993_v52  ;;  %1935 = vmatpush.bf16.msra.mxu3 %v7006_v1  ;;  %v8887_v52 = vld [vmem:[#allocation5 + $0x24] sm:$0xf]  ;;  %1911 = vmatpush.bf16.msra.mxu1 %v6966_v45  ;;  %v6946_v50 = vor.u32 %v8889_v7, %v6945_v2  ;;  %v8885_v1 = vld [vmem:[#allocation5 + $0xc] sm:$0xf0] }
 0x2dd   :  { %1924 = vmatpush.bf16.msra.mxu2 %v6970_v53  ;;  %v6950_v9 = vor.u32 %v8887_v52, %v6947_v59  ;;  %v6930_v23 = vor.u32 %v8885_v1, %v6929_v19  ;;  %v7169_v1 = vld [vmem:[#allocation5 + $0xe0] sm:$0xf] }
 0x2de   :  { %1896 = vmatpush.bf16.msra.mxu0 %v6994_v55  ;;  %v6953_v55 = vld [vmem:[#allocation5 + $0x28] sm:$0xf] }
 0x2df   :  { %v6954_v12 = vor.u32 %v8890_v61, %v6953_v55 }
 0x2e0   :  { %1936 = vmatpush.bf16.msra.mxu3 %v6990_v33  ;;  %1912 = vmatpush.bf16.msra.mxu1 %v6950_v9 }
 0x2e1   :  { %1925 = vmatpush.bf16.msra.mxu2 %v6954_v12 }
 0x2e2   :  { %1897 = vmatpush.bf16.msra.mxu0 %v6978_v24  ;;  %v6937_v24 = vld [vmem:[#allocation5 + $0x8] sm:$0xf] }
 0x2e3   :  { %v6938_v28 = vor.u32 %v8886_v47, %v6937_v24  ;;  %v7177_v24 = vld [vmem:[#allocation5 + $0xe8] sm:$0xf]  ;;  %v8946_v47 = vld [vmem:[#allocation5 + $0xf4] sm:$0xf0] }
 0x2e4   :  { %1937 = vmatpush.bf16.msra.mxu3 %v6974_v49  ;;  %1913 = vmatpush.bf16.msra.mxu1 %v6934_v3  ;;  %v7178_v3 = vor.u32 %v8946_v47, %v7177_v24  ;;  %v7131_v24 = vld [vmem:[#allocation5 + $0x98] sm:$0xf0] }
 0x2e5   :  { %1926 = vmatpush.bf16.msra.mxu2 %v6938_v28  ;;  %v8944_v28 = vld [vmem:[#allocation5 + $0xec] sm:$0xf] }
 0x2e6   :  { %1898 = vmatpush.bf16.msra.mxu0 %v6962_v39 }
 0x2e8   :  { %1938 = vmatpush.bf16.msra.mxu3 %v6958_v20 }
 0x2e9   :  { %2191 = vmatpush.bf16.msrb.mxu2 %v7178_v3  ;;  %v8929_v3 = vld [vmem:[#allocation5 + $0x6c] sm:$0xf0] }
 0x2ea   :  { %1899 = vmatpush.bf16.msra.mxu0 %v6946_v50 }
 0x2ec   :  { %1939 = vmatpush.bf16.msra.mxu3 %v6942_v5  ;;  %v7182_v5 = vor.u32 %v8944_v28, %v7179_v31  ;;  %v8927_v28 = vld [vmem:[#allocation5 + $0x64] sm:$0xf] }
 0x2ee   :  { %1900 = vmatpush.bf16.msra.mxu0 %v6930_v23  ;;  %v7171_v23 = vld [vmem:[#allocation5 + $0xf0] sm:$0xf0] }
 0x2ef   :  { %v7174_v26 = vor.u32 %v8943_v4, %v7171_v23  ;;  %v8932_v23 = vld [vmem:[#allocation5 + $0x8c] sm:$0xf] }
 0x2f0   :  { %2204 = vmatpush.bf16.msrb.mxu3 %v7182_v5  ;;  %v7134_v47 = vor.u32 %v8932_v23, %v7131_v24  ;;  %v7107_v5 = vld [vmem:[#allocation5 + $0x70] sm:$0xf0]  ;;  %v8915_v23 = vld [vmem:[#allocation5 + $0x4] sm:$0xf] }
 0x2f1   :  { %2178 = vmatpush.bf16.msrb.mxu1 %v7174_v26  ;;  %v7105_v26 = vld [vmem:[#allocation5 + $0x60] sm:$0xf]  ;;  %v7059_v24 = vld [vmem:[#allocation5 + $0x10] sm:$0xf0] }
 0x2f2   :  { %v7106_v31 = vor.u32 %v8929_v3, %v7105_v26  ;;  %v7065_v26 = vld [vmem:[#allocation5 + $0x8] sm:$0xf]  ;;  %v8918_v3 = vld [vmem:[#allocation5 + $0x14] sm:$0xf0] }
 0x357   :  { %v1630_v48 = vpop.f32.mrf.mxu0  ;;  %v1643_v33 = vpop.f32.mrf.mxu1 }
 0x358   :  { %v1673_v34 = vadd.f32 %v1630_v48, %v9885_v16  ;;  %v1674_v11 = vadd.f32 %v1643_v33, %v9888_v22  ;;  %v7153_v48 = vld [vmem:[#allocation5 + $0xc0] sm:$0xf]  ;;  %v8941_v33 = vld [vmem:[#allocation5 + $0xcc] sm:$0xf0] }
 0x35a   :  { %v1677_v36 = vmul.f32 0.5, %v1673_v34  ;;  %v1678_v39 = vmul.f32 0.5, %v1674_v11  ;;  %v8939_v34 = vld [vmem:[#allocation5 + $0xc4] sm:$0xf]  ;;  %v7154_v11 = vor.u32 %v8941_v33, %v7153_v48  ;;  %v7113_v48 = vld [vmem:[#allocation5 + $0x68] sm:$0xf] }
 0x35b   :  { %v8930_v33 = vld [vmem:[#allocation5 + $0x74] sm:$0xf0] }
 0x35c   :  { %9381 = vtanh.f32 %v1677_v36  ;;  %v7155_v36 = vld [vmem:[#allocation5 + $0xd0] sm:$0xf0] }
 0x35d   :  { %9383 = vtanh.f32 %v1678_v39  ;;  %v7161_v39 = vld [vmem:[#allocation5 + $0xc8] sm:$0xf] }
 0x35e   :  { %v1656_v41 = vpop.f32.mrf.mxu2  ;;  %v1669_v44 = vpop.f32.mrf.mxu3 }
 0x35f   :  { %v1675_v6 = vadd.f32 %v1656_v41, %v9891_v40  ;;  %v1676_v45 = vadd.f32 %v1669_v44, %v9896_v58  ;;  %v1632_v53 = vpop.f32.mrf.mxu0  ;;  %v1645_v10 = vpop.f32.mrf.mxu1  ;;  %v8942_v41 = vld [vmem:[#allocation5 + $0xd4] sm:$0xf0]  ;;  %v7158_v44 = vor.u32 %v8939_v34, %v7155_v36  ;;  %v7110_v34 = vor.u32 %v8927_v28, %v7107_v5  ;;  %v8928_v36 = vld [vmem:[#allocation5 + $0x6c] sm:$0xf] }
 0x360   :  { %v7163_v53 = vld [vmem:[#allocation5 + $0xd8] sm:$0xf0]  ;;  %v8916_v28 = vld [vmem:[#allocation5 + $0xc] sm:$0xf]  ;;  %v7066_v5 = vor.u32 %v8918_v3, %v7065_v26  ;;  %v8969_v26 = vld [vmem:[#allocation5 + $0xac] sm:$0xf0] }
 0x361   :  { %v1679_v0 = vmul.f32 0.5, %v1675_v6  ;;  %9385 = vtanh.f32 %v1676_v45  ;;  %v7162_v6 = vor.u32 %v8942_v41, %v7161_v39  ;;  %v8940_v45 = vld [vmem:[#allocation5 + $0xcc] sm:$0xf]  ;;  %2179 = vmatpush.bf16.msrb.mxu1 %v7158_v44  ;;  %v7115_v39 = vld [vmem:[#allocation5 + $0x78] sm:$0xf0] }
 0x362   :  { %v9382_v49 = vpop.eup %9381  ;;  %v7166_v10 = vor.u32 %v8940_v45, %v7163_v53  ;;  %v7118_v41 = vor.u32 %v8928_v36, %v7115_v39  ;;  %v7089_v44 = vld [vmem:[#allocation5 + $0x40] sm:$0xf]  ;;  %v8923_v45 = vld [vmem:[#allocation5 + $0x44] sm:$0xf] }
 0x363   :  { %v9384_v2 = vpop.eup %9383  ;;  %v1683_v7 = vmul.f32 0.5, %v9382_v49  ;;  %9387 = vtanh.f32 %v1679_v0  ;;  %2192 = vmatpush.bf16.msrb.mxu2 %v7162_v6  ;;  %v7137_v0 = vld [vmem:[#allocation5 + $0xa0] sm:$0xf]  ;;  %v8937_v49 = vld [vmem:[#allocation5 + $0xac] sm:$0xf0] }
 0x364   :  { %v1684_v16 = vmul.f32 0.5, %v9384_v2  ;;  %v8935_v2 = vld [vmem:[#allocation5 + $0xa4] sm:$0xf]  ;;  %2205 = vmatpush.bf16.msrb.mxu3 %v7166_v10  ;;  %v8925_v6 = vld [vmem:[#allocation5 + $0x4c] sm:$0xf0] }
 0x365   :  { %v1686_v22 = vadd.f32 0.5, %v1683_v7  ;;  %v7138_v7 = vor.u32 %v8937_v49, %v7137_v0  ;;  %v7090_v53 = vor.u32 %v8925_v6, %v7089_v44  ;;  %v7091_v10 = vld [vmem:[#allocation5 + $0x50] sm:$0xf0]  ;;  %v7097_v0 = vld [vmem:[#allocation5 + $0x48] sm:$0xf] }
 0x366   :  { %v1687_v52 = vadd.f32 0.5, %v1684_v16  ;;  %v1658_v50 = vpop.f32.mrf.mxu2  ;;  %v1671_v59 = vpop.f32.mrf.mxu3  ;;  %v7139_v16 = vld [vmem:[#allocation5 + $0xb0] sm:$0xf0]  ;;  %v8926_v49 = vld [vmem:[#allocation5 + $0x54] sm:$0xf0] }
 0x367   :  { %v9386_v55 = vpop.eup %9385  ;;  %v7142_v50 = vor.u32 %v8935_v2, %v7139_v16  ;;  %v7094_v2 = vor.u32 %v8923_v45, %v7091_v10  ;;  %v8924_v16 = vld [vmem:[#allocation5 + $0x4c] sm:$0xf]  ;;  %v7297_v6 = vld [vmem:[#allocation5 + $0xe0] sm:$0xf]  ;;  %v8977_v45 = vld [vmem:[#allocation5 + $0xec] sm:$0xf0] }
 0x368   :  { %v1690_v61 = vmul.f32 %v1687_v52, %v9976_v51  ;;  %v1691_v9 = vmul.f32 %v9386_v55, %v1686_v22  ;;  %v8945_v51 = vld [vmem:[#allocation5 + $0xec] sm:$0xf0]  ;;  %v7145_v22 = vld [vmem:[#allocation5 + $0xa8] sm:$0xf]  ;;  %v8938_v52 = vld [vmem:[#allocation5 + $0xb4] sm:$0xf0]  ;;  %v7298_v10 = vor.u32 %v8977_v45, %v7297_v6 }
 0x369   :  { %v9388_v40 = vpop.eup %9387  ;;  %v7170_v21 = vor.u32 %v8945_v51, %v7169_v1  ;;  %v7146_v59 = vor.u32 %v8938_v52, %v7145_v22  ;;  %v8936_v55 = vld [vmem:[#allocation5 + $0xac] sm:$0xf]  ;;  %2180 = vmatpush.bf16.msrb.mxu1 %v7142_v50  ;;  %v7129_v1 = vld [vmem:[#allocation5 + $0x88] sm:$0xf]  ;;  %v8934_v51 = vld [vmem:[#allocation5 + $0x94] sm:$0xf0] }
 0x36a   :  { %v9988_v12 = vadd.f32 %v1691_v9, %v1690_v61  ;;  %v1685_v58 = vmul.f32 0.5, %v9388_v40  ;;  %v7147_v61 = vld [vmem:[#allocation5 + $0xb8] sm:$0xf0]  ;;  %v7121_v40 = vld [vmem:[#allocation5 + $0x80] sm:$0xf] }
 0x36b   :  { %2165 = vmatpush.bf16.msrb.mxu0 %v7170_v21  ;;  %v7150_v9 = vor.u32 %v8936_v55, %v7147_v61  ;;  %2193 = vmatpush.bf16.msrb.mxu2 %v7146_v59  ;;  %v7130_v21 = vor.u32 %v8934_v51, %v7129_v1  ;;  %v7099_v22 = vld [vmem:[#allocation5 + $0x58] sm:$0xf0]  ;;  %v7073_v50 = vld [vmem:[#allocation5 + $0x20] sm:$0xf]  ;;  %v8921_v59 = vld [vmem:[#allocation5 + $0x2c] sm:$0xf0] }
 0x36c   :  { %9389 = vtanh.f32 %v9988_v12  ;;  %v1688_v13 = vadd.f32 0.5, %v1685_v58  ;;  %v8933_v58 = vld [vmem:[#allocation5 + $0x8c] sm:$0xf0]  ;;  %v7102_v52 = vor.u32 %v8924_v16, %v7099_v22  ;;  %v8919_v55 = vld [vmem:[#allocation5 + $0x24] sm:$0xf]  ;;  %v7074_v61 = vor.u32 %v8921_v59, %v7073_v50 }
 0x36d   :  { %2206 = vmatpush.bf16.msrb.mxu3 %v7150_v9  ;;  %v7075_v9 = vld [vmem:[#allocation5 + $0x30] sm:$0xf0]  ;;  %v7083_v1 = vld [vmem:[#allocation5 + $0x38] sm:$0xf0]  ;;  %v7057_v51 = vld [vmem:[#allocation5] sm:$0xf] }
 0x36e   :  { %v7307_v50 = vld [vmem:[#allocation5 + $0xf8] sm:$0xf0]  ;;  %v7281_v59 = vld [vmem:[#allocation5 + $0xc0] sm:$0xf]  ;;  %v8967_v3 = vld [vmem:[#allocation5 + $0xa4] sm:$0xf] }
 0x36f   :  { %2166 = vmatpush.bf16.msrb.mxu0 %v7154_v11  ;;  %2194 = vmatpush.bf16.msrb.mxu2 %v7130_v21  ;;  %v7114_v11 = vor.u32 %v8930_v33, %v7113_v48  ;;  %v8917_v21 = vld [vmem:[#allocation5 + $0xc] sm:$0xf0]  ;;  %v7067_v48 = vld [vmem:[#allocation5 + $0x18] sm:$0xf0]  ;;  %v7249_v6 = vld [vmem:[#allocation5 + $0x80] sm:$0xf] }
 0x370   :  { %v7070_v33 = vor.u32 %v8916_v28, %v7067_v48  ;;  %v7267_v28 = vld [vmem:[#allocation5 + $0xb0] sm:$0xf0]  ;;  %v8965_v45 = vld [vmem:[#allocation5 + $0x8c] sm:$0xf0] }
 0x371   :  { %2207 = vmatpush.bf16.msrb.mxu3 %v7134_v47  ;;  %v7058_v47 = vor.u32 %v8917_v21, %v7057_v51  ;;  %v7291_v21 = vld [vmem:[#allocation5 + $0xd8] sm:$0xf0] }
 0x372   :  { %v9390_v15 = vpop.eup %9389 }
 0x373   :  { %v9991_v19 = vmul.f32 %v9390_v15, %v1688_v13  ;;  %2167 = vmatpush.bf16.msrb.mxu0 %v7138_v7  ;;  %v8931_v13 = vld [vmem:[#allocation5 + $0x84] sm:$0xf]  ;;  %v7122_v15 = vor.u32 %v8933_v58, %v7121_v40  ;;  %2195 = vmatpush.bf16.msrb.mxu2 %v7114_v11  ;;  %v7098_v7 = vor.u32 %v8926_v49, %v7097_v0  ;;  %v7081_v40 = vld [vmem:[#allocation5 + $0x28] sm:$0xf]  ;;  %v8922_v58 = vld [vmem:[#allocation5 + $0x34] sm:$0xf0] }
 0x374   :  { %v240_v11 = vadd.f32 %v9898_v60, %v9856_v56  ;;  %v7299_v0 = vld [vmem:[#allocation5 + $0xf0] sm:$0xf0]  ;;  %v7305_v49 = vld [vmem:[#allocation5 + $0xe8] sm:$0xf] }
 0x375   :  { %v1700_v20 = vpack.c.bf16 %v9991_v19, %v9991_v19  ;;  %2208 = vmatpush.bf16.msrb.mxu3 %v7118_v41 }
 0x377   :  { %1901 = vmatmul.bf16.vlgmr.msra.gmra.mxu0 %v1700_v20  ;;  %1914 = vmatmul.bf16.vlgmr.msra.gmra.mxu1 %v1700_v20 }
 0x378   :  { %1927 = vmatmul.bf16.vlgmr.msra.gmra.mxu2 %v1700_v20  ;;  %1940 = vmatmul.bf16.vlgmr.msra.gmra.mxu3 %v1700_v20  ;;  %v7123_v20 = vld [vmem:[#allocation5 + $0x90] sm:$0xf0] }
 0x379   :  { %v7126_v4 = vor.u32 %v8931_v13, %v7123_v20  ;;  %2168 = vmatpush.bf16.msrb.mxu0 %v7122_v15  ;;  %2196 = vmatpush.bf16.msrb.mxu2 %v7098_v7  ;;  %v7078_v13 = vor.u32 %v8919_v55, %v7075_v9  ;;  %v7082_v15 = vor.u32 %v8922_v58, %v7081_v40  ;;  %v8920_v20 = vld [vmem:[#allocation5 + $0x2c] sm:$0xf]  ;;  %v8973_v55 = vld [vmem:[#allocation5 + $0xcc] sm:$0xf0]  ;;  %v7283_v58 = vld [vmem:[#allocation5 + $0xd0] sm:$0xf0] }
 0x37a   :  { %2209 = vmatpush.bf16.msrb.mxu3 %v7102_v52  ;;  %v269_v9 = vadd.f32 %v9900_v25, %v9866_v62  ;;  %v7282_v40 = vor.u32 %v8973_v55, %v7281_v59 }
 0x37b   :  { %2181 = vmatpush.bf16.msrb.mxu1 %v7126_v4  ;;  %v7086_v4 = vor.u32 %v8920_v20, %v7083_v1  ;;  %v298_v20 = vadd.f32 %v9902_v29, %v9868_v63  ;;  %v7273_v29 = vld [vmem:[#allocation5 + $0xa8] sm:$0xf] }
 0x37d   :  { %2169 = vmatpush.bf16.msrb.mxu0 %v7106_v31  ;;  %2197 = vmatpush.bf16.msrb.mxu2 %v7082_v15  ;;  %v7062_v31 = vor.u32 %v8915_v23, %v7059_v24  ;;  %v8974_v15 = vld [vmem:[#allocation5 + $0xd4] sm:$0xf0]  ;;  %v7265_v23 = vld [vmem:[#allocation5 + $0xa0] sm:$0xf] }
 0x37e   :  { %2210 = vmatpush.bf16.msrb.mxu3 %v7086_v4  ;;  %v8972_v4 = vld [vmem:[#allocation5 + $0xcc] sm:$0xf] }
 0x37f   :  { %2182 = vmatpush.bf16.msrb.mxu1 %v7110_v34  ;;  %v211_v34 = vadd.f32 %v9893_v42, %v9852_v54  ;;  %v8976_v42 = vld [vmem:[#allocation5 + $0xec] sm:$0xf]  ;;  %v7294_v25 = vor.u32 %v8972_v4, %v7291_v21 }
 0x380   :  { %v7310_v60 = vor.u32 %v8976_v42, %v7307_v50  ;;  %v7250_v50 = vor.u32 %v8965_v45, %v7249_v6  ;;  %v8955_v6 = vld [vmem:[#allocation5 + $0x44] sm:$0xf] }
 0x381   :  { %2170 = vmatpush.bf16.msrb.mxu0 %v7090_v53  ;;  %2198 = vmatpush.bf16.msrb.mxu2 %v7066_v5  ;;  %v8975_v53 = vld [vmem:[#allocation5 + $0xe4] sm:$0xf] }
 0x382   :  { %2211 = vmatpush.bf16.msrb.mxu3 %v7070_v33  ;;  %v7302_v22 = vor.u32 %v8975_v53, %v7299_v0  ;;  %v8963_v0 = vld [vmem:[#allocation5 + $0x84] sm:$0xf] }
 0x383   :  { %2183 = vmatpush.bf16.msrb.mxu1 %v7094_v2  ;;  %v8978_v2 = vld [vmem:[#allocation5 + $0xf4] sm:$0xf0] }
 0x384   :  { %v7306_v52 = vor.u32 %v8978_v2, %v7305_v49  ;;  %v7251_v49 = vld [vmem:[#allocation5 + $0x90] sm:$0xf0] }
 0x385   :  { %2171 = vmatpush.bf16.msrb.mxu0 %v7074_v61  ;;  %v8971_v61 = vld [vmem:[#allocation5 + $0xc4] sm:$0xf]  ;;  %v7254_v55 = vor.u32 %v8963_v0, %v7251_v49  ;;  %v8958_v0 = vld [vmem:[#allocation5 + $0x54] sm:$0xf0] }
 0x386   :  { %2463 = vmatpush.bf16.msra.mxu2 %v7306_v52  ;;  %2476 = vmatpush.bf16.msra.mxu3 %v7310_v60  ;;  %v7286_v1 = vor.u32 %v8971_v61, %v7283_v58  ;;  %v7259_v60 = vld [vmem:[#allocation5 + $0x98] sm:$0xf0] }
 0x387   :  { %2184 = vmatpush.bf16.msrb.mxu1 %v7078_v13  ;;  %v7289_v13 = vld [vmem:[#allocation5 + $0xc8] sm:$0xf] }
 0x388   :  { %v7290_v51 = vor.u32 %v8974_v15, %v7289_v13 }
 0x389   :  { %2172 = vmatpush.bf16.msrb.mxu0 %v7058_v47 }
 0x38a   :  { %2464 = vmatpush.bf16.msra.mxu2 %v7290_v51  ;;  %2477 = vmatpush.bf16.msra.mxu3 %v7294_v25 }
 0x38b   :  { %2185 = vmatpush.bf16.msrb.mxu1 %v7062_v31 }
 0x38d   :  { %2437 = vmatpush.bf16.msra.mxu0 %v7298_v10 }
 0x38f   :  { %2450 = vmatpush.bf16.msra.mxu1 %v7302_v22  ;;  %v8964_v22 = vld [vmem:[#allocation5 + $0x8c] sm:$0xf] }
 0x391   :  { %2438 = vmatpush.bf16.msra.mxu0 %v7282_v40  ;;  %v7262_v40 = vor.u32 %v8964_v22, %v7259_v60 }
 0x393   :  { %2451 = vmatpush.bf16.msra.mxu1 %v7286_v1 }
 0x3f4   :  { %v1902_v36 = vpop.f32.mrf.mxu0  ;;  %v1915_v39 = vpop.f32.mrf.mxu1 }
 0x3f5   :  { %v1945_v41 = vadd.f32 %v1902_v36, %v211_v34  ;;  %v1946_v44 = vadd.f32 %v1915_v39, %v240_v11  ;;  %v7266_v34 = vor.u32 %v8969_v26, %v7265_v23  ;;  %v8970_v11 = vld [vmem:[#allocation5 + $0xb4] sm:$0xf0]  ;;  %v8968_v36 = vld [vmem:[#allocation5 + $0xac] sm:$0xf]  ;;  %v7270_v39 = vor.u32 %v8967_v3, %v7267_v28  ;;  %v8961_v3 = vld [vmem:[#allocation5 + $0x6c] sm:$0xf0] }
 0x3f6   :  { %v8959_v28 = vld [vmem:[#allocation5 + $0x64] sm:$0xf] }
 0x3f7   :  { %v1949_v7 = vmul.f32 0.5, %v1945_v41  ;;  %v1950_v16 = vmul.f32 0.5, %v1946_v44  ;;  %v7274_v41 = vor.u32 %v8970_v11, %v7273_v29  ;;  %v7275_v44 = vld [vmem:[#allocation5 + $0xb8] sm:$0xf0]  ;;  %2439 = vmatpush.bf16.msra.mxu0 %v7266_v34  ;;  %2452 = vmatpush.bf16.msra.mxu1 %v7270_v39  ;;  %v8960_v11 = vld [vmem:[#allocation5 + $0x6c] sm:$0xf] }
 0x3f8   :  { %v7278_v10 = vor.u32 %v8968_v36, %v7275_v44  ;;  %v7243_v36 = vld [vmem:[#allocation5 + $0x78] sm:$0xf0]  ;;  %v8957_v44 = vld [vmem:[#allocation5 + $0x4c] sm:$0xf0] }
 0x3f9   :  { %9391 = vtanh.f32 %v1949_v7  ;;  %v7257_v7 = vld [vmem:[#allocation5 + $0x88] sm:$0xf]  ;;  %2465 = vmatpush.bf16.msra.mxu2 %v7274_v41  ;;  %v7246_v39 = vor.u32 %v8960_v11, %v7243_v36  ;;  %v7217_v41 = vld [vmem:[#allocation5 + $0x40] sm:$0xf] }
 0x3fa   :  { %9393 = vtanh.f32 %v1950_v16  ;;  %v8966_v16 = vld [vmem:[#allocation5 + $0x94] sm:$0xf0]  ;;  %2478 = vmatpush.bf16.msra.mxu3 %v7278_v10  ;;  %v7218_v45 = vor.u32 %v8957_v44, %v7217_v41  ;;  %v7225_v10 = vld [vmem:[#allocation5 + $0x48] sm:$0xf]  ;;  %v9008_v41 = vld [vmem:[#allocation7 + $0xec] sm:$0xf] }
 0x3fb   :  { %v1928_v24 = vpop.f32.mrf.mxu2  ;;  %v1941_v47 = vpop.f32.mrf.mxu3  ;;  %v7258_v61 = vor.u32 %v8966_v16, %v7257_v7  ;;  %2440 = vmatpush.bf16.msra.mxu0 %v7250_v50  ;;  %2453 = vmatpush.bf16.msra.mxu1 %v7254_v55  ;;  %v8956_v7 = vld [vmem:[#allocation5 + $0x4c] sm:$0xf]  ;;  %v7227_v16 = vld [vmem:[#allocation5 + $0x58] sm:$0xf0]  ;;  %v8951_v50 = vld [vmem:[#allocation5 + $0x24] sm:$0xf] }
 0x3fc   :  { %v1947_v31 = vadd.f32 %v1928_v24, %v269_v9  ;;  %v1948_v5 = vadd.f32 %v1941_v47, %v298_v20  ;;  %v1904_v48 = vpop.f32.mrf.mxu0  ;;  %v1917_v33 = vpop.f32.mrf.mxu1  ;;  %v7230_v22 = vor.u32 %v8956_v7, %v7227_v16  ;;  %v7209_v55 = vld [vmem:[#allocation5 + $0x28] sm:$0xf] }
 0x3fd   :  { %2466 = vmatpush.bf16.msra.mxu2 %v7258_v61  ;;  %v7241_v48 = vld [vmem:[#allocation5 + $0x68] sm:$0xf]  ;;  %v8962_v33 = vld [vmem:[#allocation5 + $0x74] sm:$0xf0] }
 0x3fe   :  { %v1951_v53 = vmul.f32 0.5, %v1947_v31  ;;  %9395 = vtanh.f32 %v1948_v5  ;;  %2479 = vmatpush.bf16.msra.mxu3 %v7262_v40  ;;  %v7235_v5 = vld [vmem:[#allocation5 + $0x70] sm:$0xf0]  ;;  %v7242_v29 = vor.u32 %v8962_v33, %v7241_v48  ;;  %v8954_v61 = vld [vmem:[#allocation5 + $0x34] sm:$0xf0] }
 0x3ff   :  { %v9392_v2 = vpop.eup %9391  ;;  %v7238_v34 = vor.u32 %v8959_v28, %v7235_v5  ;;  %v7210_v40 = vor.u32 %v8954_v61, %v7209_v55  ;;  %v7195_v28 = vld [vmem:[#allocation5 + $0x18] sm:$0xf0]  ;;  %v9009_v48 = vld [vmem:[#allocation7 + $0xec] sm:$0xf0]  ;;  %v9007_v33 = vld [vmem:[#allocation7 + $0xe4] sm:$0xf] }
 0x400   :  { %v9394_v52 = vpop.eup %9393  ;;  %v1955_v42 = vmul.f32 0.5, %v9392_v2  ;;  %9397 = vtanh.f32 %v1951_v53  ;;  %v7219_v53 = vld [vmem:[#allocation5 + $0x50] sm:$0xf0]  ;;  %v7226_v2 = vor.u32 %v8958_v0, %v7225_v10  ;;  %v7433_v36 = vld [vmem:[#allocation7 + $0xe8] sm:$0xf] }
 0x401   :  { %v1956_v59 = vmul.f32 0.5, %v9394_v52  ;;  %2454 = vmatpush.bf16.msra.mxu1 %v7238_v34  ;;  %2467 = vmatpush.bf16.msra.mxu2 %v7242_v29  ;;  %v7222_v49 = vor.u32 %v8955_v6, %v7219_v53  ;;  %v7201_v52 = vld [vmem:[#allocation5 + $0x20] sm:$0xf]  ;;  %v7427_v34 = vld [vmem:[#allocation7 + $0xf0] sm:$0xf0] }
 0x402   :  { %v1958_v9 = vadd.f32 0.5, %v1955_v42  ;;  %2480 = vmatpush.bf16.msra.mxu3 %v7246_v39  ;;  %v8953_v42 = vld [vmem:[#allocation5 + $0x2c] sm:$0xf0]  ;;  %v7430_v11 = vor.u32 %v9007_v33, %v7427_v34  ;;  %v9010_v39 = vld [vmem:[#allocation7 + $0xf4] sm:$0xf0] }
 0x403   :  { %v1959_v58 = vadd.f32 0.5, %v1956_v59  ;;  %v1930_v13 = vpop.f32.mrf.mxu2  ;;  %v1943_v15 = vpop.f32.mrf.mxu3  ;;  %v7202_v60 = vor.u32 %v8953_v42, %v7201_v52  ;;  %v7203_v59 = vld [vmem:[#allocation5 + $0x30] sm:$0xf0]  ;;  %v7434_v44 = vor.u32 %v9010_v39, %v7433_v36  ;;  %v7435_v6 = vld [vmem:[#allocation7 + $0xf8] sm:$0xf0] }
 0x404   :  { %v9396_v20 = vpop.eup %9395  ;;  %v7211_v13 = vld [vmem:[#allocation5 + $0x38] sm:$0xf0]  ;;  %v9005_v53 = vld [vmem:[#allocation7 + $0xcc] sm:$0xf0]  ;;  %v7438_v10 = vor.u32 %v9008_v41, %v7435_v6  ;;  %v7417_v7 = vld [vmem:[#allocation7 + $0xc8] sm:$0xf] }
 0x405   :  { %v1962_v1 = vmul.f32 %v1959_v58, %v9988_v12  ;;  %v1963_v51 = vmul.f32 %v9396_v20, %v1958_v9  ;;  %v7233_v12 = vld [vmem:[#allocation5 + $0x60] sm:$0xf]  ;;  %2455 = vmatpush.bf16.msra.mxu1 %v7222_v49  ;;  %2468 = vmatpush.bf16.msra.mxu2 %v7226_v2  ;;  %v7206_v9 = vor.u32 %v8951_v50, %v7203_v59  ;;  %v8952_v58 = vld [vmem:[#allocation5 + $0x2c] sm:$0xf]  ;;  %v9003_v49 = vld [vmem:[#allocation7 + $0xc4] sm:$0xf] }
 0x406   :  { %v9398_v4 = vpop.eup %9397  ;;  %v7234_v31 = vor.u32 %v8961_v3, %v7233_v12  ;;  %2481 = vmatpush.bf16.msra.mxu3 %v7230_v22  ;;  %v7214_v15 = vor.u32 %v8952_v58, %v7211_v13  ;;  %v7185_v20 = vld [vmem:[#allocation5] sm:$0xf]  ;;  %v8948_v3 = vld [vmem:[#allocation5 + $0xc] sm:$0xf]  ;;  %v7411_v2 = vld [vmem:[#allocation7 + $0xd0] sm:$0xf0] }
 0x407   :  { %v10004_v21 = vadd.f32 %v1963_v51, %v1962_v1  ;;  %v1957_v23 = vmul.f32 0.5, %v9398_v4  ;;  %v8949_v1 = vld [vmem:[#allocation5 + $0xc] sm:$0xf0]  ;;  %v8947_v51 = vld [vmem:[#allocation5 + $0x4] sm:$0xf]  ;;  %v7198_v5 = vor.u32 %v8948_v3, %v7195_v28  ;;  %v7414_v16 = vor.u32 %v9003_v49, %v7411_v2 }
 0x408   :  { %2441 = vmatpush.bf16.msra.mxu0 %v7234_v31  ;;  %v7186_v4 = vor.u32 %v8949_v1, %v7185_v20  ;;  %v7425_v31 = vld [vmem:[#allocation7 + $0xe0] sm:$0xf]  ;;  %v9006_v22 = vld [vmem:[#allocation7 + $0xd4] sm:$0xf0]  ;;  %v9004_v52 = vld [vmem:[#allocation7 + $0xcc] sm:$0xf] }
 0x409   :  { %9399 = vtanh.f32 %v10004_v21  ;;  %v1960_v24 = vadd.f32 0.5, %v1957_v23  ;;  %2456 = vmatpush.bf16.msra.mxu1 %v7206_v9  ;;  %2469 = vmatpush.bf16.msra.mxu2 %v7210_v40  ;;  %v7187_v23 = vld [vmem:[#allocation5 + $0x10] sm:$0xf0]  ;;  %v7426_v29 = vor.u32 %v9009_v48, %v7425_v31  ;;  %v7419_v42 = vld [vmem:[#allocation7 + $0xd8] sm:$0xf0]  ;;  %v7418_v50 = vor.u32 %v9006_v22, %v7417_v7 }
 0x40a   :  { %2482 = vmatpush.bf16.msra.mxu3 %v7214_v15  ;;  %v7393_v59 = vld [vmem:[#allocation7 + $0xa0] sm:$0xf]  ;;  %v9001_v55 = vld [vmem:[#allocation7 + $0xac] sm:$0xf0]  ;;  %v8999_v61 = vld [vmem:[#allocation7 + $0xa4] sm:$0xf] }
 0x40b   :  { %v7395_v9 = vld [vmem:[#allocation7 + $0xb0] sm:$0xf0]  ;;  %v7401_v40 = vld [vmem:[#allocation7 + $0xa8] sm:$0xf]  ;;  %v9002_v58 = vld [vmem:[#allocation7 + $0xb4] sm:$0xf0]  ;;  %v7394_v13 = vor.u32 %v9001_v55, %v7393_v59 }
 0x40c   :  { %2442 = vmatpush.bf16.msra.mxu0 %v7218_v45  ;;  %v7409_v45 = vld [vmem:[#allocation7 + $0xc0] sm:$0xf]  ;;  %v7398_v15 = vor.u32 %v8999_v61, %v7395_v9  ;;  %v9000_v20 = vld [vmem:[#allocation7 + $0xac] sm:$0xf]  ;;  %v7403_v1 = vld [vmem:[#allocation7 + $0xb8] sm:$0xf0] }
 0x40d   :  { %v7410_v0 = vor.u32 %v9005_v53, %v7409_v45  ;;  %v8998_v3 = vld [vmem:[#allocation7 + $0x94] sm:$0xf0]  ;;  %v8996_v28 = vld [vmem:[#allocation7 + $0x8c] sm:$0xf]  ;;  %v7387_v31 = vld [vmem:[#allocation7 + $0x98] sm:$0xf0] }
 0x40e   :  { %2483 = vmatpush.bf16.msra.mxu3 %v7198_v5  ;;  %v7390_v34 = vor.u32 %v8996_v28, %v7387_v31  ;;  %v8991_v36 = vld [vmem:[#allocation7 + $0x64] sm:$0xf]  ;;  %v7363_v6 = vld [vmem:[#allocation7 + $0x70] sm:$0xf0]  ;;  %v7369_v45 = vld [vmem:[#allocation7 + $0x68] sm:$0xf] }
 0x40f   :  { %v9400_v47 = vpop.eup %9399  ;;  %v8994_v53 = vld [vmem:[#allocation7 + $0x74] sm:$0xf0]  ;;  %v7366_v49 = vor.u32 %v8991_v36, %v7363_v6  ;;  %v8992_v7 = vld [vmem:[#allocation7 + $0x6c] sm:$0xf]  ;;  %v7345_v22 = vld [vmem:[#allocation7 + $0x40] sm:$0xf] }
 0x410   :  { %v10007_v25 = vmul.f32 %v9400_v47, %v1960_v24  ;;  %2443 = vmatpush.bf16.msra.mxu0 %v7202_v60  ;;  %v7193_v24 = vld [vmem:[#allocation5 + $0x8] sm:$0xf]  ;;  %v8950_v47 = vld [vmem:[#allocation5 + $0x14] sm:$0xf0]  ;;  %v7422_v60 = vor.u32 %v9004_v52, %v7419_v42  ;;  %v7370_v2 = vor.u32 %v8994_v53, %v7369_v45  ;;  %v8989_v42 = vld [vmem:[#allocation7 + $0x4c] sm:$0xf0] }
 0x411   :  { %v7194_v12 = vor.u32 %v8950_v47, %v7193_v24  ;;  %v8995_v24 = vld [vmem:[#allocation7 + $0x84] sm:$0xf]  ;;  %v7379_v47 = vld [vmem:[#allocation7 + $0x90] sm:$0xf0]  ;;  %v7346_v61 = vor.u32 %v8989_v42, %v7345_v22  ;;  %v7339_v31 = vld [vmem:[#allocation7 + $0x38] sm:$0xf0] }
 0x412   :  { %v1972_v26 = vpack.c.bf16 %v10007_v25, %v10007_v25  ;;  %v7382_v48 = vor.u32 %v8995_v24, %v7379_v47  ;;  %v8986_v24 = vld [vmem:[#allocation7 + $0x34] sm:$0xf0]  ;;  %v8984_v47 = vld [vmem:[#allocation7 + $0x2c] sm:$0xf]  ;;  %v8981_v36 = vld [vmem:[#allocation7 + $0xc] sm:$0xf0] }
 0x413   :  { %2470 = vmatpush.bf16.msra.mxu2 %v7194_v12  ;;  %v7385_v12 = vld [vmem:[#allocation7 + $0x88] sm:$0xf]  ;;  %v8982_v45 = vld [vmem:[#allocation7 + $0x14] sm:$0xf0] }
 0x414   :  { %2173 = vmatmul.bf16.vlgmr.msrb.gmra.mxu0 %v1972_v26  ;;  %2186 = vmatmul.bf16.vlgmr.msrb.gmra.mxu1 %v1972_v26  ;;  %v7386_v33 = vor.u32 %v8998_v3, %v7385_v12  ;;  %v7321_v6 = vld [vmem:[#allocation7 + $0x8] sm:$0xf] }
 0x415   :  { %2199 = vmatmul.bf16.vlgmr.msrb.gmra.mxu2 %v1972_v26  ;;  %2212 = vmatmul.bf16.vlgmr.msrb.gmra.mxu3 %v1972_v26  ;;  %v7190_v26 = vor.u32 %v8947_v51, %v7187_v23  ;;  %v7377_v51 = vld [vmem:[#allocation7 + $0x80] sm:$0xf]  ;;  %v8997_v23 = vld [vmem:[#allocation7 + $0x8c] sm:$0xf0] }
 0x416   :  { %2444 = vmatpush.bf16.msra.mxu0 %v7186_v4  ;;  %2813 = vmatpush.bf16.msrb.mxu3 %v7438_v10  ;;  %v7402_v4 = vor.u32 %v9002_v58, %v7401_v40  ;;  %v7378_v5 = vor.u32 %v8997_v23, %v7377_v51  ;;  %v7353_v40 = vld [vmem:[#allocation7 + $0x48] sm:$0xf]  ;;  %v8988_v58 = vld [vmem:[#allocation7 + $0x4c] sm:$0xf]  ;;  %v8983_v51 = vld [vmem:[#allocation7 + $0x24] sm:$0xf] }
 0x417   :  { %2457 = vmatpush.bf16.msra.mxu1 %v7190_v26  ;;  %2784 = vmatpush.bf16.msrb.mxu2 %v7434_v44  ;;  %v7406_v26 = vor.u32 %v9000_v20, %v7403_v1  ;;  %v8985_v1 = vld [vmem:[#allocation7 + $0x2c] sm:$0xf0]  ;;  %v7337_v23 = vld [vmem:[#allocation7 + $0x28] sm:$0xf] }
 0x41a   :  { %2726 = vmatpush.bf16.msrb.mxu0 %v7426_v29  ;;  %2814 = vmatpush.bf16.msrb.mxu3 %v7422_v60  ;;  %v7361_v29 = vld [vmem:[#allocation7 + $0x60] sm:$0xf]  ;;  %v7347_v60 = vld [vmem:[#allocation7 + $0x50] sm:$0xf0] }
 0x41b   :  { %2755 = vmatpush.bf16.msrb.mxu1 %v7430_v11  ;;  %2785 = vmatpush.bf16.msrb.mxu2 %v7418_v50  ;;  %v8993_v11 = vld [vmem:[#allocation7 + $0x6c] sm:$0xf0]  ;;  %v8987_v50 = vld [vmem:[#allocation7 + $0x44] sm:$0xf] }
 0x41c   :  { %v7362_v44 = vor.u32 %v8993_v11, %v7361_v29  ;;  %v7350_v9 = vor.u32 %v8987_v50, %v7347_v60  ;;  %v7338_v11 = vor.u32 %v8986_v24, %v7337_v23  ;;  %v7555_v24 = vld [vmem:[#allocation9 + $0xf0] sm:$0xf0] }
 0x41e   :  { %2727 = vmatpush.bf16.msrb.mxu0 %v7410_v0  ;;  %2815 = vmatpush.bf16.msrb.mxu3 %v7406_v26 }
 0x41f   :  { %2756 = vmatpush.bf16.msrb.mxu1 %v7414_v16  ;;  %2786 = vmatpush.bf16.msrb.mxu2 %v7402_v4  ;;  %v7371_v16 = vld [vmem:[#allocation7 + $0x78] sm:$0xf0]  ;;  %v7331_v4 = vld [vmem:[#allocation7 + $0x30] sm:$0xf0] }
 0x420   :  { %v7374_v52 = vor.u32 %v8992_v7, %v7371_v16  ;;  %v7334_v28 = vor.u32 %v8983_v51, %v7331_v4  ;;  %v7322_v16 = vor.u32 %v8982_v45, %v7321_v6  ;;  %v9041_v51 = vld [vmem:[#allocation9 + $0xec] sm:$0xf0]  ;;  %v9039_v4 = vld [vmem:[#allocation9 + $0xe4] sm:$0xf]  ;;  %v7521_v6 = vld [vmem:[#allocation9 + $0xa0] sm:$0xf] }
 0x421   :  { %v9033_v45 = vld [vmem:[#allocation9 + $0xac] sm:$0xf0] }
 0x422   :  { %2728 = vmatpush.bf16.msrb.mxu0 %v7394_v13  ;;  %2816 = vmatpush.bf16.msrb.mxu3 %v7390_v34  ;;  %v7355_v13 = vld [vmem:[#allocation7 + $0x58] sm:$0xf0] }
 0x423   :  { %2757 = vmatpush.bf16.msrb.mxu1 %v7398_v15  ;;  %2787 = vmatpush.bf16.msrb.mxu2 %v7386_v33  ;;  %v7329_v15 = vld [vmem:[#allocation7 + $0x20] sm:$0xf]  ;;  %v7358_v20 = vor.u32 %v8988_v58, %v7355_v13 }
 0x424   :  { %v7330_v3 = vor.u32 %v8985_v1, %v7329_v15  ;;  %v7553_v1 = vld [vmem:[#allocation9 + $0xe0] sm:$0xf] }
 0x425   :  { %v7554_v23 = vor.u32 %v9041_v51, %v7553_v1  ;;  %v7491_v1 = vld [vmem:[#allocation9 + $0x70] sm:$0xf0] }
 0x426   :  { %2729 = vmatpush.bf16.msrb.mxu0 %v7378_v5  ;;  %2817 = vmatpush.bf16.msrb.mxu3 %v7374_v52  ;;  %v7313_v5 = vld [vmem:[#allocation7] sm:$0xf] }
 0x427   :  { %2758 = vmatpush.bf16.msrb.mxu1 %v7382_v48  ;;  %2788 = vmatpush.bf16.msrb.mxu2 %v7370_v2 }
 0x42a   :  { %2730 = vmatpush.bf16.msrb.mxu0 %v7362_v44  ;;  %2818 = vmatpush.bf16.msrb.mxu3 %v7358_v20  ;;  %v7342_v44 = vor.u32 %v8984_v47, %v7339_v31  ;;  %v9040_v47 = vld [vmem:[#allocation9 + $0xec] sm:$0xf]  ;;  %v9042_v31 = vld [vmem:[#allocation9 + $0xf4] sm:$0xf0] }
 0x42b   :  { %2759 = vmatpush.bf16.msrb.mxu1 %v7366_v49 }
 0x42e   :  { %2731 = vmatpush.bf16.msrb.mxu0 %v7346_v61  ;;  %2819 = vmatpush.bf16.msrb.mxu3 %v7342_v44  ;;  %v9038_v44 = vld [vmem:[#allocation9 + $0xd4] sm:$0xf0] }
 0x42f   :  { %2760 = vmatpush.bf16.msrb.mxu1 %v7350_v9 }
 0x432   :  { %2732 = vmatpush.bf16.msrb.mxu0 %v7330_v3 }
 0x433   :  { %2761 = vmatpush.bf16.msrb.mxu1 %v7334_v28  ;;  %v7561_v28 = vld [vmem:[#allocation9 + $0xe8] sm:$0xf] }
 0x491   :  { %v2174_v39 = vpop.f32.mrf.mxu0  ;;  %v2187_v41 = vpop.f32.mrf.mxu1 }
 0x492   :  { %v2217_v10 = vadd.f32 %v2174_v39, %v9905_v35  ;;  %v2218_v0 = vadd.f32 %v2187_v41, %v9908_v43  ;;  %v8990_v35 = vld [vmem:[#allocation7 + $0x54] sm:$0xf0]  ;;  %v8979_v39 = vld [vmem:[#allocation7 + $0x4] sm:$0xf]  ;;  %v7315_v41 = vld [vmem:[#allocation7 + $0x10] sm:$0xf0] }
 0x493   :  { %v7354_v43 = vor.u32 %v8990_v35, %v7353_v40 }
 0x494   :  { %v2221_v59 = vmul.f32 0.5, %v2217_v10  ;;  %v2222_v55 = vmul.f32 0.5, %v2218_v0  ;;  %v8980_v10 = vld [vmem:[#allocation7 + $0xc] sm:$0xf]  ;;  %v7323_v0 = vld [vmem:[#allocation7 + $0x18] sm:$0xf0] }
 0x495   :  { %2789 = vmatpush.bf16.msrb.mxu2 %v7354_v43  ;;  %v7326_v52 = vor.u32 %v8980_v10, %v7323_v0  ;;  %v9031_v10 = vld [vmem:[#allocation9 + $0xa4] sm:$0xf]  ;;  %v7523_v0 = vld [vmem:[#allocation9 + $0xb0] sm:$0xf0] }
 0x496   :  { %9401 = vtanh.f32 %v2221_v59 }
 0x497   :  { %9403 = vtanh.f32 %v2222_v55  ;;  %2820 = vmatpush.bf16.msrb.mxu3 %v7326_v52  ;;  %v7529_v52 = vld [vmem:[#allocation9 + $0xa8] sm:$0xf] }
 0x498   :  { %v2200_v26 = vpop.f32.mrf.mxu2  ;;  %v2213_v12 = vpop.f32.mrf.mxu3 }
 0x499   :  { %v2219_v48 = vadd.f32 %v2200_v26, %v9911_v27  ;;  %v2220_v33 = vadd.f32 %v2213_v12, %v9916_v37  ;;  %v2176_v34 = vpop.f32.mrf.mxu0  ;;  %v2189_v29 = vpop.f32.mrf.mxu1  ;;  %v7314_v27 = vor.u32 %v8981_v36, %v7313_v5  ;;  %v7318_v37 = vor.u32 %v8979_v39, %v7315_v41  ;;  %2790 = vmatpush.bf16.msrb.mxu2 %v7338_v11  ;;  %v7563_v26 = vld [vmem:[#allocation9 + $0xf8] sm:$0xf0]  ;;  %v7537_v5 = vld [vmem:[#allocation9 + $0xc0] sm:$0xf]  ;;  %v9036_v11 = vld [vmem:[#allocation9 + $0xcc] sm:$0xf] }
 0x49a   :  { %v7558_v12 = vor.u32 %v9039_v4, %v7555_v24  ;;  %v7566_v3 = vor.u32 %v9040_v47, %v7563_v26  ;;  %v7547_v36 = vld [vmem:[#allocation9 + $0xd8] sm:$0xf0]  ;;  %v7545_v39 = vld [vmem:[#allocation9 + $0xc8] sm:$0xf] }
 0x49b   :  { %v2223_v53 = vmul.f32 0.5, %v2219_v48  ;;  %9405 = vtanh.f32 %v2220_v33  ;;  %2733 = vmatpush.bf16.msrb.mxu0 %v7314_v27  ;;  %2762 = vmatpush.bf16.msrb.mxu1 %v7318_v37  ;;  %v7562_v48 = vor.u32 %v9042_v31, %v7561_v28  ;;  %v9037_v33 = vld [vmem:[#allocation9 + $0xcc] sm:$0xf0]  ;;  %v7550_v41 = vor.u32 %v9036_v11, %v7547_v36  ;;  %v7531_v37 = vld [vmem:[#allocation9 + $0xb8] sm:$0xf0] }
 0x49c   :  { %v9402_v49 = vpop.eup %9401  ;;  %v7538_v34 = vor.u32 %v9037_v33, %v7537_v5  ;;  %v7522_v27 = vor.u32 %v9033_v45, %v7521_v6  ;;  %v7499_v24 = vld [vmem:[#allocation9 + $0x78] sm:$0xf0]  ;;  %v7497_v47 = vld [vmem:[#allocation9 + $0x68] sm:$0xf]  ;;  %v9021_v31 = vld [vmem:[#allocation9 + $0x4c] sm:$0xf0] }
 0x49d   :  { %v9404_v2 = vpop.eup %9403  ;;  %v2227_v7 = vmul.f32 0.5, %v9402_v49  ;;  %9407 = vtanh.f32 %v2223_v53  ;;  %2791 = vmatpush.bf16.msrb.mxu2 %v7322_v16  ;;  %v7546_v53 = vor.u32 %v9038_v44, %v7545_v39  ;;  %v9032_v49 = vld [vmem:[#allocation9 + $0xac] sm:$0xf]  ;;  %v2521_v16 = vpack.c.bf16 %v9979_v8, %v9963_v57  ;;  %v7507_v57 = vld [vmem:[#allocation9 + $0x90] sm:$0xf0] }
 0x49e   :  { %v2228_v22 = vmul.f32 0.5, %v9404_v2  ;;  %v7526_v2 = vor.u32 %v9031_v10, %v7523_v0  ;;  %v9028_v8 = vld [vmem:[#allocation9 + $0x8c] sm:$0xf]  ;;  %v9019_v5 = vld [vmem:[#allocation9 + $0x44] sm:$0xf]  ;;  %v245_v44 = vadd.f32 %v9918_v38, %v9856_v56 }
 0x49f   :  { %v2230_v42 = vadd.f32 0.5, %v2227_v7  ;;  %v7534_v7 = vor.u32 %v9032_v49, %v7531_v37  ;;  %v9022_v36 = vld [vmem:[#allocation9 + $0x54] sm:$0xf0]  ;;  %v7457_v0 = vld [vmem:[#allocation9 + $0x20] sm:$0xf] }
 0x4a0   :  { %v2231_v50 = vadd.f32 0.5, %v2228_v22  ;;  %v2202_v60 = vpop.f32.mrf.mxu2  ;;  %v2215_v59 = vpop.f32.mrf.mxu3  ;;  %v2522_v22 = vpack.c.bf16 %v10007_v25, %v9991_v19  ;;  %v7489_v19 = vld [vmem:[#allocation9 + $0x60] sm:$0xf]  ;;  %v9017_v49 = vld [vmem:[#allocation9 + $0x2c] sm:$0xf0] }
 0x4a1   :  { %v9406_v55 = vpop.eup %9405  ;;  %v7505_v60 = vld [vmem:[#allocation9 + $0x80] sm:$0xf]  ;;  %v9029_v59 = vld [vmem:[#allocation9 + $0x8c] sm:$0xf0]  ;;  %v7458_v37 = vor.u32 %v9017_v49, %v7457_v0  ;;  %v7465_v56 = vld [vmem:[#allocation9 + $0x28] sm:$0xf] }
 0x4a2   :  { %v2234_v61 = vmul.f32 %v2231_v50, %v10004_v21  ;;  %v2235_v9 = vmul.f32 %v9406_v55, %v2230_v42  ;;  %v2520_v21 = vpack.c.bf16 %v9951_v32, %v9935_v18  ;;  %v9035_v18 = vld [vmem:[#allocation9 + $0xc4] sm:$0xf]  ;;  %v7539_v32 = vld [vmem:[#allocation9 + $0xd0] sm:$0xf0]  ;;  %v9034_v42 = vld [vmem:[#allocation9 + $0xb4] sm:$0xf0] }
 0x4a3   :  { %v9408_v40 = vpop.eup %9407  ;;  %v7542_v29 = vor.u32 %v9035_v18, %v7539_v32  ;;  %v7530_v50 = vor.u32 %v9034_v42, %v7529_v52  ;;  %v9027_v55 = vld [vmem:[#allocation9 + $0x84] sm:$0xf]  ;;  %v9020_v18 = vld [vmem:[#allocation9 + $0x4c] sm:$0xf]  ;;  %v7483_v32 = vld [vmem:[#allocation9 + $0x58] sm:$0xf0] }
 0x4a4   :  { %v10016_v35 = vadd.f32 %v2235_v9, %v2234_v61  ;;  %v2229_v43 = vmul.f32 0.5, %v9408_v40  ;;  %v7506_v61 = vor.u32 %v9029_v59, %v7505_v60  ;;  %v7515_v9 = vld [vmem:[#allocation9 + $0x98] sm:$0xf0]  ;;  %v7510_v40 = vor.u32 %v9027_v55, %v7507_v57  ;;  %v9018_v38 = vld [vmem:[#allocation9 + $0x34] sm:$0xf0] }
 0x4a5   :  { %v7486_v11 = vor.u32 %v9020_v18, %v7483_v32  ;;  %v7466_v42 = vor.u32 %v9018_v38, %v7465_v56  ;;  %v303_v60 = vadd.f32 %v9926_v17, %v9868_v63  ;;  %v7449_v63 = vld [vmem:[#allocation9 + $0x8] sm:$0xf]  ;;  %v9014_v17 = vld [vmem:[#allocation9 + $0x14] sm:$0xf0]  ;;  %v7683_v38 = vld [vmem:[#allocation9 + $0xf0] sm:$0xf0] }
 0x4a6   :  { %9409 = vtanh.f32 %v10016_v35  ;;  %v2232_v58 = vadd.f32 0.5, %v2229_v43  ;;  %v7518_v43 = vor.u32 %v9028_v8, %v7515_v9 }
 0x4ac   :  { %v9410_v13 = vpop.eup %9409 }
 0x4ad   :  { %v10019_v15 = vmul.f32 %v9410_v13, %v2232_v58  ;;  %v7513_v58 = vld [vmem:[#allocation9 + $0x88] sm:$0xf]  ;;  %v9030_v13 = vld [vmem:[#allocation9 + $0x94] sm:$0xf0] }
 0x4ae   :  { %v7514_v25 = vor.u32 %v9030_v13, %v7513_v58  ;;  %v9011_v58 = vld [vmem:[#allocation9 + $0x4] sm:$0xf] }
 0x4af   :  { %v2244_v20 = vpack.c.bf16 %v10019_v15, %v10019_v15 }
 0x4b1   :  { %2445 = vmatmul.bf16.vlgmr.msra.gmra.mxu0 %v2244_v20  ;;  %2458 = vmatmul.bf16.vlgmr.msra.gmra.mxu1 %v2244_v20 }
 0x4b2   :  { %2471 = vmatmul.bf16.vlgmr.msra.gmra.mxu2 %v2244_v20  ;;  %2484 = vmatmul.bf16.vlgmr.msra.gmra.mxu3 %v2244_v20  ;;  %v9025_v20 = vld [vmem:[#allocation9 + $0x6c] sm:$0xf0] }
 0x4b3   :  { %3070 = vmatpush.bf16.msra.mxu0 %v7554_v23  ;;  %3083 = vmatpush.bf16.msra.mxu1 %v7558_v12  ;;  %v7490_v51 = vor.u32 %v9025_v20, %v7489_v19  ;;  %v9024_v23 = vld [vmem:[#allocation9 + $0x6c] sm:$0xf]  ;;  %v9026_v12 = vld [vmem:[#allocation9 + $0x74] sm:$0xf0]  ;;  %v7443_v19 = vld [vmem:[#allocation9 + $0x10] sm:$0xf0] }
 0x4b4   :  { %3109 = vmatpush.bf16.msra.mxu3 %v7566_v3  ;;  %3096 = vmatpush.bf16.msra.mxu2 %v7562_v48  ;;  %v7502_v26 = vor.u32 %v9024_v23, %v7499_v24  ;;  %v7473_v3 = vld [vmem:[#allocation9 + $0x40] sm:$0xf]  ;;  %v7498_v28 = vor.u32 %v9026_v12, %v7497_v47  ;;  %v7475_v48 = vld [vmem:[#allocation9 + $0x50] sm:$0xf0]  ;;  %v7451_v20 = vld [vmem:[#allocation9 + $0x18] sm:$0xf0] }
 0x4b5   :  { %v7474_v33 = vor.u32 %v9021_v31, %v7473_v3 }
 0x4b7   :  { %3071 = vmatpush.bf16.msra.mxu0 %v7538_v34  ;;  %3084 = vmatpush.bf16.msra.mxu1 %v7542_v29  ;;  %v7481_v34 = vld [vmem:[#allocation9 + $0x48] sm:$0xf]  ;;  %v7478_v29 = vor.u32 %v9019_v5, %v7475_v48 }
 0x4b8   :  { %3110 = vmatpush.bf16.msra.mxu3 %v7550_v41  ;;  %3097 = vmatpush.bf16.msra.mxu2 %v7546_v53  ;;  %v7482_v39 = vor.u32 %v9022_v36, %v7481_v34  ;;  %v216_v41 = vadd.f32 %v9913_v30, %v9852_v54 }
 0x4bb   :  { %3072 = vmatpush.bf16.msra.mxu0 %v7522_v27  ;;  %3085 = vmatpush.bf16.msra.mxu1 %v7526_v2  ;;  %v9015_v27 = vld [vmem:[#allocation9 + $0x24] sm:$0xf]  ;;  %v7459_v2 = vld [vmem:[#allocation9 + $0x30] sm:$0xf0] }
 0x4bc   :  { %3111 = vmatpush.bf16.msra.mxu3 %v7534_v7  ;;  %3098 = vmatpush.bf16.msra.mxu2 %v7530_v50  ;;  %v9016_v7 = vld [vmem:[#allocation9 + $0x2c] sm:$0xf]  ;;  %v7462_v30 = vor.u32 %v9015_v27, %v7459_v2  ;;  %v274_v50 = vadd.f32 %v9922_v14, %v9866_v62  ;;  %v7446_v62 = vor.u32 %v9011_v58, %v7443_v19  ;;  %v7667_v58 = vld [vmem:[#allocation9 + $0xd0] sm:$0xf0]  ;;  %v9070_v19 = vld [vmem:[#allocation9 + $0xd4] sm:$0xf0] }
 0x4bf   :  { %3073 = vmatpush.bf16.msra.mxu0 %v7506_v61  ;;  %3086 = vmatpush.bf16.msra.mxu1 %v7510_v40  ;;  %v7441_v40 = vld [vmem:[#allocation9] sm:$0xf] }
 0x4c0   :  { %3112 = vmatpush.bf16.msra.mxu3 %v7518_v43  ;;  %3099 = vmatpush.bf16.msra.mxu2 %v7514_v25  ;;  %v9013_v43 = vld [vmem:[#allocation9 + $0xc] sm:$0xf0]  ;;  %v9012_v25 = vld [vmem:[#allocation9 + $0xc] sm:$0xf] }
 0x4c1   :  { %2734 = vmatmul.bf16.vlgmr.msrb.gmra.mxu0 %v2520_v21  ;;  %2763 = vmatmul.bf16.vlgmr.msrb.gmra.mxu1 %v2520_v21  ;;  %v7442_v13 = vor.u32 %v9013_v43, %v7441_v40  ;;  %v7454_v14 = vor.u32 %v9012_v25, %v7451_v20  ;;  %v9067_v40 = vld [vmem:[#allocation9 + $0xc4] sm:$0xf] }
 0x4c2   :  { %2792 = vmatmul.bf16.vlgmr.msrb.gmra.mxu2 %v2520_v21  ;;  %2821 = vmatmul.bf16.vlgmr.msrb.gmra.mxu3 %v2520_v21  ;;  %v9023_v21 = vld [vmem:[#allocation9 + $0x64] sm:$0xf]  ;;  %v7670_v25 = vor.u32 %v9067_v40, %v7667_v58  ;;  %v7625_v40 = vld [vmem:[#allocation9 + $0x68] sm:$0xf] }
 0x4c3   :  { %v7494_v4 = vor.u32 %v9023_v21, %v7491_v1  ;;  %3074 = vmatpush.bf16.msra.mxu0 %v7490_v51  ;;  %v7450_v51 = vor.u32 %v9014_v17, %v7449_v63 }
 0x4c4   :  { %3113 = vmatpush.bf16.msra.mxu3 %v7502_v26  ;;  %3100 = vmatpush.bf16.msra.mxu2 %v7498_v28 }
 0x4c5   :  { %3087 = vmatpush.bf16.msra.mxu1 %v7494_v4 }
 0x4c7   :  { %3075 = vmatpush.bf16.msra.mxu0 %v7474_v33 }
 0x4c8   :  { %3114 = vmatpush.bf16.msra.mxu3 %v7486_v11  ;;  %3101 = vmatpush.bf16.msra.mxu2 %v7482_v39 }
 0x4c9   :  { %3088 = vmatpush.bf16.msra.mxu1 %v7478_v29 }
 0x4cb   :  { %3076 = vmatpush.bf16.msra.mxu0 %v7458_v37 }
 0x4cc   :  { %3102 = vmatpush.bf16.msra.mxu2 %v7466_v42  ;;  %v7689_v42 = vld [vmem:[#allocation9 + $0xe8] sm:$0xf] }
 0x4cd   :  { %3089 = vmatpush.bf16.msra.mxu1 %v7462_v30  ;;  %v9073_v30 = vld [vmem:[#allocation9 + $0xec] sm:$0xf0] }
 0x4cf   :  { %3077 = vmatpush.bf16.msra.mxu0 %v7442_v13  ;;  %v7673_v13 = vld [vmem:[#allocation9 + $0xc8] sm:$0xf] }
 0x4d0   :  { %3103 = vmatpush.bf16.msra.mxu2 %v7450_v51  ;;  %v7674_v20 = vor.u32 %v9070_v19, %v7673_v13  ;;  %v9065_v51 = vld [vmem:[#allocation9 + $0xac] sm:$0xf0] }
 0x4d1   :  { %2739 = vmatmul.bf16.gmra.mxu0 %v2521_v16  ;;  %2768 = vmatmul.bf16.gmra.mxu1 %v2521_v16 }
 0x4d2   :  { %2797 = vmatmul.bf16.gmra.mxu2 %v2521_v16  ;;  %2826 = vmatmul.bf16.gmra.mxu3 %v2521_v16  ;;  %v7467_v16 = vld [vmem:[#allocation9 + $0x38] sm:$0xf0] }
 0x4d3   :  { %v7470_v52 = vor.u32 %v9016_v7, %v7467_v16  ;;  %3090 = vmatpush.bf16.msra.mxu1 %v7446_v62  ;;  %v7675_v62 = vld [vmem:[#allocation9 + $0xd8] sm:$0xf0] }
 0x4d5   :  { %3115 = vmatpush.bf16.msra.mxu3 %v7470_v52  ;;  %v9071_v52 = vld [vmem:[#allocation9 + $0xe4] sm:$0xf] }
 0x4d9   :  { %3116 = vmatpush.bf16.msra.mxu3 %v7454_v14 }
 0x4e1   :  { %2744 = vmatmul.bf16.gmra.mxu0 %v2522_v22  ;;  %2773 = vmatmul.bf16.gmra.mxu1 %v2522_v22 }
 0x4e2   :  { %2802 = vmatmul.bf16.gmra.mxu2 %v2522_v22  ;;  %2831 = vmatmul.bf16.gmra.mxu3 %v2522_v22 }
 0x52e   :  { %v2446_v6 = vpop.f32.mrf.mxu0  ;;  %v2459_v45 = vpop.f32.mrf.mxu1 }
 0x52f   :  { %v2489_v53 = vadd.f32 %v2446_v6, %v216_v41  ;;  %v2490_v10 = vadd.f32 %v2459_v45, %v245_v44 }
 0x531   :  { %v2493_v22 = vmul.f32 0.5, %v2489_v53  ;;  %v2494_v54 = vmul.f32 0.5, %v2490_v10 }
 0x533   :  { %9411 = vtanh.f32 %v2493_v22 }
 0x534   :  { %9413 = vtanh.f32 %v2494_v54  ;;  %v7681_v54 = vld [vmem:[#allocation9 + $0xe0] sm:$0xf] }
 0x535   :  { %v2472_v59 = vpop.f32.mrf.mxu2  ;;  %v2485_v55 = vpop.f32.mrf.mxu3  ;;  %v7682_v56 = vor.u32 %v9073_v30, %v7681_v54  ;;  %v7641_v54 = vld [vmem:[#allocation9 + $0x88] sm:$0xf]  ;;  %v9062_v30 = vld [vmem:[#allocation9 + $0x94] sm:$0xf0] }
 0x536   :  { %v2491_v61 = vadd.f32 %v2472_v59, %v274_v50  ;;  %v2492_v57 = vadd.f32 %v2485_v55, %v303_v60  ;;  %v2448_v8 = vpop.f32.mrf.mxu0  ;;  %v2461_v9 = vpop.f32.mrf.mxu1  ;;  %v9074_v50 = vld [vmem:[#allocation9 + $0xf4] sm:$0xf0]  ;;  %v7686_v60 = vor.u32 %v9071_v52, %v7683_v38  ;;  %v9072_v55 = vld [vmem:[#allocation9 + $0xec] sm:$0xf] }
 0x537   :  { %v7690_v59 = vor.u32 %v9074_v50, %v7689_v42  ;;  %3342 = vmatpush.bf16.msrb.mxu0 %v7682_v56  ;;  %v7665_v8 = vld [vmem:[#allocation9 + $0xc0] sm:$0xf]  ;;  %v9069_v9 = vld [vmem:[#allocation9 + $0xcc] sm:$0xf0]  ;;  %v7642_v56 = vor.u32 %v9062_v30, %v7641_v54  ;;  %v9060_v38 = vld [vmem:[#allocation9 + $0x8c] sm:$0xf] }
 0x538   :  { %v2495_v21 = vmul.f32 0.5, %v2491_v61  ;;  %9415 = vtanh.f32 %v2492_v57  ;;  %v7691_v61 = vld [vmem:[#allocation9 + $0xf8] sm:$0xf0]  ;;  %3355 = vmatpush.bf16.msrb.mxu1 %v7686_v60  ;;  %v7666_v43 = vor.u32 %v9069_v9, %v7665_v8  ;;  %v7617_v60 = vld [vmem:[#allocation9 + $0x60] sm:$0xf] }
 0x539   :  { %v9412_v1 = vpop.eup %9411  ;;  %v7694_v57 = vor.u32 %v9072_v55, %v7691_v61  ;;  %3368 = vmatpush.bf16.msrb.mxu2 %v7690_v59  ;;  %v7643_v42 = vld [vmem:[#allocation9 + $0x98] sm:$0xf0]  ;;  %v9057_v59 = vld [vmem:[#allocation9 + $0x6c] sm:$0xf0]  ;;  %v9055_v55 = vld [vmem:[#allocation9 + $0x64] sm:$0xf] }
 0x53a   :  { %v9414_v4 = vpop.eup %9413  ;;  %v2499_v23 = vmul.f32 0.5, %v9412_v1  ;;  %9417 = vtanh.f32 %v2495_v21  ;;  %v9068_v21 = vld [vmem:[#allocation9 + $0xcc] sm:$0xf]  ;;  %v7649_v1 = vld [vmem:[#allocation9 + $0xa0] sm:$0xf]  ;;  %v7646_v50 = vor.u32 %v9060_v38, %v7643_v42  ;;  %v7618_v8 = vor.u32 %v9057_v59, %v7617_v60 }
 0x53b   :  { %v2500_v24 = vmul.f32 0.5, %v9414_v4  ;;  %3381 = vmatpush.bf16.msrb.mxu3 %v7694_v57  ;;  %3343 = vmatpush.bf16.msrb.mxu0 %v7666_v43  ;;  %v7678_v17 = vor.u32 %v9068_v21, %v7675_v62  ;;  %v9063_v4 = vld [vmem:[#allocation9 + $0xa4] sm:$0xf]  ;;  %v7619_v9 = vld [vmem:[#allocation9 + $0x70] sm:$0xf0] }
 0x53c   :  { %v2502_v47 = vadd.f32 0.5, %v2499_v23  ;;  %3356 = vmatpush.bf16.msrb.mxu1 %v7670_v25  ;;  %v7650_v23 = vor.u32 %v9065_v51, %v7649_v1  ;;  %v9058_v43 = vld [vmem:[#allocation9 + $0x74] sm:$0xf0]  ;;  %v7622_v19 = vor.u32 %v9055_v55, %v7619_v9  ;;  %v7627_v21 = vld [vmem:[#allocation9 + $0x78] sm:$0xf0] }
 0x53d   :  { %v2503_v26 = vadd.f32 0.5, %v2500_v24  ;;  %v2474_v12 = vpop.f32.mrf.mxu2  ;;  %v2487_v3 = vpop.f32.mrf.mxu3  ;;  %3369 = vmatpush.bf16.msrb.mxu2 %v7674_v20  ;;  %v7651_v24 = vld [vmem:[#allocation9 + $0xb0] sm:$0xf0]  ;;  %v7626_v25 = vor.u32 %v9058_v43, %v7625_v40  ;;  %v9056_v20 = vld [vmem:[#allocation9 + $0x6c] sm:$0xf] }
 0x53e   :  { %v9416_v28 = vpop.eup %9415  ;;  %v10045_v36 = vpop.f32.mrf.mxu1  ;;  %v7630_v62 = vor.u32 %v9056_v20, %v7627_v21  ;;  %v9053_v1 = vld [vmem:[#allocation9 + $0x4c] sm:$0xf0]  ;;  %v9051_v51 = vld [vmem:[#allocation9 + $0x44] sm:$0xf]  ;;  %v7593_v54 = vld [vmem:[#allocation9 + $0x28] sm:$0xf] }
 0x53f   :  { %v2506_v31 = vmul.f32 %v2503_v26, %v10016_v35  ;;  %v2507_v5 = vmul.f32 %v9416_v28, %v2502_v47  ;;  %v10043_v35 = vpop.f32.mrf.mxu0  ;;  %3382 = vmatpush.bf16.msrb.mxu3 %v7678_v17  ;;  %v7657_v47 = vld [vmem:[#allocation9 + $0xa8] sm:$0xf]  ;;  %v9066_v26 = vld [vmem:[#allocation9 + $0xb4] sm:$0xf0]  ;;  %v7654_v28 = vor.u32 %v9063_v4, %v7651_v24  ;;  %3344 = vmatpush.bf16.msrb.mxu0 %v7650_v23  ;;  %v7601_v17 = vld [vmem:[#allocation9 + $0x40] sm:$0xf] }
 0x540   :  { %v9418_v48 = vpop.eup %9417  ;;  %v7602_v4 = vor.u32 %v9053_v1, %v7601_v17  ;;  %v7603_v23 = vld [vmem:[#allocation9 + $0x50] sm:$0xf0]  ;;  %v7609_v24 = vld [vmem:[#allocation9 + $0x48] sm:$0xf]  ;;  %v9050_v30 = vld [vmem:[#allocation9 + $0x34] sm:$0xf0] }
 0x541   :  { %v2508_v33 = vadd.f32 %v2507_v5, %v2506_v31  ;;  %v2501_v18 = vmul.f32 0.5, %v9418_v48  ;;  %v7658_v31 = vor.u32 %v9066_v26, %v7657_v47  ;;  %v9064_v5 = vld [vmem:[#allocation9 + $0xac] sm:$0xf]  ;;  %v7659_v48 = vld [vmem:[#allocation9 + $0xb8] sm:$0xf0]  ;;  %3357 = vmatpush.bf16.msrb.mxu1 %v7654_v28  ;;  %v7606_v26 = vor.u32 %v9051_v51, %v7603_v23 }
 0x542   :  { %v9054_v47 = vld [vmem:[#allocation9 + $0x54] sm:$0xf0]  ;;  %v7594_v42 = vor.u32 %v9050_v30, %v7593_v54  ;;  %v7595_v60 = vld [vmem:[#allocation9 + $0x38] sm:$0xf0]  ;;  %v7569_v59 = vld [vmem:[#allocation9] sm:$0xf] }
 0x543   :  { %9419 = vtanh.f32 %v2508_v33  ;;  %v2504_v32 = vadd.f32 0.5, %v2501_v18  ;;  %v7662_v33 = vor.u32 %v9064_v5, %v7659_v48  ;;  %3370 = vmatpush.bf16.msrb.mxu2 %v7658_v31  ;;  %v7633_v18 = vld [vmem:[#allocation9 + $0x80] sm:$0xf]  ;;  %v7610_v28 = vor.u32 %v9054_v47, %v7609_v24  ;;  %v9052_v31 = vld [vmem:[#allocation9 + $0x4c] sm:$0xf] }
 0x544   :  { %v7611_v5 = vld [vmem:[#allocation9 + $0x58] sm:$0xf0]  ;;  %v9045_v40 = vld [vmem:[#allocation9 + $0xc] sm:$0xf0]  ;;  %v9043_v43 = vld [vmem:[#allocation9 + $0x4] sm:$0xf] }
 0x545   :  { %v10047_v39 = vpop.f32.mrf.mxu2  ;;  %v10049_v41 = vpop.f32.mrf.mxu3  ;;  %3383 = vmatpush.bf16.msrb.mxu3 %v7662_v33  ;;  %v7614_v48 = vor.u32 %v9052_v31, %v7611_v5  ;;  %v7585_v33 = vld [vmem:[#allocation9 + $0x20] sm:$0xf]  ;;  %v7577_v20 = vld [vmem:[#allocation9 + $0x8] sm:$0xf]  ;;  %v9046_v21 = vld [vmem:[#allocation9 + $0x14] sm:$0xf0] }
 0x546   :  { %v10053_v44 = vpop.f32.mrf.mxu1  ;;  %v7578_v1 = vor.u32 %v9046_v21, %v7577_v20  ;;  %v7579_v51 = vld [vmem:[#allocation9 + $0x18] sm:$0xf0] }
 0x547   :  { %3371 = vmatpush.bf16.msrb.mxu2 %v7642_v56 }
 0x549   :  { %v9420_v34 = vpop.eup %9419  ;;  %3384 = vmatpush.bf16.msrb.mxu3 %v7646_v50  ;;  %v9048_v50 = vld [vmem:[#allocation9 + $0x2c] sm:$0xf] }
 0x54a   :  { %v2510_v29 = vmul.f32 %v9420_v34, %v2504_v32  ;;  %v9061_v32 = vld [vmem:[#allocation9 + $0x8c] sm:$0xf0]  ;;  %v9059_v34 = vld [vmem:[#allocation9 + $0x84] sm:$0xf]  ;;  %v7598_v9 = vor.u32 %v9048_v50, %v7595_v60 }
 0x54b   :  { %3372 = vmatpush.bf16.msrb.mxu2 %v7626_v25  ;;  %v7570_v25 = vor.u32 %v9045_v40, %v7569_v59 }
 0x54c   :  { %v2523_v11 = vpack.c.bf16 %v2510_v29, %v10019_v15  ;;  %v10051_v15 = vpop.f32.mrf.mxu0  ;;  %v7634_v29 = vor.u32 %v9061_v32, %v7633_v18  ;;  %v9049_v18 = vld [vmem:[#allocation9 + $0x2c] sm:$0xf0]  ;;  %v9047_v32 = vld [vmem:[#allocation9 + $0x24] sm:$0xf] }
 0x54d   :  { %v10055_v6 = vpop.f32.mrf.mxu2  ;;  %v10057_v45 = vpop.f32.mrf.mxu3  ;;  %3385 = vmatpush.bf16.msrb.mxu3 %v7630_v62  ;;  %v9044_v62 = vld [vmem:[#allocation9 + $0xc] sm:$0xf] }
 0x54e   :  { %2749 = vmatmul.bf16.gmra.mxu0 %v2523_v11  ;;  %2778 = vmatmul.bf16.gmra.mxu1 %v2523_v11  ;;  %v10061_v10 = vpop.f32.mrf.mxu1  ;;  %v7582_v24 = vor.u32 %v9044_v62, %v7579_v51 }
 0x54f   :  { %2807 = vmatmul.bf16.gmra.mxu2 %v2523_v11  ;;  %2836 = vmatmul.bf16.gmra.mxu3 %v2523_v11  ;;  %v7635_v11 = vld [vmem:[#allocation9 + $0x90] sm:$0xf0] }
 0x550   :  { %v7638_v52 = vor.u32 %v9059_v34, %v7635_v11  ;;  %3345 = vmatpush.bf16.msrb.mxu0 %v7634_v29  ;;  %v2556_v34 = vld [vmem:[%s10727_s5] sm:$0xf]  ;;  %3373 = vmatpush.bf16.msrb.mxu2 %v7610_v28  ;;  %v7586_v29 = vor.u32 %v9049_v18, %v7585_v33 }
 0x551   :  { %v7587_v11 = vld [vmem:[#allocation9 + $0x30] sm:$0xf0]  ;;  %3386 = vmatpush.bf16.msrb.mxu3 %v7614_v48  ;;  %v10108_v23 = vperm.slane %v2556_v34, 1 }
 0x552   :  { %3358 = vmatpush.bf16.msrb.mxu1 %v7638_v52  ;;  %v7590_v38 = vor.u32 %v9047_v32, %v7587_v11  ;;  %v10118_v32 = vperm.slane %v2556_v34, 2 }
 0x554   :  { %v10059_v53 = vpop.f32.mrf.mxu0  ;;  %3346 = vmatpush.bf16.msrb.mxu0 %v7618_v8  ;;  %3374 = vmatpush.bf16.msrb.mxu2 %v7594_v42 }
 0x555   :  { %v10063_v0 = vpop.f32.mrf.mxu2  ;;  %v10065_v49 = vpop.f32.mrf.mxu3  ;;  %3387 = vmatpush.bf16.msrb.mxu3 %v7598_v9 }
 0x556   :  { %v10069_v37 = vpop.f32.mrf.mxu1  ;;  %3359 = vmatpush.bf16.msrb.mxu1 %v7622_v19  ;;  %v7571_v19 = vld [vmem:[#allocation9 + $0x10] sm:$0xf0] }
 0x557   :  { %v7574_v17 = vor.u32 %v9043_v43, %v7571_v19 }
 0x558   :  { %3347 = vmatpush.bf16.msrb.mxu0 %v7602_v4  ;;  %v10106_v4 = vperm.slane %v2556_v34, 0  ;;  %3375 = vmatpush.bf16.msrb.mxu2 %v7578_v1 }
 0x559   :  { %3388 = vmatpush.bf16.msrb.mxu3 %v7582_v24 }
 0x55a   :  { %3360 = vmatpush.bf16.msrb.mxu1 %v7606_v26  ;;  %v2736_v47 = vadd.f32 %v10043_v35, %v10106_v4  ;;  %v2765_v26 = vadd.f32 %v10045_v36, %v10108_v23  ;;  %v2794_v35 = vadd.f32 %v10047_v39, %v10118_v32 }
 0x55c   :  { %v10067_v27 = vpop.f32.mrf.mxu0  ;;  %3348 = vmatpush.bf16.msrb.mxu0 %v7586_v29  ;;  %v10120_v29 = vperm.slane %v2556_v34, 3 }
 0x55d   :  { %v10071_v2 = vpop.f32.mrf.mxu2  ;;  %v10073_v7 = vpop.f32.mrf.mxu3 }
 0x55e   :  { %3078 = vmatmul.bf16.vlgmr.msra.gmra.mxu0 %v9714_v46  ;;  %3091 = vmatmul.bf16.vlgmr.msra.gmra.mxu1 %v9714_v46  ;;  %v10077_v22 = vpop.f32.mrf.mxu1  ;;  %v2823_v36 = vadd.f32 %v10049_v41, %v10120_v29 }
 0x55f   :  { %3104 = vmatmul.bf16.vlgmr.msra.gmra.mxu2 %v9714_v46  ;;  %3117 = vmatmul.bf16.vlgmr.msra.gmra.mxu3 %v9714_v46 }
 0x560   :  { %3361 = vmatpush.bf16.msrb.mxu1 %v7590_v38  ;;  %3349 = vmatpush.bf16.msrb.mxu0 %v7570_v25 }
 0x564   :  { %v10075_v16 = vpop.f32.mrf.mxu0  ;;  %3362 = vmatpush.bf16.msrb.mxu1 %v7574_v17 }
 0x565   :  { %v10079_v14 = vpop.f32.mrf.mxu2  ;;  %v10081_v63 = vpop.f32.mrf.mxu3 }
 0x566   :  { %v10085_v3 = vpop.f32.mrf.mxu1 }
 0x56c   :  { %v10083_v12 = vpop.f32.mrf.mxu0 }
 0x56d   :  { %v10087_v61 = vpop.f32.mrf.mxu2  ;;  %v10089_v57 = vpop.f32.mrf.mxu3 }
 0x5cb   :  { %v10091_v58 = vpop.f32.mrf.mxu0  ;;  %v10093_v13 = vpop.f32.mrf.mxu1 }
 0x5d2   :  { %v10098_v52 = vpop.f32.mrf.mxu2  ;;  %v10100_v56 = vpop.f32.mrf.mxu3 }
 0x5d3   :  { %v10102_v55 = vpop.f32.mrf.mxu0  ;;  %v10104_v8 = vpop.f32.mrf.mxu1 }
 0x5da   :  { %v10114_v28 = vpop.f32.mrf.mxu2  ;;  %v10116_v31 = vpop.f32.mrf.mxu3 }
 0x5db   :  { %v3079_v5 = vpop.f32.mrf.mxu0  ;;  %v3092_v48 = vpop.f32.mrf.mxu1 }
 0x5dc   :  { %v3122_v33 = vadd.f32 %v3079_v5, %v2736_v47  ;;  %v3123_v18 = vadd.f32 %v3092_v48, %v2765_v26 }
 0x5de   :  { %v3126_v11 = vmul.f32 0.5, %v3122_v33  ;;  %v3127_v54 = vmul.f32 0.5, %v3123_v18  ;;  %v7809_v33 = vld [vmem:[#allocation9 + $0xe0] sm:$0xf]  ;;  %v9105_v18 = vld [vmem:[#allocation9 + $0xec] sm:$0xf0] }
 0x5e0   :  { %9421 = vtanh.f32 %v3126_v11  ;;  %v9103_v11 = vld [vmem:[#allocation9 + $0xe4] sm:$0xf] }
 0x5e1   :  { %9423 = vtanh.f32 %v3127_v54  ;;  %v7810_v54 = vor.u32 %v9105_v18, %v7809_v33  ;;  %v7785_v33 = vld [vmem:[#allocation9 + $0xa8] sm:$0xf]  ;;  %v9098_v18 = vld [vmem:[#allocation9 + $0xb4] sm:$0xf0] }
 0x5e2   :  { %v3105_v30 = vpop.f32.mrf.mxu2  ;;  %v3118_v38 = vpop.f32.mrf.mxu3 }
 0x5e3   :  { %v3124_v42 = vadd.f32 %v3105_v30, %v2794_v35  ;;  %v3125_v50 = vadd.f32 %v3118_v38, %v2823_v36  ;;  %v3081_v60 = vpop.f32.mrf.mxu0  ;;  %v3094_v59 = vpop.f32.mrf.mxu1  ;;  %v7811_v35 = vld [vmem:[#allocation9 + $0xf0] sm:$0xf0]  ;;  %v7817_v36 = vld [vmem:[#allocation9 + $0xe8] sm:$0xf]  ;;  %v9106_v30 = vld [vmem:[#allocation9 + $0xf4] sm:$0xf0]  ;;  %3614 = vmatpush.bf16.msra.mxu0 %v7810_v54  ;;  %v7786_v54 = vor.u32 %v9098_v18, %v7785_v33 }
 0x5e4   :  { %v7814_v38 = vor.u32 %v9103_v11, %v7811_v35  ;;  %v7819_v60 = vld [vmem:[#allocation9 + $0xf8] sm:$0xf0]  ;;  %v9096_v35 = vld [vmem:[#allocation9 + $0xac] sm:$0xf] }
 0x5e5   :  { %v3128_v9 = vmul.f32 0.5, %v3124_v42  ;;  %9425 = vtanh.f32 %v3125_v50  ;;  %v7818_v42 = vor.u32 %v9106_v30, %v7817_v36  ;;  %v9104_v50 = vld [vmem:[#allocation9 + $0xec] sm:$0xf]  ;;  %v7787_v36 = vld [vmem:[#allocation9 + $0xb8] sm:$0xf0] }
 0x5e6   :  { %v9422_v34 = vpop.eup %9421  ;;  %v7822_v59 = vor.u32 %v9104_v50, %v7819_v60  ;;  %3627 = vmatpush.bf16.msra.mxu1 %v7814_v38  ;;  %v7790_v30 = vor.u32 %v9096_v35, %v7787_v36  ;;  %v7761_v38 = vld [vmem:[#allocation9 + $0x80] sm:$0xf]  ;;  %v9091_v50 = vld [vmem:[#allocation9 + $0x84] sm:$0xf]  ;;  %v7755_v33 = vld [vmem:[#allocation9 + $0x78] sm:$0xf0] }
 0x5e7   :  { %v9424_v40 = vpop.eup %9423  ;;  %v3132_v43 = vmul.f32 0.5, %v9422_v34  ;;  %9427 = vtanh.f32 %v3128_v9  ;;  %3640 = vmatpush.bf16.msra.mxu2 %v7818_v42  ;;  %v7793_v9 = vld [vmem:[#allocation9 + $0xc0] sm:$0xf]  ;;  %v9101_v34 = vld [vmem:[#allocation9 + $0xcc] sm:$0xf0] }
 0x5e8   :  { %v3133_v19 = vmul.f32 0.5, %v9424_v40  ;;  %v9099_v40 = vld [vmem:[#allocation9 + $0xc4] sm:$0xf]  ;;  %3653 = vmatpush.bf16.msra.mxu3 %v7822_v59  ;;  %v9093_v42 = vld [vmem:[#allocation9 + $0x8c] sm:$0xf0] }
 0x5e9   :  { %v3135_v25 = vadd.f32 0.5, %v3132_v43  ;;  %v7794_v43 = vor.u32 %v9101_v34, %v7793_v9  ;;  %v7762_v60 = vor.u32 %v9093_v42, %v7761_v38  ;;  %v7763_v59 = vld [vmem:[#allocation9 + $0x90] sm:$0xf0]  ;;  %v7769_v9 = vld [vmem:[#allocation9 + $0x88] sm:$0xf] }
 0x5ea   :  { %v3136_v20 = vadd.f32 0.5, %v3133_v19  ;;  %v3107_v39 = vpop.f32.mrf.mxu2  ;;  %v3120_v21 = vpop.f32.mrf.mxu3  ;;  %v7795_v19 = vld [vmem:[#allocation9 + $0xd0] sm:$0xf0]  ;;  %v9094_v34 = vld [vmem:[#allocation9 + $0x94] sm:$0xf0] }
 0x5eb   :  { %v9426_v62 = vpop.eup %9425  ;;  %v7798_v39 = vor.u32 %v9099_v40, %v7795_v19  ;;  %3615 = vmatpush.bf16.msra.mxu0 %v7794_v43  ;;  %v7766_v40 = vor.u32 %v9091_v50, %v7763_v59  ;;  %v7770_v43 = vor.u32 %v9094_v34, %v7769_v9  ;;  %v9092_v19 = vld [vmem:[#allocation9 + $0x8c] sm:$0xf]  ;;  %v9083_v35 = vld [vmem:[#allocation9 + $0x44] sm:$0xf]  ;;  %v7737_v38 = vld [vmem:[#allocation9 + $0x48] sm:$0xf] }
 0x5ec   :  { %v3139_v41 = vmul.f32 0.0, %v3136_v20  ;;  %v3140_v17 = vmul.f32 %v9426_v62, %v3135_v25  ;;  %v7801_v25 = vld [vmem:[#allocation9 + $0xc8] sm:$0xf]  ;;  %v9102_v20 = vld [vmem:[#allocation9 + $0xd4] sm:$0xf0] }
 0x5ed   :  { %v9428_v1 = vpop.eup %9427  ;;  %v7802_v21 = vor.u32 %v9102_v20, %v7801_v25  ;;  %v9100_v62 = vld [vmem:[#allocation9 + $0xcc] sm:$0xf]  ;;  %3628 = vmatpush.bf16.msra.mxu1 %v7798_v39  ;;  %v7771_v25 = vld [vmem:[#allocation9 + $0x98] sm:$0xf0]  ;;  %v7745_v39 = vld [vmem:[#allocation9 + $0x60] sm:$0xf] }
 0x5ee   :  { %v10126_v51 = vadd.f32 %v3140_v17, %v3139_v41  ;;  %v3134_v24 = vmul.f32 0.5, %v9428_v1  ;;  %v7803_v41 = vld [vmem:[#allocation9 + $0xd8] sm:$0xf0]  ;;  %v7777_v1 = vld [vmem:[#allocation9 + $0xa0] sm:$0xf]  ;;  %v7774_v20 = vor.u32 %v9092_v19, %v7771_v25 }
 0x5ef   :  { %v7806_v17 = vor.u32 %v9100_v62, %v7803_v41  ;;  %3641 = vmatpush.bf16.msra.mxu2 %v7802_v21  ;;  %v9089_v21 = vld [vmem:[#allocation9 + $0x6c] sm:$0xf0]  ;;  %v9087_v62 = vld [vmem:[#allocation9 + $0x64] sm:$0xf]  ;;  %v9086_v42 = vld [vmem:[#allocation9 + $0x54] sm:$0xf0] }
 0x5f0   :  { %9429 = vtanh.f32 %v10126_v51  ;;  %v3137_v47 = vadd.f32 0.5, %v3134_v24  ;;  %v9097_v24 = vld [vmem:[#allocation9 + $0xac] sm:$0xf0]  ;;  %v7746_v41 = vor.u32 %v9089_v21, %v7745_v39  ;;  %v9084_v59 = vld [vmem:[#allocation9 + $0x4c] sm:$0xf] }
 0x5f1   :  { %3654 = vmatpush.bf16.msra.mxu3 %v7806_v17  ;;  %v7747_v17 = vld [vmem:[#allocation9 + $0x70] sm:$0xf0]  ;;  %v7739_v9 = vld [vmem:[#allocation9 + $0x58] sm:$0xf0]  ;;  %v9079_v19 = vld [vmem:[#allocation9 + $0x24] sm:$0xf] }
 0x5f2   :  { %v7742_v34 = vor.u32 %v9084_v59, %v7739_v9  ;;  %v7721_v39 = vld [vmem:[#allocation9 + $0x28] sm:$0xf]  ;;  %v9082_v21 = vld [vmem:[#allocation9 + $0x34] sm:$0xf0] }
 0x5f3   :  { %3642 = vmatpush.bf16.msra.mxu2 %v7786_v54  ;;  %v9085_v54 = vld [vmem:[#allocation9 + $0x4c] sm:$0xf0] }
 0x5f5   :  { %3655 = vmatpush.bf16.msra.mxu3 %v7790_v30  ;;  %v7731_v30 = vld [vmem:[#allocation9 + $0x50] sm:$0xf0] }
 0x5f6   :  { %v9430_v26 = vpop.eup %9429  ;;  %v7734_v50 = vor.u32 %v9083_v35, %v7731_v30  ;;  %v9076_v35 = vld [vmem:[#allocation9 + $0xc] sm:$0xf] }
 0x5f7   :  { %v10129_v5 = vmul.f32 %v9430_v26, %v3137_v47  ;;  %v9095_v47 = vld [vmem:[#allocation9 + $0xa4] sm:$0xf]  ;;  %v7778_v26 = vor.u32 %v9097_v24, %v7777_v1  ;;  %3643 = vmatpush.bf16.msra.mxu2 %v7770_v43  ;;  %v7753_v1 = vld [vmem:[#allocation9 + $0x68] sm:$0xf]  ;;  %v9090_v24 = vld [vmem:[#allocation9 + $0x74] sm:$0xf0] }
 0x5f8   :  { %v9081_v43 = vld [vmem:[#allocation9 + $0x2c] sm:$0xf0] }
 0x5f9   :  { %v3149_v48 = vpack.c.bf16 %v10129_v5, %v10129_v5  ;;  %3616 = vmatpush.bf16.msra.mxu0 %v7778_v26  ;;  %3656 = vmatpush.bf16.msra.mxu3 %v7774_v20  ;;  %v7754_v26 = vor.u32 %v9090_v24, %v7753_v1  ;;  %v7715_v20 = vld [vmem:[#allocation9 + $0x30] sm:$0xf0]  ;;  %v7723_v1 = vld [vmem:[#allocation9 + $0x38] sm:$0xf0]  ;;  %v7697_v24 = vld [vmem:[#allocation9] sm:$0xf] }
 0x5fb   :  { %3350 = vmatmul.bf16.vlgmr.msrb.gmra.mxu0 %v3149_v48  ;;  %3363 = vmatmul.bf16.vlgmr.msrb.gmra.mxu1 %v3149_v48 }
 0x5fc   :  { %3376 = vmatmul.bf16.vlgmr.msrb.gmra.mxu2 %v3149_v48  ;;  %3389 = vmatmul.bf16.vlgmr.msrb.gmra.mxu3 %v3149_v48  ;;  %v7779_v48 = vld [vmem:[#allocation9 + $0xb0] sm:$0xf0] }
 0x5fd   :  { %v7782_v11 = vor.u32 %v9095_v47, %v7779_v48  ;;  %3617 = vmatpush.bf16.msra.mxu0 %v7762_v60  ;;  %v7750_v47 = vor.u32 %v9087_v62, %v7747_v17  ;;  %v9088_v48 = vld [vmem:[#allocation9 + $0x6c] sm:$0xf]  ;;  %3644 = vmatpush.bf16.msra.mxu2 %v7754_v26  ;;  %v7738_v60 = vor.u32 %v9086_v42, %v7737_v38  ;;  %v9077_v26 = vld [vmem:[#allocation9 + $0xc] sm:$0xf0]  ;;  %v7707_v38 = vld [vmem:[#allocation9 + $0x18] sm:$0xf0] }
 0x5fe   :  { %v7758_v18 = vor.u32 %v9088_v48, %v7755_v33  ;;  %v7718_v62 = vor.u32 %v9079_v19, %v7715_v20  ;;  %v9080_v17 = vld [vmem:[#allocation9 + $0x2c] sm:$0xf]  ;;  %v9075_v48 = vld [vmem:[#allocation9 + $0x4] sm:$0xf]  ;;  %v7699_v33 = vld [vmem:[#allocation9 + $0x10] sm:$0xf0]  ;;  %v7710_v42 = vor.u32 %v9076_v35, %v7707_v38  ;;  %v2825_v20 = vadd.f32 %v10057_v45, %v10120_v29 }
 0x5ff   :  { %3629 = vmatpush.bf16.msra.mxu1 %v7782_v11  ;;  %v7729_v11 = vld [vmem:[#allocation9 + $0x40] sm:$0xf] }
 0x600   :  { %3657 = vmatpush.bf16.msra.mxu3 %v7758_v18  ;;  %v7730_v36 = vor.u32 %v9085_v54, %v7729_v11  ;;  %v7698_v18 = vor.u32 %v9077_v26, %v7697_v24  ;;  %v7705_v11 = vld [vmem:[#allocation9 + $0x8] sm:$0xf]  ;;  %v9078_v54 = vld [vmem:[#allocation9 + $0x14] sm:$0xf0] }
 0x601   :  { %3618 = vmatpush.bf16.msra.mxu0 %v7746_v41  ;;  %3645 = vmatpush.bf16.msra.mxu2 %v7738_v60  ;;  %v7722_v41 = vor.u32 %v9082_v21, %v7721_v39  ;;  %v7706_v30 = vor.u32 %v9078_v54, %v7705_v11  ;;  %v2767_v60 = vadd.f32 %v10053_v44, %v10108_v23 }
 0x603   :  { %3630 = vmatpush.bf16.msra.mxu1 %v7766_v40  ;;  %v7713_v40 = vld [vmem:[#allocation9 + $0x20] sm:$0xf] }
 0x604   :  { %v7714_v25 = vor.u32 %v9081_v43, %v7713_v40  ;;  %3658 = vmatpush.bf16.msra.mxu3 %v7742_v34 }
 0x605   :  { %3619 = vmatpush.bf16.msra.mxu0 %v7730_v36  ;;  %3646 = vmatpush.bf16.msra.mxu2 %v7722_v41  ;;  %v7702_v36 = vor.u32 %v9075_v48, %v7699_v33 }
 0x607   :  { %3631 = vmatpush.bf16.msra.mxu1 %v7750_v47  ;;  %v7726_v47 = vor.u32 %v9080_v17, %v7723_v1 }
 0x609   :  { %3620 = vmatpush.bf16.msra.mxu0 %v7714_v25  ;;  %3659 = vmatpush.bf16.msra.mxu3 %v7726_v47  ;;  %v2796_v25 = vadd.f32 %v10055_v6, %v10118_v32 }
 0x60a   :  { %3647 = vmatpush.bf16.msra.mxu2 %v7706_v30 }
 0x60b   :  { %3632 = vmatpush.bf16.msra.mxu1 %v7734_v50  ;;  %v2738_v50 = vadd.f32 %v10051_v15, %v10106_v4 }
 0x60d   :  { %3621 = vmatpush.bf16.msra.mxu0 %v7698_v18  ;;  %3660 = vmatpush.bf16.msra.mxu3 %v7710_v42 }
 0x60f   :  { %3633 = vmatpush.bf16.msra.mxu1 %v7718_v62 }
 0x613   :  { %3634 = vmatpush.bf16.msra.mxu1 %v7702_v36 }
 0x678   :  { %v3351_v59 = vpop.f32.mrf.mxu0  ;;  %v3364_v9 = vpop.f32.mrf.mxu1 }
 0x679   :  { %v3394_v34 = vadd.f32 %v3351_v59, %v2738_v50  ;;  %v3395_v40 = vadd.f32 %v3364_v9, %v2767_v60  ;;  %v7937_v59 = vld [vmem:[#allocation9 + $0xe0] sm:$0xf]  ;;  %v9135_v9 = vld [vmem:[#allocation9 + $0xe4] sm:$0xf] }
 0x67b   :  { %v3398_v43 = vmul.f32 0.5, %v3394_v34  ;;  %v3399_v19 = vmul.f32 0.5, %v3395_v40  ;;  %v7939_v40 = vld [vmem:[#allocation9 + $0xf0] sm:$0xf0] }
 0x67d   :  { %9431 = vtanh.f32 %v3398_v43  ;;  %v7945_v43 = vld [vmem:[#allocation9 + $0xe8] sm:$0xf] }
 0x67e   :  { %9433 = vtanh.f32 %v3399_v19  ;;  %v9138_v19 = vld [vmem:[#allocation9 + $0xf4] sm:$0xf0] }
 0x67f   :  { %v3377_v39 = vpop.f32.mrf.mxu2  ;;  %v3390_v15 = vpop.f32.mrf.mxu3 }
 0x680   :  { %v3396_v21 = vadd.f32 %v3377_v39, %v2796_v25  ;;  %v3397_v62 = vadd.f32 %v3390_v15, %v2825_v20  ;;  %v3353_v44 = vpop.f32.mrf.mxu0  ;;  %v3366_v41 = vpop.f32.mrf.mxu1  ;;  %v7942_v25 = vor.u32 %v9135_v9, %v7939_v40  ;;  %v7946_v20 = vor.u32 %v9138_v19, %v7945_v43  ;;  %v9136_v39 = vld [vmem:[#allocation9 + $0xec] sm:$0xf]  ;;  %v7947_v15 = vld [vmem:[#allocation9 + $0xf8] sm:$0xf0]  ;;  %v7889_v40 = vld [vmem:[#allocation9 + $0x80] sm:$0xf] }
 0x681   :  { %v9133_v44 = vld [vmem:[#allocation9 + $0xcc] sm:$0xf0]  ;;  %v9131_v41 = vld [vmem:[#allocation9 + $0xc4] sm:$0xf]  ;;  %v7915_v9 = vld [vmem:[#allocation9 + $0xb8] sm:$0xf0] }
 0x682   :  { %v3400_v17 = vmul.f32 0.5, %v3396_v21  ;;  %9435 = vtanh.f32 %v3397_v62  ;;  %v7950_v21 = vor.u32 %v9136_v39, %v7947_v15  ;;  %3899 = vmatpush.bf16.msrb.mxu1 %v7942_v25  ;;  %3912 = vmatpush.bf16.msrb.mxu2 %v7946_v20  ;;  %v7921_v62 = vld [vmem:[#allocation9 + $0xc0] sm:$0xf]  ;;  %v9125_v43 = vld [vmem:[#allocation9 + $0x8c] sm:$0xf0] }
 0x683   :  { %v9432_v1 = vpop.eup %9431  ;;  %v9123_v19 = vld [vmem:[#allocation9 + $0x84] sm:$0xf]  ;;  %v7890_v25 = vor.u32 %v9125_v43, %v7889_v40  ;;  %v7891_v20 = vld [vmem:[#allocation9 + $0x90] sm:$0xf0]  ;;  %v7897_v39 = vld [vmem:[#allocation9 + $0x88] sm:$0xf] }
 0x684   :  { %v9434_v24 = vpop.eup %9433  ;;  %v3404_v47 = vmul.f32 0.5, %v9432_v1  ;;  %9437 = vtanh.f32 %v3400_v17  ;;  %3925 = vmatpush.bf16.msrb.mxu3 %v7950_v21  ;;  %v7922_v17 = vor.u32 %v9133_v44, %v7921_v62  ;;  %v7923_v1 = vld [vmem:[#allocation9 + $0xd0] sm:$0xf0]  ;;  %v9126_v15 = vld [vmem:[#allocation9 + $0x94] sm:$0xf0]  ;;  %v7894_v21 = vor.u32 %v9123_v19, %v7891_v20 }
 0x685   :  { %v3405_v26 = vmul.f32 0.5, %v9434_v24  ;;  %v7929_v24 = vld [vmem:[#allocation9 + $0xc8] sm:$0xf]  ;;  %v7898_v62 = vor.u32 %v9126_v15, %v7897_v39  ;;  %v9124_v44 = vld [vmem:[#allocation9 + $0x8c] sm:$0xf] }
 0x686   :  { %v3407_v48 = vadd.f32 0.5, %v3404_v47  ;;  %v9134_v47 = vld [vmem:[#allocation9 + $0xd4] sm:$0xf0]  ;;  %v9116_v43 = vld [vmem:[#allocation9 + $0x4c] sm:$0xf] }
 0x687   :  { %v3408_v33 = vadd.f32 0.5, %v3405_v26  ;;  %v3379_v6 = vpop.f32.mrf.mxu2  ;;  %v3392_v18 = vpop.f32.mrf.mxu3  ;;  %v7926_v26 = vor.u32 %v9131_v41, %v7923_v1  ;;  %v7899_v41 = vld [vmem:[#allocation9 + $0x98] sm:$0xf0]  ;;  %v7873_v1 = vld [vmem:[#allocation9 + $0x60] sm:$0xf] }
 0x688   :  { %v9436_v11 = vpop.eup %9435  ;;  %v7931_v6 = vld [vmem:[#allocation9 + $0xd8] sm:$0xf0]  ;;  %v7841_v20 = vld [vmem:[#allocation9 + $0x20] sm:$0xf]  ;;  %v9113_v39 = vld [vmem:[#allocation9 + $0x2c] sm:$0xf0] }
 0x689   :  { %v3411_v45 = vmul.f32 %v3408_v33, %v10126_v51  ;;  %v3412_v54 = vmul.f32 %v9436_v11, %v3407_v48  ;;  %v9137_v51 = vld [vmem:[#allocation9 + $0xec] sm:$0xf0]  ;;  %v7930_v48 = vor.u32 %v9134_v47, %v7929_v24  ;;  %v9132_v33 = vld [vmem:[#allocation9 + $0xcc] sm:$0xf]  ;;  %3900 = vmatpush.bf16.msrb.mxu1 %v7926_v26  ;;  %v7905_v11 = vld [vmem:[#allocation9 + $0xa0] sm:$0xf] }
 0x68a   :  { %v9438_v35 = vpop.eup %9437  ;;  %v7938_v34 = vor.u32 %v9137_v51, %v7937_v59  ;;  %v7934_v18 = vor.u32 %v9132_v33, %v7931_v6  ;;  %v9128_v51 = vld [vmem:[#allocation9 + $0xac] sm:$0xf]  ;;  %v9121_v24 = vld [vmem:[#allocation9 + $0x6c] sm:$0xf0]  ;;  %v9119_v47 = vld [vmem:[#allocation9 + $0x64] sm:$0xf] }
 0x68b   :  { %v10142_v36 = vadd.f32 %v3412_v54, %v3411_v45  ;;  %v3406_v30 = vmul.f32 0.5, %v9438_v35  ;;  %3913 = vmatpush.bf16.msrb.mxu2 %v7930_v48  ;;  %v9129_v45 = vld [vmem:[#allocation9 + $0xac] sm:$0xf0]  ;;  %v9127_v54 = vld [vmem:[#allocation9 + $0xa4] sm:$0xf]  ;;  %v7874_v26 = vor.u32 %v9121_v24, %v7873_v1 }
 0x68c   :  { %3886 = vmatpush.bf16.msrb.mxu0 %v7938_v34  ;;  %3926 = vmatpush.bf16.msrb.mxu3 %v7934_v18  ;;  %v7906_v35 = vor.u32 %v9129_v45, %v7905_v11  ;;  %v7918_v34 = vor.u32 %v9128_v51, %v7915_v9  ;;  %v7875_v48 = vld [vmem:[#allocation9 + $0x70] sm:$0xf0]  ;;  %v7881_v33 = vld [vmem:[#allocation9 + $0x68] sm:$0xf]  ;;  %v9122_v6 = vld [vmem:[#allocation9 + $0x74] sm:$0xf0] }
 0x68d   :  { %9439 = vtanh.f32 %v10142_v36  ;;  %v3409_v38 = vadd.f32 0.5, %v3406_v30  ;;  %v7907_v30 = vld [vmem:[#allocation9 + $0xb0] sm:$0xf0]  ;;  %v7878_v18 = vor.u32 %v9119_v47, %v7875_v48  ;;  %v7882_v11 = vor.u32 %v9122_v6, %v7881_v33  ;;  %v9120_v45 = vld [vmem:[#allocation9 + $0x6c] sm:$0xf] }
 0x68e   :  { %v7865_v51 = vld [vmem:[#allocation9 + $0x48] sm:$0xf]  ;;  %v9118_v9 = vld [vmem:[#allocation9 + $0x54] sm:$0xf0]  ;;  %v7867_v19 = vld [vmem:[#allocation9 + $0x58] sm:$0xf0] }
 0x68f   :  { %v7866_v40 = vor.u32 %v9118_v9, %v7865_v51  ;;  %v9111_v15 = vld [vmem:[#allocation9 + $0x24] sm:$0xf]  ;;  %v9112_v24 = vld [vmem:[#allocation9 + $0x2c] sm:$0xf]  ;;  %v7851_v47 = vld [vmem:[#allocation9 + $0x38] sm:$0xf0]  ;;  %v2770_v51 = vadd.f32 %v10061_v10, %v10108_v23 }
 0x690   :  { %3887 = vmatpush.bf16.msrb.mxu0 %v7922_v17  ;;  %3927 = vmatpush.bf16.msrb.mxu3 %v7918_v34  ;;  %v7902_v17 = vor.u32 %v9124_v44, %v7899_v41  ;;  %v7849_v44 = vld [vmem:[#allocation9 + $0x28] sm:$0xf]  ;;  %v9114_v41 = vld [vmem:[#allocation9 + $0x34] sm:$0xf0]  ;;  %v7854_v48 = vor.u32 %v9112_v24, %v7851_v47  ;;  %v9109_v33 = vld [vmem:[#allocation9 + $0xc] sm:$0xf0] }
 0x691   :  { %v7850_v1 = vor.u32 %v9114_v41, %v7849_v44  ;;  %v9107_v6 = vld [vmem:[#allocation9 + $0x4] sm:$0xf] }
 0x693   :  { %v9440_v42 = vpop.eup %9439 }
 0x694   :  { %v10145_v50 = vmul.f32 %v9440_v42, %v3409_v38  ;;  %v7913_v38 = vld [vmem:[#allocation9 + $0xa8] sm:$0xf]  ;;  %v9130_v42 = vld [vmem:[#allocation9 + $0xb4] sm:$0xf0]  ;;  %3888 = vmatpush.bf16.msrb.mxu0 %v7906_v35  ;;  %3928 = vmatpush.bf16.msrb.mxu3 %v7902_v17 }
 0x695   :  { %v7914_v59 = vor.u32 %v9130_v42, %v7913_v38  ;;  %v9117_v38 = vld [vmem:[#allocation9 + $0x4c] sm:$0xf0]  ;;  %v9115_v42 = vld [vmem:[#allocation9 + $0x44] sm:$0xf] }
 0x696   :  { %v3421_v60 = vpack.c.bf16 %v10145_v50, %v10145_v50 }
 0x697   :  { %3914 = vmatpush.bf16.msrb.mxu2 %v7914_v59  ;;  %v7859_v59 = vld [vmem:[#allocation9 + $0x50] sm:$0xf0] }
 0x698   :  { %3622 = vmatmul.bf16.vlgmr.msra.gmra.mxu0 %v3421_v60  ;;  %3635 = vmatmul.bf16.vlgmr.msra.gmra.mxu1 %v3421_v60  ;;  %v7862_v34 = vor.u32 %v9115_v42, %v7859_v59  ;;  %v7835_v42 = vld [vmem:[#allocation9 + $0x18] sm:$0xf0]  ;;  %v2741_v59 = vadd.f32 %v10059_v53, %v10106_v4 }
 0x699   :  { %3648 = vmatmul.bf16.vlgmr.msra.gmra.mxu2 %v3421_v60  ;;  %3661 = vmatmul.bf16.vlgmr.msra.gmra.mxu3 %v3421_v60  ;;  %v7910_v60 = vor.u32 %v9127_v54, %v7907_v30  ;;  %v7883_v54 = vld [vmem:[#allocation9 + $0x78] sm:$0xf0]  ;;  %v7857_v30 = vld [vmem:[#allocation9 + $0x40] sm:$0xf] }
 0x69a   :  { %3889 = vmatpush.bf16.msrb.mxu0 %v7890_v25  ;;  %v7886_v35 = vor.u32 %v9120_v45, %v7883_v54  ;;  %v7870_v25 = vor.u32 %v9116_v43, %v7867_v19  ;;  %v7833_v45 = vld [vmem:[#allocation9 + $0x8] sm:$0xf]  ;;  %v9110_v54 = vld [vmem:[#allocation9 + $0x14] sm:$0xf0] }
 0x69b   :  { %3901 = vmatpush.bf16.msrb.mxu1 %v7910_v60  ;;  %3915 = vmatpush.bf16.msrb.mxu2 %v7898_v62  ;;  %v7858_v60 = vor.u32 %v9117_v38, %v7857_v30  ;;  %v7843_v62 = vld [vmem:[#allocation9 + $0x30] sm:$0xf0]  ;;  %v7834_v38 = vor.u32 %v9110_v54, %v7833_v45 }
 0x69c   :  { %3929 = vmatpush.bf16.msrb.mxu3 %v7886_v35  ;;  %v7846_v17 = vor.u32 %v9111_v15, %v7843_v62  ;;  %v9108_v35 = vld [vmem:[#allocation9 + $0xc] sm:$0xf] }
 0x69e   :  { %3890 = vmatpush.bf16.msrb.mxu0 %v7874_v26  ;;  %v7825_v26 = vld [vmem:[#allocation9] sm:$0xf] }
 0x69f   :  { %3902 = vmatpush.bf16.msrb.mxu1 %v7894_v21  ;;  %3916 = vmatpush.bf16.msrb.mxu2 %v7882_v11  ;;  %v7842_v21 = vor.u32 %v9113_v39, %v7841_v20  ;;  %v7826_v11 = vor.u32 %v9109_v33, %v7825_v26  ;;  %v2799_v20 = vadd.f32 %v10063_v0, %v10118_v32 }
 0x6a0   :  { %3930 = vmatpush.bf16.msrb.mxu3 %v7870_v25  ;;  %v2828_v39 = vadd.f32 %v10065_v49, %v10120_v29 }
 0x6a2   :  { %3891 = vmatpush.bf16.msrb.mxu0 %v7858_v60  ;;  %v7838_v60 = vor.u32 %v9108_v35, %v7835_v42 }
 0x6a3   :  { %3903 = vmatpush.bf16.msrb.mxu1 %v7878_v18  ;;  %3917 = vmatpush.bf16.msrb.mxu2 %v7866_v40  ;;  %v7827_v18 = vld [vmem:[#allocation9 + $0x10] sm:$0xf0] }
 0x6a4   :  { %v7830_v30 = vor.u32 %v9107_v6, %v7827_v18  ;;  %3931 = vmatpush.bf16.msrb.mxu3 %v7854_v48 }
 0x6a6   :  { %3892 = vmatpush.bf16.msrb.mxu0 %v7842_v21 }
 0x6a7   :  { %3904 = vmatpush.bf16.msrb.mxu1 %v7862_v34  ;;  %3918 = vmatpush.bf16.msrb.mxu2 %v7850_v1 }
 0x6a8   :  { %3932 = vmatpush.bf16.msrb.mxu3 %v7838_v60  ;;  %v8065_v60 = vld [vmem:[#allocation9 + $0xe0] sm:$0xf] }
 0x6aa   :  { %3893 = vmatpush.bf16.msrb.mxu0 %v7826_v11 }
 0x6ab   :  { %3905 = vmatpush.bf16.msrb.mxu1 %v7846_v17  ;;  %3919 = vmatpush.bf16.msrb.mxu2 %v7834_v38 }
 0x6af   :  { %3906 = vmatpush.bf16.msrb.mxu1 %v7830_v30 }
 0x715   :  { %v3623_v9 = vpop.f32.mrf.mxu0  ;;  %v3636_v34 = vpop.f32.mrf.mxu1 }
 0x716   :  { %v3666_v40 = vadd.f32 %v3623_v9, %v2741_v59  ;;  %v3667_v43 = vadd.f32 %v3636_v34, %v2770_v51  ;;  %v9167_v59 = vld [vmem:[#allocation9 + $0xe4] sm:$0xf]  ;;  %v8067_v9 = vld [vmem:[#allocation9 + $0xf0] sm:$0xf0]  ;;  %v8073_v34 = vld [vmem:[#allocation9 + $0xe8] sm:$0xf] }
 0x718   :  { %v3670_v19 = vmul.f32 0.5, %v3666_v40  ;;  %v3671_v25 = vmul.f32 0.5, %v3667_v43  ;;  %v9170_v40 = vld [vmem:[#allocation9 + $0xf4] sm:$0xf0]  ;;  %v8070_v43 = vor.u32 %v9167_v59, %v8067_v9  ;;  %v9157_v59 = vld [vmem:[#allocation9 + $0x8c] sm:$0xf0] }
 0x71a   :  { %9441 = vtanh.f32 %v3670_v19  ;;  %v8074_v19 = vor.u32 %v9170_v40, %v8073_v34  ;;  %4171 = vmatpush.bf16.msra.mxu1 %v8070_v43  ;;  %v8019_v34 = vld [vmem:[#allocation9 + $0x90] sm:$0xf0]  ;;  %v8025_v40 = vld [vmem:[#allocation9 + $0x88] sm:$0xf]  ;;  %v9158_v43 = vld [vmem:[#allocation9 + $0x94] sm:$0xf0] }
 0x71b   :  { %9443 = vtanh.f32 %v3671_v25  ;;  %v9168_v25 = vld [vmem:[#allocation9 + $0xec] sm:$0xf] }
 0x71c   :  { %v3649_v15 = vpop.f32.mrf.mxu2  ;;  %v3662_v53 = vpop.f32.mrf.mxu3  ;;  %4184 = vmatpush.bf16.msra.mxu2 %v8074_v19 }
 0x71d   :  { %v3668_v21 = vadd.f32 %v3649_v15, %v2799_v20  ;;  %v3669_v62 = vadd.f32 %v3662_v53, %v2828_v39  ;;  %v3625_v10 = vpop.f32.mrf.mxu0  ;;  %v3638_v44 = vpop.f32.mrf.mxu1  ;;  %v8075_v20 = vld [vmem:[#allocation9 + $0xf8] sm:$0xf0]  ;;  %v8049_v15 = vld [vmem:[#allocation9 + $0xc0] sm:$0xf]  ;;  %v9165_v53 = vld [vmem:[#allocation9 + $0xcc] sm:$0xf0] }
 0x71e   :  { %v8078_v39 = vor.u32 %v9168_v25, %v8075_v20  ;;  %v8051_v10 = vld [vmem:[#allocation9 + $0xd0] sm:$0xf0]  ;;  %v8057_v44 = vld [vmem:[#allocation9 + $0xc8] sm:$0xf]  ;;  %v8026_v25 = vor.u32 %v9158_v43, %v8025_v40  ;;  %v9156_v20 = vld [vmem:[#allocation9 + $0x8c] sm:$0xf] }
 0x71f   :  { %v3672_v41 = vmul.f32 0.5, %v3668_v21  ;;  %9445 = vtanh.f32 %v3669_v62  ;;  %v9163_v21 = vld [vmem:[#allocation9 + $0xc4] sm:$0xf]  ;;  %v8050_v62 = vor.u32 %v9165_v53, %v8049_v15  ;;  %v8001_v53 = vld [vmem:[#allocation9 + $0x60] sm:$0xf] }
 0x720   :  { %v9442_v17 = vpop.eup %9441  ;;  %4197 = vmatpush.bf16.msra.mxu3 %v8078_v39  ;;  %v8027_v39 = vld [vmem:[#allocation9 + $0x98] sm:$0xf0]  ;;  %v7971_v40 = vld [vmem:[#allocation9 + $0x30] sm:$0xf0]  ;;  %v7977_v43 = vld [vmem:[#allocation9 + $0x28] sm:$0xf] }
 0x721   :  { %v9444_v1 = vpop.eup %9443  ;;  %v3676_v24 = vmul.f32 0.5, %v9442_v17  ;;  %9447 = vtanh.f32 %v3672_v41  ;;  %v9166_v41 = vld [vmem:[#allocation9 + $0xd4] sm:$0xf0]  ;;  %v8054_v17 = vor.u32 %v9163_v21, %v8051_v10  ;;  %v8030_v15 = vor.u32 %v9156_v20, %v8027_v39  ;;  %v9153_v21 = vld [vmem:[#allocation9 + $0x6c] sm:$0xf0] }
 0x722   :  { %v3677_v47 = vmul.f32 0.5, %v9444_v1  ;;  %v8058_v1 = vor.u32 %v9166_v41, %v8057_v44  ;;  %v8002_v10 = vor.u32 %v9153_v21, %v8001_v53  ;;  %v8003_v44 = vld [vmem:[#allocation9 + $0x70] sm:$0xf0]  ;;  %v8009_v41 = vld [vmem:[#allocation9 + $0x68] sm:$0xf] }
 0x723   :  { %v3679_v26 = vadd.f32 0.5, %v3676_v24  ;;  %v9164_v24 = vld [vmem:[#allocation9 + $0xcc] sm:$0xf]  ;;  %4172 = vmatpush.bf16.msra.mxu1 %v8054_v17  ;;  %v9154_v17 = vld [vmem:[#allocation9 + $0x74] sm:$0xf0] }
 0x724   :  { %v3680_v48 = vadd.f32 0.5, %v3677_v47  ;;  %v3651_v0 = vpop.f32.mrf.mxu2  ;;  %v3664_v33 = vpop.f32.mrf.mxu3  ;;  %v8059_v47 = vld [vmem:[#allocation9 + $0xd8] sm:$0xf0]  ;;  %4185 = vmatpush.bf16.msra.mxu2 %v8058_v1  ;;  %v9144_v39 = vld [vmem:[#allocation9 + $0x2c] sm:$0xf] }
 0x725   :  { %v9446_v6 = vpop.eup %9445  ;;  %v9161_v0 = vld [vmem:[#allocation9 + $0xac] sm:$0xf0]  ;;  %v9159_v33 = vld [vmem:[#allocation9 + $0xa4] sm:$0xf]  ;;  %v7953_v53 = vld [vmem:[#allocation9] sm:$0xf] }
 0x726   :  { %v3683_v49 = vmul.f32 %v3680_v48, %v10142_v36  ;;  %v3684_v18 = vmul.f32 %v9446_v6, %v3679_v26  ;;  %v9169_v36 = vld [vmem:[#allocation9 + $0xec] sm:$0xf0]  ;;  %v8062_v26 = vor.u32 %v9164_v24, %v8059_v47  ;;  %v8033_v48 = vld [vmem:[#allocation9 + $0xa0] sm:$0xf]  ;;  %v8010_v24 = vor.u32 %v9154_v17, %v8009_v41  ;;  %v9152_v47 = vld [vmem:[#allocation9 + $0x6c] sm:$0xf] }
 0x727   :  { %v9448_v11 = vpop.eup %9447  ;;  %v8066_v51 = vor.u32 %v9169_v36, %v8065_v60  ;;  %v8034_v6 = vor.u32 %v9161_v0, %v8033_v48  ;;  %v8017_v36 = vld [vmem:[#allocation9 + $0x80] sm:$0xf]  ;;  %v7961_v17 = vld [vmem:[#allocation9 + $0x8] sm:$0xf] }
 0x728   :  { %v10158_v45 = vadd.f32 %v3684_v18, %v3683_v49  ;;  %v3678_v54 = vmul.f32 0.5, %v9448_v11  ;;  %4198 = vmatpush.bf16.msra.mxu3 %v8062_v26  ;;  %v8035_v49 = vld [vmem:[#allocation9 + $0xb0] sm:$0xf0]  ;;  %v8041_v18 = vld [vmem:[#allocation9 + $0xa8] sm:$0xf]  ;;  %v8018_v9 = vor.u32 %v9157_v59, %v8017_v36 }
 0x729   :  { %4158 = vmatpush.bf16.msra.mxu0 %v8066_v51  ;;  %v9162_v11 = vld [vmem:[#allocation9 + $0xb4] sm:$0xf0]  ;;  %v9155_v51 = vld [vmem:[#allocation9 + $0x84] sm:$0xf]  ;;  %v8011_v26 = vld [vmem:[#allocation9 + $0x78] sm:$0xf0] }
 0x72a   :  { %9449 = vtanh.f32 %v10158_v45  ;;  %v3681_v35 = vadd.f32 0.5, %v3678_v54  ;;  %v8038_v54 = vor.u32 %v9159_v33, %v8035_v49  ;;  %v8022_v19 = vor.u32 %v9155_v51, %v8019_v34  ;;  %v7985_v0 = vld [vmem:[#allocation9 + $0x40] sm:$0xf]  ;;  %v9149_v33 = vld [vmem:[#allocation9 + $0x4c] sm:$0xf0] }
 0x72b   :  { %v8014_v48 = vor.u32 %v9152_v47, %v8011_v26  ;;  %v7986_v49 = vor.u32 %v9149_v33, %v7985_v0  ;;  %v7969_v59 = vld [vmem:[#allocation9 + $0x20] sm:$0xf]  ;;  %v9145_v51 = vld [vmem:[#allocation9 + $0x2c] sm:$0xf0]  ;;  %v2743_v33 = vadd.f32 %v10067_v27, %v10106_v4 }
 0x72c   :  { %4173 = vmatpush.bf16.msra.mxu1 %v8038_v54  ;;  %v9150_v54 = vld [vmem:[#allocation9 + $0x54] sm:$0xf0]  ;;  %v7970_v34 = vor.u32 %v9145_v51, %v7969_v59 }
 0x72d   :  { %4159 = vmatpush.bf16.msra.mxu0 %v8050_v62  ;;  %v9151_v62 = vld [vmem:[#allocation9 + $0x64] sm:$0xf] }
 0x72e   :  { %v8006_v1 = vor.u32 %v9151_v62, %v8003_v44  ;;  %v9141_v62 = vld [vmem:[#allocation9 + $0xc] sm:$0xf0]  ;;  %v7955_v44 = vld [vmem:[#allocation9 + $0x10] sm:$0xf0] }
 0x72f   :  { %v7954_v41 = vor.u32 %v9141_v62, %v7953_v53 }
 0x730   :  { %v9450_v30 = vpop.eup %9449  ;;  %4174 = vmatpush.bf16.msra.mxu1 %v8022_v19  ;;  %v9146_v19 = vld [vmem:[#allocation9 + $0x34] sm:$0xf0] }
 0x731   :  { %v10161_v38 = vmul.f32 %v9450_v30, %v3681_v35  ;;  %v8042_v35 = vor.u32 %v9162_v11, %v8041_v18  ;;  %v9160_v30 = vld [vmem:[#allocation9 + $0xac] sm:$0xf]  ;;  %4160 = vmatpush.bf16.msra.mxu0 %v8034_v6  ;;  %v9147_v6 = vld [vmem:[#allocation9 + $0x44] sm:$0xf]  ;;  %v7987_v18 = vld [vmem:[#allocation9 + $0x50] sm:$0xf0]  ;;  %v7978_v20 = vor.u32 %v9146_v19, %v7977_v43 }
 0x732   :  { %v7993_v11 = vld [vmem:[#allocation9 + $0x48] sm:$0xf] }
 0x733   :  { %v3693_v42 = vpack.c.bf16 %v10161_v38, %v10161_v38  ;;  %4186 = vmatpush.bf16.msra.mxu2 %v8042_v35  ;;  %v7990_v35 = vor.u32 %v9147_v6, %v7987_v18  ;;  %v2772_v6 = vadd.f32 %v10069_v37, %v10108_v23 }
 0x734   :  { %4175 = vmatpush.bf16.msra.mxu1 %v8006_v1  ;;  %v9142_v1 = vld [vmem:[#allocation9 + $0x14] sm:$0xf0] }
 0x735   :  { %3894 = vmatmul.bf16.vlgmr.msrb.gmra.mxu0 %v3693_v42  ;;  %3907 = vmatmul.bf16.vlgmr.msrb.gmra.mxu1 %v3693_v42  ;;  %v7962_v26 = vor.u32 %v9142_v1, %v7961_v17 }
 0x736   :  { %3920 = vmatmul.bf16.vlgmr.msrb.gmra.mxu2 %v3693_v42  ;;  %3933 = vmatmul.bf16.vlgmr.msrb.gmra.mxu3 %v3693_v42  ;;  %v8043_v42 = vld [vmem:[#allocation9 + $0xb8] sm:$0xf0] }
 0x737   :  { %v8046_v60 = vor.u32 %v9160_v30, %v8043_v42  ;;  %4161 = vmatpush.bf16.msra.mxu0 %v8018_v9  ;;  %4187 = vmatpush.bf16.msra.mxu2 %v8026_v25  ;;  %v7994_v30 = vor.u32 %v9150_v54, %v7993_v11  ;;  %v9148_v42 = vld [vmem:[#allocation9 + $0x4c] sm:$0xf]  ;;  %v9143_v9 = vld [vmem:[#allocation9 + $0x24] sm:$0xf] }
 0x738   :  { %4176 = vmatpush.bf16.msra.mxu1 %v7990_v35  ;;  %v7974_v25 = vor.u32 %v9143_v9, %v7971_v40 }
 0x739   :  { %4199 = vmatpush.bf16.msra.mxu3 %v8046_v60  ;;  %v7995_v60 = vld [vmem:[#allocation9 + $0x58] sm:$0xf0] }
 0x73a   :  { %v7998_v36 = vor.u32 %v9148_v42, %v7995_v60  ;;  %v2801_v42 = vadd.f32 %v10071_v2, %v10118_v32  ;;  %v2830_v60 = vadd.f32 %v10073_v7, %v10120_v29 }
 0x73b   :  { %4162 = vmatpush.bf16.msra.mxu0 %v8002_v10  ;;  %4188 = vmatpush.bf16.msra.mxu2 %v8010_v24  ;;  %v9139_v10 = vld [vmem:[#allocation9 + $0x4] sm:$0xf]  ;;  %v9140_v24 = vld [vmem:[#allocation9 + $0xc] sm:$0xf] }
 0x73c   :  { %4177 = vmatpush.bf16.msra.mxu1 %v7974_v25  ;;  %v7958_v47 = vor.u32 %v9139_v10, %v7955_v44 }
 0x73d   :  { %4200 = vmatpush.bf16.msra.mxu3 %v8030_v15  ;;  %v7979_v15 = vld [vmem:[#allocation9 + $0x38] sm:$0xf0] }
 0x73e   :  { %v7982_v21 = vor.u32 %v9144_v39, %v7979_v15 }
 0x73f   :  { %4163 = vmatpush.bf16.msra.mxu0 %v7986_v49  ;;  %4189 = vmatpush.bf16.msra.mxu2 %v7994_v30 }
 0x740   :  { %4178 = vmatpush.bf16.msra.mxu1 %v7958_v47  ;;  %v8193_v47 = vld [vmem:[#allocation9 + $0xe0] sm:$0xf] }
 0x741   :  { %4201 = vmatpush.bf16.msra.mxu3 %v8014_v48  ;;  %v7963_v48 = vld [vmem:[#allocation9 + $0x18] sm:$0xf0] }
 0x742   :  { %v7966_v0 = vor.u32 %v9140_v24, %v7963_v48 }
 0x743   :  { %4164 = vmatpush.bf16.msra.mxu0 %v7970_v34  ;;  %4190 = vmatpush.bf16.msra.mxu2 %v7978_v20 }
 0x745   :  { %4202 = vmatpush.bf16.msra.mxu3 %v7998_v36 }
 0x747   :  { %4165 = vmatpush.bf16.msra.mxu0 %v7954_v41  ;;  %4191 = vmatpush.bf16.msra.mxu2 %v7962_v26  ;;  %v9199_v26 = vld [vmem:[#allocation9 + $0xe4] sm:$0xf] }
 0x749   :  { %4203 = vmatpush.bf16.msra.mxu3 %v7982_v21 }
 0x74d   :  { %4204 = vmatpush.bf16.msra.mxu3 %v7966_v0  ;;  %v8195_v0 = vld [vmem:[#allocation9 + $0xf0] sm:$0xf0] }
 0x7b2   :  { %v3895_v49 = vpop.f32.mrf.mxu0  ;;  %v3908_v18 = vpop.f32.mrf.mxu1 }
 0x7b3   :  { %v3938_v11 = vadd.f32 %v3895_v49, %v2743_v33  ;;  %v3939_v54 = vadd.f32 %v3908_v18, %v2772_v6  ;;  %v8201_v33 = vld [vmem:[#allocation9 + $0xe8] sm:$0xf]  ;;  %v9202_v6 = vld [vmem:[#allocation9 + $0xf4] sm:$0xf0]  ;;  %v8198_v49 = vor.u32 %v9199_v26, %v8195_v0  ;;  %v8147_v26 = vld [vmem:[#allocation9 + $0x90] sm:$0xf0] }
 0x7b4   :  { %v8202_v18 = vor.u32 %v9202_v6, %v8201_v33  ;;  %v9190_v0 = vld [vmem:[#allocation9 + $0x94] sm:$0xf0] }
 0x7b5   :  { %v3942_v35 = vmul.f32 0.5, %v3938_v11  ;;  %v3943_v30 = vmul.f32 0.5, %v3939_v54  ;;  %v9200_v11 = vld [vmem:[#allocation9 + $0xec] sm:$0xf]  ;;  %v8203_v54 = vld [vmem:[#allocation9 + $0xf8] sm:$0xf0]  ;;  %4443 = vmatpush.bf16.msrb.mxu1 %v8198_v49 }
 0x7b6   :  { %4456 = vmatpush.bf16.msrb.mxu2 %v8202_v18  ;;  %v9188_v49 = vld [vmem:[#allocation9 + $0x8c] sm:$0xf]  ;;  %v8155_v18 = vld [vmem:[#allocation9 + $0x98] sm:$0xf0] }
 0x7b7   :  { %9451 = vtanh.f32 %v3942_v35  ;;  %v8206_v35 = vor.u32 %v9200_v11, %v8203_v54  ;;  %v8158_v11 = vor.u32 %v9188_v49, %v8155_v18  ;;  %v8129_v54 = vld [vmem:[#allocation9 + $0x60] sm:$0xf] }
 0x7b8   :  { %9453 = vtanh.f32 %v3943_v30  ;;  %v8177_v30 = vld [vmem:[#allocation9 + $0xc0] sm:$0xf] }
 0x7b9   :  { %v3921_v36 = vpop.f32.mrf.mxu2  ;;  %v3934_v27 = vpop.f32.mrf.mxu3  ;;  %4469 = vmatpush.bf16.msrb.mxu3 %v8206_v35  ;;  %v9185_v35 = vld [vmem:[#allocation9 + $0x6c] sm:$0xf0]  ;;  %v8081_v49 = vld [vmem:[#allocation9] sm:$0xf] }
 0x7ba   :  { %v3940_v59 = vadd.f32 %v3921_v36, %v2801_v42  ;;  %v3941_v51 = vadd.f32 %v3934_v27, %v2830_v60  ;;  %v3897_v37 = vpop.f32.mrf.mxu0  ;;  %v3910_v9 = vpop.f32.mrf.mxu1  ;;  %v9197_v42 = vld [vmem:[#allocation9 + $0xcc] sm:$0xf0]  ;;  %v9195_v60 = vld [vmem:[#allocation9 + $0xc4] sm:$0xf]  ;;  %v8179_v27 = vld [vmem:[#allocation9 + $0xd0] sm:$0xf0] }
 0x7bb   :  { %v8178_v36 = vor.u32 %v9197_v42, %v8177_v30  ;;  %v8182_v37 = vor.u32 %v9195_v60, %v8179_v27  ;;  %v9183_v30 = vld [vmem:[#allocation9 + $0x64] sm:$0xf]  ;;  %v8130_v42 = vor.u32 %v9185_v35, %v8129_v54  ;;  %v8131_v60 = vld [vmem:[#allocation9 + $0x70] sm:$0xf0]  ;;  %v9186_v27 = vld [vmem:[#allocation9 + $0x74] sm:$0xf0] }
 0x7bc   :  { %v3944_v34 = vmul.f32 0.5, %v3940_v59  ;;  %9455 = vtanh.f32 %v3941_v51  ;;  %v8185_v59 = vld [vmem:[#allocation9 + $0xc8] sm:$0xf]  ;;  %v9198_v51 = vld [vmem:[#allocation9 + $0xd4] sm:$0xf0] }
 0x7bd   :  { %v9452_v40 = vpop.eup %9451  ;;  %v8186_v9 = vor.u32 %v9198_v51, %v8185_v59  ;;  %4444 = vmatpush.bf16.msrb.mxu1 %v8182_v37  ;;  %v8134_v59 = vor.u32 %v9183_v30, %v8131_v60  ;;  %v9184_v37 = vld [vmem:[#allocation9 + $0x6c] sm:$0xf]  ;;  %v9171_v54 = vld [vmem:[#allocation9 + $0x4] sm:$0xf]  ;;  %v8083_v35 = vld [vmem:[#allocation9 + $0x10] sm:$0xf0] }
 0x7be   :  { %v9454_v43 = vpop.eup %9453  ;;  %v3948_v19 = vmul.f32 0.5, %v9452_v40  ;;  %9457 = vtanh.f32 %v3944_v34  ;;  %v9196_v34 = vld [vmem:[#allocation9 + $0xcc] sm:$0xf]  ;;  %v8187_v40 = vld [vmem:[#allocation9 + $0xd8] sm:$0xf0] }
 0x7bf   :  { %v3949_v25 = vmul.f32 0.5, %v9454_v43  ;;  %v8190_v43 = vor.u32 %v9196_v34, %v8187_v40  ;;  %4457 = vmatpush.bf16.msrb.mxu2 %v8186_v9  ;;  %v8139_v9 = vld [vmem:[#allocation9 + $0x78] sm:$0xf0]  ;;  %v8113_v40 = vld [vmem:[#allocation9 + $0x40] sm:$0xf] }
 0x7c0   :  { %v3951_v20 = vadd.f32 0.5, %v3948_v19  ;;  %v8161_v19 = vld [vmem:[#allocation9 + $0xa0] sm:$0xf]  ;;  %v8142_v34 = vor.u32 %v9184_v37, %v8139_v9  ;;  %v9174_v60 = vld [vmem:[#allocation9 + $0x14] sm:$0xf0]  ;;  %v2746_v9 = vadd.f32 %v10075_v16, %v10106_v4 }
 0x7c1   :  { %v3952_v39 = vadd.f32 0.5, %v3949_v25  ;;  %v3923_v2 = vpop.f32.mrf.mxu2  ;;  %v3936_v15 = vpop.f32.mrf.mxu3  ;;  %v9193_v25 = vld [vmem:[#allocation9 + $0xac] sm:$0xf0]  ;;  %4470 = vmatpush.bf16.msrb.mxu3 %v8190_v43 }
 0x7c2   :  { %v9456_v53 = vpop.eup %9455  ;;  %v8163_v2 = vld [vmem:[#allocation9 + $0xb0] sm:$0xf0]  ;;  %v8169_v15 = vld [vmem:[#allocation9 + $0xa8] sm:$0xf]  ;;  %v9181_v43 = vld [vmem:[#allocation9 + $0x4c] sm:$0xf0] }
 0x7c3   :  { %v3955_v7 = vmul.f32 %v3952_v39, %v10158_v45  ;;  %v3956_v21 = vmul.f32 %v9456_v53, %v3951_v20  ;;  %v9201_v45 = vld [vmem:[#allocation9 + $0xec] sm:$0xf0]  ;;  %v9191_v20 = vld [vmem:[#allocation9 + $0xa4] sm:$0xf]  ;;  %v8162_v39 = vor.u32 %v9193_v25, %v8161_v19  ;;  %v9194_v53 = vld [vmem:[#allocation9 + $0xb4] sm:$0xf0]  ;;  %v8114_v25 = vor.u32 %v9181_v43, %v8113_v40 }
 0x7c4   :  { %v9458_v62 = vpop.eup %9457  ;;  %v8194_v48 = vor.u32 %v9201_v45, %v8193_v47  ;;  %v9187_v47 = vld [vmem:[#allocation9 + $0x84] sm:$0xf] }
 0x7c5   :  { %v10174_v10 = vadd.f32 %v3956_v21, %v3955_v7  ;;  %v3950_v44 = vmul.f32 0.5, %v9458_v62  ;;  %v8166_v7 = vor.u32 %v9191_v20, %v8163_v2  ;;  %v8170_v21 = vor.u32 %v9194_v53, %v8169_v15  ;;  %v9192_v62 = vld [vmem:[#allocation9 + $0xac] sm:$0xf]  ;;  %v9179_v19 = vld [vmem:[#allocation9 + $0x44] sm:$0xf] }
 0x7c6   :  { %4430 = vmatpush.bf16.msrb.mxu0 %v8194_v48  ;;  %v8153_v48 = vld [vmem:[#allocation9 + $0x88] sm:$0xf]  ;;  %v8150_v33 = vor.u32 %v9187_v47, %v8147_v26  ;;  %v8115_v20 = vld [vmem:[#allocation9 + $0x50] sm:$0xf0]  ;;  %v9182_v2 = vld [vmem:[#allocation9 + $0x54] sm:$0xf0] }
 0x7c7   :  { %9459 = vtanh.f32 %v10174_v10  ;;  %v3953_v41 = vadd.f32 0.5, %v3950_v44  ;;  %v8171_v44 = vld [vmem:[#allocation9 + $0xb8] sm:$0xf0]  ;;  %4445 = vmatpush.bf16.msrb.mxu1 %v8166_v7  ;;  %4458 = vmatpush.bf16.msrb.mxu2 %v8170_v21  ;;  %v8154_v6 = vor.u32 %v9190_v0, %v8153_v48  ;;  %v8118_v15 = vor.u32 %v9179_v19, %v8115_v20  ;;  %v9180_v7 = vld [vmem:[#allocation9 + $0x4c] sm:$0xf] }
 0x7c8   :  { %v8123_v21 = vld [vmem:[#allocation9 + $0x58] sm:$0xf0]  ;;  %v8099_v47 = vld [vmem:[#allocation9 + $0x30] sm:$0xf0]  ;;  %v9178_v26 = vld [vmem:[#allocation9 + $0x34] sm:$0xf0] }
 0x7ca   :  { %4431 = vmatpush.bf16.msrb.mxu0 %v8178_v36  ;;  %v8137_v36 = vld [vmem:[#allocation9 + $0x68] sm:$0xf] }
 0x7cb   :  { %4446 = vmatpush.bf16.msrb.mxu1 %v8150_v33  ;;  %4459 = vmatpush.bf16.msrb.mxu2 %v8154_v6  ;;  %v8138_v51 = vor.u32 %v9186_v27, %v8137_v36  ;;  %v9176_v33 = vld [vmem:[#allocation9 + $0x2c] sm:$0xf]  ;;  %v8107_v6 = vld [vmem:[#allocation9 + $0x38] sm:$0xf0]  ;;  %v8086_v27 = vor.u32 %v9171_v54, %v8083_v35 }
 0x7cc   :  { %v8110_v18 = vor.u32 %v9176_v33, %v8107_v6  ;;  %v9172_v36 = vld [vmem:[#allocation9 + $0xc] sm:$0xf] }
 0x7cd   :  { %v9460_v17 = vpop.eup %9459 }
 0x7ce   :  { %v10177_v1 = vmul.f32 %v9460_v17, %v3953_v41  ;;  %4432 = vmatpush.bf16.msrb.mxu0 %v8162_v39  ;;  %v8174_v41 = vor.u32 %v9192_v62, %v8171_v44  ;;  %v8145_v17 = vld [vmem:[#allocation9 + $0x80] sm:$0xf]  ;;  %v8121_v39 = vld [vmem:[#allocation9 + $0x48] sm:$0xf]  ;;  %v8126_v62 = vor.u32 %v9180_v7, %v8123_v21 }
 0x7cf   :  { %4447 = vmatpush.bf16.msrb.mxu1 %v8134_v59  ;;  %4460 = vmatpush.bf16.msrb.mxu2 %v8138_v51  ;;  %v8122_v53 = vor.u32 %v9182_v2, %v8121_v39  ;;  %v8097_v44 = vld [vmem:[#allocation9 + $0x20] sm:$0xf]  ;;  %v8091_v51 = vld [vmem:[#allocation9 + $0x18] sm:$0xf0]  ;;  %v2804_v2 = vadd.f32 %v10079_v14, %v10118_v32 }
 0x7d0   :  { %v3965_v24 = vpack.c.bf16 %v10177_v1, %v10177_v1  ;;  %4471 = vmatpush.bf16.msrb.mxu3 %v8174_v41  ;;  %v9177_v41 = vld [vmem:[#allocation9 + $0x2c] sm:$0xf0]  ;;  %v8094_v37 = vor.u32 %v9172_v36, %v8091_v51  ;;  %v9234_v51 = vld [vmem:[#allocation9 + $0xf4] sm:$0xf0] }
 0x7d2   :  { %4166 = vmatmul.bf16.vlgmr.msra.gmra.mxu0 %v3965_v24  ;;  %4179 = vmatmul.bf16.vlgmr.msra.gmra.mxu1 %v3965_v24 }
 0x7d3   :  { %4192 = vmatmul.bf16.vlgmr.msra.gmra.mxu2 %v3965_v24  ;;  %4205 = vmatmul.bf16.vlgmr.msra.gmra.mxu3 %v3965_v24  ;;  %v9189_v24 = vld [vmem:[#allocation9 + $0x8c] sm:$0xf0] }
 0x7d4   :  { %v8146_v45 = vor.u32 %v9189_v24, %v8145_v17  ;;  %4472 = vmatpush.bf16.msrb.mxu3 %v8158_v11  ;;  %v9175_v17 = vld [vmem:[#allocation9 + $0x24] sm:$0xf]  ;;  %4448 = vmatpush.bf16.msrb.mxu1 %v8118_v15  ;;  %v8098_v24 = vor.u32 %v9177_v41, %v8097_v44  ;;  %v9173_v11 = vld [vmem:[#allocation9 + $0xc] sm:$0xf0]  ;;  %v2833_v15 = vadd.f32 %v10081_v63, %v10120_v29 }
 0x7d5   :  { %4461 = vmatpush.bf16.msrb.mxu2 %v8122_v53  ;;  %v8102_v48 = vor.u32 %v9175_v17, %v8099_v47  ;;  %v8082_v30 = vor.u32 %v9173_v11, %v8081_v49 }
 0x7d6   :  { %4433 = vmatpush.bf16.msrb.mxu0 %v8146_v45  ;;  %v8105_v45 = vld [vmem:[#allocation9 + $0x28] sm:$0xf] }
 0x7d7   :  { %v8106_v0 = vor.u32 %v9178_v26, %v8105_v45 }
 0x7d8   :  { %4473 = vmatpush.bf16.msrb.mxu3 %v8142_v34  ;;  %4449 = vmatpush.bf16.msrb.mxu1 %v8102_v48  ;;  %v2775_v34 = vadd.f32 %v10077_v22, %v10108_v23 }
 0x7d9   :  { %4462 = vmatpush.bf16.msrb.mxu2 %v8106_v0 }
 0x7da   :  { %4434 = vmatpush.bf16.msrb.mxu0 %v8130_v42  ;;  %v8089_v42 = vld [vmem:[#allocation9 + $0x8] sm:$0xf] }
 0x7db   :  { %v8090_v59 = vor.u32 %v9174_v60, %v8089_v42  ;;  %v8321_v42 = vld [vmem:[#allocation9 + $0xe0] sm:$0xf]  ;;  %v9231_v60 = vld [vmem:[#allocation9 + $0xe4] sm:$0xf] }
 0x7dc   :  { %4474 = vmatpush.bf16.msrb.mxu3 %v8126_v62  ;;  %4450 = vmatpush.bf16.msrb.mxu1 %v8086_v27  ;;  %v8323_v27 = vld [vmem:[#allocation9 + $0xf0] sm:$0xf0] }
 0x7dd   :  { %4463 = vmatpush.bf16.msrb.mxu2 %v8090_v59  ;;  %v8329_v59 = vld [vmem:[#allocation9 + $0xe8] sm:$0xf] }
 0x7de   :  { %4435 = vmatpush.bf16.msrb.mxu0 %v8114_v25 }
 0x7e0   :  { %4475 = vmatpush.bf16.msrb.mxu3 %v8110_v18 }
 0x7e2   :  { %4436 = vmatpush.bf16.msrb.mxu0 %v8098_v24 }
 0x7e4   :  { %4476 = vmatpush.bf16.msrb.mxu3 %v8094_v37  ;;  %v8326_v37 = vor.u32 %v9231_v60, %v8323_v27  ;;  %v9220_v27 = vld [vmem:[#allocation9 + $0x8c] sm:$0xf] }
 0x7e6   :  { %4437 = vmatpush.bf16.msrb.mxu0 %v8082_v30  ;;  %4715 = vmatpush.bf16.msra.mxu1 %v8326_v37  ;;  %v8257_v37 = vld [vmem:[#allocation9 + $0x60] sm:$0xf] }
 0x84f   :  { %v4167_v40 = vpop.f32.mrf.mxu0  ;;  %v4180_v43 = vpop.f32.mrf.mxu1 }
 0x850   :  { %v4210_v19 = vadd.f32 %v4167_v40, %v2746_v9  ;;  %v4211_v25 = vadd.f32 %v4180_v43, %v2775_v34  ;;  %v8330_v9 = vor.u32 %v9234_v51, %v8329_v59  ;;  %v9232_v34 = vld [vmem:[#allocation9 + $0xec] sm:$0xf]  ;;  %v8331_v40 = vld [vmem:[#allocation9 + $0xf8] sm:$0xf0] }
 0x851   :  { %v8334_v43 = vor.u32 %v9232_v34, %v8331_v40  ;;  %v8283_v59 = vld [vmem:[#allocation9 + $0x98] sm:$0xf0]  ;;  %v9215_v34 = vld [vmem:[#allocation9 + $0x64] sm:$0xf] }
 0x852   :  { %v4214_v20 = vmul.f32 0.5, %v4210_v19  ;;  %v4215_v39 = vmul.f32 0.5, %v4211_v25  ;;  %4728 = vmatpush.bf16.msra.mxu2 %v8330_v9  ;;  %v8305_v19 = vld [vmem:[#allocation9 + $0xc0] sm:$0xf]  ;;  %v9229_v25 = vld [vmem:[#allocation9 + $0xcc] sm:$0xf0]  ;;  %v8286_v51 = vor.u32 %v9220_v27, %v8283_v59 }
 0x853   :  { %4741 = vmatpush.bf16.msra.mxu3 %v8334_v43  ;;  %v9217_v9 = vld [vmem:[#allocation9 + $0x6c] sm:$0xf0]  ;;  %v8259_v43 = vld [vmem:[#allocation9 + $0x70] sm:$0xf0]  ;;  %v9203_v27 = vld [vmem:[#allocation9 + $0x4] sm:$0xf] }
 0x854   :  { %9461 = vtanh.f32 %v4214_v20  ;;  %v9227_v20 = vld [vmem:[#allocation9 + $0xc4] sm:$0xf]  ;;  %v8258_v40 = vor.u32 %v9217_v9, %v8257_v37  ;;  %v8211_v59 = vld [vmem:[#allocation9 + $0x10] sm:$0xf0]  ;;  %v8217_v37 = vld [vmem:[#allocation9 + $0x8] sm:$0xf] }
 0x855   :  { %9463 = vtanh.f32 %v4215_v39  ;;  %v8306_v39 = vor.u32 %v9229_v25, %v8305_v19  ;;  %v8265_v19 = vld [vmem:[#allocation9 + $0x68] sm:$0xf]  ;;  %v9218_v25 = vld [vmem:[#allocation9 + $0x74] sm:$0xf0] }
 0x856   :  { %v4193_v53 = vpop.f32.mrf.mxu2  ;;  %v4206_v16 = vpop.f32.mrf.mxu3  ;;  %v9206_v9 = vld [vmem:[#allocation9 + $0x14] sm:$0xf0] }
 0x857   :  { %v4212_v7 = vadd.f32 %v4193_v53, %v2804_v2  ;;  %v4213_v21 = vadd.f32 %v4206_v16, %v2833_v15  ;;  %v4169_v22 = vpop.f32.mrf.mxu0  ;;  %v4182_v62 = vpop.f32.mrf.mxu1  ;;  %v8307_v2 = vld [vmem:[#allocation9 + $0xd0] sm:$0xf0]  ;;  %v8313_v15 = vld [vmem:[#allocation9 + $0xc8] sm:$0xf]  ;;  %v9230_v53 = vld [vmem:[#allocation9 + $0xd4] sm:$0xf0] }
 0x858   :  { %v8310_v16 = vor.u32 %v9227_v20, %v8307_v2  ;;  %v8315_v22 = vld [vmem:[#allocation9 + $0xd8] sm:$0xf0]  ;;  %v8262_v20 = vor.u32 %v9215_v34, %v8259_v43  ;;  %v9216_v2 = vld [vmem:[#allocation9 + $0x6c] sm:$0xf]  ;;  %v8218_v43 = vor.u32 %v9206_v9, %v8217_v37  ;;  %v9257_v37 = vld [vmem:[#allocation9 + $0xac] sm:$0xf0] }
 0x859   :  { %v4216_v44 = vmul.f32 0.5, %v4212_v7  ;;  %9465 = vtanh.f32 %v4213_v21  ;;  %v8314_v7 = vor.u32 %v9230_v53, %v8313_v15  ;;  %v9228_v21 = vld [vmem:[#allocation9 + $0xcc] sm:$0xf]  ;;  %v8267_v15 = vld [vmem:[#allocation9 + $0x78] sm:$0xf0] }
 0x85a   :  { %v9462_v41 = vpop.eup %9461  ;;  %v8318_v62 = vor.u32 %v9228_v21, %v8315_v22  ;;  %4716 = vmatpush.bf16.msra.mxu1 %v8310_v16  ;;  %v8270_v53 = vor.u32 %v9216_v2, %v8267_v15  ;;  %v8241_v16 = vld [vmem:[#allocation9 + $0x40] sm:$0xf]  ;;  %v9211_v21 = vld [vmem:[#allocation9 + $0x44] sm:$0xf]  ;;  %v9204_v34 = vld [vmem:[#allocation9 + $0xc] sm:$0xf] }
 0x85b   :  { %v9464_v17 = vpop.eup %9463  ;;  %v4220_v24 = vmul.f32 0.5, %v9462_v41  ;;  %9467 = vtanh.f32 %v4216_v44  ;;  %4729 = vmatpush.bf16.msra.mxu2 %v8314_v7  ;;  %v8289_v44 = vld [vmem:[#allocation9 + $0xa0] sm:$0xf]  ;;  %v9225_v41 = vld [vmem:[#allocation9 + $0xac] sm:$0xf0] }
 0x85c   :  { %v4221_v47 = vmul.f32 0.5, %v9464_v17  ;;  %v9223_v17 = vld [vmem:[#allocation9 + $0xa4] sm:$0xf]  ;;  %4742 = vmatpush.bf16.msra.mxu3 %v8318_v62  ;;  %v9213_v7 = vld [vmem:[#allocation9 + $0x4c] sm:$0xf0] }
 0x85d   :  { %v4223_v45 = vadd.f32 0.5, %v4220_v24  ;;  %v8290_v24 = vor.u32 %v9225_v41, %v8289_v44  ;;  %v8242_v22 = vor.u32 %v9213_v7, %v8241_v16  ;;  %v8243_v62 = vld [vmem:[#allocation9 + $0x50] sm:$0xf0]  ;;  %v8249_v44 = vld [vmem:[#allocation9 + $0x48] sm:$0xf] }
 0x85e   :  { %v4224_v26 = vadd.f32 0.5, %v4221_v47  ;;  %v4195_v14 = vpop.f32.mrf.mxu2  ;;  %v4208_v48 = vpop.f32.mrf.mxu3  ;;  %v8291_v47 = vld [vmem:[#allocation9 + $0xb0] sm:$0xf0]  ;;  %v9214_v41 = vld [vmem:[#allocation9 + $0x54] sm:$0xf0] }
 0x85f   :  { %v9466_v0 = vpop.eup %9465  ;;  %v8294_v14 = vor.u32 %v9223_v17, %v8291_v47  ;;  %v8246_v17 = vor.u32 %v9211_v21, %v8243_v62  ;;  %v9212_v47 = vld [vmem:[#allocation9 + $0x4c] sm:$0xf]  ;;  %v8449_v7 = vld [vmem:[#allocation9 + $0xe0] sm:$0xf]  ;;  %v9265_v21 = vld [vmem:[#allocation9 + $0xec] sm:$0xf0] }
 0x860   :  { %v4227_v63 = vmul.f32 %v4224_v26, %v10174_v10  ;;  %v4228_v33 = vmul.f32 %v9466_v0, %v4223_v45  ;;  %v9233_v10 = vld [vmem:[#allocation9 + $0xec] sm:$0xf0]  ;;  %v8297_v45 = vld [vmem:[#allocation9 + $0xa8] sm:$0xf]  ;;  %v9226_v26 = vld [vmem:[#allocation9 + $0xb4] sm:$0xf0]  ;;  %v8450_v62 = vor.u32 %v9265_v21, %v8449_v7 }
 0x861   :  { %v9468_v6 = vpop.eup %9467  ;;  %v8322_v36 = vor.u32 %v9233_v10, %v8321_v42  ;;  %v8298_v48 = vor.u32 %v9226_v26, %v8297_v45  ;;  %v9224_v0 = vld [vmem:[#allocation9 + $0xac] sm:$0xf]  ;;  %4717 = vmatpush.bf16.msra.mxu1 %v8294_v14  ;;  %v8281_v42 = vld [vmem:[#allocation9 + $0x88] sm:$0xf]  ;;  %v9222_v10 = vld [vmem:[#allocation9 + $0x94] sm:$0xf0] }
 0x862   :  { %v10190_v49 = vadd.f32 %v4228_v33, %v4227_v63  ;;  %v4222_v18 = vmul.f32 0.5, %v9468_v6  ;;  %v8299_v63 = vld [vmem:[#allocation9 + $0xb8] sm:$0xf0]  ;;  %v8273_v6 = vld [vmem:[#allocation9 + $0x80] sm:$0xf] }
 0x863   :  { %4702 = vmatpush.bf16.msra.mxu0 %v8322_v36  ;;  %v8302_v33 = vor.u32 %v9224_v0, %v8299_v63  ;;  %4730 = vmatpush.bf16.msra.mxu2 %v8298_v48  ;;  %v8282_v36 = vor.u32 %v9222_v10, %v8281_v42  ;;  %v8251_v45 = vld [vmem:[#allocation9 + $0x58] sm:$0xf0]  ;;  %v8225_v14 = vld [vmem:[#allocation9 + $0x20] sm:$0xf]  ;;  %v9209_v48 = vld [vmem:[#allocation9 + $0x2c] sm:$0xf0] }
 0x864   :  { %9469 = vtanh.f32 %v10190_v49  ;;  %v4225_v11 = vadd.f32 0.5, %v4222_v18  ;;  %v9221_v18 = vld [vmem:[#allocation9 + $0x8c] sm:$0xf0]  ;;  %v8254_v26 = vor.u32 %v9212_v47, %v8251_v45  ;;  %v9207_v0 = vld [vmem:[#allocation9 + $0x24] sm:$0xf]  ;;  %v8226_v63 = vor.u32 %v9209_v48, %v8225_v14 }
 0x865   :  { %4743 = vmatpush.bf16.msra.mxu3 %v8302_v33  ;;  %v8227_v33 = vld [vmem:[#allocation9 + $0x30] sm:$0xf0]  ;;  %v8235_v42 = vld [vmem:[#allocation9 + $0x38] sm:$0xf0]  ;;  %v8209_v10 = vld [vmem:[#allocation9] sm:$0xf] }
 0x866   :  { %v8459_v14 = vld [vmem:[#allocation9 + $0xf8] sm:$0xf0]  ;;  %v8433_v48 = vld [vmem:[#allocation9 + $0xc0] sm:$0xf]  ;;  %v9255_v9 = vld [vmem:[#allocation9 + $0xa4] sm:$0xf] }
 0x867   :  { %4703 = vmatpush.bf16.msra.mxu0 %v8306_v39  ;;  %4731 = vmatpush.bf16.msra.mxu2 %v8282_v36  ;;  %v8266_v39 = vor.u32 %v9218_v25, %v8265_v19  ;;  %v9205_v36 = vld [vmem:[#allocation9 + $0xc] sm:$0xf0]  ;;  %v8219_v19 = vld [vmem:[#allocation9 + $0x18] sm:$0xf0]  ;;  %v8401_v7 = vld [vmem:[#allocation9 + $0x80] sm:$0xf] }
 0x868   :  { %v8222_v25 = vor.u32 %v9204_v34, %v8219_v19  ;;  %v8419_v34 = vld [vmem:[#allocation9 + $0xb0] sm:$0xf0]  ;;  %v9253_v21 = vld [vmem:[#allocation9 + $0x8c] sm:$0xf0] }
 0x869   :  { %4744 = vmatpush.bf16.msra.mxu3 %v8286_v51  ;;  %v8210_v51 = vor.u32 %v9205_v36, %v8209_v10  ;;  %v8443_v36 = vld [vmem:[#allocation9 + $0xd8] sm:$0xf0] }
 0x86a   :  { %v9470_v54 = vpop.eup %9469 }
 0x86b   :  { %v10193_v35 = vmul.f32 %v9470_v54, %v4225_v11  ;;  %4704 = vmatpush.bf16.msra.mxu0 %v8290_v24  ;;  %v9219_v11 = vld [vmem:[#allocation9 + $0x84] sm:$0xf]  ;;  %v8274_v54 = vor.u32 %v9221_v18, %v8273_v6  ;;  %4732 = vmatpush.bf16.msra.mxu2 %v8266_v39  ;;  %v8250_v24 = vor.u32 %v9214_v41, %v8249_v44  ;;  %v8233_v6 = vld [vmem:[#allocation9 + $0x28] sm:$0xf]  ;;  %v9210_v18 = vld [vmem:[#allocation9 + $0x34] sm:$0xf0] }
 0x86c   :  { %v2777_v39 = vadd.f32 %v10085_v3, %v10108_v23  ;;  %v8451_v44 = vld [vmem:[#allocation9 + $0xf0] sm:$0xf0]  ;;  %v8457_v41 = vld [vmem:[#allocation9 + $0xe8] sm:$0xf] }
 0x86d   :  { %v4237_v30 = vpack.c.bf16 %v10193_v35, %v10193_v35  ;;  %4745 = vmatpush.bf16.msra.mxu3 %v8270_v53 }
 0x86f   :  { %4438 = vmatmul.bf16.vlgmr.msrb.gmra.mxu0 %v4237_v30  ;;  %4451 = vmatmul.bf16.vlgmr.msrb.gmra.mxu1 %v4237_v30 }
 0x870   :  { %4464 = vmatmul.bf16.vlgmr.msrb.gmra.mxu2 %v4237_v30  ;;  %4477 = vmatmul.bf16.vlgmr.msrb.gmra.mxu3 %v4237_v30  ;;  %v8275_v30 = vld [vmem:[#allocation9 + $0x90] sm:$0xf0] }
 0x871   :  { %v8278_v60 = vor.u32 %v9219_v11, %v8275_v30  ;;  %4705 = vmatpush.bf16.msra.mxu0 %v8274_v54  ;;  %4733 = vmatpush.bf16.msra.mxu2 %v8250_v24  ;;  %v8230_v11 = vor.u32 %v9207_v0, %v8227_v33  ;;  %v8234_v54 = vor.u32 %v9210_v18, %v8233_v6  ;;  %v9208_v30 = vld [vmem:[#allocation9 + $0x2c] sm:$0xf]  ;;  %v9261_v0 = vld [vmem:[#allocation9 + $0xcc] sm:$0xf0]  ;;  %v8435_v18 = vld [vmem:[#allocation9 + $0xd0] sm:$0xf0] }
 0x872   :  { %4746 = vmatpush.bf16.msra.mxu3 %v8254_v26  ;;  %v2806_v33 = vadd.f32 %v10087_v61, %v10118_v32  ;;  %v8434_v6 = vor.u32 %v9261_v0, %v8433_v48 }
 0x873   :  { %4718 = vmatpush.bf16.msra.mxu1 %v8278_v60  ;;  %v8238_v60 = vor.u32 %v9208_v30, %v8235_v42  ;;  %v2835_v30 = vadd.f32 %v10089_v57, %v10120_v29  ;;  %v8425_v57 = vld [vmem:[#allocation9 + $0xa8] sm:$0xf] }
 0x875   :  { %4706 = vmatpush.bf16.msra.mxu0 %v8258_v40  ;;  %4734 = vmatpush.bf16.msra.mxu2 %v8234_v54  ;;  %v8214_v40 = vor.u32 %v9203_v27, %v8211_v59  ;;  %v9262_v54 = vld [vmem:[#allocation9 + $0xd4] sm:$0xf0]  ;;  %v8417_v27 = vld [vmem:[#allocation9 + $0xa0] sm:$0xf] }
 0x876   :  { %4747 = vmatpush.bf16.msra.mxu3 %v8238_v60  ;;  %v9260_v60 = vld [vmem:[#allocation9 + $0xcc] sm:$0xf] }
 0x877   :  { %4719 = vmatpush.bf16.msra.mxu1 %v8262_v20  ;;  %v2748_v20 = vadd.f32 %v10083_v12, %v10106_v4  ;;  %v9264_v12 = vld [vmem:[#allocation9 + $0xec] sm:$0xf]  ;;  %v8446_v61 = vor.u32 %v9260_v60, %v8443_v36 }
 0x878   :  { %v8462_v3 = vor.u32 %v9264_v12, %v8459_v14  ;;  %v8402_v14 = vor.u32 %v9253_v21, %v8401_v7  ;;  %v9243_v7 = vld [vmem:[#allocation9 + $0x44] sm:$0xf] }
 0x879   :  { %4707 = vmatpush.bf16.msra.mxu0 %v8242_v22  ;;  %4735 = vmatpush.bf16.msra.mxu2 %v8218_v43  ;;  %v9263_v22 = vld [vmem:[#allocation9 + $0xe4] sm:$0xf] }
 0x87a   :  { %4748 = vmatpush.bf16.msra.mxu3 %v8222_v25  ;;  %v8454_v45 = vor.u32 %v9263_v22, %v8451_v44  ;;  %v9251_v44 = vld [vmem:[#allocation9 + $0x84] sm:$0xf] }
 0x87b   :  { %4720 = vmatpush.bf16.msra.mxu1 %v8246_v17  ;;  %v9266_v17 = vld [vmem:[#allocation9 + $0xf4] sm:$0xf0] }
 0x87c   :  { %v8458_v26 = vor.u32 %v9266_v17, %v8457_v41  ;;  %v8403_v41 = vld [vmem:[#allocation9 + $0x90] sm:$0xf0] }
 0x87d   :  { %4708 = vmatpush.bf16.msra.mxu0 %v8226_v63  ;;  %v9259_v63 = vld [vmem:[#allocation9 + $0xc4] sm:$0xf]  ;;  %v8406_v0 = vor.u32 %v9251_v44, %v8403_v41  ;;  %v9246_v44 = vld [vmem:[#allocation9 + $0x54] sm:$0xf0] }
 0x87e   :  { %5000 = vmatpush.bf16.msrb.mxu2 %v8458_v26  ;;  %5013 = vmatpush.bf16.msrb.mxu3 %v8462_v3  ;;  %v8438_v42 = vor.u32 %v9259_v63, %v8435_v18  ;;  %v8411_v3 = vld [vmem:[#allocation9 + $0x98] sm:$0xf0] }
 0x87f   :  { %4721 = vmatpush.bf16.msra.mxu1 %v8230_v11  ;;  %v8441_v11 = vld [vmem:[#allocation9 + $0xc8] sm:$0xf] }
 0x880   :  { %v8442_v10 = vor.u32 %v9262_v54, %v8441_v11 }
 0x881   :  { %4709 = vmatpush.bf16.msra.mxu0 %v8210_v51 }
 0x882   :  { %5001 = vmatpush.bf16.msrb.mxu2 %v8442_v10  ;;  %5014 = vmatpush.bf16.msrb.mxu3 %v8446_v61 }
 0x883   :  { %4722 = vmatpush.bf16.msra.mxu1 %v8214_v40 }
 0x885   :  { %4974 = vmatpush.bf16.msrb.mxu0 %v8450_v62 }
 0x887   :  { %4987 = vmatpush.bf16.msrb.mxu1 %v8454_v45  ;;  %v9252_v45 = vld [vmem:[#allocation9 + $0x8c] sm:$0xf] }
 0x889   :  { %4975 = vmatpush.bf16.msrb.mxu0 %v8434_v6  ;;  %v8414_v6 = vor.u32 %v9252_v45, %v8411_v3 }
 0x88b   :  { %4988 = vmatpush.bf16.msrb.mxu1 %v8438_v42 }
 0x8ec   :  { %v4439_v2 = vpop.f32.mrf.mxu0  ;;  %v4452_v15 = vpop.f32.mrf.mxu1 }
 0x8ed   :  { %v4482_v53 = vadd.f32 %v4439_v2, %v2748_v20  ;;  %v4483_v16 = vadd.f32 %v4452_v15, %v2777_v39  ;;  %v8418_v20 = vor.u32 %v9257_v37, %v8417_v27  ;;  %v9258_v39 = vld [vmem:[#allocation9 + $0xb4] sm:$0xf0]  ;;  %v9256_v2 = vld [vmem:[#allocation9 + $0xac] sm:$0xf]  ;;  %v8422_v15 = vor.u32 %v9255_v9, %v8419_v34  ;;  %v9249_v9 = vld [vmem:[#allocation9 + $0x6c] sm:$0xf0] }
 0x8ee   :  { %v9247_v34 = vld [vmem:[#allocation9 + $0x64] sm:$0xf] }
 0x8ef   :  { %v4486_v24 = vmul.f32 0.5, %v4482_v53  ;;  %v4487_v47 = vmul.f32 0.5, %v4483_v16  ;;  %v8426_v53 = vor.u32 %v9258_v39, %v8425_v57  ;;  %v8427_v16 = vld [vmem:[#allocation9 + $0xb8] sm:$0xf0]  ;;  %4976 = vmatpush.bf16.msrb.mxu0 %v8418_v20  ;;  %4989 = vmatpush.bf16.msrb.mxu1 %v8422_v15  ;;  %v9248_v39 = vld [vmem:[#allocation9 + $0x6c] sm:$0xf] }
 0x8f0   :  { %v8430_v62 = vor.u32 %v9256_v2, %v8427_v16  ;;  %v8395_v2 = vld [vmem:[#allocation9 + $0x78] sm:$0xf0]  ;;  %v9245_v16 = vld [vmem:[#allocation9 + $0x4c] sm:$0xf0] }
 0x8f1   :  { %9471 = vtanh.f32 %v4486_v24  ;;  %v8409_v24 = vld [vmem:[#allocation9 + $0x88] sm:$0xf]  ;;  %5002 = vmatpush.bf16.msrb.mxu2 %v8426_v53  ;;  %v8398_v15 = vor.u32 %v9248_v39, %v8395_v2  ;;  %v8369_v53 = vld [vmem:[#allocation9 + $0x40] sm:$0xf] }
 0x8f2   :  { %9473 = vtanh.f32 %v4487_v47  ;;  %v9254_v47 = vld [vmem:[#allocation9 + $0x94] sm:$0xf0]  ;;  %5015 = vmatpush.bf16.msrb.mxu3 %v8430_v62  ;;  %v8370_v21 = vor.u32 %v9245_v16, %v8369_v53  ;;  %v8377_v62 = vld [vmem:[#allocation9 + $0x48] sm:$0xf]  ;;  %v9296_v53 = vld [vmem:[#allocation10 + $0xec] sm:$0xf] }
 0x8f3   :  { %v4465_v59 = vpop.f32.mrf.mxu2  ;;  %v4478_v51 = vpop.f32.mrf.mxu3  ;;  %v8410_v63 = vor.u32 %v9254_v47, %v8409_v24  ;;  %4977 = vmatpush.bf16.msrb.mxu0 %v8402_v14  ;;  %4990 = vmatpush.bf16.msrb.mxu1 %v8406_v0  ;;  %v9244_v24 = vld [vmem:[#allocation9 + $0x4c] sm:$0xf]  ;;  %v8379_v47 = vld [vmem:[#allocation9 + $0x58] sm:$0xf0]  ;;  %v9239_v14 = vld [vmem:[#allocation9 + $0x24] sm:$0xf] }
 0x8f4   :  { %v4484_v40 = vadd.f32 %v4465_v59, %v2806_v33  ;;  %v4485_v43 = vadd.f32 %v4478_v51, %v2835_v30  ;;  %v4441_v19 = vpop.f32.mrf.mxu0  ;;  %v4454_v25 = vpop.f32.mrf.mxu1  ;;  %v8382_v45 = vor.u32 %v9244_v24, %v8379_v47  ;;  %v8361_v0 = vld [vmem:[#allocation9 + $0x28] sm:$0xf] }
 0x8f5   :  { %5003 = vmatpush.bf16.msrb.mxu2 %v8410_v63  ;;  %v8393_v19 = vld [vmem:[#allocation9 + $0x68] sm:$0xf]  ;;  %v9250_v25 = vld [vmem:[#allocation9 + $0x74] sm:$0xf0] }
 0x8f6   :  { %v4488_v22 = vmul.f32 0.5, %v4484_v40  ;;  %9475 = vtanh.f32 %v4485_v43  ;;  %5016 = vmatpush.bf16.msrb.mxu3 %v8414_v6  ;;  %v8387_v43 = vld [vmem:[#allocation9 + $0x70] sm:$0xf0]  ;;  %v8394_v57 = vor.u32 %v9250_v25, %v8393_v19  ;;  %v9242_v63 = vld [vmem:[#allocation9 + $0x34] sm:$0xf0] }
 0x8f7   :  { %v9472_v17 = vpop.eup %9471  ;;  %v8390_v20 = vor.u32 %v9247_v34, %v8387_v43  ;;  %v8362_v6 = vor.u32 %v9242_v63, %v8361_v0  ;;  %v8347_v34 = vld [vmem:[#allocation9 + $0x18] sm:$0xf0]  ;;  %v9297_v19 = vld [vmem:[#allocation10 + $0xec] sm:$0xf0]  ;;  %v9295_v25 = vld [vmem:[#allocation10 + $0xe4] sm:$0xf] }
 0x8f8   :  { %v9474_v26 = vpop.eup %9473  ;;  %v4492_v12 = vmul.f32 0.5, %v9472_v17  ;;  %9477 = vtanh.f32 %v4488_v22  ;;  %v8371_v22 = vld [vmem:[#allocation9 + $0x50] sm:$0xf0]  ;;  %v8378_v17 = vor.u32 %v9246_v44, %v8377_v62  ;;  %v8585_v2 = vld [vmem:[#allocation10 + $0xe8] sm:$0xf] }
 0x8f9   :  { %v4493_v48 = vmul.f32 0.5, %v9474_v26  ;;  %4991 = vmatpush.bf16.msrb.mxu1 %v8390_v20  ;;  %5004 = vmatpush.bf16.msrb.mxu2 %v8394_v57  ;;  %v8374_v41 = vor.u32 %v9243_v7, %v8371_v22  ;;  %v8353_v26 = vld [vmem:[#allocation9 + $0x20] sm:$0xf]  ;;  %v8579_v20 = vld [vmem:[#allocation10 + $0xf0] sm:$0xf0] }
 0x8fa   :  { %v4495_v33 = vadd.f32 0.5, %v4492_v12  ;;  %5017 = vmatpush.bf16.msrb.mxu3 %v8398_v15  ;;  %v9241_v12 = vld [vmem:[#allocation9 + $0x2c] sm:$0xf0]  ;;  %v8582_v39 = vor.u32 %v9295_v25, %v8579_v20  ;;  %v9298_v15 = vld [vmem:[#allocation10 + $0xf4] sm:$0xf0] }
 0x8fb   :  { %v4496_v18 = vadd.f32 0.5, %v4493_v48  ;;  %v4467_v11 = vpop.f32.mrf.mxu2  ;;  %v4480_v54 = vpop.f32.mrf.mxu3  ;;  %v8354_v3 = vor.u32 %v9241_v12, %v8353_v26  ;;  %v8355_v48 = vld [vmem:[#allocation9 + $0x30] sm:$0xf0]  ;;  %v8586_v16 = vor.u32 %v9298_v15, %v8585_v2  ;;  %v8587_v7 = vld [vmem:[#allocation10 + $0xf8] sm:$0xf0] }
 0x8fc   :  { %v9476_v30 = vpop.eup %9475  ;;  %v8363_v11 = vld [vmem:[#allocation9 + $0x38] sm:$0xf0]  ;;  %v9293_v22 = vld [vmem:[#allocation10 + $0xcc] sm:$0xf0]  ;;  %v8590_v62 = vor.u32 %v9296_v53, %v8587_v7  ;;  %v8569_v24 = vld [vmem:[#allocation10 + $0xc8] sm:$0xf] }
 0x8fd   :  { %v4499_v42 = vmul.f32 %v4496_v18, %v10190_v49  ;;  %v4500_v10 = vmul.f32 %v9476_v30, %v4495_v33  ;;  %v8385_v49 = vld [vmem:[#allocation9 + $0x60] sm:$0xf]  ;;  %4992 = vmatpush.bf16.msrb.mxu1 %v8374_v41  ;;  %5005 = vmatpush.bf16.msrb.mxu2 %v8378_v17  ;;  %v8358_v33 = vor.u32 %v9239_v14, %v8355_v48  ;;  %v9240_v18 = vld [vmem:[#allocation9 + $0x2c] sm:$0xf]  ;;  %v9291_v41 = vld [vmem:[#allocation10 + $0xc4] sm:$0xf] }
 0x8fe   :  { %v9478_v60 = vpop.eup %9477  ;;  %v8386_v40 = vor.u32 %v9249_v9, %v8385_v49  ;;  %5018 = vmatpush.bf16.msrb.mxu3 %v8382_v45  ;;  %v8366_v54 = vor.u32 %v9240_v18, %v8363_v11  ;;  %v8337_v30 = vld [vmem:[#allocation9] sm:$0xf]  ;;  %v9236_v9 = vld [vmem:[#allocation9 + $0xc] sm:$0xf]  ;;  %v8563_v17 = vld [vmem:[#allocation10 + $0xd0] sm:$0xf0] }
 0x8ff   :  { %v10206_v36 = vadd.f32 %v4500_v10, %v4499_v42  ;;  %v4494_v27 = vmul.f32 0.5, %v9478_v60  ;;  %v9237_v42 = vld [vmem:[#allocation9 + $0xc] sm:$0xf0]  ;;  %v9235_v10 = vld [vmem:[#allocation9 + $0x4] sm:$0xf]  ;;  %v8350_v43 = vor.u32 %v9236_v9, %v8347_v34  ;;  %v8566_v47 = vor.u32 %v9291_v41, %v8563_v17 }
 0x900   :  { %4978 = vmatpush.bf16.msrb.mxu0 %v8386_v40  ;;  %v8338_v60 = vor.u32 %v9237_v42, %v8337_v30  ;;  %v8577_v40 = vld [vmem:[#allocation10 + $0xe0] sm:$0xf]  ;;  %v9294_v45 = vld [vmem:[#allocation10 + $0xd4] sm:$0xf0]  ;;  %v9292_v26 = vld [vmem:[#allocation10 + $0xcc] sm:$0xf] }
 0x901   :  { %9479 = vtanh.f32 %v10206_v36  ;;  %v4497_v59 = vadd.f32 0.5, %v4494_v27  ;;  %4993 = vmatpush.bf16.msrb.mxu1 %v8358_v33  ;;  %5006 = vmatpush.bf16.msrb.mxu2 %v8362_v6  ;;  %v8339_v27 = vld [vmem:[#allocation9 + $0x10] sm:$0xf0]  ;;  %v8578_v57 = vor.u32 %v9297_v19, %v8577_v40  ;;  %v8571_v12 = vld [vmem:[#allocation10 + $0xd8] sm:$0xf0]  ;;  %v8570_v14 = vor.u32 %v9294_v45, %v8569_v24 }
 0x902   :  { %5019 = vmatpush.bf16.msrb.mxu3 %v8366_v54  ;;  %v8545_v48 = vld [vmem:[#allocation10 + $0xa0] sm:$0xf]  ;;  %v9289_v0 = vld [vmem:[#allocation10 + $0xac] sm:$0xf0]  ;;  %v9287_v63 = vld [vmem:[#allocation10 + $0xa4] sm:$0xf] }
 0x903   :  { %v8547_v33 = vld [vmem:[#allocation10 + $0xb0] sm:$0xf0]  ;;  %v8553_v6 = vld [vmem:[#allocation10 + $0xa8] sm:$0xf]  ;;  %v9290_v18 = vld [vmem:[#allocation10 + $0xb4] sm:$0xf0]  ;;  %v8546_v11 = vor.u32 %v9289_v0, %v8545_v48 }
 0x904   :  { %4979 = vmatpush.bf16.msrb.mxu0 %v8370_v21  ;;  %v8561_v21 = vld [vmem:[#allocation10 + $0xc0] sm:$0xf]  ;;  %v8550_v54 = vor.u32 %v9287_v63, %v8547_v33  ;;  %v9288_v30 = vld [vmem:[#allocation10 + $0xac] sm:$0xf]  ;;  %v8555_v42 = vld [vmem:[#allocation10 + $0xb8] sm:$0xf0] }
 0x905   :  { %v8562_v44 = vor.u32 %v9293_v22, %v8561_v21  ;;  %v9286_v9 = vld [vmem:[#allocation10 + $0x94] sm:$0xf0]  ;;  %v9284_v34 = vld [vmem:[#allocation10 + $0x8c] sm:$0xf]  ;;  %v8539_v40 = vld [vmem:[#allocation10 + $0x98] sm:$0xf0] }
 0x906   :  { %5020 = vmatpush.bf16.msrb.mxu3 %v8350_v43  ;;  %v8542_v20 = vor.u32 %v9284_v34, %v8539_v40  ;;  %v8513_v2 = vld [vmem:[#allocation10 + $0x60] sm:$0xf]  ;;  %v9281_v15 = vld [vmem:[#allocation10 + $0x6c] sm:$0xf0]  ;;  %v9279_v53 = vld [vmem:[#allocation10 + $0x64] sm:$0xf] }
 0x907   :  { %v9480_v51 = vpop.eup %9479  ;;  %v8514_v21 = vor.u32 %v9281_v15, %v8513_v2  ;;  %v8515_v22 = vld [vmem:[#allocation10 + $0x70] sm:$0xf0]  ;;  %v8523_v45 = vld [vmem:[#allocation10 + $0x78] sm:$0xf0]  ;;  %v9272_v34 = vld [vmem:[#allocation10 + $0x2c] sm:$0xf] }
 0x908   :  { %v10209_v61 = vmul.f32 %v9480_v51, %v4497_v59  ;;  %4980 = vmatpush.bf16.msrb.mxu0 %v8354_v3  ;;  %v8345_v59 = vld [vmem:[#allocation9 + $0x8] sm:$0xf]  ;;  %v9238_v51 = vld [vmem:[#allocation9 + $0x14] sm:$0xf0]  ;;  %v8574_v3 = vor.u32 %v9292_v26, %v8571_v12  ;;  %v8518_v24 = vor.u32 %v9279_v53, %v8515_v22  ;;  %v9277_v12 = vld [vmem:[#allocation10 + $0x4c] sm:$0xf0] }
 0x909   :  { %v8346_v49 = vor.u32 %v9238_v51, %v8345_v59  ;;  %v9283_v59 = vld [vmem:[#allocation10 + $0x84] sm:$0xf]  ;;  %v8531_v51 = vld [vmem:[#allocation10 + $0x90] sm:$0xf0]  ;;  %v8473_v22 = vld [vmem:[#allocation10 + $0x8] sm:$0xf] }
 0x90a   :  { %v4509_v37 = vpack.c.bf16 %v10209_v61, %v10209_v61  ;;  %v8534_v19 = vor.u32 %v9283_v59, %v8531_v51  ;;  %v8483_v59 = vld [vmem:[#allocation10 + $0x30] sm:$0xf0]  ;;  %v2809_v51 = vadd.f32 %v10098_v52, %v10118_v32 }
 0x90b   :  { %5007 = vmatpush.bf16.msrb.mxu2 %v8346_v49  ;;  %v8537_v49 = vld [vmem:[#allocation10 + $0x88] sm:$0xf] }
 0x90c   :  { %4710 = vmatmul.bf16.vlgmr.msra.gmra.mxu0 %v4509_v37  ;;  %4723 = vmatmul.bf16.vlgmr.msra.gmra.mxu1 %v4509_v37  ;;  %v8538_v25 = vor.u32 %v9286_v9, %v8537_v49  ;;  %v8489_v49 = vld [vmem:[#allocation10 + $0x28] sm:$0xf]  ;;  %v9274_v9 = vld [vmem:[#allocation10 + $0x34] sm:$0xf0] }
 0x90d   :  { %4736 = vmatmul.bf16.vlgmr.msra.gmra.mxu2 %v4509_v37  ;;  %4749 = vmatmul.bf16.vlgmr.msra.gmra.mxu3 %v4509_v37  ;;  %v8342_v37 = vor.u32 %v9235_v10, %v8339_v27  ;;  %v8529_v10 = vld [vmem:[#allocation10 + $0x80] sm:$0xf]  ;;  %v9285_v27 = vld [vmem:[#allocation10 + $0x8c] sm:$0xf0]  ;;  %v8490_v52 = vor.u32 %v9274_v9, %v8489_v49  ;;  %v8707_v9 = vld [vmem:[#allocation12 + $0xf0] sm:$0xf0] }
 0x90e   :  { %4981 = vmatpush.bf16.msrb.mxu0 %v8338_v60  ;;  %5350 = vmatpush.bf16.msra.mxu3 %v8590_v62  ;;  %v8554_v60 = vor.u32 %v9290_v18, %v8553_v6  ;;  %v8530_v43 = vor.u32 %v9285_v27, %v8529_v10  ;;  %v8521_v62 = vld [vmem:[#allocation10 + $0x68] sm:$0xf]  ;;  %v9278_v18 = vld [vmem:[#allocation10 + $0x54] sm:$0xf0]  ;;  %v9271_v27 = vld [vmem:[#allocation10 + $0x24] sm:$0xf] }
 0x90f   :  { %4994 = vmatpush.bf16.msrb.mxu1 %v8342_v37  ;;  %5321 = vmatpush.bf16.msra.mxu2 %v8586_v16  ;;  %v8558_v37 = vor.u32 %v9288_v30, %v8555_v42  ;;  %v8505_v6 = vld [vmem:[#allocation10 + $0x48] sm:$0xf]  ;;  %v8507_v30 = vld [vmem:[#allocation10 + $0x58] sm:$0xf0]  ;;  %v8481_v42 = vld [vmem:[#allocation10 + $0x20] sm:$0xf] }
 0x912   :  { %5263 = vmatpush.bf16.msra.mxu0 %v8578_v57  ;;  %5351 = vmatpush.bf16.msra.mxu3 %v8574_v3  ;;  %v2751_v57 = vadd.f32 %v10091_v58, %v10106_v4  ;;  %v8499_v3 = vld [vmem:[#allocation10 + $0x50] sm:$0xf0] }
 0x913   :  { %5292 = vmatpush.bf16.msra.mxu1 %v8582_v39  ;;  %5322 = vmatpush.bf16.msra.mxu2 %v8570_v14  ;;  %v2780_v39 = vadd.f32 %v10093_v13, %v10108_v23  ;;  %v8497_v13 = vld [vmem:[#allocation10 + $0x40] sm:$0xf]  ;;  %v9275_v14 = vld [vmem:[#allocation10 + $0x44] sm:$0xf] }
 0x914   :  { %v8498_v63 = vor.u32 %v9277_v12, %v8497_v13  ;;  %v8502_v33 = vor.u32 %v9275_v14, %v8499_v3 }
 0x916   :  { %5264 = vmatpush.bf16.msra.mxu0 %v8562_v44  ;;  %5352 = vmatpush.bf16.msra.mxu3 %v8558_v37  ;;  %v9282_v44 = vld [vmem:[#allocation10 + $0x74] sm:$0xf0]  ;;  %v2838_v37 = vadd.f32 %v10100_v56, %v10120_v29  ;;  %v9267_v56 = vld [vmem:[#allocation10 + $0x4] sm:$0xf] }
 0x917   :  { %5293 = vmatpush.bf16.msra.mxu1 %v8566_v47  ;;  %5323 = vmatpush.bf16.msra.mxu2 %v8554_v60  ;;  %v8522_v58 = vor.u32 %v9282_v44, %v8521_v62  ;;  %v9280_v47 = vld [vmem:[#allocation10 + $0x6c] sm:$0xf]  ;;  %v9273_v60 = vld [vmem:[#allocation10 + $0x2c] sm:$0xf0]  ;;  %v9270_v62 = vld [vmem:[#allocation10 + $0x14] sm:$0xf0] }
 0x918   :  { %v8526_v26 = vor.u32 %v9280_v47, %v8523_v45 }
 0x91a   :  { %5265 = vmatpush.bf16.msra.mxu0 %v8546_v11  ;;  %5353 = vmatpush.bf16.msra.mxu3 %v8542_v20  ;;  %v8506_v11 = vor.u32 %v9278_v18, %v8505_v6  ;;  %v8491_v20 = vld [vmem:[#allocation10 + $0x38] sm:$0xf0] }
 0x91b   :  { %5294 = vmatpush.bf16.msra.mxu1 %v8550_v54  ;;  %5324 = vmatpush.bf16.msra.mxu2 %v8538_v25  ;;  %v9276_v54 = vld [vmem:[#allocation10 + $0x4c] sm:$0xf]  ;;  %v8486_v25 = vor.u32 %v9271_v27, %v8483_v59  ;;  %v8705_v59 = vld [vmem:[#allocation12 + $0xe0] sm:$0xf] }
 0x91c   :  { %v8510_v10 = vor.u32 %v9276_v54, %v8507_v30 }
 0x91e   :  { %5266 = vmatpush.bf16.msra.mxu0 %v8530_v43  ;;  %5354 = vmatpush.bf16.msra.mxu3 %v8526_v26  ;;  %v8474_v26 = vor.u32 %v9270_v62, %v8473_v22  ;;  %v8673_v22 = vld [vmem:[#allocation12 + $0xa0] sm:$0xf]  ;;  %v9321_v62 = vld [vmem:[#allocation12 + $0xac] sm:$0xf0] }
 0x91f   :  { %5295 = vmatpush.bf16.msra.mxu1 %v8534_v19  ;;  %5325 = vmatpush.bf16.msra.mxu2 %v8522_v58  ;;  %v8482_v19 = vor.u32 %v9273_v60, %v8481_v42 }
 0x922   :  { %5267 = vmatpush.bf16.msra.mxu0 %v8514_v21  ;;  %5355 = vmatpush.bf16.msra.mxu3 %v8510_v10  ;;  %v8494_v21 = vor.u32 %v9272_v34, %v8491_v20  ;;  %v9328_v34 = vld [vmem:[#allocation12 + $0xec] sm:$0xf]  ;;  %v9330_v20 = vld [vmem:[#allocation12 + $0xf4] sm:$0xf0] }
 0x923   :  { %5296 = vmatpush.bf16.msra.mxu1 %v8518_v24  ;;  %5326 = vmatpush.bf16.msra.mxu2 %v8506_v11 }
 0x926   :  { %5268 = vmatpush.bf16.msra.mxu0 %v8498_v63  ;;  %5356 = vmatpush.bf16.msra.mxu3 %v8494_v21  ;;  %v9326_v21 = vld [vmem:[#allocation12 + $0xd4] sm:$0xf0] }
 0x927   :  { %5297 = vmatpush.bf16.msra.mxu1 %v8502_v33  ;;  %5327 = vmatpush.bf16.msra.mxu2 %v8490_v52  ;;  %v9324_v52 = vld [vmem:[#allocation12 + $0xcc] sm:$0xf] }
 0x92a   :  { %5269 = vmatpush.bf16.msra.mxu0 %v8482_v19 }
 0x92b   :  { %5298 = vmatpush.bf16.msra.mxu1 %v8486_v25  ;;  %5328 = vmatpush.bf16.msra.mxu2 %v8474_v26  ;;  %v8713_v25 = vld [vmem:[#allocation12 + $0xe8] sm:$0xf]  ;;  %v5058_v26 = vpack.c.bf16 %v10177_v1, %v10161_v38  ;;  %v9315_v38 = vld [vmem:[#allocation12 + $0x84] sm:$0xf] }
 0x989   :  { %v4711_v16 = vpop.f32.mrf.mxu0  ;;  %v4724_v7 = vpop.f32.mrf.mxu1 }
 0x98a   :  { %v4754_v41 = vadd.f32 %v4711_v16, %v2751_v57  ;;  %v4755_v17 = vadd.f32 %v4724_v7, %v2780_v39  ;;  %v8465_v57 = vld [vmem:[#allocation10] sm:$0xf]  ;;  %v9269_v16 = vld [vmem:[#allocation10 + $0xc] sm:$0xf0]  ;;  %v8467_v7 = vld [vmem:[#allocation10 + $0x10] sm:$0xf0] }
 0x98b   :  { %v8466_v58 = vor.u32 %v9269_v16, %v8465_v57  ;;  %v8470_v47 = vor.u32 %v9267_v56, %v8467_v7  ;;  %v8689_v57 = vld [vmem:[#allocation12 + $0xc0] sm:$0xf]  ;;  %v8699_v16 = vld [vmem:[#allocation12 + $0xd8] sm:$0xf0]  ;;  %v8697_v56 = vld [vmem:[#allocation12 + $0xc8] sm:$0xf] }
 0x98c   :  { %v4758_v48 = vmul.f32 0.5, %v4754_v41  ;;  %v4759_v0 = vmul.f32 0.5, %v4755_v17  ;;  %v9268_v41 = vld [vmem:[#allocation10 + $0xc] sm:$0xf]  ;;  %v8475_v17 = vld [vmem:[#allocation10 + $0x18] sm:$0xf0]  ;;  %v10247_v7 = vor.u32 %v9324_v52, %v8699_v16 }
 0x98d   :  { %v8478_v14 = vor.u32 %v9268_v41, %v8475_v17  ;;  %5270 = vmatpush.bf16.msra.mxu0 %v8466_v58  ;;  %5299 = vmatpush.bf16.msra.mxu1 %v8470_v47  ;;  %v9319_v41 = vld [vmem:[#allocation12 + $0xa4] sm:$0xf]  ;;  %v8675_v17 = vld [vmem:[#allocation12 + $0xb0] sm:$0xf0]  ;;  %v10252_v58 = vor.u32 %v9321_v62, %v8673_v22  ;;  %v8683_v47 = vld [vmem:[#allocation12 + $0xb8] sm:$0xf0] }
 0x98e   :  { %9481 = vtanh.f32 %v4758_v48  ;;  %v8627_v52 = vld [vmem:[#allocation12 + $0x50] sm:$0xf0]  ;;  %v8633_v22 = vld [vmem:[#allocation12 + $0x48] sm:$0xf] }
 0x98f   :  { %9483 = vtanh.f32 %v4759_v0  ;;  %5357 = vmatpush.bf16.msra.mxu3 %v8478_v14  ;;  %v8681_v14 = vld [vmem:[#allocation12 + $0xa8] sm:$0xf] }
 0x990   :  { %v4737_v40 = vpop.f32.mrf.mxu2  ;;  %v4750_v43 = vpop.f32.mrf.mxu3 }
 0x991   :  { %v4756_v39 = vadd.f32 %v4737_v40, %v2809_v51  ;;  %v4757_v2 = vadd.f32 %v4750_v43, %v2838_v37  ;;  %v4713_v15 = vpop.f32.mrf.mxu0  ;;  %v4726_v53 = vpop.f32.mrf.mxu1  ;;  %v9329_v51 = vld [vmem:[#allocation12 + $0xec] sm:$0xf0]  ;;  %v9327_v37 = vld [vmem:[#allocation12 + $0xe4] sm:$0xf]  ;;  %v8715_v40 = vld [vmem:[#allocation12 + $0xf8] sm:$0xf0] }
 0x992   :  { %v10231_v49 = vor.u32 %v9329_v51, %v8705_v59  ;;  %v10233_v43 = vor.u32 %v9327_v37, %v8707_v9  ;;  %v10235_v19 = vor.u32 %v9328_v34, %v8715_v40  ;;  %v8643_v59 = vld [vmem:[#allocation12 + $0x70] sm:$0xf0]  ;;  %v9312_v9 = vld [vmem:[#allocation12 + $0x6c] sm:$0xf]  ;;  %v8651_v34 = vld [vmem:[#allocation12 + $0x78] sm:$0xf0] }
 0x993   :  { %v4760_v44 = vmul.f32 0.5, %v4756_v39  ;;  %9485 = vtanh.f32 %v4757_v2  ;;  %v9323_v39 = vld [vmem:[#allocation12 + $0xc4] sm:$0xf]  ;;  %v8691_v2 = vld [vmem:[#allocation12 + $0xd0] sm:$0xf0] }
 0x994   :  { %v9482_v24 = vpop.eup %9481  ;;  %v10244_v53 = vor.u32 %v9323_v39, %v8691_v2  ;;  %v8649_v40 = vld [vmem:[#allocation12 + $0x68] sm:$0xf]  ;;  %v9309_v39 = vld [vmem:[#allocation12 + $0x4c] sm:$0xf0]  ;;  %v9307_v2 = vld [vmem:[#allocation12 + $0x44] sm:$0xf] }
 0x995   :  { %v9484_v45 = vpop.eup %9483  ;;  %v4764_v13 = vmul.f32 0.5, %v9482_v24  ;;  %9487 = vtanh.f32 %v4760_v44  ;;  %v10249_v44 = vor.u32 %v9326_v21, %v8697_v56  ;;  %v9320_v24 = vld [vmem:[#allocation12 + $0xac] sm:$0xf]  ;;  %v8635_v21 = vld [vmem:[#allocation12 + $0x58] sm:$0xf0]  ;;  %v10296_v62 = vor.u32 %v9307_v2, %v8627_v52 }
 0x996   :  { %v4765_v12 = vmul.f32 0.5, %v9484_v45  ;;  %v10256_v45 = vor.u32 %v9319_v41, %v8675_v17  ;;  %v9308_v56 = vld [vmem:[#allocation12 + $0x4c] sm:$0xf]  ;;  %v9310_v17 = vld [vmem:[#allocation12 + $0x54] sm:$0xf0] }
 0x997   :  { %v4767_v3 = vadd.f32 0.5, %v4764_v13  ;;  %v10258_v13 = vor.u32 %v9320_v24, %v8683_v47  ;;  %v10298_v41 = vor.u32 %v9308_v56, %v8635_v21  ;;  %v10301_v24 = vor.u32 %v9310_v17, %v8633_v22  ;;  %v8593_v52 = vld [vmem:[#allocation12] sm:$0xf]  ;;  %v9301_v56 = vld [vmem:[#allocation12 + $0xc] sm:$0xf0] }
 0x998   :  { %v4768_v48 = vadd.f32 0.5, %v4765_v12  ;;  %v4739_v0 = vpop.f32.mrf.mxu2  ;;  %v4752_v63 = vpop.f32.mrf.mxu3  ;;  %v5059_v12 = vpack.c.bf16 %v10209_v61, %v10193_v35  ;;  %v8665_v61 = vld [vmem:[#allocation12 + $0x88] sm:$0xf]  ;;  %v2753_v47 = vadd.f32 %v10102_v55, %v10106_v4  ;;  %v8611_v55 = vld [vmem:[#allocation12 + $0x30] sm:$0xf0]  ;;  %v10327_v22 = vor.u32 %v9301_v56, %v8593_v52 }
 0x999   :  { %v9486_v33 = vpop.eup %9485  ;;  %v8657_v0 = vld [vmem:[#allocation12 + $0x80] sm:$0xf]  ;;  %v9317_v63 = vld [vmem:[#allocation12 + $0x8c] sm:$0xf0]  ;;  %v9304_v4 = vld [vmem:[#allocation12 + $0x2c] sm:$0xf] }
 0x99a   :  { %v4771_v6 = vmul.f32 %v4768_v48, %v10206_v36  ;;  %v4772_v18 = vmul.f32 %v9486_v33, %v4767_v3  ;;  %v5057_v36 = vpack.c.bf16 %v10145_v50, %v10129_v5  ;;  %v10238_v5 = vor.u32 %v9330_v20, %v8713_v25  ;;  %v9325_v50 = vld [vmem:[#allocation12 + $0xcc] sm:$0xf0]  ;;  %v9322_v3 = vld [vmem:[#allocation12 + $0xb4] sm:$0xf0]  ;;  %v8659_v33 = vld [vmem:[#allocation12 + $0x90] sm:$0xf0] }
 0x99b   :  { %v9488_v11 = vpop.eup %9487  ;;  %v10242_v15 = vor.u32 %v9325_v50, %v8689_v57  ;;  %v10268_v48 = vor.u32 %v9322_v3, %v8681_v14  ;;  %v10271_v1 = vor.u32 %v9317_v63, %v8657_v0  ;;  %v10287_v25 = vor.u32 %v9312_v9, %v8651_v34  ;;  %v9314_v20 = vld [vmem:[#allocation12 + $0x74] sm:$0xf0]  ;;  %v8625_v57 = vld [vmem:[#allocation12 + $0x40] sm:$0xf]  ;;  %v9299_v21 = vld [vmem:[#allocation12 + $0x4] sm:$0xf] }
 0x99c   :  { %v10222_v54 = vadd.f32 %v4772_v18, %v4771_v6  ;;  %v4766_v30 = vmul.f32 0.5, %v9488_v11  ;;  %v9316_v6 = vld [vmem:[#allocation12 + $0x8c] sm:$0xf]  ;;  %v8667_v18 = vld [vmem:[#allocation12 + $0x98] sm:$0xf0]  ;;  %v10273_v11 = vor.u32 %v9315_v38, %v8659_v33  ;;  %v10289_v50 = vor.u32 %v9314_v20, %v8649_v40 }
 0x99d   :  { %v10275_v35 = vor.u32 %v9316_v6, %v8667_v18  ;;  %v10292_v16 = vor.u32 %v9309_v39, %v8625_v57  ;;  %v8609_v63 = vld [vmem:[#allocation12 + $0x20] sm:$0xf]  ;;  %v9305_v38 = vld [vmem:[#allocation12 + $0x2c] sm:$0xf0]  ;;  %v9303_v33 = vld [vmem:[#allocation12 + $0x24] sm:$0xf]  ;;  %v2840_v9 = vadd.f32 %v10116_v31, %v10120_v29 }
 0x99e   :  { %9489 = vtanh.f32 %v10222_v54  ;;  %v4769_v42 = vadd.f32 0.5, %v4766_v30  ;;  %v9318_v30 = vld [vmem:[#allocation12 + $0x94] sm:$0xf0]  ;;  %v10311_v6 = vor.u32 %v9305_v38, %v8609_v63  ;;  %v8595_v17 = vld [vmem:[#allocation12 + $0x10] sm:$0xf0] }
 0x99f   :  { %v10329_v31 = vor.u32 %v9299_v21, %v8595_v17 }
 0x9a4   :  { %v9490_v10 = vpop.eup %9489 }
 0x9a5   :  { %v10225_v60 = vmul.f32 %v9490_v10, %v4769_v42  ;;  %v8641_v42 = vld [vmem:[#allocation12 + $0x60] sm:$0xf]  ;;  %v10278_v10 = vor.u32 %v9318_v30, %v8665_v61  ;;  %v10313_v61 = vor.u32 %v9303_v33, %v8611_v55 }
 0x9a7   :  { %v4781_v27 = vpack.c.bf16 %v10225_v60, %v10225_v60 }
 0x9a9   :  { %4982 = vmatmul.bf16.vlgmr.msrb.gmra.mxu0 %v4781_v27  ;;  %4995 = vmatmul.bf16.vlgmr.msrb.gmra.mxu1 %v4781_v27 }
 0x9aa   :  { %5008 = vmatmul.bf16.vlgmr.msrb.gmra.mxu2 %v4781_v27  ;;  %5021 = vmatmul.bf16.vlgmr.msrb.gmra.mxu3 %v4781_v27  ;;  %v9313_v27 = vld [vmem:[#allocation12 + $0x6c] sm:$0xf0] }
 0x9ab   :  { %5607 = vmatpush.bf16.msrb.mxu0 %v10231_v49  ;;  %5620 = vmatpush.bf16.msrb.mxu1 %v10233_v43  ;;  %v10282_v51 = vor.u32 %v9313_v27, %v8641_v42  ;;  %v8617_v42 = vld [vmem:[#allocation12 + $0x28] sm:$0xf]  ;;  %v9306_v27 = vld [vmem:[#allocation12 + $0x34] sm:$0xf0] }
 0x9ac   :  { %5646 = vmatpush.bf16.msrb.mxu3 %v10235_v19  ;;  %5633 = vmatpush.bf16.msrb.mxu2 %v10238_v5 }
 0x9af   :  { %5608 = vmatpush.bf16.msrb.mxu0 %v10242_v15  ;;  %5621 = vmatpush.bf16.msrb.mxu1 %v10244_v53 }
 0x9b0   :  { %5647 = vmatpush.bf16.msrb.mxu3 %v10247_v7  ;;  %5634 = vmatpush.bf16.msrb.mxu2 %v10249_v44 }
 0x9b3   :  { %5609 = vmatpush.bf16.msrb.mxu0 %v10252_v58  ;;  %5622 = vmatpush.bf16.msrb.mxu1 %v10256_v45 }
 0x9b4   :  { %5648 = vmatpush.bf16.msrb.mxu3 %v10258_v13  ;;  %5635 = vmatpush.bf16.msrb.mxu2 %v10268_v48 }
 0x9b7   :  { %5610 = vmatpush.bf16.msrb.mxu0 %v10271_v1  ;;  %5623 = vmatpush.bf16.msrb.mxu1 %v10273_v11 }
 0x9b8   :  { %5649 = vmatpush.bf16.msrb.mxu3 %v10275_v35  ;;  %5636 = vmatpush.bf16.msrb.mxu2 %v10278_v10 }
 0x9b9   :  { %5271 = vmatmul.bf16.vlgmr.msra.gmra.mxu0 %v5057_v36  ;;  %5300 = vmatmul.bf16.vlgmr.msra.gmra.mxu1 %v5057_v36 }
 0x9ba   :  { %5329 = vmatmul.bf16.vlgmr.msra.gmra.mxu2 %v5057_v36  ;;  %5358 = vmatmul.bf16.vlgmr.msra.gmra.mxu3 %v5057_v36  ;;  %v9311_v36 = vld [vmem:[#allocation12 + $0x64] sm:$0xf] }
 0x9bb   :  { %v10284_v37 = vor.u32 %v9311_v36, %v8643_v59  ;;  %5611 = vmatpush.bf16.msrb.mxu0 %v10282_v51  ;;  %v10318_v36 = vor.u32 %v9306_v27, %v8617_v42  ;;  %v2811_v59 = vadd.f32 %v10114_v28, %v10118_v32  ;;  %v8603_v28 = vld [vmem:[#allocation12 + $0x18] sm:$0xf0] }
 0x9bc   :  { %5650 = vmatpush.bf16.msrb.mxu3 %v10287_v25  ;;  %5637 = vmatpush.bf16.msrb.mxu2 %v10289_v50 }
 0x9bd   :  { %5624 = vmatpush.bf16.msrb.mxu1 %v10284_v37 }
 0x9bf   :  { %5612 = vmatpush.bf16.msrb.mxu0 %v10292_v16 }
 0x9c0   :  { %5651 = vmatpush.bf16.msrb.mxu3 %v10298_v41  ;;  %5638 = vmatpush.bf16.msrb.mxu2 %v10301_v24 }
 0x9c1   :  { %5625 = vmatpush.bf16.msrb.mxu1 %v10296_v62 }
 0x9c3   :  { %5613 = vmatpush.bf16.msrb.mxu0 %v10311_v6 }
 0x9c4   :  { %5639 = vmatpush.bf16.msrb.mxu2 %v10318_v36 }
 0x9c5   :  { %5626 = vmatpush.bf16.msrb.mxu1 %v10313_v61 }
 0x9c7   :  { %5614 = vmatpush.bf16.msrb.mxu0 %v10327_v22 }
 0x9c9   :  { %5276 = vmatmul.bf16.gmra.mxu0 %v5058_v26  ;;  %5305 = vmatmul.bf16.gmra.mxu1 %v5058_v26 }
 0x9ca   :  { %5334 = vmatmul.bf16.gmra.mxu2 %v5058_v26  ;;  %5363 = vmatmul.bf16.gmra.mxu3 %v5058_v26  ;;  %v2782_v26 = vadd.f32 %v10104_v8, %v10108_v23  ;;  %v8619_v8 = vld [vmem:[#allocation12 + $0x38] sm:$0xf0] }
 0x9cb   :  { %v10315_v30 = vor.u32 %v9304_v4, %v8619_v8  ;;  %5627 = vmatpush.bf16.msrb.mxu1 %v10329_v31  ;;  %5686 = vmatpush.bf16.msra.mxu0 %v10231_v49 }
 0x9cd   :  { %5652 = vmatpush.bf16.msrb.mxu3 %v10315_v30 }
 0x9cf   :  { %5699 = vmatpush.bf16.msra.mxu1 %v10233_v43  ;;  %5687 = vmatpush.bf16.msra.mxu0 %v10242_v15 }
 0x9d3   :  { %5700 = vmatpush.bf16.msra.mxu1 %v10244_v53  ;;  %5688 = vmatpush.bf16.msra.mxu0 %v10252_v58 }
 0x9d7   :  { %5701 = vmatpush.bf16.msra.mxu1 %v10256_v45  ;;  %5689 = vmatpush.bf16.msra.mxu0 %v10271_v1 }
 0x9d9   :  { %5281 = vmatmul.bf16.gmra.mxu0 %v5059_v12  ;;  %5310 = vmatmul.bf16.gmra.mxu1 %v5059_v12 }
 0x9da   :  { %5339 = vmatmul.bf16.gmra.mxu2 %v5059_v12  ;;  %5368 = vmatmul.bf16.gmra.mxu3 %v5059_v12 }
 0x9db   :  { %5702 = vmatpush.bf16.msra.mxu1 %v10273_v11  ;;  %5690 = vmatpush.bf16.msra.mxu0 %v10282_v51 }
 0x9df   :  { %5703 = vmatpush.bf16.msra.mxu1 %v10284_v37  ;;  %5691 = vmatpush.bf16.msra.mxu0 %v10292_v16 }
 0x9e3   :  { %5704 = vmatpush.bf16.msra.mxu1 %v10296_v62  ;;  %5692 = vmatpush.bf16.msra.mxu0 %v10311_v6 }
 0x9e7   :  { %5705 = vmatpush.bf16.msra.mxu1 %v10313_v61  ;;  %5693 = vmatpush.bf16.msra.mxu0 %v10327_v22 }
 0x9eb   :  { %5706 = vmatpush.bf16.msra.mxu1 %v10329_v31 }
 0xa26   :  { %v4983_v12 = vpop.f32.mrf.mxu0  ;;  %v4996_v14 = vpop.f32.mrf.mxu1 }
 0xa27   :  { %v5026_v3 = vadd.f32 %v4983_v12, %v2753_v47  ;;  %v5027_v0 = vadd.f32 %v4996_v14, %v2782_v26  ;;  %v9300_v47 = vld [vmem:[#allocation12 + $0xc] sm:$0xf]  ;;  %v8601_v26 = vld [vmem:[#allocation12 + $0x8] sm:$0xf]  ;;  %v9302_v12 = vld [vmem:[#allocation12 + $0x14] sm:$0xf0] }
 0xa28   :  { %v10331_v29 = vor.u32 %v9300_v47, %v8603_v28 }
 0xa29   :  { %v5030_v23 = vmul.f32 0.5, %v5026_v3  ;;  %v5031_v18 = vmul.f32 0.5, %v5027_v0  ;;  %v10334_v3 = vor.u32 %v9302_v12, %v8601_v26 }
 0xa2a   :  { %5653 = vmatpush.bf16.msrb.mxu3 %v10331_v29 }
 0xa2b   :  { %9491 = vtanh.f32 %v5030_v23  ;;  %5640 = vmatpush.bf16.msrb.mxu2 %v10334_v3 }
 0xa2c   :  { %9493 = vtanh.f32 %v5031_v18 }
 0xa2d   :  { %v5009_v34 = vpop.f32.mrf.mxu2  ;;  %v5022_v40 = vpop.f32.mrf.mxu3 }
 0xa2e   :  { %v5028_v20 = vadd.f32 %v5009_v34, %v2811_v59  ;;  %v5029_v57 = vadd.f32 %v5022_v40, %v2840_v9  ;;  %v4985_v39 = vpop.f32.mrf.mxu0  ;;  %v4998_v2 = vpop.f32.mrf.mxu1  ;;  %5725 = vmatpush.bf16.msra.mxu3 %v10235_v19 }
 0xa2f   :  { %5712 = vmatpush.bf16.msra.mxu2 %v10238_v5 }
 0xa30   :  { %v5032_v32 = vmul.f32 0.5, %v5028_v20  ;;  %9495 = vtanh.f32 %v5029_v57 }
 0xa31   :  { %v9492_v14 = vpop.eup %9491 }
 0xa32   :  { %v9494_v0 = vpop.eup %9493  ;;  %v5036_v63 = vmul.f32 0.5, %v9492_v14  ;;  %9497 = vtanh.f32 %v5032_v32  ;;  %5726 = vmatpush.bf16.msra.mxu3 %v10247_v7 }
 0xa33   :  { %v5037_v38 = vmul.f32 0.5, %v9494_v0  ;;  %5713 = vmatpush.bf16.msra.mxu2 %v10249_v44 }
 0xa34   :  { %v5039_v33 = vadd.f32 0.5, %v5036_v63 }
 0xa35   :  { %v5040_v55 = vadd.f32 0.5, %v5037_v38  ;;  %v5011_v4 = vpop.f32.mrf.mxu2  ;;  %v5024_v8 = vpop.f32.mrf.mxu3 }
 0xa36   :  { %v9496_v23 = vpop.eup %9495  ;;  %5727 = vmatpush.bf16.msra.mxu3 %v10258_v13 }
 0xa37   :  { %v5043_v18 = vmul.f32 %v5040_v55, %v10222_v54  ;;  %v5044_v42 = vmul.f32 %v9496_v23, %v5039_v33  ;;  %5714 = vmatpush.bf16.msra.mxu2 %v10268_v48 }
 0xa38   :  { %v9498_v27 = vpop.eup %9497 }
 0xa39   :  { %v5045_v59 = vadd.f32 %v5044_v42, %v5043_v18  ;;  %v5038_v9 = vmul.f32 0.5, %v9498_v27 }
 0xa3a   :  { %5728 = vmatpush.bf16.msra.mxu3 %v10275_v35 }
 0xa3b   :  { %9499 = vtanh.f32 %v5045_v59  ;;  %v5041_v54 = vadd.f32 0.5, %v5038_v9  ;;  %5715 = vmatpush.bf16.msra.mxu2 %v10278_v10 }
 0xa3d   :  { %v5330_v57 = vpop.f32.mrf.mxu2  ;;  %v5359_v39 = vpop.f32.mrf.mxu3 }
 0xa3e   :  { %5729 = vmatpush.bf16.msra.mxu3 %v10287_v25 }
 0xa3f   :  { %5716 = vmatpush.bf16.msra.mxu2 %v10289_v50 }
 0xa41   :  { %v9500_v34 = vpop.eup %9499 }
 0xa42   :  { %v5047_v40 = vmul.f32 %v9500_v34, %v5041_v54  ;;  %5730 = vmatpush.bf16.msra.mxu3 %v10298_v41  ;;  %v5093_v54 = vld [vmem:[%s10730_s8] sm:$0xf] }
 0xa43   :  { %5717 = vmatpush.bf16.msra.mxu2 %v10301_v24 }
 0xa44   :  { %v5060_v20 = vpack.c.bf16 %v5047_v40, %v10225_v60  ;;  %v5301_v60 = vpop.f32.mrf.mxu1 }
 0xa45   :  { %v10413_v56 = vpop.f32.mrf.mxu2  ;;  %v10415_v21 = vpop.f32.mrf.mxu3 }
 0xa46   :  { %5286 = vmatmul.bf16.gmra.mxu0 %v5060_v20  ;;  %5315 = vmatmul.bf16.gmra.mxu1 %v5060_v20 }
 0xa47   :  { %5344 = vmatmul.bf16.gmra.mxu2 %v5060_v20  ;;  %5373 = vmatmul.bf16.gmra.mxu3 %v5060_v20  ;;  %v10464_v20 = vperm.slane %v5093_v54, 0 }
 0xa48   :  { %5718 = vmatpush.bf16.msra.mxu2 %v10318_v36  ;;  %5731 = vmatpush.bf16.msra.mxu3 %v10315_v30 }
 0xa4c   :  { %5719 = vmatpush.bf16.msra.mxu2 %v10334_v3  ;;  %5732 = vmatpush.bf16.msra.mxu3 %v10331_v29  ;;  %v10411_v52 = vpop.f32.mrf.mxu1 }
 0xa4d   :  { %v10421_v28 = vpop.f32.mrf.mxu2  ;;  %v10423_v32 = vpop.f32.mrf.mxu3 }
 0xa4e   :  { %10735 = vst [vmem:[#allocation16_spill] sm:$0xff] %v10421_v28 }
 0xa4f   :  { %10736 = vst [vmem:[#allocation17_spill] sm:$0xff] %v10423_v32 }
 0xa54   :  { %v10419_v47 = vpop.f32.mrf.mxu1 }
 0xa55   :  { %v10429_v14 = vpop.f32.mrf.mxu2  ;;  %v10431_v0 = vpop.f32.mrf.mxu3 }
 0xa56   :  { %5615 = vmatmul.bf16.vlgmr.msrb.gmra.mxu0 %v9714_v46  ;;  %5628 = vmatmul.bf16.vlgmr.msrb.gmra.mxu1 %v9714_v46  ;;  %10739 = vst [vmem:[#allocation20_spill] sm:$0xff] %v10429_v14 }
 0xa57   :  { %5641 = vmatmul.bf16.vlgmr.msrb.gmra.mxu2 %v9714_v46  ;;  %5654 = vmatmul.bf16.vlgmr.msrb.gmra.mxu3 %v9714_v46  ;;  %v5272_v46 = vpop.f32.mrf.mxu0  ;;  %10740 = vst [vmem:[#allocation21_spill] sm:$0xff] %v10431_v0 }
 0xa58   :  { %5765 = vmatpush.bf16.msrb.mxu0 %v10231_v49  ;;  %5778 = vmatpush.bf16.msrb.mxu1 %v10233_v43 }
 0xa59   :  { %5791 = vmatpush.bf16.msrb.mxu2 %v10238_v5  ;;  %5804 = vmatpush.bf16.msrb.mxu3 %v10235_v19 }
 0xa5c   :  { %5766 = vmatpush.bf16.msrb.mxu0 %v10242_v15  ;;  %5779 = vmatpush.bf16.msrb.mxu1 %v10244_v53  ;;  %v10427_v12 = vpop.f32.mrf.mxu1 }
 0xa5d   :  { %5792 = vmatpush.bf16.msrb.mxu2 %v10249_v44  ;;  %5805 = vmatpush.bf16.msrb.mxu3 %v10247_v7  ;;  %10738 = vst [vmem:[#allocation19_spill] sm:$0xff] %v10427_v12  ;;  %v10437_v33 = vpop.f32.mrf.mxu2  ;;  %v10439_v55 = vpop.f32.mrf.mxu3 }
 0xa5e   :  { %10743 = vst [vmem:[#allocation24_spill] sm:$0xff] %v10437_v33  ;;  %v10474_v33 = vperm.slane %v5093_v54, 2 }
 0xa5f   :  { %v10409_v2 = vpop.f32.mrf.mxu0  ;;  %10744 = vst [vmem:[#allocation25_spill] sm:$0xff] %v10439_v55 }
 0xa60   :  { %5767 = vmatpush.bf16.msrb.mxu0 %v10252_v58  ;;  %5780 = vmatpush.bf16.msrb.mxu1 %v10256_v45 }
 0xa61   :  { %5793 = vmatpush.bf16.msrb.mxu2 %v10268_v48  ;;  %5806 = vmatpush.bf16.msrb.mxu3 %v10258_v13 }
 0xa64   :  { %5768 = vmatpush.bf16.msrb.mxu0 %v10271_v1  ;;  %5781 = vmatpush.bf16.msrb.mxu1 %v10273_v11  ;;  %v10435_v38 = vpop.f32.mrf.mxu1 }
 0xa65   :  { %5794 = vmatpush.bf16.msrb.mxu2 %v10278_v10  ;;  %5807 = vmatpush.bf16.msrb.mxu3 %v10275_v35  ;;  %10742 = vst [vmem:[#allocation23_spill] sm:$0xff] %v10435_v38  ;;  %v10445_v23 = vpop.f32.mrf.mxu2  ;;  %v10447_v18 = vpop.f32.mrf.mxu3 }
 0xa66   :  { %10747 = vst [vmem:[#allocation28_spill] sm:$0xff] %v10445_v23  ;;  %v10466_v23 = vperm.slane %v5093_v54, 1 }
 0xa67   :  { %v10417_v17 = vpop.f32.mrf.mxu0  ;;  %10748 = vst [vmem:[#allocation29_spill] sm:$0xff] %v10447_v18 }
 0xa68   :  { %5769 = vmatpush.bf16.msrb.mxu0 %v10282_v51  ;;  %5782 = vmatpush.bf16.msrb.mxu1 %v10284_v37 }
 0xa69   :  { %5795 = vmatpush.bf16.msrb.mxu2 %v10289_v50  ;;  %5808 = vmatpush.bf16.msrb.mxu3 %v10287_v25 }
 0xa6c   :  { %5770 = vmatpush.bf16.msrb.mxu0 %v10292_v16  ;;  %5783 = vmatpush.bf16.msrb.mxu1 %v10296_v62  ;;  %v10443_v8 = vpop.f32.mrf.mxu1 }
 0xa6d   :  { %5796 = vmatpush.bf16.msrb.mxu2 %v10301_v24  ;;  %5809 = vmatpush.bf16.msrb.mxu3 %v10298_v41  ;;  %10746 = vst [vmem:[#allocation27_spill] sm:$0xff] %v10443_v8 }
 0xa6f   :  { %v10425_v26 = vpop.f32.mrf.mxu0 }
 0xa70   :  { %5771 = vmatpush.bf16.msrb.mxu0 %v10311_v6  ;;  %5784 = vmatpush.bf16.msrb.mxu1 %v10313_v61  ;;  %10737 = vst [vmem:[#allocation18_spill] sm:$0xff] %v10425_v26 }
 0xa71   :  { %5797 = vmatpush.bf16.msrb.mxu2 %v10318_v36  ;;  %5810 = vmatpush.bf16.msrb.mxu3 %v10315_v30 }
 0xa74   :  { %5772 = vmatpush.bf16.msrb.mxu0 %v10327_v22  ;;  %5785 = vmatpush.bf16.msrb.mxu1 %v10329_v31 }
 0xa75   :  { %5798 = vmatpush.bf16.msrb.mxu2 %v10334_v3  ;;  %5811 = vmatpush.bf16.msrb.mxu3 %v10331_v29 }
 0xa77   :  { %v10433_v63 = vpop.f32.mrf.mxu0 }
 0xa78   :  { %10741 = vst [vmem:[#allocation22_spill] sm:$0xff] %v10433_v63  ;;  %v5331_v63 = vadd.f32 %v5330_v57, %v10474_v33 }
 0xa7f   :  { %v10441_v4 = vpop.f32.mrf.mxu0 }
 0xa80   :  { %10745 = vst [vmem:[#allocation26_spill] sm:$0xff] %v10441_v4 }
 0xac3   :  { %v10449_v42 = vpop.f32.mrf.mxu0  ;;  %v10451_v27 = vpop.f32.mrf.mxu1 }
 0xac4   :  { %10749 = vst [vmem:[#allocation30_spill] sm:$0xff] %v10449_v42  ;;  %v5273_v42 = vadd.f32 %v5272_v46, %v10464_v20 }
 0xac5   :  { %10750 = vst [vmem:[#allocation31_spill] sm:$0xff] %v10451_v27  ;;  %v5302_v27 = vadd.f32 %v5301_v60, %v10466_v23 }
 0xaca   :  { %v10453_v59 = vpop.f32.mrf.mxu2  ;;  %v10455_v9 = vpop.f32.mrf.mxu3 }
 0xacb   :  { %10751 = vst [vmem:[#allocation32_spill] sm:$0xff] %v10453_v59  ;;  %v10460_v34 = vpop.f32.mrf.mxu0  ;;  %v10462_v40 = vpop.f32.mrf.mxu1 }
 0xacc   :  { %10752 = vst [vmem:[#allocation33_spill] sm:$0xff] %v10455_v9 }
 0xacd   :  { %10753 = vst [vmem:[#allocation34_spill] sm:$0xff] %v10460_v34  ;;  %v10476_v34 = vperm.slane %v5093_v54, 3 }
 0xace   :  { %10754 = vst [vmem:[#allocation35_spill] sm:$0xff] %v10462_v40 }
 0xacf   :  { %v5360_v46 = vadd.f32 %v5359_v39, %v10476_v34 }
 0xad2   :  { %v10470_v18 = vpop.f32.mrf.mxu2  ;;  %v10472_v59 = vpop.f32.mrf.mxu3 }
 0xad3   :  { %10755 = vst [vmem:[#allocation36_spill] sm:$0xff] %v10470_v18  ;;  %v5616_v9 = vpop.f32.mrf.mxu0  ;;  %v5629_v8 = vpop.f32.mrf.mxu1 }
 0xad4   :  { %10756 = vst [vmem:[#allocation37_spill] sm:$0xff] %v10472_v59  ;;  %v5659_v4 = vadd.f32 %v5616_v9, %v5273_v42  ;;  %v5660_v55 = vadd.f32 %v5629_v8, %v5302_v27 }
 0xad6   :  { %v5663_v40 = vmul.f32 0.5, %v5659_v4  ;;  %v5664_v38 = vmul.f32 0.5, %v5660_v55 }
 0xad8   :  { %9501 = vtanh.f32 %v5663_v40 }
 0xad9   :  { %9503 = vtanh.f32 %v5664_v38 }
 0xada   :  { %v5642_v60 = vpop.f32.mrf.mxu2  ;;  %v5655_v18 = vpop.f32.mrf.mxu3 }
 0xadb   :  { %v5661_v0 = vadd.f32 %v5642_v60, %v5331_v63  ;;  %v5662_v59 = vadd.f32 %v5655_v18, %v5360_v46  ;;  %v5618_v14 = vpop.f32.mrf.mxu0  ;;  %v5631_v12 = vpop.f32.mrf.mxu1 }
 0xadd   :  { %v5665_v42 = vmul.f32 0.5, %v5661_v0  ;;  %9505 = vtanh.f32 %v5662_v59 }
 0xade   :  { %v9502_v8 = vpop.eup %9501 }
 0xadf   :  { %v9504_v27 = vpop.eup %9503  ;;  %v5669_v9 = vmul.f32 0.5, %v9502_v8  ;;  %9507 = vtanh.f32 %v5665_v42 }
 0xae0   :  { %v5670_v54 = vmul.f32 0.5, %v9504_v27 }
 0xae1   :  { %v5672_v55 = vadd.f32 0.5, %v5669_v9  ;;  %v5333_v9 = vadd.f32 %v10413_v56, %v10474_v33 }
 0xae2   :  { %v5673_v4 = vadd.f32 0.5, %v5670_v54  ;;  %v5644_v40 = vpop.f32.mrf.mxu2  ;;  %v5657_v57 = vpop.f32.mrf.mxu3  ;;  %v5362_v54 = vadd.f32 %v10415_v21, %v10476_v34 }
 0xae3   :  { %v9506_v26 = vpop.eup %9505 }
 0xae4   :  { %v5676_v39 = vmul.f32 0.0, %v5673_v4  ;;  %v5677_v38 = vmul.f32 %v9506_v26, %v5672_v55  ;;  %v5304_v26 = vadd.f32 %v10411_v52, %v10466_v23 }
 0xae5   :  { %v9508_v32 = vpop.eup %9507 }
 0xae6   :  { %v10480_v28 = vadd.f32 %v5677_v38, %v5676_v39  ;;  %v5671_v12 = vmul.f32 0.5, %v9508_v32  ;;  %v5275_v32 = vadd.f32 %v10409_v2, %v10464_v20 }
 0xae8   :  { %9509 = vtanh.f32 %v10480_v28  ;;  %v5674_v14 = vadd.f32 0.5, %v5671_v12 }
 0xaee   :  { %v9510_v0 = vpop.eup %9509 }
 0xaef   :  { %v5680_v63 = vmul.f32 %v9510_v0, %v5674_v14 }
 0xaf1   :  { %v5685_v18 = vpack.c.bf16 %v5680_v63, %v5680_v63 }
 0xaf3   :  { %5694 = vmatmul.bf16.vlgmr.msra.gmra.mxu0 %v5685_v18  ;;  %5707 = vmatmul.bf16.vlgmr.msra.gmra.mxu1 %v5685_v18 }
 0xaf4   :  { %5720 = vmatmul.bf16.vlgmr.msra.gmra.mxu2 %v5685_v18  ;;  %5733 = vmatmul.bf16.vlgmr.msra.gmra.mxu3 %v5685_v18 }
 0xaf5   :  { %5844 = vmatpush.bf16.msra.mxu0 %v10231_v49  ;;  %5857 = vmatpush.bf16.msra.mxu1 %v10233_v43 }
 0xaf6   :  { %5870 = vmatpush.bf16.msra.mxu2 %v10238_v5  ;;  %5883 = vmatpush.bf16.msra.mxu3 %v10235_v19 }
 0xaf9   :  { %5845 = vmatpush.bf16.msra.mxu0 %v10242_v15  ;;  %5858 = vmatpush.bf16.msra.mxu1 %v10244_v53 }
 0xafa   :  { %5871 = vmatpush.bf16.msra.mxu2 %v10249_v44  ;;  %5884 = vmatpush.bf16.msra.mxu3 %v10247_v7 }
 0xafd   :  { %5846 = vmatpush.bf16.msra.mxu0 %v10252_v58  ;;  %5859 = vmatpush.bf16.msra.mxu1 %v10256_v45 }
 0xafe   :  { %5872 = vmatpush.bf16.msra.mxu2 %v10268_v48  ;;  %5885 = vmatpush.bf16.msra.mxu3 %v10258_v13 }
 0xb01   :  { %5847 = vmatpush.bf16.msra.mxu0 %v10271_v1  ;;  %5860 = vmatpush.bf16.msra.mxu1 %v10273_v11 }
 0xb02   :  { %5873 = vmatpush.bf16.msra.mxu2 %v10278_v10  ;;  %5886 = vmatpush.bf16.msra.mxu3 %v10275_v35 }
 0xb05   :  { %5848 = vmatpush.bf16.msra.mxu0 %v10282_v51  ;;  %5861 = vmatpush.bf16.msra.mxu1 %v10284_v37 }
 0xb06   :  { %5874 = vmatpush.bf16.msra.mxu2 %v10289_v50  ;;  %5887 = vmatpush.bf16.msra.mxu3 %v10287_v25 }
 0xb09   :  { %5849 = vmatpush.bf16.msra.mxu0 %v10292_v16  ;;  %5862 = vmatpush.bf16.msra.mxu1 %v10296_v62 }
 0xb0a   :  { %5875 = vmatpush.bf16.msra.mxu2 %v10301_v24  ;;  %5888 = vmatpush.bf16.msra.mxu3 %v10298_v41 }
 0xb0d   :  { %5850 = vmatpush.bf16.msra.mxu0 %v10311_v6  ;;  %5863 = vmatpush.bf16.msra.mxu1 %v10313_v61 }
 0xb0e   :  { %5876 = vmatpush.bf16.msra.mxu2 %v10318_v36  ;;  %5889 = vmatpush.bf16.msra.mxu3 %v10315_v30 }
 0xb11   :  { %5851 = vmatpush.bf16.msra.mxu0 %v10327_v22  ;;  %5864 = vmatpush.bf16.msra.mxu1 %v10329_v31 }
 0xb12   :  { %5877 = vmatpush.bf16.msra.mxu2 %v10334_v3  ;;  %5890 = vmatpush.bf16.msra.mxu3 %v10331_v29 }
 0xb70   :  { %v5695_v59 = vpop.f32.mrf.mxu0  ;;  %v5708_v46 = vpop.f32.mrf.mxu1 }
 0xb71   :  { %v5738_v60 = vadd.f32 %v5695_v59, %v5275_v32  ;;  %v5739_v42 = vadd.f32 %v5708_v46, %v5304_v26 }
 0xb73   :  { %v5742_v8 = vmul.f32 0.5, %v5738_v60  ;;  %v5743_v27 = vmul.f32 0.5, %v5739_v42 }
 0xb75   :  { %9511 = vtanh.f32 %v5742_v8 }
 0xb76   :  { %9513 = vtanh.f32 %v5743_v27 }
 0xb77   :  { %v5721_v55 = vpop.f32.mrf.mxu2  ;;  %v5734_v4 = vpop.f32.mrf.mxu3 }
 0xb78   :  { %v5740_v2 = vadd.f32 %v5721_v55, %v5333_v9  ;;  %v5741_v40 = vadd.f32 %v5734_v4, %v5362_v54  ;;  %v5697_v57 = vpop.f32.mrf.mxu0  ;;  %v5710_v52 = vpop.f32.mrf.mxu1  ;;  %v5307_v55 = vadd.f32 %v10419_v47, %v10466_v23 }
 0xb7a   :  { %v5744_v39 = vmul.f32 0.5, %v5740_v2  ;;  %9515 = vtanh.f32 %v5741_v40 }
 0xb7b   :  { %v9512_v38 = vpop.eup %9511 }
 0xb7c   :  { %v9514_v12 = vpop.eup %9513  ;;  %v5748_v14 = vmul.f32 0.5, %v9512_v38  ;;  %9517 = vtanh.f32 %v5744_v39  ;;  %v10757_v38 = vld [vmem:[#allocation16_spill] sm:$0xff] }
 0xb7d   :  { %v5749_v0 = vmul.f32 0.5, %v9514_v12  ;;  %v5336_v12 = vadd.f32 %v10757_v38, %v10474_v33 }
 0xb7e   :  { %v5751_v63 = vadd.f32 0.5, %v5748_v14  ;;  %v10758_v14 = vld [vmem:[#allocation17_spill] sm:$0xff] }
 0xb7f   :  { %v5752_v18 = vadd.f32 0.5, %v5749_v0  ;;  %v5723_v56 = vpop.f32.mrf.mxu2  ;;  %v5736_v32 = vpop.f32.mrf.mxu3  ;;  %v5365_v0 = vadd.f32 %v10758_v14, %v10476_v34 }
 0xb80   :  { %v9516_v26 = vpop.eup %9515 }
 0xb81   :  { %v5755_v21 = vmul.f32 %v5752_v18, %v10480_v28  ;;  %v5756_v59 = vmul.f32 %v9516_v26, %v5751_v63  ;;  %v5278_v28 = vadd.f32 %v10417_v17, %v10464_v20 }
 0xb82   :  { %v9518_v46 = vpop.eup %9517 }
 0xb83   :  { %v10524_v60 = vadd.f32 %v5756_v59, %v5755_v21  ;;  %v5750_v42 = vmul.f32 0.5, %v9518_v46 }
 0xb85   :  { %9519 = vtanh.f32 %v10524_v60  ;;  %v5753_v8 = vadd.f32 0.5, %v5750_v42 }
 0xb8b   :  { %v9520_v27 = vpop.eup %9519 }
 0xb8c   :  { %v5759_v9 = vmul.f32 %v9520_v27, %v5753_v8 }
 0xb8e   :  { %v5764_v54 = vpack.c.bf16 %v5759_v9, %v5759_v9 }
 0xb90   :  { %5773 = vmatmul.bf16.vlgmr.msrb.gmra.mxu0 %v5764_v54  ;;  %5786 = vmatmul.bf16.vlgmr.msrb.gmra.mxu1 %v5764_v54 }
 0xb91   :  { %5799 = vmatmul.bf16.vlgmr.msrb.gmra.mxu2 %v5764_v54  ;;  %5812 = vmatmul.bf16.vlgmr.msrb.gmra.mxu3 %v5764_v54 }
 0xb92   :  { %5923 = vmatpush.bf16.msrb.mxu0 %v10231_v49  ;;  %5936 = vmatpush.bf16.msrb.mxu1 %v10233_v43 }
 0xb93   :  { %5949 = vmatpush.bf16.msrb.mxu2 %v10238_v5  ;;  %5962 = vmatpush.bf16.msrb.mxu3 %v10235_v19 }
 0xb96   :  { %5924 = vmatpush.bf16.msrb.mxu0 %v10242_v15  ;;  %5937 = vmatpush.bf16.msrb.mxu1 %v10244_v53 }
 0xb97   :  { %5950 = vmatpush.bf16.msrb.mxu2 %v10249_v44  ;;  %5963 = vmatpush.bf16.msrb.mxu3 %v10247_v7 }
 0xb9a   :  { %5925 = vmatpush.bf16.msrb.mxu0 %v10252_v58  ;;  %5938 = vmatpush.bf16.msrb.mxu1 %v10256_v45 }
 0xb9b   :  { %5951 = vmatpush.bf16.msrb.mxu2 %v10268_v48  ;;  %5964 = vmatpush.bf16.msrb.mxu3 %v10258_v13 }
 0xb9e   :  { %5926 = vmatpush.bf16.msrb.mxu0 %v10271_v1  ;;  %5939 = vmatpush.bf16.msrb.mxu1 %v10273_v11 }
 0xb9f   :  { %5952 = vmatpush.bf16.msrb.mxu2 %v10278_v10  ;;  %5965 = vmatpush.bf16.msrb.mxu3 %v10275_v35 }
 0xba2   :  { %5927 = vmatpush.bf16.msrb.mxu0 %v10282_v51  ;;  %5940 = vmatpush.bf16.msrb.mxu1 %v10284_v37 }
 0xba3   :  { %5953 = vmatpush.bf16.msrb.mxu2 %v10289_v50  ;;  %5966 = vmatpush.bf16.msrb.mxu3 %v10287_v25 }
 0xba6   :  { %5928 = vmatpush.bf16.msrb.mxu0 %v10292_v16  ;;  %5941 = vmatpush.bf16.msrb.mxu1 %v10296_v62 }
 0xba7   :  { %5954 = vmatpush.bf16.msrb.mxu2 %v10301_v24  ;;  %5967 = vmatpush.bf16.msrb.mxu3 %v10298_v41 }
 0xbaa   :  { %5929 = vmatpush.bf16.msrb.mxu0 %v10311_v6  ;;  %5942 = vmatpush.bf16.msrb.mxu1 %v10313_v61 }
 0xbab   :  { %5955 = vmatpush.bf16.msrb.mxu2 %v10318_v36  ;;  %5968 = vmatpush.bf16.msrb.mxu3 %v10315_v30 }
 0xbae   :  { %5930 = vmatpush.bf16.msrb.mxu0 %v10327_v22  ;;  %5943 = vmatpush.bf16.msrb.mxu1 %v10329_v31 }
 0xbaf   :  { %5956 = vmatpush.bf16.msrb.mxu2 %v10334_v3  ;;  %5969 = vmatpush.bf16.msrb.mxu3 %v10331_v29 }
 0xc0d   :  { %v5774_v4 = vpop.f32.mrf.mxu0  ;;  %v5787_v2 = vpop.f32.mrf.mxu1 }
 0xc0e   :  { %v5817_v40 = vadd.f32 %v5774_v4, %v5278_v28  ;;  %v5818_v57 = vadd.f32 %v5787_v2, %v5307_v55 }
 0xc10   :  { %v5821_v52 = vmul.f32 0.5, %v5817_v40  ;;  %v5822_v39 = vmul.f32 0.5, %v5818_v57 }
 0xc12   :  { %9521 = vtanh.f32 %v5821_v52 }
 0xc13   :  { %9523 = vtanh.f32 %v5822_v39 }
 0xc14   :  { %v5800_v63 = vpop.f32.mrf.mxu2  ;;  %v5813_v18 = vpop.f32.mrf.mxu3 }
 0xc15   :  { %v5819_v17 = vadd.f32 %v5800_v63, %v5336_v12  ;;  %v5820_v56 = vadd.f32 %v5813_v18, %v5365_v0  ;;  %v5776_v32 = vpop.f32.mrf.mxu0  ;;  %v5789_v47 = vpop.f32.mrf.mxu1  ;;  %v10760_v0 = vld [vmem:[#allocation19_spill] sm:$0xff] }
 0xc16   :  { %v5309_v63 = vadd.f32 %v10760_v0, %v10466_v23 }
 0xc17   :  { %v5823_v26 = vmul.f32 0.5, %v5819_v17  ;;  %9525 = vtanh.f32 %v5820_v56 }
 0xc18   :  { %v9522_v21 = vpop.eup %9521 }
 0xc19   :  { %v9524_v59 = vpop.eup %9523  ;;  %v5827_v46 = vmul.f32 0.5, %v9522_v21  ;;  %9527 = vtanh.f32 %v5823_v26  ;;  %v10761_v21 = vld [vmem:[#allocation20_spill] sm:$0xff] }
 0xc1a   :  { %v5828_v42 = vmul.f32 0.5, %v9524_v59  ;;  %v5338_v59 = vadd.f32 %v10761_v21, %v10474_v33 }
 0xc1b   :  { %v5830_v8 = vadd.f32 0.5, %v5827_v46  ;;  %v10762_v46 = vld [vmem:[#allocation21_spill] sm:$0xff] }
 0xc1c   :  { %v5831_v27 = vadd.f32 0.5, %v5828_v42  ;;  %v5802_v9 = vpop.f32.mrf.mxu2  ;;  %v5815_v54 = vpop.f32.mrf.mxu3  ;;  %v5367_v42 = vadd.f32 %v10762_v46, %v10476_v34 }
 0xc1d   :  { %v9526_v28 = vpop.eup %9525 }
 0xc1e   :  { %v5834_v55 = vmul.f32 %v5831_v27, %v10524_v60  ;;  %v5835_v4 = vmul.f32 %v9526_v28, %v5830_v8  ;;  %v10759_v60 = vld [vmem:[#allocation18_spill] sm:$0xff] }
 0xc1f   :  { %v9528_v2 = vpop.eup %9527  ;;  %v5280_v14 = vadd.f32 %v10759_v60, %v10464_v20 }
 0xc20   :  { %v10568_v40 = vadd.f32 %v5835_v4, %v5834_v55  ;;  %v5829_v57 = vmul.f32 0.5, %v9528_v2 }
 0xc22   :  { %9529 = vtanh.f32 %v10568_v40  ;;  %v5832_v52 = vadd.f32 0.5, %v5829_v57 }
 0xc28   :  { %v9530_v39 = vpop.eup %9529 }
 0xc29   :  { %v5838_v38 = vmul.f32 %v9530_v39, %v5832_v52 }
 0xc2b   :  { %v5843_v12 = vpack.c.bf16 %v5838_v38, %v5838_v38 }
 0xc2d   :  { %5852 = vmatmul.bf16.vlgmr.msra.gmra.mxu0 %v5843_v12  ;;  %5865 = vmatmul.bf16.vlgmr.msra.gmra.mxu1 %v5843_v12 }
 0xc2e   :  { %5878 = vmatmul.bf16.vlgmr.msra.gmra.mxu2 %v5843_v12  ;;  %5891 = vmatmul.bf16.vlgmr.msra.gmra.mxu3 %v5843_v12 }
 0xc2f   :  { %6002 = vmatpush.bf16.msra.mxu0 %v10231_v49  ;;  %6015 = vmatpush.bf16.msra.mxu1 %v10233_v43 }
 0xc30   :  { %6028 = vmatpush.bf16.msra.mxu2 %v10238_v5  ;;  %6041 = vmatpush.bf16.msra.mxu3 %v10235_v19 }
 0xc33   :  { %6003 = vmatpush.bf16.msra.mxu0 %v10242_v15  ;;  %6016 = vmatpush.bf16.msra.mxu1 %v10244_v53 }
 0xc34   :  { %6029 = vmatpush.bf16.msra.mxu2 %v10249_v44  ;;  %6042 = vmatpush.bf16.msra.mxu3 %v10247_v7 }
 0xc37   :  { %6004 = vmatpush.bf16.msra.mxu0 %v10252_v58  ;;  %6017 = vmatpush.bf16.msra.mxu1 %v10256_v45 }
 0xc38   :  { %6030 = vmatpush.bf16.msra.mxu2 %v10268_v48  ;;  %6043 = vmatpush.bf16.msra.mxu3 %v10258_v13 }
 0xc3b   :  { %6005 = vmatpush.bf16.msra.mxu0 %v10271_v1  ;;  %6018 = vmatpush.bf16.msra.mxu1 %v10273_v11 }
 0xc3c   :  { %6031 = vmatpush.bf16.msra.mxu2 %v10278_v10  ;;  %6044 = vmatpush.bf16.msra.mxu3 %v10275_v35 }
 0xc3f   :  { %6006 = vmatpush.bf16.msra.mxu0 %v10282_v51  ;;  %6019 = vmatpush.bf16.msra.mxu1 %v10284_v37 }
 0xc40   :  { %6032 = vmatpush.bf16.msra.mxu2 %v10289_v50  ;;  %6045 = vmatpush.bf16.msra.mxu3 %v10287_v25 }
 0xc43   :  { %6007 = vmatpush.bf16.msra.mxu0 %v10292_v16  ;;  %6020 = vmatpush.bf16.msra.mxu1 %v10296_v62 }
 0xc44   :  { %6033 = vmatpush.bf16.msra.mxu2 %v10301_v24  ;;  %6046 = vmatpush.bf16.msra.mxu3 %v10298_v41 }
 0xc47   :  { %6008 = vmatpush.bf16.msra.mxu0 %v10311_v6  ;;  %6021 = vmatpush.bf16.msra.mxu1 %v10313_v61 }
 0xc48   :  { %6034 = vmatpush.bf16.msra.mxu2 %v10318_v36  ;;  %6047 = vmatpush.bf16.msra.mxu3 %v10315_v30 }
 0xc4b   :  { %6009 = vmatpush.bf16.msra.mxu0 %v10327_v22  ;;  %6022 = vmatpush.bf16.msra.mxu1 %v10329_v31 }
 0xc4c   :  { %6035 = vmatpush.bf16.msra.mxu2 %v10334_v3  ;;  %6048 = vmatpush.bf16.msra.mxu3 %v10331_v29 }
 0xcaa   :  { %v5853_v18 = vpop.f32.mrf.mxu0  ;;  %v5866_v17 = vpop.f32.mrf.mxu1 }
 0xcab   :  { %v5896_v56 = vadd.f32 %v5853_v18, %v5280_v14  ;;  %v5897_v32 = vadd.f32 %v5866_v17, %v5309_v63 }
 0xcad   :  { %v5900_v47 = vmul.f32 0.5, %v5896_v56  ;;  %v5901_v26 = vmul.f32 0.5, %v5897_v32 }
 0xcaf   :  { %9531 = vtanh.f32 %v5900_v47 }
 0xcb0   :  { %9533 = vtanh.f32 %v5901_v26 }
 0xcb1   :  { %v5879_v8 = vpop.f32.mrf.mxu2  ;;  %v5892_v27 = vpop.f32.mrf.mxu3 }
 0xcb2   :  { %v5898_v9 = vadd.f32 %v5879_v8, %v5338_v59  ;;  %v5899_v54 = vadd.f32 %v5892_v27, %v5367_v42  ;;  %v5855_v28 = vpop.f32.mrf.mxu0  ;;  %v5868_v55 = vpop.f32.mrf.mxu1  ;;  %v10764_v42 = vld [vmem:[#allocation23_spill] sm:$0xff] }
 0xcb3   :  { %v5312_v8 = vadd.f32 %v10764_v42, %v10466_v23 }
 0xcb4   :  { %v5902_v4 = vmul.f32 0.5, %v5898_v9  ;;  %9535 = vtanh.f32 %v5899_v54 }
 0xcb5   :  { %v9532_v2 = vpop.eup %9531 }
 0xcb6   :  { %v9534_v57 = vpop.eup %9533  ;;  %v5906_v52 = vmul.f32 0.5, %v9532_v2  ;;  %9537 = vtanh.f32 %v5902_v4  ;;  %v10765_v2 = vld [vmem:[#allocation24_spill] sm:$0xff] }
 0xcb7   :  { %v5907_v39 = vmul.f32 0.5, %v9534_v57  ;;  %v5341_v57 = vadd.f32 %v10765_v2, %v10474_v33 }
 0xcb8   :  { %v5909_v38 = vadd.f32 0.5, %v5906_v52  ;;  %v10766_v52 = vld [vmem:[#allocation25_spill] sm:$0xff] }
 0xcb9   :  { %v5910_v12 = vadd.f32 0.5, %v5907_v39  ;;  %v5881_v60 = vpop.f32.mrf.mxu2  ;;  %v5894_v14 = vpop.f32.mrf.mxu3  ;;  %v5370_v39 = vadd.f32 %v10766_v52, %v10476_v34 }
 0xcba   :  { %v9536_v0 = vpop.eup %9535 }
 0xcbb   :  { %v5913_v63 = vmul.f32 %v5910_v12, %v10568_v40  ;;  %v5914_v18 = vmul.f32 %v9536_v0, %v5909_v38  ;;  %v10763_v40 = vld [vmem:[#allocation22_spill] sm:$0xff] }
 0xcbc   :  { %v9538_v17 = vpop.eup %9537  ;;  %v5283_v46 = vadd.f32 %v10763_v40, %v10464_v20 }
 0xcbd   :  { %v10612_v56 = vadd.f32 %v5914_v18, %v5913_v63  ;;  %v5908_v32 = vmul.f32 0.5, %v9538_v17 }
 0xcbf   :  { %9539 = vtanh.f32 %v10612_v56  ;;  %v5911_v47 = vadd.f32 0.5, %v5908_v32 }
 0xcc5   :  { %v9540_v26 = vpop.eup %9539 }
 0xcc6   :  { %v5917_v21 = vmul.f32 %v9540_v26, %v5911_v47 }
 0xcc8   :  { %v5922_v59 = vpack.c.bf16 %v5917_v21, %v5917_v21 }
 0xcca   :  { %5931 = vmatmul.bf16.vlgmr.msrb.gmra.mxu0 %v5922_v59  ;;  %5944 = vmatmul.bf16.vlgmr.msrb.gmra.mxu1 %v5922_v59 }
 0xccb   :  { %5957 = vmatmul.bf16.vlgmr.msrb.gmra.mxu2 %v5922_v59  ;;  %5970 = vmatmul.bf16.vlgmr.msrb.gmra.mxu3 %v5922_v59 }
 0xccc   :  { %6081 = vmatpush.bf16.msrb.mxu0 %v10231_v49  ;;  %6094 = vmatpush.bf16.msrb.mxu1 %v10233_v43 }
 0xccd   :  { %6107 = vmatpush.bf16.msrb.mxu2 %v10238_v5  ;;  %6120 = vmatpush.bf16.msrb.mxu3 %v10235_v19 }
 0xcd0   :  { %6082 = vmatpush.bf16.msrb.mxu0 %v10242_v15  ;;  %6095 = vmatpush.bf16.msrb.mxu1 %v10244_v53 }
 0xcd1   :  { %6108 = vmatpush.bf16.msrb.mxu2 %v10249_v44  ;;  %6121 = vmatpush.bf16.msrb.mxu3 %v10247_v7 }
 0xcd4   :  { %6083 = vmatpush.bf16.msrb.mxu0 %v10252_v58  ;;  %6096 = vmatpush.bf16.msrb.mxu1 %v10256_v45 }
 0xcd5   :  { %6109 = vmatpush.bf16.msrb.mxu2 %v10268_v48  ;;  %6122 = vmatpush.bf16.msrb.mxu3 %v10258_v13 }
 0xcd8   :  { %6084 = vmatpush.bf16.msrb.mxu0 %v10271_v1  ;;  %6097 = vmatpush.bf16.msrb.mxu1 %v10273_v11 }
 0xcd9   :  { %6110 = vmatpush.bf16.msrb.mxu2 %v10278_v10  ;;  %6123 = vmatpush.bf16.msrb.mxu3 %v10275_v35 }
 0xcdc   :  { %6085 = vmatpush.bf16.msrb.mxu0 %v10282_v51  ;;  %6098 = vmatpush.bf16.msrb.mxu1 %v10284_v37 }
 0xcdd   :  { %6111 = vmatpush.bf16.msrb.mxu2 %v10289_v50  ;;  %6124 = vmatpush.bf16.msrb.mxu3 %v10287_v25 }
 0xce0   :  { %6086 = vmatpush.bf16.msrb.mxu0 %v10292_v16  ;;  %6099 = vmatpush.bf16.msrb.mxu1 %v10296_v62 }
 0xce1   :  { %6112 = vmatpush.bf16.msrb.mxu2 %v10301_v24  ;;  %6125 = vmatpush.bf16.msrb.mxu3 %v10298_v41 }
 0xce4   :  { %6087 = vmatpush.bf16.msrb.mxu0 %v10311_v6  ;;  %6100 = vmatpush.bf16.msrb.mxu1 %v10313_v61 }
 0xce5   :  { %6113 = vmatpush.bf16.msrb.mxu2 %v10318_v36  ;;  %6126 = vmatpush.bf16.msrb.mxu3 %v10315_v30 }
 0xce8   :  { %6088 = vmatpush.bf16.msrb.mxu0 %v10327_v22  ;;  %6101 = vmatpush.bf16.msrb.mxu1 %v10329_v31 }
 0xce9   :  { %6114 = vmatpush.bf16.msrb.mxu2 %v10334_v3  ;;  %6127 = vmatpush.bf16.msrb.mxu3 %v10331_v29 }
 0xd47   :  { %v5932_v27 = vpop.f32.mrf.mxu0  ;;  %v5945_v9 = vpop.f32.mrf.mxu1 }
 0xd48   :  { %v5975_v54 = vadd.f32 %v5932_v27, %v5283_v46  ;;  %v5976_v28 = vadd.f32 %v5945_v9, %v5312_v8 }
 0xd4a   :  { %v5979_v55 = vmul.f32 0.5, %v5975_v54  ;;  %v5980_v4 = vmul.f32 0.5, %v5976_v28 }
 0xd4c   :  { %9541 = vtanh.f32 %v5979_v55 }
 0xd4d   :  { %9543 = vtanh.f32 %v5980_v4 }
 0xd4e   :  { %v5958_v38 = vpop.f32.mrf.mxu2  ;;  %v5971_v12 = vpop.f32.mrf.mxu3 }
 0xd4f   :  { %v5977_v60 = vadd.f32 %v5958_v38, %v5341_v57  ;;  %v5978_v14 = vadd.f32 %v5971_v12, %v5370_v39  ;;  %v5934_v0 = vpop.f32.mrf.mxu0  ;;  %v5947_v63 = vpop.f32.mrf.mxu1 }
 0xd50   :  { %v10771_v0 = vld [vmem:[#allocation30_spill] sm:$0xff] }
 0xd51   :  { %v5981_v18 = vmul.f32 0.5, %v5977_v60  ;;  %9545 = vtanh.f32 %v5978_v14  ;;  %v5288_v63 = vadd.f32 %v10771_v0, %v10464_v20 }
 0xd52   :  { %v9542_v17 = vpop.eup %9541 }
 0xd53   :  { %v9544_v32 = vpop.eup %9543  ;;  %v5985_v47 = vmul.f32 0.5, %v9542_v17  ;;  %9547 = vtanh.f32 %v5981_v18  ;;  %v10772_v18 = vld [vmem:[#allocation31_spill] sm:$0xff] }
 0xd54   :  { %v5986_v26 = vmul.f32 0.5, %v9544_v32  ;;  %v5317_v17 = vadd.f32 %v10772_v18, %v10466_v23 }
 0xd55   :  { %v5988_v21 = vadd.f32 0.5, %v5985_v47 }
 0xd56   :  { %v5989_v59 = vadd.f32 0.5, %v5986_v26  ;;  %v5960_v40 = vpop.f32.mrf.mxu2  ;;  %v5973_v46 = vpop.f32.mrf.mxu3 }
 0xd57   :  { %v9546_v42 = vpop.eup %9545  ;;  %v10773_v46 = vld [vmem:[#allocation32_spill] sm:$0xff] }
 0xd58   :  { %v5992_v8 = vmul.f32 %v5989_v59, %v10612_v56  ;;  %v5993_v27 = vmul.f32 %v9546_v42, %v5988_v21  ;;  %v5346_v42 = vadd.f32 %v10773_v46, %v10474_v33 }
 0xd59   :  { %v9548_v9 = vpop.eup %9547 }
 0xd5a   :  { %v10656_v54 = vadd.f32 %v5993_v27, %v5992_v8  ;;  %v5987_v28 = vmul.f32 0.5, %v9548_v9  ;;  %v10774_v8 = vld [vmem:[#allocation33_spill] sm:$0xff] }
 0xd5b   :  { %v5375_v27 = vadd.f32 %v10774_v8, %v10476_v34 }
 0xd5c   :  { %9549 = vtanh.f32 %v10656_v54  ;;  %v5990_v55 = vadd.f32 0.5, %v5987_v28 }
 0xd62   :  { %v9550_v4 = vpop.eup %9549 }
 0xd63   :  { %v5996_v2 = vmul.f32 %v9550_v4, %v5990_v55 }
 0xd65   :  { %v6001_v57 = vpack.c.bf16 %v5996_v2, %v5996_v2 }
 0xd67   :  { %6010 = vmatmul.bf16.vlgmr.msra.gmra.mxu0 %v6001_v57  ;;  %6023 = vmatmul.bf16.vlgmr.msra.gmra.mxu1 %v6001_v57 }
 0xd68   :  { %6036 = vmatmul.bf16.vlgmr.msra.gmra.mxu2 %v6001_v57  ;;  %6049 = vmatmul.bf16.vlgmr.msra.gmra.mxu3 %v6001_v57 }
 0xd69   :  { %6160 = vmatpush.bf16.msra.mxu0 %v10231_v49  ;;  %6173 = vmatpush.bf16.msra.mxu1 %v10233_v43  ;;  %v10767_v49 = vld [vmem:[#allocation26_spill] sm:$0xff] }
 0xd6a   :  { %6186 = vmatpush.bf16.msra.mxu2 %v10238_v5  ;;  %6199 = vmatpush.bf16.msra.mxu3 %v10235_v19  ;;  %v5285_v43 = vadd.f32 %v10767_v49, %v10464_v20  ;;  %v10768_v19 = vld [vmem:[#allocation27_spill] sm:$0xff] }
 0xd6b   :  { %v5314_v5 = vadd.f32 %v10768_v19, %v10466_v23 }
 0xd6d   :  { %6161 = vmatpush.bf16.msra.mxu0 %v10242_v15  ;;  %6174 = vmatpush.bf16.msra.mxu1 %v10244_v53 }
 0xd6e   :  { %6187 = vmatpush.bf16.msra.mxu2 %v10249_v44  ;;  %6200 = vmatpush.bf16.msra.mxu3 %v10247_v7 }
 0xd71   :  { %6162 = vmatpush.bf16.msra.mxu0 %v10252_v58  ;;  %6175 = vmatpush.bf16.msra.mxu1 %v10256_v45 }
 0xd72   :  { %6188 = vmatpush.bf16.msra.mxu2 %v10268_v48  ;;  %6201 = vmatpush.bf16.msra.mxu3 %v10258_v13  ;;  %v10769_v13 = vld [vmem:[#allocation28_spill] sm:$0xff] }
 0xd73   :  { %v5343_v48 = vadd.f32 %v10769_v13, %v10474_v33 }
 0xd75   :  { %6163 = vmatpush.bf16.msra.mxu0 %v10271_v1  ;;  %6176 = vmatpush.bf16.msra.mxu1 %v10273_v11  ;;  %v10770_v1 = vld [vmem:[#allocation29_spill] sm:$0xff] }
 0xd76   :  { %6189 = vmatpush.bf16.msra.mxu2 %v10278_v10  ;;  %6202 = vmatpush.bf16.msra.mxu3 %v10275_v35  ;;  %v5372_v11 = vadd.f32 %v10770_v1, %v10476_v34 }
 0xd79   :  { %6164 = vmatpush.bf16.msra.mxu0 %v10282_v51  ;;  %6177 = vmatpush.bf16.msra.mxu1 %v10284_v37 }
 0xd7a   :  { %6190 = vmatpush.bf16.msra.mxu2 %v10289_v50  ;;  %6203 = vmatpush.bf16.msra.mxu3 %v10287_v25 }
 0xd7d   :  { %6165 = vmatpush.bf16.msra.mxu0 %v10292_v16  ;;  %6178 = vmatpush.bf16.msra.mxu1 %v10296_v62 }
 0xd7e   :  { %6191 = vmatpush.bf16.msra.mxu2 %v10301_v24  ;;  %6204 = vmatpush.bf16.msra.mxu3 %v10298_v41 }
 0xd81   :  { %6166 = vmatpush.bf16.msra.mxu0 %v10311_v6  ;;  %6179 = vmatpush.bf16.msra.mxu1 %v10313_v61 }
 0xd82   :  { %6192 = vmatpush.bf16.msra.mxu2 %v10318_v36  ;;  %6205 = vmatpush.bf16.msra.mxu3 %v10315_v30 }
 0xd85   :  { %6167 = vmatpush.bf16.msra.mxu0 %v10327_v22  ;;  %6180 = vmatpush.bf16.msra.mxu1 %v10329_v31 }
 0xd86   :  { %6193 = vmatpush.bf16.msra.mxu2 %v10334_v3  ;;  %6206 = vmatpush.bf16.msra.mxu3 %v10331_v29 }
 0xde4   :  { %v6011_v15 = vpop.f32.mrf.mxu0  ;;  %v6024_v53 = vpop.f32.mrf.mxu1 }
 0xde5   :  { %v6054_v7 = vadd.f32 %v6011_v15, %v5285_v43  ;;  %v6055_v44 = vadd.f32 %v6024_v53, %v5314_v5 }
 0xde7   :  { %v6058_v58 = vmul.f32 0.5, %v6054_v7  ;;  %v6059_v45 = vmul.f32 0.5, %v6055_v44 }
 0xde9   :  { %9551 = vtanh.f32 %v6058_v58 }
 0xdea   :  { %9553 = vtanh.f32 %v6059_v45 }
 0xdeb   :  { %v6037_v35 = vpop.f32.mrf.mxu2  ;;  %v6050_v10 = vpop.f32.mrf.mxu3 }
 0xdec   :  { %v6056_v51 = vadd.f32 %v6037_v35, %v5343_v48  ;;  %v6057_v37 = vadd.f32 %v6050_v10, %v5372_v11  ;;  %v6013_v25 = vpop.f32.mrf.mxu0  ;;  %v6026_v50 = vpop.f32.mrf.mxu1 }
 0xded   :  { %v10775_v25 = vld [vmem:[#allocation34_spill] sm:$0xff] }
 0xdee   :  { %v6060_v16 = vmul.f32 0.5, %v6056_v51  ;;  %9555 = vtanh.f32 %v6057_v37  ;;  %v5290_v50 = vadd.f32 %v10775_v25, %v10464_v20 }
 0xdef   :  { %v9552_v62 = vpop.eup %9551 }
 0xdf0   :  { %v9554_v41 = vpop.eup %9553  ;;  %v6064_v24 = vmul.f32 0.5, %v9552_v62  ;;  %9557 = vtanh.f32 %v6060_v16  ;;  %v10776_v16 = vld [vmem:[#allocation35_spill] sm:$0xff] }
 0xdf1   :  { %v6065_v6 = vmul.f32 0.5, %v9554_v41  ;;  %v5319_v62 = vadd.f32 %v10776_v16, %v10466_v23 }
 0xdf2   :  { %v6067_v61 = vadd.f32 0.5, %v6064_v24 }
 0xdf3   :  { %v6068_v30 = vadd.f32 0.5, %v6065_v6  ;;  %v6039_v36 = vpop.f32.mrf.mxu2  ;;  %v6052_v22 = vpop.f32.mrf.mxu3 }
 0xdf4   :  { %v9556_v31 = vpop.eup %9555  ;;  %v10777_v22 = vld [vmem:[#allocation36_spill] sm:$0xff] }
 0xdf5   :  { %v6071_v29 = vmul.f32 %v6068_v30, %v10656_v54  ;;  %v6072_v3 = vmul.f32 %v9556_v31, %v6067_v61  ;;  %v5348_v31 = vadd.f32 %v10777_v22, %v10474_v33 }
 0xdf6   :  { %v9558_v56 = vpop.eup %9557 }
 0xdf7   :  { %v6073_v52 = vadd.f32 %v6072_v3, %v6071_v29  ;;  %v6066_v39 = vmul.f32 0.5, %v9558_v56  ;;  %v10778_v29 = vld [vmem:[#allocation37_spill] sm:$0xff] }
 0xdf8   :  { %v5377_v3 = vadd.f32 %v10778_v29, %v10476_v34 }
 0xdf9   :  { %9559 = vtanh.f32 %v6073_v52  ;;  %v6069_v38 = vadd.f32 0.5, %v6066_v39 }
 0xdff   :  { %v9560_v12 = vpop.eup %9559 }
 0xe00   :  { %v6075_v60 = vmul.f32 %v9560_v12, %v6069_v38 }
 0xe02   :  { %v6080_v14 = vpack.c.bf16 %v6075_v60, %v6075_v60 }
 0xe04   :  { %6089 = vmatmul.bf16.vlgmr.msrb.gmra.mxu0 %v6080_v14  ;;  %6102 = vmatmul.bf16.vlgmr.msrb.gmra.mxu1 %v6080_v14 }
 0xe05   :  { %6115 = vmatmul.bf16.vlgmr.msrb.gmra.mxu2 %v6080_v14  ;;  %6128 = vmatmul.bf16.vlgmr.msrb.gmra.mxu3 %v6080_v14 }
 0xe81   :  { %v6090_v32 = vpop.f32.mrf.mxu0  ;;  %v6103_v47 = vpop.f32.mrf.mxu1 }
 0xe82   :  { %v6133_v26 = vadd.f32 %v6090_v32, %v5288_v63  ;;  %v6134_v21 = vadd.f32 %v6103_v47, %v5317_v17 }
 0xe84   :  { %v6137_v59 = vmul.f32 0.5, %v6133_v26  ;;  %v6138_v40 = vmul.f32 0.5, %v6134_v21 }
 0xe86   :  { %9561 = vtanh.f32 %v6137_v59 }
 0xe87   :  { %9563 = vtanh.f32 %v6138_v40 }
 0xe88   :  { %v6116_v9 = vpop.f32.mrf.mxu2  ;;  %v6129_v54 = vpop.f32.mrf.mxu3 }
 0xe89   :  { %v6135_v28 = vadd.f32 %v6116_v9, %v5346_v42  ;;  %v6136_v55 = vadd.f32 %v6129_v54, %v5375_v27  ;;  %v6092_v4 = vpop.f32.mrf.mxu0  ;;  %v6105_v2 = vpop.f32.mrf.mxu1  ;;  %v9339_v42 = vld [vmem:[%s10732_s10] ss:$0 sm:$0xff]  ;;  %v9340_v54 = vld [vmem:[#allocation4] ss:$0 sm:$0xff] }
 0xe8b   :  { %v6139_v57 = vmul.f32 0.5, %v6135_v28  ;;  %9565 = vtanh.f32 %v6136_v55 }
 0xe8c   :  { %v9562_v49 = vpop.eup %9561 }
 0xe8d   :  { %v9564_v43 = vpop.eup %9563  ;;  %v6143_v19 = vmul.f32 0.5, %v9562_v49  ;;  %9567 = vtanh.f32 %v6139_v57 }
 0xe8e   :  { %v6144_v5 = vmul.f32 0.5, %v9564_v43 }
 0xe8f   :  { %v6146_v15 = vadd.f32 0.5, %v6143_v19 }
 0xe90   :  { %v6147_v53 = vadd.f32 0.5, %v6144_v5  ;;  %v6118_v7 = vpop.f32.mrf.mxu2  ;;  %v6131_v44 = vpop.f32.mrf.mxu3 }
 0xe91   :  { %v9566_v58 = vpop.eup %9565 }
 0xe92   :  { %v6150_v45 = vmul.f32 %v6147_v53, %v6073_v52  ;;  %v6151_v13 = vmul.f32 %v9566_v58, %v6146_v15 }
 0xe93   :  { %v9568_v48 = vpop.eup %9567 }
 0xe94   :  { %v6152_v1 = vadd.f32 %v6151_v13, %v6150_v45  ;;  %v6145_v11 = vmul.f32 0.5, %v9568_v48 }
 0xe96   :  { %9569 = vtanh.f32 %v6152_v1  ;;  %v6148_v35 = vadd.f32 0.5, %v6145_v11 }
 0xe9c   :  { %v9570_v10 = vpop.eup %9569 }
 0xe9d   :  { %v6154_v51 = vmul.f32 %v9570_v10, %v6148_v35 }
 0xe9f   :  { %v6159_v37 = vpack.c.bf16 %v6154_v51, %v6154_v51 }
 0xea1   :  { %6168 = vmatmul.bf16.vlgmr.msra.gmra.mxu0 %v6159_v37  ;;  %6181 = vmatmul.bf16.vlgmr.msra.gmra.mxu1 %v6159_v37 }
 0xea2   :  { %6194 = vmatmul.bf16.vlgmr.msra.gmra.mxu2 %v6159_v37  ;;  %6207 = vmatmul.bf16.vlgmr.msra.gmra.mxu3 %v6159_v37 }
 0xf1e   :  { %v6169_v41 = vpop.f32.mrf.mxu0  ;;  %v6182_v24 = vpop.f32.mrf.mxu1 }
 0xf1f   :  { %v6212_v6 = vadd.f32 %v6169_v41, %v5290_v50  ;;  %v6213_v61 = vadd.f32 %v6182_v24, %v5319_v62 }
 0xf21   :  { %v6216_v30 = vmul.f32 0.5, %v6212_v6  ;;  %v6217_v36 = vmul.f32 0.5, %v6213_v61 }
 0xf23   :  { %9571 = vtanh.f32 %v6216_v30 }
 0xf24   :  { %9573 = vtanh.f32 %v6217_v36 }
 0xf25   :  { %v6195_v56 = vpop.f32.mrf.mxu2  ;;  %v6208_v52 = vpop.f32.mrf.mxu3 }
 0xf26   :  { %v6214_v20 = vadd.f32 %v6195_v56, %v5348_v31  ;;  %v6215_v39 = vadd.f32 %v6208_v52, %v5377_v3  ;;  %v6171_v38 = vpop.f32.mrf.mxu0  ;;  %v6184_v23 = vpop.f32.mrf.mxu1 }
 0xf28   :  { %v6218_v12 = vmul.f32 0.5, %v6214_v20  ;;  %9575 = vtanh.f32 %v6215_v39 }
 0xf29   :  { %v9572_v60 = vpop.eup %9571 }
 0xf2a   :  { %v9574_v14 = vpop.eup %9573  ;;  %v6222_v0 = vmul.f32 0.5, %v9572_v60  ;;  %9577 = vtanh.f32 %v6218_v12 }
 0xf2b   :  { %v6223_v63 = vmul.f32 0.5, %v9574_v14 }
 0xf2c   :  { %v6225_v18 = vadd.f32 0.5, %v6222_v0 }
 0xf2d   :  { %v6226_v17 = vadd.f32 0.5, %v6223_v63  ;;  %v6197_v33 = vpop.f32.mrf.mxu2  ;;  %v6210_v32 = vpop.f32.mrf.mxu3 }
 0xf2e   :  { %v9576_v47 = vpop.eup %9575 }
 0xf2f   :  { %v6229_v34 = vmul.f32 %v6226_v17, %v6152_v1  ;;  %v6230_v26 = vmul.f32 %v9576_v47, %v6225_v18 }
 0xf30   :  { %v9578_v21 = vpop.eup %9577 }
 0xf31   :  { %v6231_v59 = vadd.f32 %v6230_v26, %v6229_v34  ;;  %v6224_v40 = vmul.f32 0.5, %v9578_v21 }
 0xf33   :  { %9579 = vtanh.f32 %v6231_v59  ;;  %v6227_v46 = vadd.f32 0.5, %v6224_v40 }
 0xf39   :  { %v9580_v8 = vpop.eup %9579 }
 0xf3a   :  { %v6233_v27 = vmul.f32 %v9580_v8, %v6227_v46 }
 0xf3c   :  { %v6238_v9 = vmul.f32 %v9339_v42, %v6233_v27 }
 0xf3e   :  { %6239 = vadd.xlane.f32.xlu0 %v6238_v9 }
 0xfb1   :  { %v6240_v28 = vpop.xlane.xlu0 %6239 }
 0xfb2   :  { %v6245_v55 = vadd.f32 %v9340_v54, %v6240_v28 }
 0xfb4   :  { %6247 = vst.msk [vmem:[%s10734_s12] sm:$0xff] %vm6246_vm2, %v6245_v55 }
 0xfb5   :  { %6252 = vsyncpa [#allocation6], 1 }
 0xfb6   :  { %6253 = vsyncpa [#allocation8], 1 }
 0xfb7   :  { %6254 = vsyncpa [#allocation11], 1 }

</bundles_post_ra>
